<compile_context>
chip_gen: v7x
topology: tpu7x:2x2x1
jax: 0.10.0
libtpu: 0.0.40
codegen_flags: <defaults>
</compile_context>

<pallas_src>
import functools
import math

import jax
import jax.numpy as jnp
from jax.experimental import pallas as pl
from jax.experimental.pallas import tpu as pltpu


# ----------------------------------------------------------------------------
# Device-adaptive VMEM budget
# ----------------------------------------------------------------------------
def _default_vmem_limit():
    try:
        cap = int(pltpu.get_tpu_info().vmem_capacity_bytes)
        return max(32 * 1024 * 1024, min(96 * 1024 * 1024, (cap * 3) // 4))
    except Exception:
        return 32 * 1024 * 1024


_VMEM_LIMIT = _default_vmem_limit()


# ----------------------------------------------------------------------------
# GEMM kernels: out(Cout, M) = W(Cout, K) @ col(K, M) + bias [+ residual]
# bf16 MXU operands, f32 accumulation, bf16 output.
# ----------------------------------------------------------------------------
def _gemm1_kernel(w_ref, c_ref, b_ref, o_ref):
    # Single K step: no scratch, no @pl.when (review fast path).
    acc = jnp.dot(w_ref[...], c_ref[...], preferred_element_type=jnp.float32)
    o_ref[...] = (acc + b_ref[...]).astype(o_ref.dtype)


def _gemm1_res_kernel(w_ref, c_ref, b_ref, r_ref, o_ref):
    acc = jnp.dot(w_ref[...], c_ref[...], preferred_element_type=jnp.float32)
    acc = acc + b_ref[...] + r_ref[...].astype(jnp.float32)
    o_ref[...] = acc.astype(o_ref.dtype)


def _gemm_kernel(w_ref, c_ref, b_ref, o_ref, acc_ref):
    @pl.when(pl.program_id(2) == 0)
    def _():
        acc_ref[...] = jnp.zeros_like(acc_ref)

    acc_ref[...] += jnp.dot(w_ref[...], c_ref[...],
                            preferred_element_type=jnp.float32)

    @pl.when(pl.program_id(2) == pl.num_programs(2) - 1)
    def _():
        o_ref[...] = (acc_ref[...] + b_ref[...]).astype(o_ref.dtype)


def _gemm_res_kernel(w_ref, c_ref, b_ref, r_ref, o_ref, acc_ref):
    @pl.when(pl.program_id(2) == 0)
    def _():
        acc_ref[...] = jnp.zeros_like(acc_ref)

    acc_ref[...] += jnp.dot(w_ref[...], c_ref[...],
                            preferred_element_type=jnp.float32)

    @pl.when(pl.program_id(2) == pl.num_programs(2) - 1)
    def _():
        o_ref[...] = (acc_ref[...] + b_ref[...]
                      + r_ref[...].astype(jnp.float32)).astype(o_ref.dtype)


def _pick_tile(dim, candidates, min_steps=2):
    # Prefer 128-aligned tiles that give >= 2 grid steps (pipelining + both TCs).
    for c in candidates:
        if dim % c == 0 and dim // c >= min_steps:
            return c
    return dim


def gemm_bias(w, col, bias, residual=None):
    """w: (Cout, K), col: (K, M), bias: (Cout,). Returns (Cout, M) bf16.
    residual (optional, (Cout, M)) is fused into the epilogue."""
    w = w.astype(jnp.bfloat16)          # no-op: params / activations are bf16
    col = col.astype(jnp.bfloat16)
    cout, k = w.shape
    k2, m = col.shape
    assert k == k2
    tm = _pick_tile(m, (512, 256, 128))
    tk = _pick_tile(k, (512, 256))
    tco = _pick_tile(cout, (256, 128))
    m_steps, co_steps, k_steps = m // tm, cout // tco, k // tk
    bias2 = bias.reshape(cout, 1).astype(jnp.float32)

    flops = 2 * cout * k * m
    bytes_accessed = (w.size + col.size + cout * m) * 2 + bias2.size * 4
    if residual is not None:
        residual = residual.astype(jnp.bfloat16)
        bytes_accessed += residual.size * 2

    if k_steps == 1:
        # Grid (M, Cout): M outermost so the large col block is re-used
        # (DMA skipped) across consecutive Cout tiles.
        grid = (m_steps, co_steps)
        w_spec = pl.BlockSpec((tco, tk), lambda j, io: (io, 0))
        c_spec = pl.BlockSpec((tk, tm), lambda j, io: (0, j))
        b_spec = pl.BlockSpec((tco, 1), lambda j, io: (io, 0))
        o_spec = pl.BlockSpec((tco, tm), lambda j, io: (io, j))
        r_spec = pl.BlockSpec((tco, tm), lambda j, io: (io, j))
        scratch = []
        sem = ("parallel", "parallel")
        kernel = _gemm1_res_kernel if residual is not None else _gemm1_kernel
    else:
        grid = (m_steps, co_steps, k_steps)
        w_spec = pl.BlockSpec((tco, tk), lambda j, io, kk: (io, kk))
        c_spec = pl.BlockSpec((tk, tm), lambda j, io, kk: (kk, j))
        b_spec = pl.BlockSpec((tco, 1), lambda j, io, kk: (io, 0))
        o_spec = pl.BlockSpec((tco, tm), lambda j, io, kk: (io, j))
        r_spec = pl.BlockSpec((tco, tm), lambda j, io, kk: (io, j))
        scratch = [pltpu.VMEM((tco, tm), jnp.float32)]
        sem = ("parallel", "parallel", "arbitrary")
        kernel = _gemm_res_kernel if residual is not None else _gemm_kernel

    in_specs = [w_spec, c_spec, b_spec]
    args = [w, col, bias2]
    if residual is not None:
        in_specs.append(r_spec)
        args.append(residual)

    return pl.pallas_call(
        kernel,
        out_shape=jax.ShapeDtypeStruct((cout, m), jnp.bfloat16),
        grid=grid,
        in_specs=in_specs,
        out_specs=o_spec,
        scratch_shapes=scratch,
        compiler_params=pltpu.CompilerParams(
            dimension_semantics=sem,
            vmem_limit_bytes=_VMEM_LIMIT),
        cost_estimate=pl.CostEstimate(
            flops=int(flops),
            transcendentals=0,
            bytes_accessed=int(bytes_accessed)),
    )(*args)


# ----------------------------------------------------------------------------
# Convolution (channels-first layout, bf16 activations)
# ----------------------------------------------------------------------------
def _im2col(x, kh, kw, stride, padding, hout, wout):
    """x: (Cin, N, H, W) bf16 -> (K_padded, M) bf16 with K padded to 16."""
    cin, n, _, _ = x.shape
    m = n * hout * wout
    xp = jnp.pad(x, ((0, 0), (0, 0), (padding, padding), (padding, padding)))
    cols = []
    for ih in range(kh):
        for iw in range(kw):
            t = xp[:, :, ih:ih + hout * stride:stride,
                   iw:iw + wout * stride:stride]
            cols.append(t.reshape(cin, m))
    k = kh * kw * cin
    k_pad = (-k) % 16          # bf16 sublane packing (review item)
    if k_pad:
        cols.append(jnp.zeros((k_pad, m), x.dtype))
    return jnp.concatenate(cols, axis=0)


def _conv_weight_gemm(w, k_target):
    """w: (Cout, Cin, KH, KW) -> (Cout, k_target), tap-major to match _im2col."""
    cout, cin, kh, kw = w.shape
    wm = jnp.transpose(w, (0, 2, 3, 1)).reshape(cout, kh * kw * cin)
    if k_target > kh * kw * cin:
        wm = jnp.pad(wm, ((0, 0), (0, k_target - kh * kw * cin)))
    return wm


def conv2d(x, w, b, *, stride=1, padding=0, residual=None):
    """x: (Cin, N, H, W) bf16, w: (Cout, Cin, KH, KW) bf16, b: (Cout,) f32.
    residual (optional): (Cout, N*Hout*Wout) bf16, fused into the epilogue.
    Returns (Cout, N, Hout, Wout) bf16."""
    cin, n, h, wd = x.shape
    cout, _, kh, kw = w.shape
    hout = (h + 2 * padding - kh) // stride + 1
    wout = (wd + 2 * padding - kw) // stride + 1
    m = n * hout * wout
    if kh == 1 and kw == 1 and stride == 1 and padding == 0:
        col = x.reshape(cin, m)            # 1x1 conv: plain matmul, no im2col
        wm = w.reshape(cout, cin)
    else:
        # TODO(synk): implicit-GEMM (taps as reduction grid axis reading the
        # padded activation directly) would avoid this KH*KW-larger bf16 buffer.
        col = _im2col(x, kh, kw, stride, padding, hout, wout)
        wm = _conv_weight_gemm(w, col.shape[0])
    out = gemm_bias(wm, col, b, residual=residual)
    return out.reshape(cout, n, hout, wout)


# ----------------------------------------------------------------------------
# GroupNorm (+ optional fused SiLU) — no XLA transposes, no gamma/beta tiling
# ----------------------------------------------------------------------------
def _gn_kernel(x_ref, g_ref, b_ref, o_ref, *, eps, apply_silu):
    x = x_ref[...].astype(jnp.float32)                 # (CG, N, HW)
    # Per-sample stats over (CG, HW): two single-axis reductions (lane, outer).
    mean = jnp.mean(jnp.mean(x, axis=2, keepdims=True), axis=0, keepdims=True)
    d = x - mean
    var = jnp.mean(jnp.mean(jnp.square(d), axis=2, keepdims=True),
                   axis=0, keepdims=True)
    y = d * jax.lax.rsqrt(var + eps)
    y = y * g_ref[...] + b_ref[...]                    # (CG, 1, 1) broadcast
    if apply_silu:
        y = y * jax.nn.sigmoid(y)                      # f32 math (v5e EUP)
    o_ref[...] = y.astype(o_ref.dtype)


def group_norm(x, gamma, beta, n_groups, *, eps=1e-5, silu=False):
    """GroupNorm over (C, N, H, W) bf16 activations, optionally fused with SiLU."""
    c, n, h, w = x.shape
    g = n_groups
    cg = c // g
    hw = h * w
    xg = x.reshape(c, n, hw)                            # contiguous -> free
    gam = gamma.reshape(c, 1, 1).astype(jnp.float32)
    bet = beta.reshape(c, 1, 1).astype(jnp.float32)
    kernel = functools.partial(_gn_kernel, eps=eps, apply_silu=silu)
    y = pl.pallas_call(
        kernel,
        out_shape=jax.ShapeDtypeStruct((c, n, hw), x.dtype),
        grid=(g,),
        in_specs=[pl.BlockSpec((cg, n, hw), lambda gi: (gi, 0, 0)),
                  pl.BlockSpec((cg, 1, 1), lambda gi: (gi, 0, 0)),
                  pl.BlockSpec((cg, 1, 1), lambda gi: (gi, 0, 0))],
        out_specs=pl.BlockSpec((cg, n, hw), lambda gi: (gi, 0, 0)),
        compiler_params=pltpu.CompilerParams(
            dimension_semantics=("parallel",)),
    )(xg, gam, bet)
    return y.reshape(c, n, h, w)


# ----------------------------------------------------------------------------
# Non-local (self-attention) block
# ----------------------------------------------------------------------------
def _attn_kernel(qkv_ref, o_ref, *, c, scale):
    # qkv_ref: (3C, N, HW) bf16 — q/k/v row bands straight from the fused GEMM.
    n = qkv_ref.shape[1]
    for i in range(n):                                  # static unroll (small N)
        q = qkv_ref[0:c, i, :]                          # (C, HW) bf16
        k = qkv_ref[c:2 * c, i, :]
        v = qkv_ref[2 * c:3 * c, i, :]
        # s[i, j] = sum_c q[c, i] * k[c, j]
        s = jax.lax.dot_general(q, k, (((0,), (0,)), ((), ())),
                                preferred_element_type=jnp.float32) * scale
        s = s - jnp.max(s, axis=-1, keepdims=True)
        p = jnp.exp(s)
        p = p * pl.reciprocal(jnp.sum(p, axis=-1, keepdims=True), approx=True)
        # o[c, i] = sum_j v[c, j] * p[i, j]
        o = jax.lax.dot_general(v, p.astype(v.dtype), (((1,), (1,)), ((), ())),
                                preferred_element_type=jnp.float32)
        o_ref[:, i, :] = o.astype(o_ref.dtype)


def nonlocal_block(p, x):
    c, n, h, w = x.shape
    hw = h * w
    m = n * hw
    gam, bet, ng = p["gn"]
    hn = group_norm(x, gam, bet, ng, silu=False)
    # Fused q/k/v 1x1 convs: one (3C, C) x (C, M) GEMM.
    wq, bq = p["q"]
    wk, bk = p["k"]
    wv, bv = p["v"]
    wqkv = jnp.concatenate(
        [wq.reshape(c, c), wk.reshape(c, c), wv.reshape(c, c)], axis=0)
    bqkv = jnp.concatenate([bq, bk, bv])
    qkv = gemm_bias(wqkv, hn.reshape(c, m), bqkv)       # (3C, M) bf16
    qkv3 = qkv.reshape(3 * c, n, hw)                    # free reshape
    # TODO(synk): flash-style K/V streaming for large HW (v7x VMEM budget).
    kernel = functools.partial(_attn_kernel, c=c, scale=float(c) ** -0.5)
    o = pl.pallas_call(
        kernel,
        out_shape=jax.ShapeDtypeStruct((c, n, hw), jnp.bfloat16),
        grid=(1,),
        in_specs=[pl.BlockSpec((3 * c, n, hw), lambda i: (0, 0, 0))],
        out_specs=pl.BlockSpec((c, n, hw), lambda i: (0, 0, 0)),
        compiler_params=pltpu.CompilerParams(
            dimension_semantics=("arbitrary",)),
    )(qkv3)
    # Output projection with the block residual fused into the GEMM epilogue.
    wp, bp = p["proj"]
    out = gemm_bias(wp.reshape(c, c), o.reshape(c, m), bp,
                    residual=x.reshape(c, m))
    return out.reshape(c, n, h, w)


# ----------------------------------------------------------------------------
# Blocks
# ----------------------------------------------------------------------------
def residual_block(p, x):
    cin, n, h, w = x.shape
    g, b, ng = p["gn1"]
    hh = group_norm(x, g, b, ng, silu=True)
    hh = conv2d(hh, *p["conv1"], stride=1, padding=1)
    g, b, ng = p["gn2"]
    hh = group_norm(hh, g, b, ng, silu=True)
    # Dropout == identity at inference.
    # TODO(synk): training-mode dropout (random masking) is not implemented.
    if p["shortcut"] is not None:
        sc = conv2d(x, *p["shortcut"], stride=1, padding=0)
    else:
        sc = x
    cout = sc.shape[0]
    # Residual add fused into conv2's GEMM epilogue.
    return conv2d(hh, *p["conv2"], stride=1, padding=1,
                  residual=sc.reshape(cout, n * h * w))


def downsample_block(p, x):
    return conv2d(x, *p, stride=2, padding=1)


# ----------------------------------------------------------------------------
# Parameter init (deterministic, PyTorch-like uniform fan-in init)
# ----------------------------------------------------------------------------
def _init_conv(key, cout, cin, kh, kw):
    kw_, kb_ = jax.random.split(key)
    bound = 1.0 / math.sqrt(cin * kh * kw)
    w = jax.random.uniform(kw_, (cout, cin, kh, kw), jnp.float32, -bound, bound)
    b = jax.random.uniform(kb_, (cout,), jnp.float32, -bound, bound)
    return w.astype(jnp.bfloat16), b                    # weights stored bf16


def find_cs(m, out_channels):
    return [out_channels * i // (m + 2) for i in range(1, m + 2)]


def find_n_groups(c):
    for i in range(4, 13):
        if c % i == 0:
            return i
    return 1


def init_residual_block(key, cin, cout):
    ks = jax.random.split(key, 3)
    return {
        "gn1": (jnp.ones((cin,)), jnp.zeros((cin,)), find_n_groups(cin)),
        "conv1": _init_conv(ks[0], cout, cin, 3, 3),
        "gn2": (jnp.ones((cout,)), jnp.zeros((cout,)), find_n_groups(cout)),
        "conv2": _init_conv(ks[1], cout, cout, 3, 3),
        "shortcut": _init_conv(ks[2], cout, cin, 1, 1) if cin != cout else None,
    }


def init_downsample_block(key, cin, cout):
    return _init_conv(key, cout, cin, 3, 3)


def init_nonlocal_block(key, c):
    ks = jax.random.split(key, 4)
    return {
        "gn": (jnp.ones((c,)), jnp.zeros((c,)), find_n_groups(c)),
        "q": _init_conv(ks[0], c, c, 1, 1),
        "k": _init_conv(ks[1], c, c, 1, 1),
        "v": _init_conv(ks[2], c, c, 1, 1),
        "proj": _init_conv(ks[3], c, c, 1, 1),
    }


def init_cnn_encoder(key, out_channels=32, m=2):
    cs = find_cs(m, out_channels)
    n_keys = 1 + 2 * (len(cs) - 1) + 3 + 1
    keys = iter(jax.random.split(key, n_keys))
    params = {"cs": cs, "out_channels": out_channels}
    params["first_conv"] = _init_conv(next(keys), cs[0], 3, 3, 3)
    stages = []
    for i in range(len(cs) - 1):
        rp = init_residual_block(next(keys), cs[i], cs[i + 1])
        dp = init_downsample_block(next(keys), cs[i + 1], cs[i + 1])
        stages.append((rp, dp))
    params["stages"] = stages
    params["res_a"] = init_residual_block(next(keys), cs[-1], cs[-1])
    params["attn"] = init_nonlocal_block(next(keys), cs[-1])
    params["res_b"] = init_residual_block(next(keys), cs[-1], cs[-1])
    params["gn"] = (jnp.ones((cs[-1],)), jnp.zeros((cs[-1],)),
                    find_n_groups(cs[-1]))
    params["out_conv"] = _init_conv(next(keys), out_channels, cs[-1], 3, 3)
    return params


# ----------------------------------------------------------------------------
# Encoder forward
# ----------------------------------------------------------------------------
def cnn_encoder_forward(params, x_nchw):
    # NCHW -> canonical (C, N, H, W) bf16 layout once at entry (lane dim = N*H*W).
    x = jnp.transpose(x_nchw, (1, 0, 2, 3)).astype(jnp.bfloat16)
    x = conv2d(x, *params["first_conv"], stride=1, padding=1)
    for rp, dp in params["stages"]:
        x = residual_block(rp, x)
        x = downsample_block(dp, x)
    x = residual_block(params["res_a"], x)
    x = nonlocal_block(params["attn"], x)
    x = residual_block(params["res_b"], x)
    g, b, ng = params["gn"]
    x = group_norm(x, g, b, ng, silu=True)     # GroupNorm + swish fused
    x = conv2d(x, *params["out_conv"], stride=1, padding=1)
    return jnp.transpose(x, (1, 0, 2, 3)).astype(jnp.float32)   # back to NCHW


# ----------------------------------------------------------------------------
if __name__ == "__main__":
    key = jax.random.PRNGKey(0)
    kp, kx = jax.random.split(key)

    out_channels, m = 32, 2  # cs = [8, 16, 24]; two downsamples: 16 -> 4
    params = init_cnn_encoder(kp, out_channels=out_channels, m=m)

    x = jax.random.normal(kx, (2, 3, 16, 16), dtype=jnp.float32)  # NCHW

    fwd = jax.jit(lambda inp: cnn_encoder_forward(params, inp))
    y = fwd(x)
    y = jax.block_until_ready(y)

    assert y.shape == (2, out_channels, 4, 4), y.shape
    assert y.dtype == jnp.float32
    assert bool(jnp.all(jnp.isfinite(y)))
    print("KERNEL_OK")
</pallas_src>

<mosaic_0001>
module attributes {stable_mosaic.version = 11 : i64} {
  func.func @_gemm1_kernel(%arg0: i32, %arg1: i32, %arg2: memref<8x32xbf16, #tpu.memory_space<vmem>>, %arg3: memref<32x256xbf16, #tpu.memory_space<vmem>>, %arg4: memref<8x1xf32, #tpu.memory_space<vmem>>, %arg5: memref<8x256xbf16, #tpu.memory_space<vmem>>) attributes {dimension_semantics = [#tpu.dimension_semantics<parallel>, #tpu.dimension_semantics<parallel>], iteration_bounds = array<i64: 2, 1>, scalar_prefetch = 0 : i64, scratch_operands = 0 : i64, tpu.core_type = #tpu.core_type<tc>, window_params = [{transform_indices = @transform_0, window_bounds = array<i64: 8, 32>}, {transform_indices = @transform_1, window_bounds = array<i64: 32, 256>}, {transform_indices = @transform_2, window_bounds = array<i64: 8, 1>}, {transform_indices = @transform_3, window_bounds = array<i64: 8, 256>}]} {
    %c0 = arith.constant 0 : index
    %c0_0 = arith.constant 0 : index
    %0 = vector.load %arg2[%c0, %c0_0] : memref<8x32xbf16, #tpu.memory_space<vmem>>, vector<8x32xbf16>
    %c0_1 = arith.constant 0 : index
    %c0_2 = arith.constant 0 : index
    %1 = vector.load %arg3[%c0_1, %c0_2] : memref<32x256xbf16, #tpu.memory_space<vmem>>, vector<32x256xbf16>
    %cst = arith.constant dense<0.000000e+00> : vector<8x256xf32>
    %2 = tpu.matmul %0, %1, %cst {dimension_numbers = #tpu.dot_dimension_numbers<[1], [0], [0], [1], [0, 0, 1, 1], [], []>} : vector<8x32xbf16>, vector<32x256xbf16>, vector<8x256xf32> -> vector<8x256xf32>
    %c0_3 = arith.constant 0 : index
    %c0_4 = arith.constant 0 : index
    %3 = vector.load %arg4[%c0_3, %c0_4] : memref<8x1xf32, #tpu.memory_space<vmem>>, vector<8x1xf32>
    %4 = vector.broadcast %3 : vector<8x1xf32> to vector<8x256xf32>
    %5 = arith.addf %2, %4 : vector<8x256xf32>
    %6 = arith.truncf %5 : vector<8x256xf32> to vector<8x256xbf16>
    %c0_5 = arith.constant 0 : index
    %c0_6 = arith.constant 0 : index
    %7 = vector.load %arg5[%c0_5, %c0_6] : memref<8x256xbf16, #tpu.memory_space<vmem>>, vector<8x256xbf16>
    tpu.vector_store %arg5[%c0_5, %c0_6], %6 {strides = array<i32>} : memref<8x256xbf16, #tpu.memory_space<vmem>>, vector<8x256xbf16>,
    return
  }
  func.func @transform_0(%arg0: i32, %arg1: i32) -> (i32, i32) {
    %c0_i32 = arith.constant 0 : i32
    %c0_i32_0 = arith.constant 0 : i32
    return %arg1, %c0_i32 : i32, i32
  }
  func.func @transform_1(%arg0: i32, %arg1: i32) -> (i32, i32) {
    %c0_i32 = arith.constant 0 : i32
    %c0_i32_0 = arith.constant 0 : i32
    return %c0_i32, %arg0 : i32, i32
  }
  func.func @transform_2(%arg0: i32, %arg1: i32) -> (i32, i32) {
    %c0_i32 = arith.constant 0 : i32
    %c0_i32_0 = arith.constant 0 : i32
    return %arg1, %c0_i32 : i32, i32
  }
  func.func @transform_3(%arg0: i32, %arg1: i32) -> (i32, i32) {
    %c0_i32 = arith.constant 0 : i32
    return %arg1, %arg0 : i32, i32
  }
}

module attributes {stable_mosaic.version = 11 : i64} {
  func.func @_gn_kernel(%arg0: i32, %arg1: memref<2x2x256xbf16, #tpu.memory_space<vmem>>, %arg2: memref<2x1x1xf32, #tpu.memory_space<vmem>>, %arg3: memref<2x1x1xf32, #tpu.memory_space<vmem>>, %arg4: memref<2x2x256xbf16, #tpu.memory_space<vmem>>) attributes {dimension_semantics = [#tpu.dimension_semantics<parallel>], iteration_bounds = array<i64: 4>, scalar_prefetch = 0 : i64, scratch_operands = 0 : i64, tpu.core_type = #tpu.core_type<tc>, window_params = [{transform_indices = @transform_0, window_bounds = array<i64: 2, 2, 256>}, {transform_indices = @transform_1, window_bounds = array<i64: 2, 1, 1>}, {transform_indices = @transform_2, window_bounds = array<i64: 2, 1, 1>}, {transform_indices = @transform_3, window_bounds = array<i64: 2, 2, 256>}]} {
    %c0 = arith.constant 0 : index
    %c0_0 = arith.constant 0 : index
    %c0_1 = arith.constant 0 : index
    %0 = vector.load %arg1[%c0, %c0_0, %c0_1] : memref<2x2x256xbf16, #tpu.memory_space<vmem>>, vector<2x2x256xbf16>
    %1 = arith.extf %0 : vector<2x2x256xbf16> to vector<2x2x256xf32>
    %cst = arith.constant dense<0.000000e+00> : vector<2x2xf32>
    %2 = vector.multi_reduction <add>, %1, %cst [2] : vector<2x2x256xf32> to vector<2x2xf32>
    %3 = vector.shape_cast %2 : vector<2x2xf32> to vector<2x2x1xf32>
    %cst_2 = arith.constant 2.560000e+02 : f32
    %4 = vector.broadcast %cst_2 : f32 to vector<2x2x1xf32>
    %5 = arith.divf %3, %4 : vector<2x2x1xf32>
    %cst_3 = arith.constant dense<0.000000e+00> : vector<2x1xf32>
    %6 = vector.multi_reduction <add>, %5, %cst_3 [0] : vector<2x2x1xf32> to vector<2x1xf32>
    %7 = vector.shape_cast %6 : vector<2x1xf32> to vector<1x2x1xf32>
    %cst_4 = arith.constant 2.000000e+00 : f32
    %8 = vector.broadcast %cst_4 : f32 to vector<1x2x1xf32>
    %9 = arith.divf %7, %8 : vector<1x2x1xf32>
    %10 = vector.broadcast %9 : vector<1x2x1xf32> to vector<2x2x256xf32>
    %11 = arith.subf %1, %10 : vector<2x2x256xf32>
    %12 = arith.mulf %11, %11 : vector<2x2x256xf32>
    %cst_5 = arith.constant dense<0.000000e+00> : vector<2x2xf32>
    %13 = vector.multi_reduction <add>, %12, %cst_5 [2] : vector<2x2x256xf32> to vector<2x2xf32>
    %14 = vector.shape_cast %13 : vector<2x2xf32> to vector<2x2x1xf32>
    %cst_6 = arith.constant 2.560000e+02 : f32
    %15 = vector.broadcast %cst_6 : f32 to vector<2x2x1xf32>
    %16 = arith.divf %14, %15 : vector<2x2x1xf32>
    %cst_7 = arith.constant dense<0.000000e+00> : vector<2x1xf32>
    %17 = vector.multi_reduction <add>, %16, %cst_7 [0] : vector<2x2x1xf32> to vector<2x1xf32>
    %18 = vector.shape_cast %17 : vector<2x1xf32> to vector<1x2x1xf32>
    %cst_8 = arith.constant 2.000000e+00 : f32
    %19 = vector.broadcast %cst_8 : f32 to vector<1x2x1xf32>
    %20 = arith.divf %18, %19 : vector<1x2x1xf32>
    %cst_9 = arith.constant 9.99999974E-6 : f32
    %21 = vector.broadcast %cst_9 : f32 to vector<1x2x1xf32>
    %22 = arith.addf %20, %21 : vector<1x2x1xf32>
    %23 = math.rsqrt %22 : vector<1x2x1xf32>
    %24 = vector.broadcast %23 : vector<1x2x1xf32> to vector<2x2x256xf32>
    %25 = arith.mulf %11, %24 : vector<2x2x256xf32>
    %c0_10 = arith.constant 0 : index
    %c0_11 = arith.constant 0 : index
    %c0_12 = arith.constant 0 : index
    %26 = vector.load %arg2[%c0_10, %c0_11, %c0_12] : memref<2x1x1xf32, #tpu.memory_space<vmem>>, vector<2x1x1xf32>
    %27 = vector.broadcast %26 : vector<2x1x1xf32> to vector<2x2x256xf32>
    %28 = arith.mulf %25, %27 : vector<2x2x256xf32>
    %c0_13 = arith.constant 0 : index
    %c0_14 = arith.constant 0 : index
    %c0_15 = arith.constant 0 : index
    %29 = vector.load %arg3[%c0_13, %c0_14, %c0_15] : memref<2x1x1xf32, #tpu.memory_space<vmem>>, vector<2x1x1xf32>
    %30 = vector.broadcast %29 : vector<2x1x1xf32> to vector<2x2x256xf32>
    %31 = arith.addf %28, %30 : vector<2x2x256xf32>
    %32 = arith.negf %31 : vector<2x2x256xf32>
    %33 = math.exp %32 : vector<2x2x256xf32>
    %cst_16 = arith.constant 1.000000e+00 : f32
    %34 = vector.broadcast %cst_16 : f32 to vector<2x2x256xf32>
    %35 = arith.addf %34, %33 : vector<2x2x256xf32>
    %36 = arith.divf %34, %35 : vector<2x2x256xf32>
    %37 = arith.mulf %31, %36 : vector<2x2x256xf32>
    %38 = arith.truncf %37 : vector<2x2x256xf32> to vector<2x2x256xbf16>
    %c0_17 = arith.constant 0 : index
    %c0_18 = arith.constant 0 : index
    %c0_19 = arith.constant 0 : index
    %39 = vector.load %arg4[%c0_17, %c0_18, %c0_19] : memref<2x2x256xbf16, #tpu.memory_space<vmem>>, vector<2x2x256xbf16>
    tpu.vector_store %arg4[%c0_17, %c0_18, %c0_19], %38 {strides = array<i32>} : memref<2x2x256xbf16, #tpu.memory_space<vmem>>, vector<2x2x256xbf16>,
    return
  }
  func.func @transform_0(%arg0: i32) -> (i32, i32, i32) {
    %c0_i32 = arith.constant 0 : i32
    %c0_i32_0 = arith.constant 0 : i32
    %c0_i32_1 = arith.constant 0 : i32
    return %arg0, %c0_i32, %c0_i32_0 : i32, i32, i32
  }
  func.func @transform_1(%arg0: i32) -> (i32, i32, i32) {
    %c0_i32 = arith.constant 0 : i32
    %c0_i32_0 = arith.constant 0 : i32
    %c0_i32_1 = arith.constant 0 : i32
    return %arg0, %c0_i32, %c0_i32_0 : i32, i32, i32
  }
  func.func @transform_2(%arg0: i32) -> (i32, i32, i32) {
    %c0_i32 = arith.constant 0 : i32
    %c0_i32_0 = arith.constant 0 : i32
    %c0_i32_1 = arith.constant 0 : i32
    return %arg0, %c0_i32, %c0_i32_0 : i32, i32, i32
  }
  func.func @transform_3(%arg0: i32) -> (i32, i32, i32) {
    %c0_i32 = arith.constant 0 : i32
    %c0_i32_0 = arith.constant 0 : i32
    %c0_i32_1 = arith.constant 0 : i32
    return %arg0, %c0_i32, %c0_i32_0 : i32, i32, i32
  }
}

module attributes {stable_mosaic.version = 11 : i64} {
  func.func @_gemm1_kernel(%arg0: i32, %arg1: i32, %arg2: memref<16x80xbf16, #tpu.memory_space<vmem>>, %arg3: memref<80x256xbf16, #tpu.memory_space<vmem>>, %arg4: memref<16x1xf32, #tpu.memory_space<vmem>>, %arg5: memref<16x256xbf16, #tpu.memory_space<vmem>>) attributes {dimension_semantics = [#tpu.dimension_semantics<parallel>, #tpu.dimension_semantics<parallel>], iteration_bounds = array<i64: 2, 1>, scalar_prefetch = 0 : i64, scratch_operands = 0 : i64, tpu.core_type = #tpu.core_type<tc>, window_params = [{transform_indices = @transform_0, window_bounds = array<i64: 16, 80>}, {transform_indices = @transform_1, window_bounds = array<i64: 80, 256>}, {transform_indices = @transform_2, window_bounds = array<i64: 16, 1>}, {transform_indices = @transform_3, window_bounds = array<i64: 16, 256>}]} {
    %c0 = arith.constant 0 : index
    %c0_0 = arith.constant 0 : index
    %0 = vector.load %arg2[%c0, %c0_0] : memref<16x80xbf16, #tpu.memory_space<vmem>>, vector<16x80xbf16>
    %c0_1 = arith.constant 0 : index
    %c0_2 = arith.constant 0 : index
    %1 = vector.load %arg3[%c0_1, %c0_2] : memref<80x256xbf16, #tpu.memory_space<vmem>>, vector<80x256xbf16>
    %cst = arith.constant dense<0.000000e+00> : vector<16x256xf32>
    %2 = tpu.matmul %0, %1, %cst {dimension_numbers = #tpu.dot_dimension_numbers<[1], [0], [0], [1], [0, 0, 1, 1], [], []>} : vector<16x80xbf16>, vector<80x256xbf16>, vector<16x256xf32> -> vector<16x256xf32>
    %c0_3 = arith.constant 0 : index
    %c0_4 = arith.constant 0 : index
    %3 = vector.load %arg4[%c0_3, %c0_4] : memref<16x1xf32, #tpu.memory_space<vmem>>, vector<16x1xf32>
    %4 = vector.broadcast %3 : vector<16x1xf32> to vector<16x256xf32>
    %5 = arith.addf %2, %4 : vector<16x256xf32>
    %6 = arith.truncf %5 : vector<16x256xf32> to vector<16x256xbf16>
    %c0_5 = arith.constant 0 : index
    %c0_6 = arith.constant 0 : index
    %7 = vector.load %arg5[%c0_5, %c0_6] : memref<16x256xbf16, #tpu.memory_space<vmem>>, vector<16x256xbf16>
    tpu.vector_store %arg5[%c0_5, %c0_6], %6 {strides = array<i32>} : memref<16x256xbf16, #tpu.memory_space<vmem>>, vector<16x256xbf16>,
    return
  }
  func.func @transform_0(%arg0: i32, %arg1: i32) -> (i32, i32) {
    %c0_i32 = arith.constant 0 : i32
    %c0_i32_0 = arith.constant 0 : i32
    return %arg1, %c0_i32 : i32, i32
  }
  func.func @transform_1(%arg0: i32, %arg1: i32) -> (i32, i32) {
    %c0_i32 = arith.constant 0 : i32
    %c0_i32_0 = arith.constant 0 : i32
    return %c0_i32, %arg0 : i32, i32
  }
  func.func @transform_2(%arg0: i32, %arg1: i32) -> (i32, i32) {
    %c0_i32 = arith.constant 0 : i32
    %c0_i32_0 = arith.constant 0 : i32
    return %arg1, %c0_i32 : i32, i32
  }
  func.func @transform_3(%arg0: i32, %arg1: i32) -> (i32, i32) {
    %c0_i32 = arith.constant 0 : i32
    return %arg1, %arg0 : i32, i32
  }
}

module attributes {stable_mosaic.version = 11 : i64} {
  func.func @_gn_kernel(%arg0: i32, %arg1: memref<4x2x256xbf16, #tpu.memory_space<vmem>>, %arg2: memref<4x1x1xf32, #tpu.memory_space<vmem>>, %arg3: memref<4x1x1xf32, #tpu.memory_space<vmem>>, %arg4: memref<4x2x256xbf16, #tpu.memory_space<vmem>>) attributes {dimension_semantics = [#tpu.dimension_semantics<parallel>], iteration_bounds = array<i64: 4>, scalar_prefetch = 0 : i64, scratch_operands = 0 : i64, tpu.core_type = #tpu.core_type<tc>, window_params = [{transform_indices = @transform_0, window_bounds = array<i64: 4, 2, 256>}, {transform_indices = @transform_1, window_bounds = array<i64: 4, 1, 1>}, {transform_indices = @transform_2, window_bounds = array<i64: 4, 1, 1>}, {transform_indices = @transform_3, window_bounds = array<i64: 4, 2, 256>}]} {
    %c0 = arith.constant 0 : index
    %c0_0 = arith.constant 0 : index
    %c0_1 = arith.constant 0 : index
    %0 = vector.load %arg1[%c0, %c0_0, %c0_1] : memref<4x2x256xbf16, #tpu.memory_space<vmem>>, vector<4x2x256xbf16>
    %1 = arith.extf %0 : vector<4x2x256xbf16> to vector<4x2x256xf32>
    %cst = arith.constant dense<0.000000e+00> : vector<4x2xf32>
    %2 = vector.multi_reduction <add>, %1, %cst [2] : vector<4x2x256xf32> to vector<4x2xf32>
    %3 = vector.shape_cast %2 : vector<4x2xf32> to vector<4x2x1xf32>
    %cst_2 = arith.constant 2.560000e+02 : f32
    %4 = vector.broadcast %cst_2 : f32 to vector<4x2x1xf32>
    %5 = arith.divf %3, %4 : vector<4x2x1xf32>
    %cst_3 = arith.constant dense<0.000000e+00> : vector<2x1xf32>
    %6 = vector.multi_reduction <add>, %5, %cst_3 [0] : vector<4x2x1xf32> to vector<2x1xf32>
    %7 = vector.shape_cast %6 : vector<2x1xf32> to vector<1x2x1xf32>
    %cst_4 = arith.constant 4.000000e+00 : f32
    %8 = vector.broadcast %cst_4 : f32 to vector<1x2x1xf32>
    %9 = arith.divf %7, %8 : vector<1x2x1xf32>
    %10 = vector.broadcast %9 : vector<1x2x1xf32> to vector<4x2x256xf32>
    %11 = arith.subf %1, %10 : vector<4x2x256xf32>
    %12 = arith.mulf %11, %11 : vector<4x2x256xf32>
    %cst_5 = arith.constant dense<0.000000e+00> : vector<4x2xf32>
    %13 = vector.multi_reduction <add>, %12, %cst_5 [2] : vector<4x2x256xf32> to vector<4x2xf32>
    %14 = vector.shape_cast %13 : vector<4x2xf32> to vector<4x2x1xf32>
    %cst_6 = arith.constant 2.560000e+02 : f32
    %15 = vector.broadcast %cst_6 : f32 to vector<4x2x1xf32>
    %16 = arith.divf %14, %15 : vector<4x2x1xf32>
    %cst_7 = arith.constant dense<0.000000e+00> : vector<2x1xf32>
    %17 = vector.multi_reduction <add>, %16, %cst_7 [0] : vector<4x2x1xf32> to vector<2x1xf32>
    %18 = vector.shape_cast %17 : vector<2x1xf32> to vector<1x2x1xf32>
    %cst_8 = arith.constant 4.000000e+00 : f32
    %19 = vector.broadcast %cst_8 : f32 to vector<1x2x1xf32>
    %20 = arith.divf %18, %19 : vector<1x2x1xf32>
    %cst_9 = arith.constant 9.99999974E-6 : f32
    %21 = vector.broadcast %cst_9 : f32 to vector<1x2x1xf32>
    %22 = arith.addf %20, %21 : vector<1x2x1xf32>
    %23 = math.rsqrt %22 : vector<1x2x1xf32>
    %24 = vector.broadcast %23 : vector<1x2x1xf32> to vector<4x2x256xf32>
    %25 = arith.mulf %11, %24 : vector<4x2x256xf32>
    %c0_10 = arith.constant 0 : index
    %c0_11 = arith.constant 0 : index
    %c0_12 = arith.constant 0 : index
    %26 = vector.load %arg2[%c0_10, %c0_11, %c0_12] : memref<4x1x1xf32, #tpu.memory_space<vmem>>, vector<4x1x1xf32>
    %27 = vector.broadcast %26 : vector<4x1x1xf32> to vector<4x2x256xf32>
    %28 = arith.mulf %25, %27 : vector<4x2x256xf32>
    %c0_13 = arith.constant 0 : index
    %c0_14 = arith.constant 0 : index
    %c0_15 = arith.constant 0 : index
    %29 = vector.load %arg3[%c0_13, %c0_14, %c0_15] : memref<4x1x1xf32, #tpu.memory_space<vmem>>, vector<4x1x1xf32>
    %30 = vector.broadcast %29 : vector<4x1x1xf32> to vector<4x2x256xf32>
    %31 = arith.addf %28, %30 : vector<4x2x256xf32>
    %32 = arith.negf %31 : vector<4x2x256xf32>
    %33 = math.exp %32 : vector<4x2x256xf32>
    %cst_16 = arith.constant 1.000000e+00 : f32
    %34 = vector.broadcast %cst_16 : f32 to vector<4x2x256xf32>
    %35 = arith.addf %34, %33 : vector<4x2x256xf32>
    %36 = arith.divf %34, %35 : vector<4x2x256xf32>
    %37 = arith.mulf %31, %36 : vector<4x2x256xf32>
    %38 = arith.truncf %37 : vector<4x2x256xf32> to vector<4x2x256xbf16>
    %c0_17 = arith.constant 0 : index
    %c0_18 = arith.constant 0 : index
    %c0_19 = arith.constant 0 : index
    %39 = vector.load %arg4[%c0_17, %c0_18, %c0_19] : memref<4x2x256xbf16, #tpu.memory_space<vmem>>, vector<4x2x256xbf16>
    tpu.vector_store %arg4[%c0_17, %c0_18, %c0_19], %38 {strides = array<i32>} : memref<4x2x256xbf16, #tpu.memory_space<vmem>>, vector<4x2x256xbf16>,
    return
  }
  func.func @transform_0(%arg0: i32) -> (i32, i32, i32) {
    %c0_i32 = arith.constant 0 : i32
    %c0_i32_0 = arith.constant 0 : i32
    %c0_i32_1 = arith.constant 0 : i32
    return %arg0, %c0_i32, %c0_i32_0 : i32, i32, i32
  }
  func.func @transform_1(%arg0: i32) -> (i32, i32, i32) {
    %c0_i32 = arith.constant 0 : i32
    %c0_i32_0 = arith.constant 0 : i32
    %c0_i32_1 = arith.constant 0 : i32
    return %arg0, %c0_i32, %c0_i32_0 : i32, i32, i32
  }
  func.func @transform_2(%arg0: i32) -> (i32, i32, i32) {
    %c0_i32 = arith.constant 0 : i32
    %c0_i32_0 = arith.constant 0 : i32
    %c0_i32_1 = arith.constant 0 : i32
    return %arg0, %c0_i32, %c0_i32_0 : i32, i32, i32
  }
  func.func @transform_3(%arg0: i32) -> (i32, i32, i32) {
    %c0_i32 = arith.constant 0 : i32
    %c0_i32_0 = arith.constant 0 : i32
    %c0_i32_1 = arith.constant 0 : i32
    return %arg0, %c0_i32, %c0_i32_0 : i32, i32, i32
  }
}

module attributes {stable_mosaic.version = 11 : i64} {
  func.func @_gemm1_kernel(%arg0: i32, %arg1: i32, %arg2: memref<16x8xbf16, #tpu.memory_space<vmem>>, %arg3: memref<8x256xbf16, #tpu.memory_space<vmem>>, %arg4: memref<16x1xf32, #tpu.memory_space<vmem>>, %arg5: memref<16x256xbf16, #tpu.memory_space<vmem>>) attributes {dimension_semantics = [#tpu.dimension_semantics<parallel>, #tpu.dimension_semantics<parallel>], iteration_bounds = array<i64: 2, 1>, scalar_prefetch = 0 : i64, scratch_operands = 0 : i64, tpu.core_type = #tpu.core_type<tc>, window_params = [{transform_indices = @transform_0, window_bounds = array<i64: 16, 8>}, {transform_indices = @transform_1, window_bounds = array<i64: 8, 256>}, {transform_indices = @transform_2, window_bounds = array<i64: 16, 1>}, {transform_indices = @transform_3, window_bounds = array<i64: 16, 256>}]} {
    %c0 = arith.constant 0 : index
    %c0_0 = arith.constant 0 : index
    %0 = vector.load %arg2[%c0, %c0_0] : memref<16x8xbf16, #tpu.memory_space<vmem>>, vector<16x8xbf16>
    %c0_1 = arith.constant 0 : index
    %c0_2 = arith.constant 0 : index
    %1 = vector.load %arg3[%c0_1, %c0_2] : memref<8x256xbf16, #tpu.memory_space<vmem>>, vector<8x256xbf16>
    %cst = arith.constant dense<0.000000e+00> : vector<16x256xf32>
    %2 = tpu.matmul %0, %1, %cst {dimension_numbers = #tpu.dot_dimension_numbers<[1], [0], [0], [1], [0, 0, 1, 1], [], []>} : vector<16x8xbf16>, vector<8x256xbf16>, vector<16x256xf32> -> vector<16x256xf32>
    %c0_3 = arith.constant 0 : index
    %c0_4 = arith.constant 0 : index
    %3 = vector.load %arg4[%c0_3, %c0_4] : memref<16x1xf32, #tpu.memory_space<vmem>>, vector<16x1xf32>
    %4 = vector.broadcast %3 : vector<16x1xf32> to vector<16x256xf32>
    %5 = arith.addf %2, %4 : vector<16x256xf32>
    %6 = arith.truncf %5 : vector<16x256xf32> to vector<16x256xbf16>
    %c0_5 = arith.constant 0 : index
    %c0_6 = arith.constant 0 : index
    %7 = vector.load %arg5[%c0_5, %c0_6] : memref<16x256xbf16, #tpu.memory_space<vmem>>, vector<16x256xbf16>
    tpu.vector_store %arg5[%c0_5, %c0_6], %6 {strides = array<i32>} : memref<16x256xbf16, #tpu.memory_space<vmem>>, vector<16x256xbf16>,
    return
  }
  func.func @transform_0(%arg0: i32, %arg1: i32) -> (i32, i32) {
    %c0_i32 = arith.constant 0 : i32
    %c0_i32_0 = arith.constant 0 : i32
    return %arg1, %c0_i32 : i32, i32
  }
  func.func @transform_1(%arg0: i32, %arg1: i32) -> (i32, i32) {
    %c0_i32 = arith.constant 0 : i32
    %c0_i32_0 = arith.constant 0 : i32
    return %c0_i32, %arg0 : i32, i32
  }
  func.func @transform_2(%arg0: i32, %arg1: i32) -> (i32, i32) {
    %c0_i32 = arith.constant 0 : i32
    %c0_i32_0 = arith.constant 0 : i32
    return %arg1, %c0_i32 : i32, i32
  }
  func.func @transform_3(%arg0: i32, %arg1: i32) -> (i32, i32) {
    %c0_i32 = arith.constant 0 : i32
    return %arg1, %arg0 : i32, i32
  }
}

module attributes {stable_mosaic.version = 11 : i64} {
  func.func @_gemm1_res_kernel(%arg0: i32, %arg1: i32, %arg2: memref<16x144xbf16, #tpu.memory_space<vmem>>, %arg3: memref<144x256xbf16, #tpu.memory_space<vmem>>, %arg4: memref<16x1xf32, #tpu.memory_space<vmem>>, %arg5: memref<16x256xbf16, #tpu.memory_space<vmem>>, %arg6: memref<16x256xbf16, #tpu.memory_space<vmem>>) attributes {dimension_semantics = [#tpu.dimension_semantics<parallel>, #tpu.dimension_semantics<parallel>], iteration_bounds = array<i64: 2, 1>, scalar_prefetch = 0 : i64, scratch_operands = 0 : i64, tpu.core_type = #tpu.core_type<tc>, window_params = [{transform_indices = @transform_0, window_bounds = array<i64: 16, 144>}, {transform_indices = @transform_1, window_bounds = array<i64: 144, 256>}, {transform_indices = @transform_2, window_bounds = array<i64: 16, 1>}, {transform_indices = @transform_3, window_bounds = array<i64: 16, 256>}, {transform_indices = @transform_4, window_bounds = array<i64: 16, 256>}]} {
    %c0 = arith.constant 0 : index
    %c0_0 = arith.constant 0 : index
    %0 = vector.load %arg2[%c0, %c0_0] : memref<16x144xbf16, #tpu.memory_space<vmem>>, vector<16x144xbf16>
    %c0_1 = arith.constant 0 : index
    %c0_2 = arith.constant 0 : index
    %1 = vector.load %arg3[%c0_1, %c0_2] : memref<144x256xbf16, #tpu.memory_space<vmem>>, vector<144x256xbf16>
    %cst = arith.constant dense<0.000000e+00> : vector<16x256xf32>
    %2 = tpu.matmul %0, %1, %cst {dimension_numbers = #tpu.dot_dimension_numbers<[1], [0], [0], [1], [0, 0, 1, 1], [], []>} : vector<16x144xbf16>, vector<144x256xbf16>, vector<16x256xf32> -> vector<16x256xf32>
    %c0_3 = arith.constant 0 : index
    %c0_4 = arith.constant 0 : index
    %3 = vector.load %arg4[%c0_3, %c0_4] : memref<16x1xf32, #tpu.memory_space<vmem>>, vector<16x1xf32>
    %4 = vector.broadcast %3 : vector<16x1xf32> to vector<16x256xf32>
    %5 = arith.addf %2, %4 : vector<16x256xf32>
    %c0_5 = arith.constant 0 : index
    %c0_6 = arith.constant 0 : index
    %6 = vector.load %arg5[%c0_5, %c0_6] : memref<16x256xbf16, #tpu.memory_space<vmem>>, vector<16x256xbf16>
    %7 = arith.extf %6 : vector<16x256xbf16> to vector<16x256xf32>
    %8 = arith.addf %5, %7 : vector<16x256xf32>
    %9 = arith.truncf %8 : vector<16x256xf32> to vector<16x256xbf16>
    %c0_7 = arith.constant 0 : index
    %c0_8 = arith.constant 0 : index
    %10 = vector.load %arg6[%c0_7, %c0_8] : memref<16x256xbf16, #tpu.memory_space<vmem>>, vector<16x256xbf16>
    tpu.vector_store %arg6[%c0_7, %c0_8], %9 {strides = array<i32>} : memref<16x256xbf16, #tpu.memory_space<vmem>>, vector<16x256xbf16>,
    return
  }
  func.func @transform_0(%arg0: i32, %arg1: i32) -> (i32, i32) {
    %c0_i32 = arith.constant 0 : i32
    %c0_i32_0 = arith.constant 0 : i32
    return %arg1, %c0_i32 : i32, i32
  }
  func.func @transform_1(%arg0: i32, %arg1: i32) -> (i32, i32) {
    %c0_i32 = arith.constant 0 : i32
    %c0_i32_0 = arith.constant 0 : i32
    return %c0_i32, %arg0 : i32, i32
  }
  func.func @transform_2(%arg0: i32, %arg1: i32) -> (i32, i32) {
    %c0_i32 = arith.constant 0 : i32
    %c0_i32_0 = arith.constant 0 : i32
    return %arg1, %c0_i32 : i32, i32
  }
  func.func @transform_3(%arg0: i32, %arg1: i32) -> (i32, i32) {
    %c0_i32 = arith.constant 0 : i32
    return %arg1, %arg0 : i32, i32
  }
  func.func @transform_4(%arg0: i32, %arg1: i32) -> (i32, i32) {
    %c0_i32 = arith.constant 0 : i32
    return %arg1, %arg0 : i32, i32
  }
}

module attributes {stable_mosaic.version = 11 : i64} {
  func.func @_gemm1_kernel(%arg0: i32, %arg1: i32, %arg2: memref<16x144xbf16, #tpu.memory_space<vmem>>, %arg3: memref<144x128xbf16, #tpu.memory_space<vmem>>, %arg4: memref<16x1xf32, #tpu.memory_space<vmem>>, %arg5: memref<16x128xbf16, #tpu.memory_space<vmem>>) attributes {dimension_semantics = [#tpu.dimension_semantics<parallel>, #tpu.dimension_semantics<parallel>], iteration_bounds = array<i64: 1, 1>, scalar_prefetch = 0 : i64, scratch_operands = 0 : i64, tpu.core_type = #tpu.core_type<tc>, window_params = [{transform_indices = @transform_0, window_bounds = array<i64: 16, 144>}, {transform_indices = @transform_1, window_bounds = array<i64: 144, 128>}, {transform_indices = @transform_2, window_bounds = array<i64: 16, 1>}, {transform_indices = @transform_3, window_bounds = array<i64: 16, 128>}]} {
    %c0 = arith.constant 0 : index
    %c0_0 = arith.constant 0 : index
    %0 = vector.load %arg2[%c0, %c0_0] : memref<16x144xbf16, #tpu.memory_space<vmem>>, vector<16x144xbf16>
    %c0_1 = arith.constant 0 : index
    %c0_2 = arith.constant 0 : index
    %1 = vector.load %arg3[%c0_1, %c0_2] : memref<144x128xbf16, #tpu.memory_space<vmem>>, vector<144x128xbf16>
    %cst = arith.constant dense<0.000000e+00> : vector<16x128xf32>
    %2 = tpu.matmul %0, %1, %cst {dimension_numbers = #tpu.dot_dimension_numbers<[1], [0], [0], [1], [0, 0, 1, 1], [], []>} : vector<16x144xbf16>, vector<144x128xbf16>, vector<16x128xf32> -> vector<16x128xf32>
    %c0_3 = arith.constant 0 : index
    %c0_4 = arith.constant 0 : index
    %3 = vector.load %arg4[%c0_3, %c0_4] : memref<16x1xf32, #tpu.memory_space<vmem>>, vector<16x1xf32>
    %4 = vector.broadcast %3 : vector<16x1xf32> to vector<16x128xf32>
    %5 = arith.addf %2, %4 : vector<16x128xf32>
    %6 = arith.truncf %5 : vector<16x128xf32> to vector<16x128xbf16>
    %c0_5 = arith.constant 0 : index
    %c0_6 = arith.constant 0 : index
    %7 = vector.load %arg5[%c0_5, %c0_6] : memref<16x128xbf16, #tpu.memory_space<vmem>>, vector<16x128xbf16>
    tpu.vector_store %arg5[%c0_5, %c0_6], %6 {strides = array<i32>} : memref<16x128xbf16, #tpu.memory_space<vmem>>, vector<16x128xbf16>,
    return
  }
  func.func @transform_0(%arg0: i32, %arg1: i32) -> (i32, i32) {
    %c0_i32 = arith.constant 0 : i32
    %c0_i32_0 = arith.constant 0 : i32
    return %arg1, %c0_i32 : i32, i32
  }
  func.func @transform_1(%arg0: i32, %arg1: i32) -> (i32, i32) {
    %c0_i32 = arith.constant 0 : i32
    %c0_i32_0 = arith.constant 0 : i32
    return %c0_i32, %arg0 : i32, i32
  }
  func.func @transform_2(%arg0: i32, %arg1: i32) -> (i32, i32) {
    %c0_i32 = arith.constant 0 : i32
    %c0_i32_0 = arith.constant 0 : i32
    return %arg1, %c0_i32 : i32, i32
  }
  func.func @transform_3(%arg0: i32, %arg1: i32) -> (i32, i32) {
    %c0_i32 = arith.constant 0 : i32
    return %arg1, %arg0 : i32, i32
  }
}

module attributes {stable_mosaic.version = 11 : i64} {
  func.func @_gn_kernel(%arg0: i32, %arg1: memref<4x2x64xbf16, #tpu.memory_space<vmem>>, %arg2: memref<4x1x1xf32, #tpu.memory_space<vmem>>, %arg3: memref<4x1x1xf32, #tpu.memory_space<vmem>>, %arg4: memref<4x2x64xbf16, #tpu.memory_space<vmem>>) attributes {dimension_semantics = [#tpu.dimension_semantics<parallel>], iteration_bounds = array<i64: 4>, scalar_prefetch = 0 : i64, scratch_operands = 0 : i64, tpu.core_type = #tpu.core_type<tc>, window_params = [{transform_indices = @transform_0, window_bounds = array<i64: 4, 2, 64>}, {transform_indices = @transform_1, window_bounds = array<i64: 4, 1, 1>}, {transform_indices = @transform_2, window_bounds = array<i64: 4, 1, 1>}, {transform_indices = @transform_3, window_bounds = array<i64: 4, 2, 64>}]} {
    %c0 = arith.constant 0 : index
    %c0_0 = arith.constant 0 : index
    %c0_1 = arith.constant 0 : index
    %0 = vector.load %arg1[%c0, %c0_0, %c0_1] : memref<4x2x64xbf16, #tpu.memory_space<vmem>>, vector<4x2x64xbf16>
    %1 = arith.extf %0 : vector<4x2x64xbf16> to vector<4x2x64xf32>
    %cst = arith.constant dense<0.000000e+00> : vector<4x2xf32>
    %2 = vector.multi_reduction <add>, %1, %cst [2] : vector<4x2x64xf32> to vector<4x2xf32>
    %3 = vector.shape_cast %2 : vector<4x2xf32> to vector<4x2x1xf32>
    %cst_2 = arith.constant 6.400000e+01 : f32
    %4 = vector.broadcast %cst_2 : f32 to vector<4x2x1xf32>
    %5 = arith.divf %3, %4 : vector<4x2x1xf32>
    %cst_3 = arith.constant dense<0.000000e+00> : vector<2x1xf32>
    %6 = vector.multi_reduction <add>, %5, %cst_3 [0] : vector<4x2x1xf32> to vector<2x1xf32>
    %7 = vector.shape_cast %6 : vector<2x1xf32> to vector<1x2x1xf32>
    %cst_4 = arith.constant 4.000000e+00 : f32
    %8 = vector.broadcast %cst_4 : f32 to vector<1x2x1xf32>
    %9 = arith.divf %7, %8 : vector<1x2x1xf32>
    %10 = vector.broadcast %9 : vector<1x2x1xf32> to vector<4x2x64xf32>
    %11 = arith.subf %1, %10 : vector<4x2x64xf32>
    %12 = arith.mulf %11, %11 : vector<4x2x64xf32>
    %cst_5 = arith.constant dense<0.000000e+00> : vector<4x2xf32>
    %13 = vector.multi_reduction <add>, %12, %cst_5 [2] : vector<4x2x64xf32> to vector<4x2xf32>
    %14 = vector.shape_cast %13 : vector<4x2xf32> to vector<4x2x1xf32>
    %cst_6 = arith.constant 6.400000e+01 : f32
    %15 = vector.broadcast %cst_6 : f32 to vector<4x2x1xf32>
    %16 = arith.divf %14, %15 : vector<4x2x1xf32>
    %cst_7 = arith.constant dense<0.000000e+00> : vector<2x1xf32>
    %17 = vector.multi_reduction <add>, %16, %cst_7 [0] : vector<4x2x1xf32> to vector<2x1xf32>
    %18 = vector.shape_cast %17 : vector<2x1xf32> to vector<1x2x1xf32>
    %cst_8 = arith.constant 4.000000e+00 : f32
    %19 = vector.broadcast %cst_8 : f32 to vector<1x2x1xf32>
    %20 = arith.divf %18, %19 : vector<1x2x1xf32>
    %cst_9 = arith.constant 9.99999974E-6 : f32
    %21 = vector.broadcast %cst_9 : f32 to vector<1x2x1xf32>
    %22 = arith.addf %20, %21 : vector<1x2x1xf32>
    %23 = math.rsqrt %22 : vector<1x2x1xf32>
    %24 = vector.broadcast %23 : vector<1x2x1xf32> to vector<4x2x64xf32>
    %25 = arith.mulf %11, %24 : vector<4x2x64xf32>
    %c0_10 = arith.constant 0 : index
    %c0_11 = arith.constant 0 : index
    %c0_12 = arith.constant 0 : index
    %26 = vector.load %arg2[%c0_10, %c0_11, %c0_12] : memref<4x1x1xf32, #tpu.memory_space<vmem>>, vector<4x1x1xf32>
    %27 = vector.broadcast %26 : vector<4x1x1xf32> to vector<4x2x64xf32>
    %28 = arith.mulf %25, %27 : vector<4x2x64xf32>
    %c0_13 = arith.constant 0 : index
    %c0_14 = arith.constant 0 : index
    %c0_15 = arith.constant 0 : index
    %29 = vector.load %arg3[%c0_13, %c0_14, %c0_15] : memref<4x1x1xf32, #tpu.memory_space<vmem>>, vector<4x1x1xf32>
    %30 = vector.broadcast %29 : vector<4x1x1xf32> to vector<4x2x64xf32>
    %31 = arith.addf %28, %30 : vector<4x2x64xf32>
    %32 = arith.negf %31 : vector<4x2x64xf32>
    %33 = math.exp %32 : vector<4x2x64xf32>
    %cst_16 = arith.constant 1.000000e+00 : f32
    %34 = vector.broadcast %cst_16 : f32 to vector<4x2x64xf32>
    %35 = arith.addf %34, %33 : vector<4x2x64xf32>
    %36 = arith.divf %34, %35 : vector<4x2x64xf32>
    %37 = arith.mulf %31, %36 : vector<4x2x64xf32>
    %38 = arith.truncf %37 : vector<4x2x64xf32> to vector<4x2x64xbf16>
    %c0_17 = arith.constant 0 : index
    %c0_18 = arith.constant 0 : index
    %c0_19 = arith.constant 0 : index
    %39 = vector.load %arg4[%c0_17, %c0_18, %c0_19] : memref<4x2x64xbf16, #tpu.memory_space<vmem>>, vector<4x2x64xbf16>
    tpu.vector_store %arg4[%c0_17, %c0_18, %c0_19], %38 {strides = array<i32>} : memref<4x2x64xbf16, #tpu.memory_space<vmem>>, vector<4x2x64xbf16>,
    return
  }
  func.func @transform_0(%arg0: i32) -> (i32, i32, i32) {
    %c0_i32 = arith.constant 0 : i32
    %c0_i32_0 = arith.constant 0 : i32
    %c0_i32_1 = arith.constant 0 : i32
    return %arg0, %c0_i32, %c0_i32_0 : i32, i32, i32
  }
  func.func @transform_1(%arg0: i32) -> (i32, i32, i32) {
    %c0_i32 = arith.constant 0 : i32
    %c0_i32_0 = arith.constant 0 : i32
    %c0_i32_1 = arith.constant 0 : i32
    return %arg0, %c0_i32, %c0_i32_0 : i32, i32, i32
  }
  func.func @transform_2(%arg0: i32) -> (i32, i32, i32) {
    %c0_i32 = arith.constant 0 : i32
    %c0_i32_0 = arith.constant 0 : i32
    %c0_i32_1 = arith.constant 0 : i32
    return %arg0, %c0_i32, %c0_i32_0 : i32, i32, i32
  }
  func.func @transform_3(%arg0: i32) -> (i32, i32, i32) {
    %c0_i32 = arith.constant 0 : i32
    %c0_i32_0 = arith.constant 0 : i32
    %c0_i32_1 = arith.constant 0 : i32
    return %arg0, %c0_i32, %c0_i32_0 : i32, i32, i32
  }
}

module attributes {stable_mosaic.version = 11 : i64} {
  func.func @_gemm1_kernel(%arg0: i32, %arg1: i32, %arg2: memref<24x144xbf16, #tpu.memory_space<vmem>>, %arg3: memref<144x128xbf16, #tpu.memory_space<vmem>>, %arg4: memref<24x1xf32, #tpu.memory_space<vmem>>, %arg5: memref<24x128xbf16, #tpu.memory_space<vmem>>) attributes {dimension_semantics = [#tpu.dimension_semantics<parallel>, #tpu.dimension_semantics<parallel>], iteration_bounds = array<i64: 1, 1>, scalar_prefetch = 0 : i64, scratch_operands = 0 : i64, tpu.core_type = #tpu.core_type<tc>, window_params = [{transform_indices = @transform_0, window_bounds = array<i64: 24, 144>}, {transform_indices = @transform_1, window_bounds = array<i64: 144, 128>}, {transform_indices = @transform_2, window_bounds = array<i64: 24, 1>}, {transform_indices = @transform_3, window_bounds = array<i64: 24, 128>}]} {
    %c0 = arith.constant 0 : index
    %c0_0 = arith.constant 0 : index
    %0 = vector.load %arg2[%c0, %c0_0] : memref<24x144xbf16, #tpu.memory_space<vmem>>, vector<24x144xbf16>
    %c0_1 = arith.constant 0 : index
    %c0_2 = arith.constant 0 : index
    %1 = vector.load %arg3[%c0_1, %c0_2] : memref<144x128xbf16, #tpu.memory_space<vmem>>, vector<144x128xbf16>
    %cst = arith.constant dense<0.000000e+00> : vector<24x128xf32>
    %2 = tpu.matmul %0, %1, %cst {dimension_numbers = #tpu.dot_dimension_numbers<[1], [0], [0], [1], [0, 0, 1, 1], [], []>} : vector<24x144xbf16>, vector<144x128xbf16>, vector<24x128xf32> -> vector<24x128xf32>
    %c0_3 = arith.constant 0 : index
    %c0_4 = arith.constant 0 : index
    %3 = vector.load %arg4[%c0_3, %c0_4] : memref<24x1xf32, #tpu.memory_space<vmem>>, vector<24x1xf32>
    %4 = vector.broadcast %3 : vector<24x1xf32> to vector<24x128xf32>
    %5 = arith.addf %2, %4 : vector<24x128xf32>
    %6 = arith.truncf %5 : vector<24x128xf32> to vector<24x128xbf16>
    %c0_5 = arith.constant 0 : index
    %c0_6 = arith.constant 0 : index
    %7 = vector.load %arg5[%c0_5, %c0_6] : memref<24x128xbf16, #tpu.memory_space<vmem>>, vector<24x128xbf16>
    tpu.vector_store %arg5[%c0_5, %c0_6], %6 {strides = array<i32>} : memref<24x128xbf16, #tpu.memory_space<vmem>>, vector<24x128xbf16>,
    return
  }
  func.func @transform_0(%arg0: i32, %arg1: i32) -> (i32, i32) {
    %c0_i32 = arith.constant 0 : i32
    %c0_i32_0 = arith.constant 0 : i32
    return %arg1, %c0_i32 : i32, i32
  }
  func.func @transform_1(%arg0: i32, %arg1: i32) -> (i32, i32) {
    %c0_i32 = arith.constant 0 : i32
    %c0_i32_0 = arith.constant 0 : i32
    return %c0_i32, %arg0 : i32, i32
  }
  func.func @transform_2(%arg0: i32, %arg1: i32) -> (i32, i32) {
    %c0_i32 = arith.constant 0 : i32
    %c0_i32_0 = arith.constant 0 : i32
    return %arg1, %c0_i32 : i32, i32
  }
  func.func @transform_3(%arg0: i32, %arg1: i32) -> (i32, i32) {
    %c0_i32 = arith.constant 0 : i32
    return %arg1, %arg0 : i32, i32
  }
}

module attributes {stable_mosaic.version = 11 : i64} {
  func.func @_gn_kernel(%arg0: i32, %arg1: memref<6x2x64xbf16, #tpu.memory_space<vmem>>, %arg2: memref<6x1x1xf32, #tpu.memory_space<vmem>>, %arg3: memref<6x1x1xf32, #tpu.memory_space<vmem>>, %arg4: memref<6x2x64xbf16, #tpu.memory_space<vmem>>) attributes {dimension_semantics = [#tpu.dimension_semantics<parallel>], iteration_bounds = array<i64: 4>, scalar_prefetch = 0 : i64, scratch_operands = 0 : i64, tpu.core_type = #tpu.core_type<tc>, window_params = [{transform_indices = @transform_0, window_bounds = array<i64: 6, 2, 64>}, {transform_indices = @transform_1, window_bounds = array<i64: 6, 1, 1>}, {transform_indices = @transform_2, window_bounds = array<i64: 6, 1, 1>}, {transform_indices = @transform_3, window_bounds = array<i64: 6, 2, 64>}]} {
    %c0 = arith.constant 0 : index
    %c0_0 = arith.constant 0 : index
    %c0_1 = arith.constant 0 : index
    %0 = vector.load %arg1[%c0, %c0_0, %c0_1] : memref<6x2x64xbf16, #tpu.memory_space<vmem>>, vector<6x2x64xbf16>
    %1 = arith.extf %0 : vector<6x2x64xbf16> to vector<6x2x64xf32>
    %cst = arith.constant dense<0.000000e+00> : vector<6x2xf32>
    %2 = vector.multi_reduction <add>, %1, %cst [2] : vector<6x2x64xf32> to vector<6x2xf32>
    %3 = vector.shape_cast %2 : vector<6x2xf32> to vector<6x2x1xf32>
    %cst_2 = arith.constant 6.400000e+01 : f32
    %4 = vector.broadcast %cst_2 : f32 to vector<6x2x1xf32>
    %5 = arith.divf %3, %4 : vector<6x2x1xf32>
    %cst_3 = arith.constant dense<0.000000e+00> : vector<2x1xf32>
    %6 = vector.multi_reduction <add>, %5, %cst_3 [0] : vector<6x2x1xf32> to vector<2x1xf32>
    %7 = vector.shape_cast %6 : vector<2x1xf32> to vector<1x2x1xf32>
    %cst_4 = arith.constant 6.000000e+00 : f32
    %8 = vector.broadcast %cst_4 : f32 to vector<1x2x1xf32>
    %9 = arith.divf %7, %8 : vector<1x2x1xf32>
    %10 = vector.broadcast %9 : vector<1x2x1xf32> to vector<6x2x64xf32>
    %11 = arith.subf %1, %10 : vector<6x2x64xf32>
    %12 = arith.mulf %11, %11 : vector<6x2x64xf32>
    %cst_5 = arith.constant dense<0.000000e+00> : vector<6x2xf32>
    %13 = vector.multi_reduction <add>, %12, %cst_5 [2] : vector<6x2x64xf32> to vector<6x2xf32>
    %14 = vector.shape_cast %13 : vector<6x2xf32> to vector<6x2x1xf32>
    %cst_6 = arith.constant 6.400000e+01 : f32
    %15 = vector.broadcast %cst_6 : f32 to vector<6x2x1xf32>
    %16 = arith.divf %14, %15 : vector<6x2x1xf32>
    %cst_7 = arith.constant dense<0.000000e+00> : vector<2x1xf32>
    %17 = vector.multi_reduction <add>, %16, %cst_7 [0] : vector<6x2x1xf32> to vector<2x1xf32>
    %18 = vector.shape_cast %17 : vector<2x1xf32> to vector<1x2x1xf32>
    %cst_8 = arith.constant 6.000000e+00 : f32
    %19 = vector.broadcast %cst_8 : f32 to vector<1x2x1xf32>
    %20 = arith.divf %18, %19 : vector<1x2x1xf32>
    %cst_9 = arith.constant 9.99999974E-6 : f32
    %21 = vector.broadcast %cst_9 : f32 to vector<1x2x1xf32>
    %22 = arith.addf %20, %21 : vector<1x2x1xf32>
    %23 = math.rsqrt %22 : vector<1x2x1xf32>
    %24 = vector.broadcast %23 : vector<1x2x1xf32> to vector<6x2x64xf32>
    %25 = arith.mulf %11, %24 : vector<6x2x64xf32>
    %c0_10 = arith.constant 0 : index
    %c0_11 = arith.constant 0 : index
    %c0_12 = arith.constant 0 : index
    %26 = vector.load %arg2[%c0_10, %c0_11, %c0_12] : memref<6x1x1xf32, #tpu.memory_space<vmem>>, vector<6x1x1xf32>
    %27 = vector.broadcast %26 : vector<6x1x1xf32> to vector<6x2x64xf32>
    %28 = arith.mulf %25, %27 : vector<6x2x64xf32>
    %c0_13 = arith.constant 0 : index
    %c0_14 = arith.constant 0 : index
    %c0_15 = arith.constant 0 : index
    %29 = vector.load %arg3[%c0_13, %c0_14, %c0_15] : memref<6x1x1xf32, #tpu.memory_space<vmem>>, vector<6x1x1xf32>
    %30 = vector.broadcast %29 : vector<6x1x1xf32> to vector<6x2x64xf32>
    %31 = arith.addf %28, %30 : vector<6x2x64xf32>
    %32 = arith.negf %31 : vector<6x2x64xf32>
    %33 = math.exp %32 : vector<6x2x64xf32>
    %cst_16 = arith.constant 1.000000e+00 : f32
    %34 = vector.broadcast %cst_16 : f32 to vector<6x2x64xf32>
    %35 = arith.addf %34, %33 : vector<6x2x64xf32>
    %36 = arith.divf %34, %35 : vector<6x2x64xf32>
    %37 = arith.mulf %31, %36 : vector<6x2x64xf32>
    %38 = arith.truncf %37 : vector<6x2x64xf32> to vector<6x2x64xbf16>
    %c0_17 = arith.constant 0 : index
    %c0_18 = arith.constant 0 : index
    %c0_19 = arith.constant 0 : index
    %39 = vector.load %arg4[%c0_17, %c0_18, %c0_19] : memref<6x2x64xbf16, #tpu.memory_space<vmem>>, vector<6x2x64xbf16>
    tpu.vector_store %arg4[%c0_17, %c0_18, %c0_19], %38 {strides = array<i32>} : memref<6x2x64xbf16, #tpu.memory_space<vmem>>, vector<6x2x64xbf16>,
    return
  }
  func.func @transform_0(%arg0: i32) -> (i32, i32, i32) {
    %c0_i32 = arith.constant 0 : i32
    %c0_i32_0 = arith.constant 0 : i32
    %c0_i32_1 = arith.constant 0 : i32
    return %arg0, %c0_i32, %c0_i32_0 : i32, i32, i32
  }
  func.func @transform_1(%arg0: i32) -> (i32, i32, i32) {
    %c0_i32 = arith.constant 0 : i32
    %c0_i32_0 = arith.constant 0 : i32
    %c0_i32_1 = arith.constant 0 : i32
    return %arg0, %c0_i32, %c0_i32_0 : i32, i32, i32
  }
  func.func @transform_2(%arg0: i32) -> (i32, i32, i32) {
    %c0_i32 = arith.constant 0 : i32
    %c0_i32_0 = arith.constant 0 : i32
    %c0_i32_1 = arith.constant 0 : i32
    return %arg0, %c0_i32, %c0_i32_0 : i32, i32, i32
  }
  func.func @transform_3(%arg0: i32) -> (i32, i32, i32) {
    %c0_i32 = arith.constant 0 : i32
    %c0_i32_0 = arith.constant 0 : i32
    %c0_i32_1 = arith.constant 0 : i32
    return %arg0, %c0_i32, %c0_i32_0 : i32, i32, i32
  }
}

module attributes {stable_mosaic.version = 11 : i64} {
  func.func @_gemm1_kernel(%arg0: i32, %arg1: i32, %arg2: memref<24x16xbf16, #tpu.memory_space<vmem>>, %arg3: memref<16x128xbf16, #tpu.memory_space<vmem>>, %arg4: memref<24x1xf32, #tpu.memory_space<vmem>>, %arg5: memref<24x128xbf16, #tpu.memory_space<vmem>>) attributes {dimension_semantics = [#tpu.dimension_semantics<parallel>, #tpu.dimension_semantics<parallel>], iteration_bounds = array<i64: 1, 1>, scalar_prefetch = 0 : i64, scratch_operands = 0 : i64, tpu.core_type = #tpu.core_type<tc>, window_params = [{transform_indices = @transform_0, window_bounds = array<i64: 24, 16>}, {transform_indices = @transform_1, window_bounds = array<i64: 16, 128>}, {transform_indices = @transform_2, window_bounds = array<i64: 24, 1>}, {transform_indices = @transform_3, window_bounds = array<i64: 24, 128>}]} {
    %c0 = arith.constant 0 : index
    %c0_0 = arith.constant 0 : index
    %0 = vector.load %arg2[%c0, %c0_0] : memref<24x16xbf16, #tpu.memory_space<vmem>>, vector<24x16xbf16>
    %c0_1 = arith.constant 0 : index
    %c0_2 = arith.constant 0 : index
    %1 = vector.load %arg3[%c0_1, %c0_2] : memref<16x128xbf16, #tpu.memory_space<vmem>>, vector<16x128xbf16>
    %cst = arith.constant dense<0.000000e+00> : vector<24x128xf32>
    %2 = tpu.matmul %0, %1, %cst {dimension_numbers = #tpu.dot_dimension_numbers<[1], [0], [0], [1], [0, 0, 1, 1], [], []>} : vector<24x16xbf16>, vector<16x128xbf16>, vector<24x128xf32> -> vector<24x128xf32>
    %c0_3 = arith.constant 0 : index
    %c0_4 = arith.constant 0 : index
    %3 = vector.load %arg4[%c0_3, %c0_4] : memref<24x1xf32, #tpu.memory_space<vmem>>, vector<24x1xf32>
    %4 = vector.broadcast %3 : vector<24x1xf32> to vector<24x128xf32>
    %5 = arith.addf %2, %4 : vector<24x128xf32>
    %6 = arith.truncf %5 : vector<24x128xf32> to vector<24x128xbf16>
    %c0_5 = arith.constant 0 : index
    %c0_6 = arith.constant 0 : index
    %7 = vector.load %arg5[%c0_5, %c0_6] : memref<24x128xbf16, #tpu.memory_space<vmem>>, vector<24x128xbf16>
    tpu.vector_store %arg5[%c0_5, %c0_6], %6 {strides = array<i32>} : memref<24x128xbf16, #tpu.memory_space<vmem>>, vector<24x128xbf16>,
    return
  }
  func.func @transform_0(%arg0: i32, %arg1: i32) -> (i32, i32) {
    %c0_i32 = arith.constant 0 : i32
    %c0_i32_0 = arith.constant 0 : i32
    return %arg1, %c0_i32 : i32, i32
  }
  func.func @transform_1(%arg0: i32, %arg1: i32) -> (i32, i32) {
    %c0_i32 = arith.constant 0 : i32
    %c0_i32_0 = arith.constant 0 : i32
    return %c0_i32, %arg0 : i32, i32
  }
  func.func @transform_2(%arg0: i32, %arg1: i32) -> (i32, i32) {
    %c0_i32 = arith.constant 0 : i32
    %c0_i32_0 = arith.constant 0 : i32
    return %arg1, %c0_i32 : i32, i32
  }
  func.func @transform_3(%arg0: i32, %arg1: i32) -> (i32, i32) {
    %c0_i32 = arith.constant 0 : i32
    return %arg1, %arg0 : i32, i32
  }
}

module attributes {stable_mosaic.version = 11 : i64} {
  func.func @_gemm1_res_kernel(%arg0: i32, %arg1: i32, %arg2: memref<24x224xbf16, #tpu.memory_space<vmem>>, %arg3: memref<224x128xbf16, #tpu.memory_space<vmem>>, %arg4: memref<24x1xf32, #tpu.memory_space<vmem>>, %arg5: memref<24x128xbf16, #tpu.memory_space<vmem>>, %arg6: memref<24x128xbf16, #tpu.memory_space<vmem>>) attributes {dimension_semantics = [#tpu.dimension_semantics<parallel>, #tpu.dimension_semantics<parallel>], iteration_bounds = array<i64: 1, 1>, scalar_prefetch = 0 : i64, scratch_operands = 0 : i64, tpu.core_type = #tpu.core_type<tc>, window_params = [{transform_indices = @transform_0, window_bounds = array<i64: 24, 224>}, {transform_indices = @transform_1, window_bounds = array<i64: 224, 128>}, {transform_indices = @transform_2, window_bounds = array<i64: 24, 1>}, {transform_indices = @transform_3, window_bounds = array<i64: 24, 128>}, {transform_indices = @transform_4, window_bounds = array<i64: 24, 128>}]} {
    %c0 = arith.constant 0 : index
    %c0_0 = arith.constant 0 : index
    %0 = vector.load %arg2[%c0, %c0_0] : memref<24x224xbf16, #tpu.memory_space<vmem>>, vector<24x224xbf16>
    %c0_1 = arith.constant 0 : index
    %c0_2 = arith.constant 0 : index
    %1 = vector.load %arg3[%c0_1, %c0_2] : memref<224x128xbf16, #tpu.memory_space<vmem>>, vector<224x128xbf16>
    %cst = arith.constant dense<0.000000e+00> : vector<24x128xf32>
    %2 = tpu.matmul %0, %1, %cst {dimension_numbers = #tpu.dot_dimension_numbers<[1], [0], [0], [1], [0, 0, 1, 1], [], []>} : vector<24x224xbf16>, vector<224x128xbf16>, vector<24x128xf32> -> vector<24x128xf32>
    %c0_3 = arith.constant 0 : index
    %c0_4 = arith.constant 0 : index
    %3 = vector.load %arg4[%c0_3, %c0_4] : memref<24x1xf32, #tpu.memory_space<vmem>>, vector<24x1xf32>
    %4 = vector.broadcast %3 : vector<24x1xf32> to vector<24x128xf32>
    %5 = arith.addf %2, %4 : vector<24x128xf32>
    %c0_5 = arith.constant 0 : index
    %c0_6 = arith.constant 0 : index
    %6 = vector.load %arg5[%c0_5, %c0_6] : memref<24x128xbf16, #tpu.memory_space<vmem>>, vector<24x128xbf16>
    %7 = arith.extf %6 : vector<24x128xbf16> to vector<24x128xf32>
    %8 = arith.addf %5, %7 : vector<24x128xf32>
    %9 = arith.truncf %8 : vector<24x128xf32> to vector<24x128xbf16>
    %c0_7 = arith.constant 0 : index
    %c0_8 = arith.constant 0 : index
    %10 = vector.load %arg6[%c0_7, %c0_8] : memref<24x128xbf16, #tpu.memory_space<vmem>>, vector<24x128xbf16>
    tpu.vector_store %arg6[%c0_7, %c0_8], %9 {strides = array<i32>} : memref<24x128xbf16, #tpu.memory_space<vmem>>, vector<24x128xbf16>,
    return
  }
  func.func @transform_0(%arg0: i32, %arg1: i32) -> (i32, i32) {
    %c0_i32 = arith.constant 0 : i32
    %c0_i32_0 = arith.constant 0 : i32
    return %arg1, %c0_i32 : i32, i32
  }
  func.func @transform_1(%arg0: i32, %arg1: i32) -> (i32, i32) {
    %c0_i32 = arith.constant 0 : i32
    %c0_i32_0 = arith.constant 0 : i32
    return %c0_i32, %arg0 : i32, i32
  }
  func.func @transform_2(%arg0: i32, %arg1: i32) -> (i32, i32) {
    %c0_i32 = arith.constant 0 : i32
    %c0_i32_0 = arith.constant 0 : i32
    return %arg1, %c0_i32 : i32, i32
  }
  func.func @transform_3(%arg0: i32, %arg1: i32) -> (i32, i32) {
    %c0_i32 = arith.constant 0 : i32
    return %arg1, %arg0 : i32, i32
  }
  func.func @transform_4(%arg0: i32, %arg1: i32) -> (i32, i32) {
    %c0_i32 = arith.constant 0 : i32
    return %arg1, %arg0 : i32, i32
  }
}

module attributes {stable_mosaic.version = 11 : i64} {
  func.func @_gemm1_kernel(%arg0: i32, %arg1: i32, %arg2: memref<24x224xbf16, #tpu.memory_space<vmem>>, %arg3: memref<224x32xbf16, #tpu.memory_space<vmem>>, %arg4: memref<24x1xf32, #tpu.memory_space<vmem>>, %arg5: memref<24x32xbf16, #tpu.memory_space<vmem>>) attributes {dimension_semantics = [#tpu.dimension_semantics<parallel>, #tpu.dimension_semantics<parallel>], iteration_bounds = array<i64: 1, 1>, scalar_prefetch = 0 : i64, scratch_operands = 0 : i64, tpu.core_type = #tpu.core_type<tc>, window_params = [{transform_indices = @transform_0, window_bounds = array<i64: 24, 224>}, {transform_indices = @transform_1, window_bounds = array<i64: 224, 32>}, {transform_indices = @transform_2, window_bounds = array<i64: 24, 1>}, {transform_indices = @transform_3, window_bounds = array<i64: 24, 32>}]} {
    %c0 = arith.constant 0 : index
    %c0_0 = arith.constant 0 : index
    %0 = vector.load %arg2[%c0, %c0_0] : memref<24x224xbf16, #tpu.memory_space<vmem>>, vector<24x224xbf16>
    %c0_1 = arith.constant 0 : index
    %c0_2 = arith.constant 0 : index
    %1 = vector.load %arg3[%c0_1, %c0_2] : memref<224x32xbf16, #tpu.memory_space<vmem>>, vector<224x32xbf16>
    %cst = arith.constant dense<0.000000e+00> : vector<24x32xf32>
    %2 = tpu.matmul %0, %1, %cst {dimension_numbers = #tpu.dot_dimension_numbers<[1], [0], [0], [1], [0, 0, 1, 1], [], []>} : vector<24x224xbf16>, vector<224x32xbf16>, vector<24x32xf32> -> vector<24x32xf32>
    %c0_3 = arith.constant 0 : index
    %c0_4 = arith.constant 0 : index
    %3 = vector.load %arg4[%c0_3, %c0_4] : memref<24x1xf32, #tpu.memory_space<vmem>>, vector<24x1xf32>
    %4 = vector.broadcast %3 : vector<24x1xf32> to vector<24x32xf32>
    %5 = arith.addf %2, %4 : vector<24x32xf32>
    %6 = arith.truncf %5 : vector<24x32xf32> to vector<24x32xbf16>
    %c0_5 = arith.constant 0 : index
    %c0_6 = arith.constant 0 : index
    %7 = vector.load %arg5[%c0_5, %c0_6] : memref<24x32xbf16, #tpu.memory_space<vmem>>, vector<24x32xbf16>
    tpu.vector_store %arg5[%c0_5, %c0_6], %6 {strides = array<i32>} : memref<24x32xbf16, #tpu.memory_space<vmem>>, vector<24x32xbf16>,
    return
  }
  func.func @transform_0(%arg0: i32, %arg1: i32) -> (i32, i32) {
    %c0_i32 = arith.constant 0 : i32
    %c0_i32_0 = arith.constant 0 : i32
    return %arg1, %c0_i32 : i32, i32
  }
  func.func @transform_1(%arg0: i32, %arg1: i32) -> (i32, i32) {
    %c0_i32 = arith.constant 0 : i32
    %c0_i32_0 = arith.constant 0 : i32
    return %c0_i32, %arg0 : i32, i32
  }
  func.func @transform_2(%arg0: i32, %arg1: i32) -> (i32, i32) {
    %c0_i32 = arith.constant 0 : i32
    %c0_i32_0 = arith.constant 0 : i32
    return %arg1, %c0_i32 : i32, i32
  }
  func.func @transform_3(%arg0: i32, %arg1: i32) -> (i32, i32) {
    %c0_i32 = arith.constant 0 : i32
    return %arg1, %arg0 : i32, i32
  }
}

module attributes {stable_mosaic.version = 11 : i64} {
  func.func @_gn_kernel(%arg0: i32, %arg1: memref<6x2x16xbf16, #tpu.memory_space<vmem>>, %arg2: memref<6x1x1xf32, #tpu.memory_space<vmem>>, %arg3: memref<6x1x1xf32, #tpu.memory_space<vmem>>, %arg4: memref<6x2x16xbf16, #tpu.memory_space<vmem>>) attributes {dimension_semantics = [#tpu.dimension_semantics<parallel>], iteration_bounds = array<i64: 4>, scalar_prefetch = 0 : i64, scratch_operands = 0 : i64, tpu.core_type = #tpu.core_type<tc>, window_params = [{transform_indices = @transform_0, window_bounds = array<i64: 6, 2, 16>}, {transform_indices = @transform_1, window_bounds = array<i64: 6, 1, 1>}, {transform_indices = @transform_2, window_bounds = array<i64: 6, 1, 1>}, {transform_indices = @transform_3, window_bounds = array<i64: 6, 2, 16>}]} {
    %c0 = arith.constant 0 : index
    %c0_0 = arith.constant 0 : index
    %c0_1 = arith.constant 0 : index
    %0 = vector.load %arg1[%c0, %c0_0, %c0_1] : memref<6x2x16xbf16, #tpu.memory_space<vmem>>, vector<6x2x16xbf16>
    %1 = arith.extf %0 : vector<6x2x16xbf16> to vector<6x2x16xf32>
    %cst = arith.constant dense<0.000000e+00> : vector<6x2xf32>
    %2 = vector.multi_reduction <add>, %1, %cst [2] : vector<6x2x16xf32> to vector<6x2xf32>
    %3 = vector.shape_cast %2 : vector<6x2xf32> to vector<6x2x1xf32>
    %cst_2 = arith.constant 1.600000e+01 : f32
    %4 = vector.broadcast %cst_2 : f32 to vector<6x2x1xf32>
    %5 = arith.divf %3, %4 : vector<6x2x1xf32>
    %cst_3 = arith.constant dense<0.000000e+00> : vector<2x1xf32>
    %6 = vector.multi_reduction <add>, %5, %cst_3 [0] : vector<6x2x1xf32> to vector<2x1xf32>
    %7 = vector.shape_cast %6 : vector<2x1xf32> to vector<1x2x1xf32>
    %cst_4 = arith.constant 6.000000e+00 : f32
    %8 = vector.broadcast %cst_4 : f32 to vector<1x2x1xf32>
    %9 = arith.divf %7, %8 : vector<1x2x1xf32>
    %10 = vector.broadcast %9 : vector<1x2x1xf32> to vector<6x2x16xf32>
    %11 = arith.subf %1, %10 : vector<6x2x16xf32>
    %12 = arith.mulf %11, %11 : vector<6x2x16xf32>
    %cst_5 = arith.constant dense<0.000000e+00> : vector<6x2xf32>
    %13 = vector.multi_reduction <add>, %12, %cst_5 [2] : vector<6x2x16xf32> to vector<6x2xf32>
    %14 = vector.shape_cast %13 : vector<6x2xf32> to vector<6x2x1xf32>
    %cst_6 = arith.constant 1.600000e+01 : f32
    %15 = vector.broadcast %cst_6 : f32 to vector<6x2x1xf32>
    %16 = arith.divf %14, %15 : vector<6x2x1xf32>
    %cst_7 = arith.constant dense<0.000000e+00> : vector<2x1xf32>
    %17 = vector.multi_reduction <add>, %16, %cst_7 [0] : vector<6x2x1xf32> to vector<2x1xf32>
    %18 = vector.shape_cast %17 : vector<2x1xf32> to vector<1x2x1xf32>
    %cst_8 = arith.constant 6.000000e+00 : f32
    %19 = vector.broadcast %cst_8 : f32 to vector<1x2x1xf32>
    %20 = arith.divf %18, %19 : vector<1x2x1xf32>
    %cst_9 = arith.constant 9.99999974E-6 : f32
    %21 = vector.broadcast %cst_9 : f32 to vector<1x2x1xf32>
    %22 = arith.addf %20, %21 : vector<1x2x1xf32>
    %23 = math.rsqrt %22 : vector<1x2x1xf32>
    %24 = vector.broadcast %23 : vector<1x2x1xf32> to vector<6x2x16xf32>
    %25 = arith.mulf %11, %24 : vector<6x2x16xf32>
    %c0_10 = arith.constant 0 : index
    %c0_11 = arith.constant 0 : index
    %c0_12 = arith.constant 0 : index
    %26 = vector.load %arg2[%c0_10, %c0_11, %c0_12] : memref<6x1x1xf32, #tpu.memory_space<vmem>>, vector<6x1x1xf32>
    %27 = vector.broadcast %26 : vector<6x1x1xf32> to vector<6x2x16xf32>
    %28 = arith.mulf %25, %27 : vector<6x2x16xf32>
    %c0_13 = arith.constant 0 : index
    %c0_14 = arith.constant 0 : index
    %c0_15 = arith.constant 0 : index
    %29 = vector.load %arg3[%c0_13, %c0_14, %c0_15] : memref<6x1x1xf32, #tpu.memory_space<vmem>>, vector<6x1x1xf32>
    %30 = vector.broadcast %29 : vector<6x1x1xf32> to vector<6x2x16xf32>
    %31 = arith.addf %28, %30 : vector<6x2x16xf32>
    %32 = arith.negf %31 : vector<6x2x16xf32>
    %33 = math.exp %32 : vector<6x2x16xf32>
    %cst_16 = arith.constant 1.000000e+00 : f32
    %34 = vector.broadcast %cst_16 : f32 to vector<6x2x16xf32>
    %35 = arith.addf %34, %33 : vector<6x2x16xf32>
    %36 = arith.divf %34, %35 : vector<6x2x16xf32>
    %37 = arith.mulf %31, %36 : vector<6x2x16xf32>
    %38 = arith.truncf %37 : vector<6x2x16xf32> to vector<6x2x16xbf16>
    %c0_17 = arith.constant 0 : index
    %c0_18 = arith.constant 0 : index
    %c0_19 = arith.constant 0 : index
    %39 = vector.load %arg4[%c0_17, %c0_18, %c0_19] : memref<6x2x16xbf16, #tpu.memory_space<vmem>>, vector<6x2x16xbf16>
    tpu.vector_store %arg4[%c0_17, %c0_18, %c0_19], %38 {strides = array<i32>} : memref<6x2x16xbf16, #tpu.memory_space<vmem>>, vector<6x2x16xbf16>,
    return
  }
  func.func @transform_0(%arg0: i32) -> (i32, i32, i32) {
    %c0_i32 = arith.constant 0 : i32
    %c0_i32_0 = arith.constant 0 : i32
    %c0_i32_1 = arith.constant 0 : i32
    return %arg0, %c0_i32, %c0_i32_0 : i32, i32, i32
  }
  func.func @transform_1(%arg0: i32) -> (i32, i32, i32) {
    %c0_i32 = arith.constant 0 : i32
    %c0_i32_0 = arith.constant 0 : i32
    %c0_i32_1 = arith.constant 0 : i32
    return %arg0, %c0_i32, %c0_i32_0 : i32, i32, i32
  }
  func.func @transform_2(%arg0: i32) -> (i32, i32, i32) {
    %c0_i32 = arith.constant 0 : i32
    %c0_i32_0 = arith.constant 0 : i32
    %c0_i32_1 = arith.constant 0 : i32
    return %arg0, %c0_i32, %c0_i32_0 : i32, i32, i32
  }
  func.func @transform_3(%arg0: i32) -> (i32, i32, i32) {
    %c0_i32 = arith.constant 0 : i32
    %c0_i32_0 = arith.constant 0 : i32
    %c0_i32_1 = arith.constant 0 : i32
    return %arg0, %c0_i32, %c0_i32_0 : i32, i32, i32
  }
}

module attributes {stable_mosaic.version = 11 : i64} {
  func.func @_gemm1_res_kernel(%arg0: i32, %arg1: i32, %arg2: memref<24x224xbf16, #tpu.memory_space<vmem>>, %arg3: memref<224x32xbf16, #tpu.memory_space<vmem>>, %arg4: memref<24x1xf32, #tpu.memory_space<vmem>>, %arg5: memref<24x32xbf16, #tpu.memory_space<vmem>>, %arg6: memref<24x32xbf16, #tpu.memory_space<vmem>>) attributes {dimension_semantics = [#tpu.dimension_semantics<parallel>, #tpu.dimension_semantics<parallel>], iteration_bounds = array<i64: 1, 1>, scalar_prefetch = 0 : i64, scratch_operands = 0 : i64, tpu.core_type = #tpu.core_type<tc>, window_params = [{transform_indices = @transform_0, window_bounds = array<i64: 24, 224>}, {transform_indices = @transform_1, window_bounds = array<i64: 224, 32>}, {transform_indices = @transform_2, window_bounds = array<i64: 24, 1>}, {transform_indices = @transform_3, window_bounds = array<i64: 24, 32>}, {transform_indices = @transform_4, window_bounds = array<i64: 24, 32>}]} {
    %c0 = arith.constant 0 : index
    %c0_0 = arith.constant 0 : index
    %0 = vector.load %arg2[%c0, %c0_0] : memref<24x224xbf16, #tpu.memory_space<vmem>>, vector<24x224xbf16>
    %c0_1 = arith.constant 0 : index
    %c0_2 = arith.constant 0 : index
    %1 = vector.load %arg3[%c0_1, %c0_2] : memref<224x32xbf16, #tpu.memory_space<vmem>>, vector<224x32xbf16>
    %cst = arith.constant dense<0.000000e+00> : vector<24x32xf32>
    %2 = tpu.matmul %0, %1, %cst {dimension_numbers = #tpu.dot_dimension_numbers<[1], [0], [0], [1], [0, 0, 1, 1], [], []>} : vector<24x224xbf16>, vector<224x32xbf16>, vector<24x32xf32> -> vector<24x32xf32>
    %c0_3 = arith.constant 0 : index
    %c0_4 = arith.constant 0 : index
    %3 = vector.load %arg4[%c0_3, %c0_4] : memref<24x1xf32, #tpu.memory_space<vmem>>, vector<24x1xf32>
    %4 = vector.broadcast %3 : vector<24x1xf32> to vector<24x32xf32>
    %5 = arith.addf %2, %4 : vector<24x32xf32>
    %c0_5 = arith.constant 0 : index
    %c0_6 = arith.constant 0 : index
    %6 = vector.load %arg5[%c0_5, %c0_6] : memref<24x32xbf16, #tpu.memory_space<vmem>>, vector<24x32xbf16>
    %7 = arith.extf %6 : vector<24x32xbf16> to vector<24x32xf32>
    %8 = arith.addf %5, %7 : vector<24x32xf32>
    %9 = arith.truncf %8 : vector<24x32xf32> to vector<24x32xbf16>
    %c0_7 = arith.constant 0 : index
    %c0_8 = arith.constant 0 : index
    %10 = vector.load %arg6[%c0_7, %c0_8] : memref<24x32xbf16, #tpu.memory_space<vmem>>, vector<24x32xbf16>
    tpu.vector_store %arg6[%c0_7, %c0_8], %9 {strides = array<i32>} : memref<24x32xbf16, #tpu.memory_space<vmem>>, vector<24x32xbf16>,
    return
  }
  func.func @transform_0(%arg0: i32, %arg1: i32) -> (i32, i32) {
    %c0_i32 = arith.constant 0 : i32
    %c0_i32_0 = arith.constant 0 : i32
    return %arg1, %c0_i32 : i32, i32
  }
  func.func @transform_1(%arg0: i32, %arg1: i32) -> (i32, i32) {
    %c0_i32 = arith.constant 0 : i32
    %c0_i32_0 = arith.constant 0 : i32
    return %c0_i32, %arg0 : i32, i32
  }
  func.func @transform_2(%arg0: i32, %arg1: i32) -> (i32, i32) {
    %c0_i32 = arith.constant 0 : i32
    %c0_i32_0 = arith.constant 0 : i32
    return %arg1, %c0_i32 : i32, i32
  }
  func.func @transform_3(%arg0: i32, %arg1: i32) -> (i32, i32) {
    %c0_i32 = arith.constant 0 : i32
    return %arg1, %arg0 : i32, i32
  }
  func.func @transform_4(%arg0: i32, %arg1: i32) -> (i32, i32) {
    %c0_i32 = arith.constant 0 : i32
    return %arg1, %arg0 : i32, i32
  }
}

module attributes {stable_mosaic.version = 11 : i64} {
  func.func @_gn_kernel(%arg0: i32, %arg1: memref<6x2x16xbf16, #tpu.memory_space<vmem>>, %arg2: memref<6x1x1xf32, #tpu.memory_space<vmem>>, %arg3: memref<6x1x1xf32, #tpu.memory_space<vmem>>, %arg4: memref<6x2x16xbf16, #tpu.memory_space<vmem>>) attributes {dimension_semantics = [#tpu.dimension_semantics<parallel>], iteration_bounds = array<i64: 4>, scalar_prefetch = 0 : i64, scratch_operands = 0 : i64, tpu.core_type = #tpu.core_type<tc>, window_params = [{transform_indices = @transform_0, window_bounds = array<i64: 6, 2, 16>}, {transform_indices = @transform_1, window_bounds = array<i64: 6, 1, 1>}, {transform_indices = @transform_2, window_bounds = array<i64: 6, 1, 1>}, {transform_indices = @transform_3, window_bounds = array<i64: 6, 2, 16>}]} {
    %c0 = arith.constant 0 : index
    %c0_0 = arith.constant 0 : index
    %c0_1 = arith.constant 0 : index
    %0 = vector.load %arg1[%c0, %c0_0, %c0_1] : memref<6x2x16xbf16, #tpu.memory_space<vmem>>, vector<6x2x16xbf16>
    %1 = arith.extf %0 : vector<6x2x16xbf16> to vector<6x2x16xf32>
    %cst = arith.constant dense<0.000000e+00> : vector<6x2xf32>
    %2 = vector.multi_reduction <add>, %1, %cst [2] : vector<6x2x16xf32> to vector<6x2xf32>
    %3 = vector.shape_cast %2 : vector<6x2xf32> to vector<6x2x1xf32>
    %cst_2 = arith.constant 1.600000e+01 : f32
    %4 = vector.broadcast %cst_2 : f32 to vector<6x2x1xf32>
    %5 = arith.divf %3, %4 : vector<6x2x1xf32>
    %cst_3 = arith.constant dense<0.000000e+00> : vector<2x1xf32>
    %6 = vector.multi_reduction <add>, %5, %cst_3 [0] : vector<6x2x1xf32> to vector<2x1xf32>
    %7 = vector.shape_cast %6 : vector<2x1xf32> to vector<1x2x1xf32>
    %cst_4 = arith.constant 6.000000e+00 : f32
    %8 = vector.broadcast %cst_4 : f32 to vector<1x2x1xf32>
    %9 = arith.divf %7, %8 : vector<1x2x1xf32>
    %10 = vector.broadcast %9 : vector<1x2x1xf32> to vector<6x2x16xf32>
    %11 = arith.subf %1, %10 : vector<6x2x16xf32>
    %12 = arith.mulf %11, %11 : vector<6x2x16xf32>
    %cst_5 = arith.constant dense<0.000000e+00> : vector<6x2xf32>
    %13 = vector.multi_reduction <add>, %12, %cst_5 [2] : vector<6x2x16xf32> to vector<6x2xf32>
    %14 = vector.shape_cast %13 : vector<6x2xf32> to vector<6x2x1xf32>
    %cst_6 = arith.constant 1.600000e+01 : f32
    %15 = vector.broadcast %cst_6 : f32 to vector<6x2x1xf32>
    %16 = arith.divf %14, %15 : vector<6x2x1xf32>
    %cst_7 = arith.constant dense<0.000000e+00> : vector<2x1xf32>
    %17 = vector.multi_reduction <add>, %16, %cst_7 [0] : vector<6x2x1xf32> to vector<2x1xf32>
    %18 = vector.shape_cast %17 : vector<2x1xf32> to vector<1x2x1xf32>
    %cst_8 = arith.constant 6.000000e+00 : f32
    %19 = vector.broadcast %cst_8 : f32 to vector<1x2x1xf32>
    %20 = arith.divf %18, %19 : vector<1x2x1xf32>
    %cst_9 = arith.constant 9.99999974E-6 : f32
    %21 = vector.broadcast %cst_9 : f32 to vector<1x2x1xf32>
    %22 = arith.addf %20, %21 : vector<1x2x1xf32>
    %23 = math.rsqrt %22 : vector<1x2x1xf32>
    %24 = vector.broadcast %23 : vector<1x2x1xf32> to vector<6x2x16xf32>
    %25 = arith.mulf %11, %24 : vector<6x2x16xf32>
    %c0_10 = arith.constant 0 : index
    %c0_11 = arith.constant 0 : index
    %c0_12 = arith.constant 0 : index
    %26 = vector.load %arg2[%c0_10, %c0_11, %c0_12] : memref<6x1x1xf32, #tpu.memory_space<vmem>>, vector<6x1x1xf32>
    %27 = vector.broadcast %26 : vector<6x1x1xf32> to vector<6x2x16xf32>
    %28 = arith.mulf %25, %27 : vector<6x2x16xf32>
    %c0_13 = arith.constant 0 : index
    %c0_14 = arith.constant 0 : index
    %c0_15 = arith.constant 0 : index
    %29 = vector.load %arg3[%c0_13, %c0_14, %c0_15] : memref<6x1x1xf32, #tpu.memory_space<vmem>>, vector<6x1x1xf32>
    %30 = vector.broadcast %29 : vector<6x1x1xf32> to vector<6x2x16xf32>
    %31 = arith.addf %28, %30 : vector<6x2x16xf32>
    %32 = arith.truncf %31 : vector<6x2x16xf32> to vector<6x2x16xbf16>
    %c0_16 = arith.constant 0 : index
    %c0_17 = arith.constant 0 : index
    %c0_18 = arith.constant 0 : index
    %33 = vector.load %arg4[%c0_16, %c0_17, %c0_18] : memref<6x2x16xbf16, #tpu.memory_space<vmem>>, vector<6x2x16xbf16>
    tpu.vector_store %arg4[%c0_16, %c0_17, %c0_18], %32 {strides = array<i32>} : memref<6x2x16xbf16, #tpu.memory_space<vmem>>, vector<6x2x16xbf16>,
    return
  }
  func.func @transform_0(%arg0: i32) -> (i32, i32, i32) {
    %c0_i32 = arith.constant 0 : i32
    %c0_i32_0 = arith.constant 0 : i32
    %c0_i32_1 = arith.constant 0 : i32
    return %arg0, %c0_i32, %c0_i32_0 : i32, i32, i32
  }
  func.func @transform_1(%arg0: i32) -> (i32, i32, i32) {
    %c0_i32 = arith.constant 0 : i32
    %c0_i32_0 = arith.constant 0 : i32
    %c0_i32_1 = arith.constant 0 : i32
    return %arg0, %c0_i32, %c0_i32_0 : i32, i32, i32
  }
  func.func @transform_2(%arg0: i32) -> (i32, i32, i32) {
    %c0_i32 = arith.constant 0 : i32
    %c0_i32_0 = arith.constant 0 : i32
    %c0_i32_1 = arith.constant 0 : i32
    return %arg0, %c0_i32, %c0_i32_0 : i32, i32, i32
  }
  func.func @transform_3(%arg0: i32) -> (i32, i32, i32) {
    %c0_i32 = arith.constant 0 : i32
    %c0_i32_0 = arith.constant 0 : i32
    %c0_i32_1 = arith.constant 0 : i32
    return %arg0, %c0_i32, %c0_i32_0 : i32, i32, i32
  }
}

module attributes {stable_mosaic.version = 11 : i64} {
  func.func @_gemm1_kernel(%arg0: i32, %arg1: i32, %arg2: memref<72x24xbf16, #tpu.memory_space<vmem>>, %arg3: memref<24x32xbf16, #tpu.memory_space<vmem>>, %arg4: memref<72x1xf32, #tpu.memory_space<vmem>>, %arg5: memref<72x32xbf16, #tpu.memory_space<vmem>>) attributes {dimension_semantics = [#tpu.dimension_semantics<parallel>, #tpu.dimension_semantics<parallel>], iteration_bounds = array<i64: 1, 1>, scalar_prefetch = 0 : i64, scratch_operands = 0 : i64, tpu.core_type = #tpu.core_type<tc>, window_params = [{transform_indices = @transform_0, window_bounds = array<i64: 72, 24>}, {transform_indices = @transform_1, window_bounds = array<i64: 24, 32>}, {transform_indices = @transform_2, window_bounds = array<i64: 72, 1>}, {transform_indices = @transform_3, window_bounds = array<i64: 72, 32>}]} {
    %c0 = arith.constant 0 : index
    %c0_0 = arith.constant 0 : index
    %0 = vector.load %arg2[%c0, %c0_0] : memref<72x24xbf16, #tpu.memory_space<vmem>>, vector<72x24xbf16>
    %c0_1 = arith.constant 0 : index
    %c0_2 = arith.constant 0 : index
    %1 = vector.load %arg3[%c0_1, %c0_2] : memref<24x32xbf16, #tpu.memory_space<vmem>>, vector<24x32xbf16>
    %cst = arith.constant dense<0.000000e+00> : vector<72x32xf32>
    %2 = tpu.matmul %0, %1, %cst {dimension_numbers = #tpu.dot_dimension_numbers<[1], [0], [0], [1], [0, 0, 1, 1], [], []>} : vector<72x24xbf16>, vector<24x32xbf16>, vector<72x32xf32> -> vector<72x32xf32>
    %c0_3 = arith.constant 0 : index
    %c0_4 = arith.constant 0 : index
    %3 = vector.load %arg4[%c0_3, %c0_4] : memref<72x1xf32, #tpu.memory_space<vmem>>, vector<72x1xf32>
    %4 = vector.broadcast %3 : vector<72x1xf32> to vector<72x32xf32>
    %5 = arith.addf %2, %4 : vector<72x32xf32>
    %6 = arith.truncf %5 : vector<72x32xf32> to vector<72x32xbf16>
    %c0_5 = arith.constant 0 : index
    %c0_6 = arith.constant 0 : index
    %7 = vector.load %arg5[%c0_5, %c0_6] : memref<72x32xbf16, #tpu.memory_space<vmem>>, vector<72x32xbf16>
    tpu.vector_store %arg5[%c0_5, %c0_6], %6 {strides = array<i32>} : memref<72x32xbf16, #tpu.memory_space<vmem>>, vector<72x32xbf16>,
    return
  }
  func.func @transform_0(%arg0: i32, %arg1: i32) -> (i32, i32) {
    %c0_i32 = arith.constant 0 : i32
    %c0_i32_0 = arith.constant 0 : i32
    return %arg1, %c0_i32 : i32, i32
  }
  func.func @transform_1(%arg0: i32, %arg1: i32) -> (i32, i32) {
    %c0_i32 = arith.constant 0 : i32
    %c0_i32_0 = arith.constant 0 : i32
    return %c0_i32, %arg0 : i32, i32
  }
  func.func @transform_2(%arg0: i32, %arg1: i32) -> (i32, i32) {
    %c0_i32 = arith.constant 0 : i32
    %c0_i32_0 = arith.constant 0 : i32
    return %arg1, %c0_i32 : i32, i32
  }
  func.func @transform_3(%arg0: i32, %arg1: i32) -> (i32, i32) {
    %c0_i32 = arith.constant 0 : i32
    return %arg1, %arg0 : i32, i32
  }
}

module attributes {stable_mosaic.version = 11 : i64} {
  func.func @_gemm1_res_kernel(%arg0: i32, %arg1: i32, %arg2: memref<24x24xbf16, #tpu.memory_space<vmem>>, %arg3: memref<24x32xbf16, #tpu.memory_space<vmem>>, %arg4: memref<24x1xf32, #tpu.memory_space<vmem>>, %arg5: memref<24x32xbf16, #tpu.memory_space<vmem>>, %arg6: memref<24x32xbf16, #tpu.memory_space<vmem>>) attributes {dimension_semantics = [#tpu.dimension_semantics<parallel>, #tpu.dimension_semantics<parallel>], iteration_bounds = array<i64: 1, 1>, scalar_prefetch = 0 : i64, scratch_operands = 0 : i64, tpu.core_type = #tpu.core_type<tc>, window_params = [{transform_indices = @transform_0, window_bounds = array<i64: 24, 24>}, {transform_indices = @transform_1, window_bounds = array<i64: 24, 32>}, {transform_indices = @transform_2, window_bounds = array<i64: 24, 1>}, {transform_indices = @transform_3, window_bounds = array<i64: 24, 32>}, {transform_indices = @transform_4, window_bounds = array<i64: 24, 32>}]} {
    %c0 = arith.constant 0 : index
    %c0_0 = arith.constant 0 : index
    %0 = vector.load %arg2[%c0, %c0_0] : memref<24x24xbf16, #tpu.memory_space<vmem>>, vector<24x24xbf16>
    %c0_1 = arith.constant 0 : index
    %c0_2 = arith.constant 0 : index
    %1 = vector.load %arg3[%c0_1, %c0_2] : memref<24x32xbf16, #tpu.memory_space<vmem>>, vector<24x32xbf16>
    %cst = arith.constant dense<0.000000e+00> : vector<24x32xf32>
    %2 = tpu.matmul %0, %1, %cst {dimension_numbers = #tpu.dot_dimension_numbers<[1], [0], [0], [1], [0, 0, 1, 1], [], []>} : vector<24x24xbf16>, vector<24x32xbf16>, vector<24x32xf32> -> vector<24x32xf32>
    %c0_3 = arith.constant 0 : index
    %c0_4 = arith.constant 0 : index
    %3 = vector.load %arg4[%c0_3, %c0_4] : memref<24x1xf32, #tpu.memory_space<vmem>>, vector<24x1xf32>
    %4 = vector.broadcast %3 : vector<24x1xf32> to vector<24x32xf32>
    %5 = arith.addf %2, %4 : vector<24x32xf32>
    %c0_5 = arith.constant 0 : index
    %c0_6 = arith.constant 0 : index
    %6 = vector.load %arg5[%c0_5, %c0_6] : memref<24x32xbf16, #tpu.memory_space<vmem>>, vector<24x32xbf16>
    %7 = arith.extf %6 : vector<24x32xbf16> to vector<24x32xf32>
    %8 = arith.addf %5, %7 : vector<24x32xf32>
    %9 = arith.truncf %8 : vector<24x32xf32> to vector<24x32xbf16>
    %c0_7 = arith.constant 0 : index
    %c0_8 = arith.constant 0 : index
    %10 = vector.load %arg6[%c0_7, %c0_8] : memref<24x32xbf16, #tpu.memory_space<vmem>>, vector<24x32xbf16>
    tpu.vector_store %arg6[%c0_7, %c0_8], %9 {strides = array<i32>} : memref<24x32xbf16, #tpu.memory_space<vmem>>, vector<24x32xbf16>,
    return
  }
  func.func @transform_0(%arg0: i32, %arg1: i32) -> (i32, i32) {
    %c0_i32 = arith.constant 0 : i32
    %c0_i32_0 = arith.constant 0 : i32
    return %arg1, %c0_i32 : i32, i32
  }
  func.func @transform_1(%arg0: i32, %arg1: i32) -> (i32, i32) {
    %c0_i32 = arith.constant 0 : i32
    %c0_i32_0 = arith.constant 0 : i32
    return %c0_i32, %arg0 : i32, i32
  }
  func.func @transform_2(%arg0: i32, %arg1: i32) -> (i32, i32) {
    %c0_i32 = arith.constant 0 : i32
    %c0_i32_0 = arith.constant 0 : i32
    return %arg1, %c0_i32 : i32, i32
  }
  func.func @transform_3(%arg0: i32, %arg1: i32) -> (i32, i32) {
    %c0_i32 = arith.constant 0 : i32
    return %arg1, %arg0 : i32, i32
  }
  func.func @transform_4(%arg0: i32, %arg1: i32) -> (i32, i32) {
    %c0_i32 = arith.constant 0 : i32
    return %arg1, %arg0 : i32, i32
  }
}

module attributes {stable_mosaic.version = 11 : i64} {
  func.func @_attn_kernel(%arg0: i32, %arg1: memref<72x2x16xbf16, #tpu.memory_space<vmem>>, %arg2: memref<24x2x16xbf16, #tpu.memory_space<vmem>>) attributes {dimension_semantics = [#tpu.dimension_semantics<arbitrary>], iteration_bounds = array<i64: 1>, scalar_prefetch = 0 : i64, scratch_operands = 0 : i64, tpu.core_type = #tpu.core_type<tc>, window_params = [{pipeline_mode = #tpu.pipeline_mode<synchronous>, transform_indices = @transform_0, window_bounds = array<i64: 72, 2, 16>}, {pipeline_mode = #tpu.pipeline_mode<synchronous>, transform_indices = @transform_1, window_bounds = array<i64: 24, 2, 16>}]} {
    %c0 = arith.constant 0 : index
    %c0_0 = arith.constant 0 : index
    %c0_1 = arith.constant 0 : index
    %0 = vector.load %arg1[%c0, %c0_0, %c0_1] : memref<72x2x16xbf16, #tpu.memory_space<vmem>>, vector<24x1x16xbf16>
    %1 = vector.shape_cast %0 : vector<24x1x16xbf16> to vector<24x16xbf16>
    %c24 = arith.constant 24 : index
    %c0_2 = arith.constant 0 : index
    %c0_3 = arith.constant 0 : index
    %2 = vector.load %arg1[%c24, %c0_2, %c0_3] : memref<72x2x16xbf16, #tpu.memory_space<vmem>>, vector<24x1x16xbf16>
    %3 = vector.shape_cast %2 : vector<24x1x16xbf16> to vector<24x16xbf16>
    %c48 = arith.constant 48 : index
    %c0_4 = arith.constant 0 : index
    %c0_5 = arith.constant 0 : index
    %4 = vector.load %arg1[%c48, %c0_4, %c0_5] : memref<72x2x16xbf16, #tpu.memory_space<vmem>>, vector<24x1x16xbf16>
    %5 = vector.shape_cast %4 : vector<24x1x16xbf16> to vector<24x16xbf16>
    %cst = arith.constant dense<0.000000e+00> : vector<16x16xf32>
    %6 = tpu.matmul %1, %3, %cst {dimension_numbers = #tpu.dot_dimension_numbers<[0], [0], [1], [1], [0, 1, 1, 1], [], []>} : vector<24x16xbf16>, vector<24x16xbf16>, vector<16x16xf32> -> vector<16x16xf32>
    %cst_6 = arith.constant 0.204124153 : f32
    %7 = vector.broadcast %cst_6 : f32 to vector<16x16xf32>
    %8 = arith.mulf %6, %7 : vector<16x16xf32>
    %cst_7 = arith.constant dense<0xFF800000> : vector<16xf32>
    %9 = vector.multi_reduction <maximumf>, %8, %cst_7 [1] : vector<16x16xf32> to vector<16xf32>
    %10 = vector.shape_cast %9 : vector<16xf32> to vector<16x1xf32>
    %11 = vector.broadcast %10 : vector<16x1xf32> to vector<16x16xf32>
    %12 = arith.subf %8, %11 : vector<16x16xf32>
    %13 = math.exp %12 : vector<16x16xf32>
    %cst_8 = arith.constant dense<0.000000e+00> : vector<16xf32>
    %14 = vector.multi_reduction <add>, %13, %cst_8 [1] : vector<16x16xf32> to vector<16xf32>
    %15 = vector.shape_cast %14 : vector<16xf32> to vector<16x1xf32>
    %16 = tpu.reciprocal %15 {approx = true} : vector<16x1xf32> -> vector<16x1xf32>
    %17 = vector.broadcast %16 : vector<16x1xf32> to vector<16x16xf32>
    %18 = arith.mulf %13, %17 : vector<16x16xf32>
    %19 = arith.truncf %18 : vector<16x16xf32> to vector<16x16xbf16>
    %cst_9 = arith.constant dense<0.000000e+00> : vector<24x16xf32>
    %20 = tpu.matmul %5, %19, %cst_9 {dimension_numbers = #tpu.dot_dimension_numbers<[1], [1], [0], [0], [0, 0, 1, 0], [], []>} : vector<24x16xbf16>, vector<16x16xbf16>, vector<24x16xf32> -> vector<24x16xf32>
    %21 = arith.truncf %20 : vector<24x16xf32> to vector<24x16xbf16>
    %c0_10 = arith.constant 0 : index
    %c0_11 = arith.constant 0 : index
    %c0_12 = arith.constant 0 : index
    %22 = vector.load %arg2[%c0_10, %c0_11, %c0_12] : memref<24x2x16xbf16, #tpu.memory_space<vmem>>, vector<24x1x16xbf16>
    %23 = vector.shape_cast %22 : vector<24x1x16xbf16> to vector<24x16xbf16>
    %24 = vector.shape_cast %21 : vector<24x16xbf16> to vector<24x1x16xbf16>
    tpu.vector_store %arg2[%c0_10, %c0_11, %c0_12], %24 {strides = array<i32>} : memref<24x2x16xbf16, #tpu.memory_space<vmem>>, vector<24x1x16xbf16>,
    %c0_13 = arith.constant 0 : index
    %c1 = arith.constant 1 : index
    %c0_14 = arith.constant 0 : index
    %25 = vector.load %arg1[%c0_13, %c1, %c0_14] : memref<72x2x16xbf16, #tpu.memory_space<vmem>>, vector<24x1x16xbf16>
    %26 = vector.shape_cast %25 : vector<24x1x16xbf16> to vector<24x16xbf16>
    %c24_15 = arith.constant 24 : index
    %c1_16 = arith.constant 1 : index
    %c0_17 = arith.constant 0 : index
    %27 = vector.load %arg1[%c24_15, %c1_16, %c0_17] : memref<72x2x16xbf16, #tpu.memory_space<vmem>>, vector<24x1x16xbf16>
    %28 = vector.shape_cast %27 : vector<24x1x16xbf16> to vector<24x16xbf16>
    %c48_18 = arith.constant 48 : index
    %c1_19 = arith.constant 1 : index
    %c0_20 = arith.constant 0 : index
    %29 = vector.load %arg1[%c48_18, %c1_19, %c0_20] : memref<72x2x16xbf16, #tpu.memory_space<vmem>>, vector<24x1x16xbf16>
    %30 = vector.shape_cast %29 : vector<24x1x16xbf16> to vector<24x16xbf16>
    %cst_21 = arith.constant dense<0.000000e+00> : vector<16x16xf32>
    %31 = tpu.matmul %26, %28, %cst_21 {dimension_numbers = #tpu.dot_dimension_numbers<[0], [0], [1], [1], [0, 1, 1, 1], [], []>} : vector<24x16xbf16>, vector<24x16xbf16>, vector<16x16xf32> -> vector<16x16xf32>
    %cst_22 = arith.constant 0.204124153 : f32
    %32 = vector.broadcast %cst_22 : f32 to vector<16x16xf32>
    %33 = arith.mulf %31, %32 : vector<16x16xf32>
    %cst_23 = arith.constant dense<0xFF800000> : vector<16xf32>
    %34 = vector.multi_reduction <maximumf>, %33, %cst_23 [1] : vector<16x16xf32> to vector<16xf32>
    %35 = vector.shape_cast %34 : vector<16xf32> to vector<16x1xf32>
    %36 = vector.broadcast %35 : vector<16x1xf32> to vector<16x16xf32>
    %37 = arith.subf %33, %36 : vector<16x16xf32>
    %38 = math.exp %37 : vector<16x16xf32>
    %cst_24 = arith.constant dense<0.000000e+00> : vector<16xf32>
    %39 = vector.multi_reduction <add>, %38, %cst_24 [1] : vector<16x16xf32> to vector<16xf32>
    %40 = vector.shape_cast %39 : vector<16xf32> to vector<16x1xf32>
    %41 = tpu.reciprocal %40 {approx = true} : vector<16x1xf32> -> vector<16x1xf32>
    %42 = vector.broadcast %41 : vector<16x1xf32> to vector<16x16xf32>
    %43 = arith.mulf %38, %42 : vector<16x16xf32>
    %44 = arith.truncf %43 : vector<16x16xf32> to vector<16x16xbf16>
    %cst_25 = arith.constant dense<0.000000e+00> : vector<24x16xf32>
    %45 = tpu.matmul %30, %44, %cst_25 {dimension_numbers = #tpu.dot_dimension_numbers<[1], [1], [0], [0], [0, 0, 1, 0], [], []>} : vector<24x16xbf16>, vector<16x16xbf16>, vector<24x16xf32> -> vector<24x16xf32>
    %46 = arith.truncf %45 : vector<24x16xf32> to vector<24x16xbf16>
    %c0_26 = arith.constant 0 : index
    %c1_27 = arith.constant 1 : index
    %c0_28 = arith.constant 0 : index
    %47 = vector.load %arg2[%c0_26, %c1_27, %c0_28] : memref<24x2x16xbf16, #tpu.memory_space<vmem>>, vector<24x1x16xbf16>
    %48 = vector.shape_cast %47 : vector<24x1x16xbf16> to vector<24x16xbf16>
    %49 = vector.shape_cast %46 : vector<24x16xbf16> to vector<24x1x16xbf16>
    tpu.vector_store %arg2[%c0_26, %c1_27, %c0_28], %49 {strides = array<i32>} : memref<24x2x16xbf16, #tpu.memory_space<vmem>>, vector<24x1x16xbf16>,
    return
  }
  func.func @transform_0(%arg0: i32) -> (i32, i32, i32) {
    %c0_i32 = arith.constant 0 : i32
    %c0_i32_0 = arith.constant 0 : i32
    %c0_i32_1 = arith.constant 0 : i32
    %c0_i32_2 = arith.constant 0 : i32
    return %c0_i32, %c0_i32_0, %c0_i32_1 : i32, i32, i32
  }
  func.func @transform_1(%arg0: i32) -> (i32, i32, i32) {
    %c0_i32 = arith.constant 0 : i32
    %c0_i32_0 = arith.constant 0 : i32
    %c0_i32_1 = arith.constant 0 : i32
    %c0_i32_2 = arith.constant 0 : i32
    return %c0_i32, %c0_i32_0, %c0_i32_1 : i32, i32, i32
  }
}

module attributes {stable_mosaic.version = 11 : i64} {
  func.func @_gemm1_kernel(%arg0: i32, %arg1: i32, %arg2: memref<32x224xbf16, #tpu.memory_space<vmem>>, %arg3: memref<224x32xbf16, #tpu.memory_space<vmem>>, %arg4: memref<32x1xf32, #tpu.memory_space<vmem>>, %arg5: memref<32x32xbf16, #tpu.memory_space<vmem>>) attributes {dimension_semantics = [#tpu.dimension_semantics<parallel>, #tpu.dimension_semantics<parallel>], iteration_bounds = array<i64: 1, 1>, scalar_prefetch = 0 : i64, scratch_operands = 0 : i64, tpu.core_type = #tpu.core_type<tc>, window_params = [{transform_indices = @transform_0, window_bounds = array<i64: 32, 224>}, {transform_indices = @transform_1, window_bounds = array<i64: 224, 32>}, {transform_indices = @transform_2, window_bounds = array<i64: 32, 1>}, {transform_indices = @transform_3, window_bounds = array<i64: 32, 32>}]} {
    %c0 = arith.constant 0 : index
    %c0_0 = arith.constant 0 : index
    %0 = vector.load %arg2[%c0, %c0_0] : memref<32x224xbf16, #tpu.memory_space<vmem>>, vector<32x224xbf16>
    %c0_1 = arith.constant 0 : index
    %c0_2 = arith.constant 0 : index
    %1 = vector.load %arg3[%c0_1, %c0_2] : memref<224x32xbf16, #tpu.memory_space<vmem>>, vector<224x32xbf16>
    %cst = arith.constant dense<0.000000e+00> : vector<32x32xf32>
    %2 = tpu.matmul %0, %1, %cst {dimension_numbers = #tpu.dot_dimension_numbers<[1], [0], [0], [1], [0, 0, 1, 1], [], []>} : vector<32x224xbf16>, vector<224x32xbf16>, vector<32x32xf32> -> vector<32x32xf32>
    %c0_3 = arith.constant 0 : index
    %c0_4 = arith.constant 0 : index
    %3 = vector.load %arg4[%c0_3, %c0_4] : memref<32x1xf32, #tpu.memory_space<vmem>>, vector<32x1xf32>
    %4 = vector.broadcast %3 : vector<32x1xf32> to vector<32x32xf32>
    %5 = arith.addf %2, %4 : vector<32x32xf32>
    %6 = arith.truncf %5 : vector<32x32xf32> to vector<32x32xbf16>
    %c0_5 = arith.constant 0 : index
    %c0_6 = arith.constant 0 : index
    %7 = vector.load %arg5[%c0_5, %c0_6] : memref<32x32xbf16, #tpu.memory_space<vmem>>, vector<32x32xbf16>
    tpu.vector_store %arg5[%c0_5, %c0_6], %6 {strides = array<i32>} : memref<32x32xbf16, #tpu.memory_space<vmem>>, vector<32x32xbf16>,
    return
  }
  func.func @transform_0(%arg0: i32, %arg1: i32) -> (i32, i32) {
    %c0_i32 = arith.constant 0 : i32
    %c0_i32_0 = arith.constant 0 : i32
    return %arg1, %c0_i32 : i32, i32
  }
  func.func @transform_1(%arg0: i32, %arg1: i32) -> (i32, i32) {
    %c0_i32 = arith.constant 0 : i32
    %c0_i32_0 = arith.constant 0 : i32
    return %c0_i32, %arg0 : i32, i32
  }
  func.func @transform_2(%arg0: i32, %arg1: i32) -> (i32, i32) {
    %c0_i32 = arith.constant 0 : i32
    %c0_i32_0 = arith.constant 0 : i32
    return %arg1, %c0_i32 : i32, i32
  }
  func.func @transform_3(%arg0: i32, %arg1: i32) -> (i32, i32) {
    %c0_i32 = arith.constant 0 : i32
    return %arg1, %arg0 : i32, i32
  }
}

</mosaic_0001>

<bundles_post_ra>
// kernel: _lambda_.27
= control target key start
LH: loop header
LB: loop body
LE: loop exit
PB: predicated region body
PF: predicated region fallthrough
CT: control target
= control target key end

     0   :  { %s611_s12 = smov 0   ;;  %s613_s13 = smov 0   ;;  %s682_s0 = inlined_call_operand.vmem [shape: bf16[8,32], index: 0, kind: input, shape index: {}]   ;;  %s683_s1 = inlined_call_operand.vmem [shape: bf16[32,512], index: 1, kind: input, shape index: {}]   ;;  %s684_s2 = inlined_call_operand.vmem [shape: f32[8,1], index: 2, kind: input, shape index: {}]   ;;  %s685_s3 = inlined_call_operand.vmem [shape: bf16[8,512], index: 3, kind: output, shape index: {}]  }
   0x1   :  { %s615_s14 = smov 0   ;;  %s617_s15 = smov 0  }
   0x2   :  { %s619_s16 = smov 0  }
   0x3 LB: > { %s25_s17 = sadd.s32 1, %s584_s15  ;;  %p65_p1 = scmp.ne.s32.totalorder %s576_s13, %s572_s12  ;;  %s588_s16 = sphi %s619_s16, %s13_s16   ;;  %s584_s15 = sphi %s617_s15, %s689_s15   ;;  %s580_s14 = sphi %s615_s14, %s688_s14   ;;  %s576_s13 = sphi %s613_s13, %s687_s13   ;;  %s572_s12 = sphi %s611_s12, %s686_s12  }
   0x4   : > { %p27_p0 = scmp.ge.s32.totalorder %s25_s17, 2  ;;  %p66_p2 = scmp.eq.s32.totalorder %s588_s16, 0 }
   0x5   : > { %s58_s19 = sadd.s32 1, %s576_s13  ;;  %p484_p5 = scmp.ge.s32.totalorder %s588_s16, 2 }
   0x6   : > { %s691_s17 = smov (%p27_p0, %s25_s17), 0  ;;  %p67_p3 = por %p66_p2, %p65_p1 }
   0x7   : > { %s55_s18 = ssub.s32 %s584_s15, %s691_s17  ;;  %159 = sbr.rel (%p484_p5) target bundleno = 21 (0x15), region = 24 }
   0x8   : > { %p56_p4 = scmp.eq.s32.totalorder %s55_s18, 0 }
   0xa   : > { %s646_s20 = scalar_select %p56_p4, %s576_s13, %s58_s19  }
   0xe   : > { %162 = sbr.rel (!%p67_p3) target bundleno = 21 (0x15), region = 28  ;;  %s164_s21 = sand.u32 (%p67_p3), 1, %s576_s13  }
   0xf   : > { %s500_s22 = sshll.u32 (%p67_p3), %s584_s15, 3  ;;  %s485_s23 = sshll.u32 (%p67_p3), %s164_s21, 5 }
  0x10   : > { %s169_s26 = scalar_lea.vmem (%p67_p3), %s683_s1, %s500_s22  ;;  %s166_s27 = scalar_lea.vmem (%p67_p3), [#allocation2], %s485_s23 }
  0x11   : > { %v203_v0 = vld [vmem:[%s169_s26] sm:$0xff] (%p67_p3)  ;;  %v205_v1 = vld [vmem:[%s169_s26 + $0x10] sm:$0xff] (%p67_p3) }
  0x12   : > { %v207_v2 = vld [vmem:[%s169_s26 + $0x20] sm:$0xff] (%p67_p3)  ;;  %204 = vst [vmem:[%s166_s27] sm:$0xff] (%p67_p3), %v203_v0  ;;  %206 = vst [vmem:[%s166_s27 + $0x8] sm:$0xff] (%p67_p3), %v205_v1  ;;  %v209_v3 = vld [vmem:[%s169_s26 + $0x30] sm:$0xff] (%p67_p3) }
  0x13   : > { %208 = vst [vmem:[%s166_s27 + $0x10] sm:$0xff] (%p67_p3), %v207_v2  ;;  %210 = vst [vmem:[%s166_s27 + $0x18] sm:$0xff] (%p67_p3), %v209_v3 }
  0x15 PF: > { %p488_p6 = scmp.ge.s32.totalorder %s588_s16, 1  ;;  %p215_p7 = scmp.lt.s32.totalorder %s588_s16, 3 }
  0x17   : > { %p216_p8 = pnand %p488_p6, %p215_p7 }
  0x18   : > { %s222_s28 = sand.u32 (!%p216_p8), 1, %s572_s12   ;;  %v282_v4 = vld [vmem:[%s684_s2] sm:$0xff] (!%p216_p8)  ;;  %v590_v5 = vmov (!%p216_p8), 0   ;;  %vm308_vm0 = vcmask (!%p216_p8), 261120   ;;  %s490_s8 = sshll.u32 (!%p216_p8), %s580_s14, 1 }
  0x19   : > { %219 = sbr.rel (%p216_p8) target bundleno = 254 (0xfe), region = 66  ;;  %s489_s4 = sshll.u32 (!%p216_p8), %s222_s28, 5  ;;  %344 = vmatprep.mubr.bf16.mxu0 (!%p216_p8), %v590_v5  ;;  %543 = vset.pattern.permute.xlu0 (!%p216_p8), %v590_v5  ;;  %v277_v10 = vld [vmem:[%s682_s0] sm:$0xf] (!%p216_p8) }
  0x1a   : > { %285 = vperm.xlu0 (!%p216_p8), %543, %v282_v4   ;;  %s224_s5 = scalar_lea.vmem (!%p216_p8), [#allocation2], %s489_s4  ;;  %p269_p9 = scmp.lt.s32.totalorder (!%p216_p8), %s490_s8, 3 }
  0x1b   : > { %v544_v6 = vld [vmem:[%s224_s5 + $0x4] ss:$8 sps:$4 sm:$0xff] (!%p216_p8)   ;;  %v546_v7 = vld [vmem:[%s224_s5] ss:$8 sps:$4 sm:$0xff] (!%p216_p8)   ;;  %v547_v8 = vld [vmem:[%s224_s5 + $0x14] ss:$8 sps:$4 sm:$0xff] (!%p216_p8)  }
  0x1c   : > { %312 = vmatprep.subr.bf16.mxu0 (!%p216_p8), %v544_v6  ;;  %v549_v9 = vld [vmem:[%s224_s5 + $0x10] ss:$8 sps:$4 sm:$0xff] (!%p216_p8)  }
  0x1d   : > { %313 = vmatpush1.bf16.msra.mxu0 (!%p216_p8), %v546_v7 }
  0x1e   : > { %314 = vmatprep.subr.bf16.mxu0 (!%p216_p8), %v547_v8 }
  0x20   : > { %s693_s8 = smov (!%p269_p9, %s490_s8), 3 }
  0x21   : > { %315 = vmatpush1.bf16.msra.mxu0 %v549_v9  ;;  %s491_s9 = sshll.u32 %s693_s8, 2 }
  0x22   : > { %s274_s12 = scalar_lea.vmem %s685_s3, %s491_s9 }
  0x24   : > { %496 = vmatmul.mubr.msk.bf16.vlgmr.msra.gmra.mrb[0].mxu0 %vm308_vm0, %v277_v10 }
  0x99   : > { %v286_v11 = vpop.permute.xlu0 %285 }
  0xf7   : > { %v346_v12 = vpop.f32.mrb[0].mxu0 }
  0xf8   : > { %v347_v13 = vadd.f32 %v346_v12, %v286_v11  ;;  %v348_v14 = vpop.f32.mrb[1].mxu0 }
  0xf9   : > { %v349_v15 = vadd.f32 %v348_v14, %v286_v11  ;;  %v350_v16 = vpop.f32.mrb[2].mxu0 }
  0xfa   : > { %v351_v17 = vpop.f32.mrb[3].mxu0 }
  0xfb   : > { %v501_v18 = vpack.c.bf16 %v349_v15, %v347_v13 }
  0xfd   : > { %361 = vst [vmem:[%s274_s12] sm:$0xff] %v501_v18 }
  0xfe PF: > { %s13_s16 = sadd.s32 1, %s588_s16   ;;  %s686_s12 = smov %s576_s13 }
  0xff   : > { %p10_p10 = scmp.ge.s32.totalorder %s13_s16, 4   ;;  %s687_s13 = smov %s646_s20 }
 0x100   : > { %s688_s14 = smov %s584_s15  ;;  %s689_s15 = smov %s691_s17 }
 0x101   :  { %12 = sbr.rel (!%p10_p10) target bundleno = 3 (0x3), region = 111 }

// kernel: _lambda_.28
= control target key start
LH: loop header
LB: loop body
LE: loop exit
PB: predicated region body
PF: predicated region fallthrough
CT: control target
= control target key end

     0   :  { %s596_s12 = smov 0   ;;  %s657_s0 = inlined_call_operand.vmem [shape: bf16[8,2,256], index: 0, kind: input, shape index: {}]   ;;  %s658_s1 = inlined_call_operand.vmem [shape: f32[8,1,1], index: 1, kind: input, shape index: {}]   ;;  %s659_s2 = inlined_call_operand.vmem [shape: f32[8,1,1], index: 2, kind: input, shape index: {}]   ;;  %s660_s3 = inlined_call_operand.vmem [shape: bf16[8,2,256], index: 3, kind: output, shape index: {}]  }
   0x1 LB: > { %s517_s13 = sadd.s32 4294967295, %s570_s12   ;;  %p521_p0 = scmp.ge.s32.totalorder %s570_s12, 1  ;;  %s570_s12 = sphi %s596_s12, %s13_s12  }
   0x2   : > { %p158_p1 = scmp.lt.s32.totalorder %s570_s12, 5 }
   0x4   : > { %p159_p2 = pnand %p521_p0, %p158_p1 }
   0x5   : > { %s522_s14 = sshll.u32 (!%p159_p2), %s517_s13, 1  ;;  %v221_v0 = vlaneseq (!%p159_p2)  ;;  %v572_v1 = vmov (!%p159_p2), 1983009808   ;;  %v573_v3 = vmov (!%p159_p2), 0   ;;  %vm238_vm0 = vcmask (!%p159_p2), 1041408  }
   0x6   : > { %162 = sbr.rel (%p159_p2) target bundleno = 404 (0x194), region = 32  ;;  %p191_p3 = scmp.lt.s32.totalorder (!%p159_p2), %s522_s14, 7  ;;  %v219_v2 = vunpack.c.l.s4 (!%p159_p2), %v572_v1  ;;  %553 = vset.pattern.permute.xlu1 (!%p159_p2), %v573_v3  ;;  %552 = vset.pattern.permute.xlu0 (!%p159_p2), %v573_v3  ;;  %v574_v25 = vmov (!%p159_p2), 269488144  }
   0x7   : > { %v604_v4 = vshrl.u32 (!%p159_p2), %v221_v0, 7  ;;  %v259_v26 = vunpack.c.l.s4 (!%p159_p2), %v574_v25 }
   0x8   : > { %v220_v5 = vunpack.c.0.s8 (!%p159_p2), %v219_v2 }
   0x9   : > { %v260_v28 = vunpack.c.0.s8 (!%p159_p2), %v259_v26 }
   0xa   : > { %v619_v6 = vsub.s32 (!%p159_p2), %v220_v5, %v604_v4 }
   0xb   : > { %v263_v33 = vsub.s32 (!%p159_p2), %v260_v28, %v604_v4 }
   0xd   : > { %s662_s14 = smov (!%p191_p3, %s522_s14), 7 }
   0xe   : > { %s523_s15 = sshll.u32 %s662_s14, 1  ;;  %s199_s18 = scalar_lea.vmem %s658_s1, %s662_s14 }
   0xf   : > { %s194_s21 = scalar_lea.vmem %s657_s0, %s523_s15  ;;  %v529_v7 = vld [vmem:[%s199_s18 + $0x1] ss:$0 sm:$0xff]  ;;  %s625_s24 = scalar_lea.vmem %s659_s2, %s662_s14  ;;  %v528_v23 = vld [vmem:[%s199_s18] ss:$0 sm:$0xff] }
  0x10   : > { %v212_v8 = vld [vmem:[%s194_s21] sm:$0x3]  ;;  %v213_v9 = vld [vmem:[%s194_s21 + $0x2] sm:$0x3]  ;;  %338 = vperm.xlu1 %553, %v529_v7   ;;  %s210_s27 = scalar_lea.vmem %s660_s3, %s523_s15 }
  0x11   : > { %v214_v10 = vunpack.c.l.bf16 %v212_v8  ;;  %v215_v11 = vunpack.c.l.bf16 %v213_v9  ;;  %v530_v12 = vld [vmem:[%s625_s24] ss:$0 sm:$0xff]  ;;  %v531_v51 = vld [vmem:[%s625_s24 + $0x1] ss:$0 sm:$0xff] }
  0x13   : > { %v224_v13 = vrot.slane %v214_v10, %v619_v6  ;;  %v232_v14 = vrot.slane %v215_v11, %v619_v6 }
  0x14   : > { %356 = vperm.xlu1 %553, %v530_v12  }
  0x15   : > { %v225_v15 = vcombine.high %v224_v13, %v224_v13  ;;  %v239_v16 = vsel %vm238_vm0, %v224_v13, 0.0  ;;  %v233_v17 = vcombine.high %v232_v14, %v232_v14  ;;  %v244_v19 = vsel %vm238_vm0, %v232_v14, 0.0 }
  0x17   : > { %v240_v18 = vsel %vm238_vm0, %v225_v15, 0.0  ;;  %v245_v20 = vsel %vm238_vm0, %v233_v17, 0.0  ;;  %v575_v17 = vmov 1966171168  }
  0x18   : > { %v241_v21 = vadd.f32 %v240_v18, %v239_v16  ;;  %v246_v22 = vadd.f32 %v245_v20, %v244_v19  ;;  %v411_v18 = vunpack.c.l.s4 %v575_v17 }
  0x1a   : > { %242 = vadd.xlane.f32.xlu0 %v241_v21  ;;  %v412_v21 = vunpack.c.0.s8 %v411_v18 }
  0x1c   : > { %v415_v26 = vsub.s32 %v412_v21, %v604_v4 }
  0x1e   : > { %247 = vadd.xlane.f32.xlu0 %v246_v22 }
  0x34   : > { %334 = vperm.xlu0 %552, %v528_v23  }
  0x8f   : > { %v339_v52 = vpop.permute.xlu1 %338 }
  0x93   : > { %v357_v53 = vpop.permute.xlu1 %356 }
  0xa7   : > { %v243_v24 = vpop.xlane.xlu0 %242 }
  0xa8   : > { %v250_v27 = vmul.f32 0.00390625, %v243_v24 }
  0xaa   : > { %v252_v31 = vsel %vm238_vm0, %v250_v27, 0.0 }
  0xab   : > { %v248_v29 = vpop.xlane.xlu0 %247 }
  0xac   : > { %v251_v30 = vmul.f32 0.00390625, %v248_v29 }
  0xae   : > { %v253_v32 = vsel %vm238_vm0, %v251_v30, 0.0 }
  0xaf   : > { %v254_v34 = vadd.f32 %v253_v32, %v252_v31 }
  0xb1   : > { %v256_v35 = vmul.f32 0.5, %v254_v34 }
  0xb3   : > { %v264_v36 = vrot.slane %v256_v35, %v263_v33  ;;  %v335_v1 = vpop.permute.xlu0 %334 }
  0xb5   : > { %v266_v37 = vsub.f32 %v214_v10, %v264_v36  ;;  %v267_v38 = vsub.f32 %v215_v11, %v264_v36 }
  0xb7   : > { %v268_v39 = vmul.f32 %v266_v37, %v266_v37  ;;  %v269_v40 = vmul.f32 %v267_v38, %v267_v38 }
  0xb9   : > { %v278_v41 = vrot.slane %v268_v39, %v619_v6  ;;  %v286_v42 = vrot.slane %v269_v40, %v619_v6 }
  0xbb   : > { %v279_v43 = vcombine.high %v278_v41, %v278_v41  ;;  %v287_v44 = vcombine.high %v286_v42, %v286_v42  ;;  %v292_v45 = vsel %vm238_vm0, %v278_v41, 0.0  ;;  %v297_v49 = vsel %vm238_vm0, %v286_v42, 0.0 }
  0xbd   : > { %v293_v46 = vsel %vm238_vm0, %v279_v43, 0.0  ;;  %v298_v48 = vsel %vm238_vm0, %v287_v44, 0.0 }
  0xbe   : > { %v294_v47 = vadd.f32 %v293_v46, %v292_v45  ;;  %v299_v50 = vadd.f32 %v298_v48, %v297_v49 }
  0xc0   : > { %295 = vadd.xlane.f32.xlu1 %v294_v47 }
  0xc4   : > { %300 = vadd.xlane.f32.xlu1 %v299_v50 }
  0xd5   : > { %360 = vperm.xlu1 %553, %v531_v51  }
 0x14d   : > { %v296_v54 = vpop.xlane.xlu1 %295 }
 0x14e   : > { %v302_v55 = vmul.f32 0.00390625, %v296_v54 }
 0x150   : > { %v304_v58 = vsel %vm238_vm0, %v302_v55, 0.0 }
 0x151   : > { %v301_v56 = vpop.xlane.xlu1 %300 }
 0x152   : > { %v303_v57 = vmul.f32 0.00390625, %v301_v56 }
 0x154   : > { %v305_v59 = vsel %vm238_vm0, %v303_v57, 0.0 }
 0x155   : > { %v306_v60 = vadd.f32 %v305_v59, %v304_v58  ;;  %v361_v8 = vpop.permute.xlu1 %360 }
 0x157   : > { %v307_v61 = vmul.f32 0.5, %v306_v60 }
 0x159   : > { %v308_v62 = vadd.f32 1e-05, %v307_v61 }
 0x15b   : > { %554 = vrsqrt.f32 %v308_v62 }
 0x165   : > { %v555_v63 = vpop.eup %554 }
 0x166   : > { %v317_v0 = vrot.slane %v555_v63, %v263_v33 }
 0x168   : > { %v320_v2 = vmul.f32 %v317_v0, %v267_v38  ;;  %v319_v3 = vmul.f32 %v317_v0, %v266_v37 }
 0x16a   : > { %v342_v5 = vmul.f32 %v339_v52, %v320_v2  ;;  %v341_v7 = vmul.f32 %v335_v1, %v319_v3 }
 0x16c   : > { %v364_v9 = vadd.f32 %v361_v8, %v342_v5  ;;  %v363_v10 = vadd.f32 %v357_v53, %v341_v7 }
 0x16e   : > { %v533_v11 = vmul.f32 -1.442695, %v364_v9  ;;  %v532_v12 = vmul.f32 -1.442695, %v363_v10 }
 0x170   : > { %556 = vpow2.f32 %v533_v11 }
 0x171   : > { %558 = vpow2.f32 %v532_v12 }
 0x17a   : > { %v557_v13 = vpop.eup %556 }
 0x17b   : > { %v559_v14 = vpop.eup %558  ;;  %v372_v15 = vadd.f32 1.0, %v557_v13 }
 0x17c   : > { %v371_v16 = vadd.f32 1.0, %v559_v14 }
 0x17d   : > { %560 = vrcp.f32 %v372_v15 }
 0x17e   : > { %562 = vrcp.f32 %v371_v16 }
 0x187   : > { %v561_v19 = vpop.eup %560 }
 0x188   : > { %v563_v20 = vpop.eup %562  ;;  %v378_v22 = vmul.f32 %v561_v19, %v364_v9 }
 0x189   : > { %v377_v23 = vmul.f32 %v563_v20, %v363_v10 }
 0x18a   : > { %v395_v24 = vrot.slane %v378_v22, %v619_v6 }
 0x18b   : > { %v387_v25 = vrot.slane %v377_v23, %v619_v6 }
 0x18c   : > { %v396_v27 = vcombine.high %v395_v24, %v395_v24 }
 0x18d   : > { %v388_v28 = vcombine.high %v387_v25, %v387_v25 }
 0x18e   : > { %v535_v29 = vpack.c.bf16 %v396_v27, %v395_v24 }
 0x18f   : > { %v534_v30 = vpack.c.bf16 %v388_v28, %v387_v25 }
 0x190   : > { %v431_v31 = vrot.slane %v535_v29, %v415_v26 }
 0x191   : > { %v416_v32 = vrot.slane %v534_v30, %v415_v26 }
 0x192   : > { %537 = vst.sshfl [vmem:[%s210_s27 + $0x2] sm:$0x5 pattern:$0x73625140] %v431_v31 }
 0x193   : > { %536 = vst.sshfl [vmem:[%s210_s27] sm:$0x5 pattern:$0x73625140] %v416_v32 }
 0x194 PF: > { %s13_s12 = sadd.s32 1, %s570_s12  }
 0x195   : > { %p10_p4 = scmp.ge.s32.totalorder %s13_s12, 6  }
 0x197   :  { %12 = sbr.rel (!%p10_p4) target bundleno = 1 (0x1), region = 68 }

// kernel: _lambda_.29
= control target key start
LH: loop header
LB: loop body
LE: loop exit
PB: predicated region body
PF: predicated region fallthrough
CT: control target
= control target key end

     0   :  { %s739_s12 = smov 0   ;;  %s741_s13 = smov 0   ;;  %s824_s0 = inlined_call_operand.vmem [shape: bf16[16,80], index: 0, kind: input, shape index: {}]   ;;  %s825_s1 = inlined_call_operand.vmem [shape: bf16[80,512], index: 1, kind: input, shape index: {}]   ;;  %s826_s2 = inlined_call_operand.vmem [shape: f32[16,1], index: 2, kind: input, shape index: {}]   ;;  %s827_s3 = inlined_call_operand.vmem [shape: bf16[16,512], index: 3, kind: output, shape index: {}]  }
   0x1   :  { %s743_s14 = smov 0   ;;  %s745_s15 = smov 0  }
   0x2   :  { %s747_s16 = smov 0  }
   0x3 LB: > { %s25_s17 = sadd.s32 1, %s712_s15  ;;  %s585_s18 = sadd.s32 4294967295, %s716_s16   ;;  %s716_s16 = sphi %s747_s16, %s13_s16   ;;  %s712_s15 = sphi %s745_s15, %s832_s15   ;;  %s708_s14 = sphi %s743_s14, %s831_s14   ;;  %s704_s13 = sphi %s741_s13, %s830_s13   ;;  %s700_s12 = sphi %s739_s12, %s829_s12  }
   0x4   : > { %p27_p0 = scmp.ge.s32.totalorder %s25_s17, 2  ;;  %p65_p1 = scmp.ne.s32.totalorder %s704_s13, %s700_s12 }
   0x5   : > { %p66_p2 = scmp.eq.s32.totalorder %s716_s16, 0  ;;  %p123_p4 = scmp.eq.s32.totalorder %s585_s18, 1 }
   0x6   : > { %s834_s17 = smov (%p27_p0, %s25_s17), 0  ;;  %s58_s20 = sadd.s32 1, %s704_s13 }
   0x7   : > { %p67_p3 = por %p66_p2, %p65_p1  ;;  %s55_s19 = ssub.s32 %s712_s15, %s834_s17 }
   0x8   : > { %p56_p5 = scmp.eq.s32.totalorder %s55_s19, 0  ;;  %p774_p6 = por %p123_p4, %p65_p1 }
   0x9   : > { %p590_p7 = scmp.ge.s32.totalorder %s716_s16, 2 }
   0xa   : > { %s779_s22 = scalar_select %p56_p5, %s704_s13, %s58_s20  }
   0xb   : > { %163 = sbr.rel (%p590_p7) target bundleno = 27 (0x1b), region = 24 }
  0x12   : > { %166 = sbr.rel (!%p67_p3) target bundleno = 27 (0x1b), region = 28  ;;  %s168_s23 = sand.u32 (%p67_p3), 1, %s704_s13  }
  0x13   : > { %s614_s24 = sshll.u32 (%p67_p3), %s712_s15, 3  ;;  %s618_s25 = smul.u32 (%p67_p3), 80, %s168_s23 }
  0x14   : > { %s173_s28 = scalar_lea.vmem (%p67_p3), %s825_s1, %s614_s24 }
  0x15   : > { %v219_v0 = vld [vmem:[%s173_s28] sm:$0xff] (%p67_p3)  ;;  %v221_v1 = vld [vmem:[%s173_s28 + $0x10] sm:$0xff] (%p67_p3)  ;;  %s170_s29 = scalar_lea.vmem (%p67_p3), [#allocation2], %s618_s25 }
  0x16   : > { %v223_v2 = vld [vmem:[%s173_s28 + $0x20] sm:$0xff] (%p67_p3)  ;;  %v225_v3 = vld [vmem:[%s173_s28 + $0x30] sm:$0xff] (%p67_p3)  ;;  %220 = vst [vmem:[%s170_s29] sm:$0xff] (%p67_p3), %v219_v0  ;;  %222 = vst [vmem:[%s170_s29 + $0x8] sm:$0xff] (%p67_p3), %v221_v1 }
  0x17   : > { %v227_v4 = vld [vmem:[%s173_s28 + $0x40] sm:$0xff] (%p67_p3)  ;;  %v229_v5 = vld [vmem:[%s173_s28 + $0x50] sm:$0xff] (%p67_p3)  ;;  %224 = vst [vmem:[%s170_s29 + $0x10] sm:$0xff] (%p67_p3), %v223_v2  ;;  %226 = vst [vmem:[%s170_s29 + $0x18] sm:$0xff] (%p67_p3), %v225_v3 }
  0x18   : > { %228 = vst [vmem:[%s170_s29 + $0x20] sm:$0xff] (%p67_p3), %v227_v4  ;;  %230 = vst [vmem:[%s170_s29 + $0x28] sm:$0xff] (%p67_p3), %v229_v5  ;;  %v231_v6 = vld [vmem:[%s173_s28 + $0x60] sm:$0xff] (%p67_p3)  ;;  %v233_v7 = vld [vmem:[%s173_s28 + $0x70] sm:$0xff] (%p67_p3) }
  0x19   : > { %v235_v8 = vld [vmem:[%s173_s28 + $0x80] sm:$0xff]  ;;  %232 = vst [vmem:[%s170_s29 + $0x30] sm:$0xff] %v231_v6  ;;  %234 = vst [vmem:[%s170_s29 + $0x38] sm:$0xff] %v233_v7  ;;  %v237_v9 = vld [vmem:[%s173_s28 + $0x90] sm:$0xff] }
  0x1a   : > { %236 = vst [vmem:[%s170_s29 + $0x40] sm:$0xff] %v235_v8  ;;  %238 = vst [vmem:[%s170_s29 + $0x48] sm:$0xff] %v237_v9 }
  0x1b PF: > { %p593_p8 = scmp.ge.s32.totalorder %s716_s16, 1  ;;  %p243_p9 = scmp.lt.s32.totalorder %s716_s16, 3 }
  0x1d   : > { %p244_p10 = pnand %p593_p8, %p243_p9 }
  0x1e   : > { %s250_s30 = sand.u32 (!%p244_p10), 1, %s700_s12   ;;  %v718_v10 = vmov (!%p244_p10), 0   ;;  %v310_v11 = vld [vmem:[%s826_s2] sm:$0xff] (!%p244_p10)  ;;  %v311_v12 = vld [vmem:[%s826_s2 + $0x8] sm:$0xff] (!%p244_p10)  ;;  %vm377_vm0 = vcmask (!%p244_p10), 654336  }
  0x1f   : > { %247 = sbr.rel (%p244_p10) target bundleno = 284 (0x11c), region = 66  ;;  %413 = vmatprep.mubr.bf16.mxu0 (!%p244_p10), %v718_v10  ;;  %661 = vset.pattern.permute.xlu0 (!%p244_p10), %v718_v10  ;;  %v677_v23 = vld [vmem:[%s824_s0] sm:$0xff] (!%p244_p10)   ;;  %s594_s18 = sshll.u32 (!%p244_p10), %s250_s30, 4 }
  0x20   : > { %s619_s4 = smul.u32 (!%p244_p10), 80, %s250_s30  ;;  %314 = vperm.xlu0 (!%p244_p10), %661, %v310_v11   ;;  %s281_s19 = scalar_lea.vmem (!%p244_p10), [#allocation3], %s594_s18 }
  0x22   : > { %s252_s9 = scalar_lea.vmem (!%p244_p10), [#allocation2], %s619_s4 }
  0x23   : > { %v662_v13 = vld [vmem:[%s252_s9 + $0x4] ss:$8 sps:$4 sm:$0xff] (!%p244_p10)   ;;  %v664_v14 = vld [vmem:[%s252_s9] ss:$8 sps:$4 sm:$0xff] (!%p244_p10)   ;;  %v665_v15 = vld [vmem:[%s252_s9 + $0x14] ss:$8 sps:$4 sm:$0xff] (!%p244_p10)  }
  0x24   : > { %381 = vmatprep.subr.bf16.mxu0 (!%p244_p10), %v662_v13  ;;  %319 = vperm.xlu0 (!%p244_p10), %661, %v311_v12   ;;  %v667_v16 = vld [vmem:[%s252_s9 + $0x10] ss:$8 sps:$4 sm:$0xff] (!%p244_p10)   ;;  %v668_v17 = vld [vmem:[%s252_s9 + $0x24] ss:$8 sps:$4 sm:$0xff] (!%p244_p10)   ;;  %v670_v18 = vld [vmem:[%s252_s9 + $0x20] ss:$8 sps:$4 sm:$0xff] (!%p244_p10)  }
  0x25   : > { %382 = vmatpush1.bf16.msra.mxu0 (!%p244_p10), %v664_v14  ;;  %v671_v19 = vld [vmem:[%s252_s9 + $0x34] ss:$8 sps:$4 sm:$0xff] (!%p244_p10)   ;;  %v673_v20 = vld [vmem:[%s252_s9 + $0x30] ss:$8 sps:$4 sm:$0xff] (!%p244_p10)   ;;  %v674_v21 = vld [vmem:[%s252_s9 + $0x44] ss:$8 sps:$4 sm:$0xff] (!%p244_p10)  }
  0x26   : > { %383 = vmatprep.subr.bf16.mxu0 %v665_v15  ;;  %v676_v22 = vld [vmem:[%s252_s9 + $0x40] ss:$8 sps:$4 sm:$0xff]   ;;  %s617_s20 = sshll.u32 (%p774_p6), %s708_s14, 3 }
  0x27   : > { %s450_s24 = scalar_lea.vmem (%p774_p6), %s827_s3, %s617_s20 }
  0x29   : > { %384 = vmatpush1.bf16.msra.mxu0 %v667_v16 }
  0x2a   : > { %385 = vmatprep.subr.bf16.mxu0 %v668_v17 }
  0x2d   : > { %386 = vmatpush1.bf16.msra.mxu0 %v670_v18 }
  0x2e   : > { %387 = vmatprep.subr.bf16.mxu0 %v671_v19 }
  0x31   : > { %388 = vmatpush1.bf16.msra.mxu0 %v673_v20 }
  0x32   : > { %389 = vmatprep.subr.bf16.mxu0 %v674_v21 }
  0x35   : > { %390 = vmatpush1.bf16.msra.mxu0 %v676_v22 }
  0x38   : > { %606 = vmatmul.mubr.msk.bf16.vlgmr.msra.gmra.mrb[0].mxu0 %vm377_vm0, %v677_v23 }
  0x9f   : > { %v315_v24 = vpop.permute.xlu0 %314 }
  0xa3   : > { %v320_v28 = vpop.permute.xlu0 %319 }
 0x10b   : > { %v415_v25 = vpop.f32.mrb[0].mxu0 }
 0x10c   : > { %v416_v26 = vadd.f32 %v415_v25, %v315_v24  ;;  %v417_v27 = vpop.f32.mrb[1].mxu0 }
 0x10d   : > { %v418_v29 = vadd.f32 %v417_v27, %v315_v24  ;;  %v419_v30 = vpop.f32.mrb[2].mxu0  ;;  %444 = sbr.rel (!%p774_p6) target bundleno = 284 (0x11c), region = 74 }
 0x10e   : > { %v420_v31 = vadd.f32 %v419_v30, %v320_v28  ;;  %v421_v32 = vpop.f32.mrb[3].mxu0 }
 0x10f   : > { %v615_v33 = vpack.c.bf16 %v418_v29, %v416_v26  ;;  %v422_v34 = vadd.f32 %v421_v32, %v320_v28 }
 0x111   : > { %436 = vst [vmem:[%s281_s19] sm:$0xff] %v615_v33  ;;  %v616_v35 = vpack.c.bf16 %v422_v34, %v420_v31 }
 0x113   : > { %437 = vst [vmem:[%s281_s19 + $0x8] sm:$0xff] %v616_v35 }
 0x118   : > { %v480_v36 = vld [vmem:[%s281_s19] sm:$0xff] }
 0x119   : > { %481 = vst [vmem:[%s450_s24] sm:$0xff] %v480_v36 }
 0x11a   : > { %v482_v37 = vld [vmem:[%s281_s19 + $0x8] sm:$0xff] }
 0x11b   : > { %483 = vst [vmem:[%s450_s24 + $0x10] sm:$0xff] %v482_v37 }
 0x11c PF: > { %s13_s16 = sadd.s32 1, %s716_s16   ;;  %s829_s12 = smov %s704_s13 }
 0x11d   : > { %p10_p11 = scmp.ge.s32.totalorder %s13_s16, 4   ;;  %s830_s13 = smov %s779_s22 }
 0x11e   : > { %s831_s14 = smov %s712_s15  ;;  %s832_s15 = smov %s834_s17 }
 0x11f   :  { %12 = sbr.rel (!%p10_p11) target bundleno = 3 (0x3), region = 149 }

// kernel: _lambda_.30
= control target key start
LH: loop header
LB: loop body
LE: loop exit
PB: predicated region body
PF: predicated region fallthrough
CT: control target
= control target key end

     0   :  { %s822_s12 = smov 0   ;;  %s923_s0 = inlined_call_operand.vmem [shape: bf16[16,2,256], index: 0, kind: input, shape index: {}]   ;;  %s924_s1 = inlined_call_operand.vmem [shape: f32[16,1,1], index: 1, kind: input, shape index: {}]   ;;  %s925_s2 = inlined_call_operand.vmem [shape: f32[16,1,1], index: 2, kind: input, shape index: {}]   ;;  %s926_s3 = inlined_call_operand.vmem [shape: bf16[16,2,256], index: 3, kind: output, shape index: {}]  }
   0x1 LB: > { %s725_s13 = sadd.s32 4294967295, %s796_s12   ;;  %p729_p0 = scmp.ge.s32.totalorder %s796_s12, 1  ;;  %s796_s12 = sphi %s822_s12, %s13_s12  }
   0x2   : > { %p158_p1 = scmp.lt.s32.totalorder %s796_s12, 5 }
   0x4   : > { %p159_p2 = pnand %p729_p0, %p158_p1 }
   0x5   : > { %s730_s14 = sshll.u32 (!%p159_p2), %s725_s13, 2  ;;  %v227_v0 = vlaneseq (!%p159_p2)  ;;  %v798_v1 = vmov (!%p159_p2), 1983009808   ;;  %vm264_vm0 = vcmask (!%p159_p2), 1041408   ;;  %v799_v34 = vmov (!%p159_p2), 0  }
   0x6   : > { %162 = sbr.rel (%p159_p2) target bundleno = 479 (0x1df), region = 32  ;;  %p191_p3 = scmp.lt.s32.totalorder (!%p159_p2), %s730_s14, 15  ;;  %v225_v2 = vunpack.c.l.s4 (!%p159_p2), %v798_v1  ;;  %771 = vset.pattern.permute.xlu1 (!%p159_p2), %v799_v34  ;;  %770 = vset.pattern.permute.xlu0 (!%p159_p2), %v799_v34  ;;  %v800_v39 = vmov (!%p159_p2), 269488144  }
   0x7   : > { %v830_v3 = vshrl.u32 (!%p159_p2), %v227_v0, 7  ;;  %v301_v40 = vunpack.c.l.s4 (!%p159_p2), %v800_v39 }
   0x8   : > { %v226_v4 = vunpack.c.0.s8 (!%p159_p2), %v225_v2 }
   0x9   : > { %v302_v48 = vunpack.c.0.s8 (!%p159_p2), %v301_v40 }
   0xa   : > { %v841_v5 = vsub.s32 (!%p159_p2), %v226_v4, %v830_v3 }
   0xb   : > { %v865_v52 = vsub.s32 (!%p159_p2), %v302_v48, %v830_v3 }
   0xd   : > { %s928_s14 = smov (!%p191_p3, %s730_s14), 15 }
   0xe   : > { %s731_s15 = sshll.u32 %s928_s14, 1  ;;  %s199_s21 = scalar_lea.vmem %s924_s1, %s928_s14 }
   0xf   : > { %s194_s18 = scalar_lea.vmem %s923_s0, %s731_s15  ;;  %s204_s24 = scalar_lea.vmem %s925_s2, %s928_s14 }
  0x10   : > { %v212_v6 = vld [vmem:[%s194_s18] sm:$0x3]  ;;  %v214_v7 = vld [vmem:[%s194_s18 + $0x4] sm:$0x3]  ;;  %v213_v8 = vld [vmem:[%s194_s18 + $0x2] sm:$0x3]  ;;  %s210_s27 = scalar_lea.vmem %s926_s3, %s731_s15 }
  0x11   : > { %v216_v9 = vunpack.c.l.bf16 %v212_v6  ;;  %v218_v10 = vunpack.c.l.bf16 %v214_v7  ;;  %v217_v11 = vunpack.c.l.bf16 %v213_v8  ;;  %v843_v12 = vld [vmem:[%s194_s18 + $0x6] sm:$0x3] }
  0x12   : > { %v219_v13 = vunpack.c.l.bf16 %v843_v12 }
  0x13   : > { %v230_v14 = vrot.slane %v216_v9, %v841_v5  ;;  %v246_v15 = vrot.slane %v218_v10, %v841_v5  ;;  %v238_v16 = vrot.slane %v217_v11, %v841_v5 }
  0x14   : > { %v254_v17 = vrot.slane %v219_v13, %v841_v5 }
  0x15   : > { %v231_v18 = vcombine.high %v230_v14, %v230_v14  ;;  %v265_v19 = vsel %vm264_vm0, %v230_v14, 0.0  ;;  %v247_v20 = vcombine.high %v246_v15, %v246_v15  ;;  %v275_v21 = vsel %vm264_vm0, %v246_v15, 0.0 }
  0x16   : > { %v239_v22 = vcombine.high %v238_v16, %v238_v16  ;;  %v255_v23 = vcombine.high %v254_v17, %v254_v17  ;;  %v270_v26 = vsel %vm264_vm0, %v238_v16, 0.0  ;;  %v280_v27 = vsel %vm264_vm0, %v254_v17, 0.0  ;;  %v737_v17 = vld [vmem:[%s199_s21 + $0x1] ss:$0 sm:$0xff] }
  0x17   : > { %v266_v24 = vsel %vm264_vm0, %v231_v18, 0.0  ;;  %v276_v25 = vsel %vm264_vm0, %v247_v20, 0.0  ;;  %v738_v18 = vld [vmem:[%s199_s21 + $0x2] ss:$0 sm:$0xff]  ;;  %v736_v20 = vld [vmem:[%s199_s21] ss:$0 sm:$0xff] }
  0x18   : > { %v267_v28 = vadd.f32 %v266_v24, %v265_v19  ;;  %v277_v29 = vadd.f32 %v276_v25, %v275_v21  ;;  %v271_v30 = vsel %vm264_vm0, %v239_v22, 0.0  ;;  %v281_v31 = vsel %vm264_vm0, %v255_v23, 0.0  ;;  %v739_v19 = vld [vmem:[%s199_s21 + $0x3] ss:$0 sm:$0xff]  ;;  %v740_v21 = vld [vmem:[%s204_s24] ss:$0 sm:$0xff] }
  0x19   : > { %v272_v32 = vadd.f32 %v271_v30, %v270_v26  ;;  %v282_v33 = vadd.f32 %v281_v31, %v280_v27  ;;  %v741_v22 = vld [vmem:[%s204_s24 + $0x1] ss:$0 sm:$0xff]  ;;  %v742_v23 = vld [vmem:[%s204_s24 + $0x2] ss:$0 sm:$0xff]  ;;  %v743_v31 = vld [vmem:[%s204_s24 + $0x3] ss:$0 sm:$0xff] }
  0x1a   : > { %268 = vadd.xlane.f32.xlu0 %v267_v28  ;;  %278 = vadd.xlane.f32.xlu1 %v277_v29 }
  0x1e   : > { %273 = vadd.xlane.f32.xlu0 %v272_v32  ;;  %283 = vadd.xlane.f32.xlu1 %v282_v33 }
  0xa7   : > { %v269_v35 = vpop.xlane.xlu0 %268  ;;  %v279_v36 = vpop.xlane.xlu1 %278 }
  0xa8   : > { %v286_v37 = vmul.f32 0.00390625, %v269_v35  ;;  %v288_v42 = vmul.f32 0.00390625, %v279_v36 }
  0xaa   : > { %v290_v45 = vsel %vm264_vm0, %v286_v37, 0.0  ;;  %v293_v49 = vsel %vm264_vm0, %v288_v42, 0.0 }
  0xab   : > { %v274_v38 = vpop.xlane.xlu0 %273  ;;  %v284_v41 = vpop.xlane.xlu1 %283 }
  0xac   : > { %v287_v43 = vmul.f32 0.00390625, %v274_v38  ;;  %v289_v44 = vmul.f32 0.00390625, %v284_v41 }
  0xae   : > { %v291_v46 = vsel %vm264_vm0, %v287_v43, 0.0  ;;  %v295_v50 = vsel %vm264_vm0, %v289_v44, 0.0 }
  0xaf   : > { %v292_v47 = vadd.f32 %v291_v46, %v290_v45 }
  0xb1   : > { %v294_v51 = vadd.f32 %v293_v49, %v292_v47 }
  0xb3   : > { %v296_v53 = vadd.f32 %v295_v50, %v294_v51 }
  0xb5   : > { %v298_v54 = vmul.f32 0.25, %v296_v53 }
  0xb7   : > { %v306_v55 = vrot.slane %v298_v54, %v865_v52 }
  0xb9   : > { %v868_v56 = vsub.f32 %v217_v11, %v306_v55  ;;  %v870_v57 = vsub.f32 %v216_v9, %v306_v55  ;;  %v872_v58 = vsub.f32 %v218_v10, %v306_v55  ;;  %v311_v24 = vsub.f32 %v219_v13, %v306_v55 }
  0xbb   : > { %v313_v59 = vmul.f32 %v868_v56, %v868_v56  ;;  %v312_v60 = vmul.f32 %v870_v57, %v870_v57  ;;  %v314_v61 = vmul.f32 %v872_v58, %v872_v58  ;;  %v315_v25 = vmul.f32 %v311_v24, %v311_v24 }
  0xbd   : > { %v334_v62 = vrot.slane %v313_v59, %v841_v5  ;;  %v326_v63 = vrot.slane %v312_v60, %v841_v5  ;;  %v342_v0 = vrot.slane %v314_v61, %v841_v5  ;;  %v350_v26 = vrot.slane %v315_v25, %v841_v5 }
  0xbf   : > { %v335_v1 = vcombine.high %v334_v62, %v334_v62  ;;  %v327_v2 = vcombine.high %v326_v63, %v326_v63  ;;  %v343_v4 = vcombine.high %v342_v0, %v342_v0  ;;  %v365_v6 = vsel %vm264_vm0, %v334_v62, 0.0 }
  0xc0   : > { %v360_v8 = vsel %vm264_vm0, %v326_v63, 0.0  ;;  %v370_v15 = vsel %vm264_vm0, %v342_v0, 0.0  ;;  %v351_v27 = vcombine.high %v350_v26, %v350_v26  ;;  %v375_v29 = vsel %vm264_vm0, %v350_v26, 0.0 }
  0xc1   : > { %v366_v7 = vsel %vm264_vm0, %v335_v1, 0.0  ;;  %v361_v9 = vsel %vm264_vm0, %v327_v2, 0.0  ;;  %v371_v14 = vsel %vm264_vm0, %v343_v4, 0.0 }
  0xc2   : > { %v367_v10 = vadd.f32 %v366_v7, %v365_v6  ;;  %v362_v11 = vadd.f32 %v361_v9, %v360_v8  ;;  %v372_v16 = vadd.f32 %v371_v14, %v370_v15  ;;  %v376_v28 = vsel %vm264_vm0, %v351_v27, 0.0 }
  0xc3   : > { %v377_v30 = vadd.f32 %v376_v28, %v375_v29 }
  0xc4   : > { %368 = vadd.xlane.f32.xlu1 %v367_v10  ;;  %363 = vadd.xlane.f32.xlu0 %v362_v11 }
  0xc8   : > { %373 = vadd.xlane.f32.xlu0 %v372_v16 }
  0xd5   : > { %436 = vperm.xlu1 %771, %v737_v17  }
  0xd9   : > { %440 = vperm.xlu1 %771, %v738_v18  }
  0xdd   : > { %444 = vperm.xlu1 %771, %v739_v19  }
  0xde   : > { %432 = vperm.xlu0 %770, %v736_v20  }
  0xe1   : > { %476 = vperm.xlu1 %771, %v740_v21   ;;  %v801_v21 = vmov 1966171168  }
  0xe5   : > { %480 = vperm.xlu1 %771, %v741_v22   ;;  %v585_v22 = vunpack.c.l.s4 %v801_v21 }
  0xe7   : > { %v586_v25 = vunpack.c.0.s8 %v585_v22 }
  0xe9   : > { %484 = vperm.xlu1 %771, %v742_v23  }
 0x10d   : > { %378 = vadd.xlane.f32.xlu1 %v377_v30 }
 0x11e   : > { %488 = vperm.xlu1 %771, %v743_v31  }
 0x151   : > { %v369_v32 = vpop.xlane.xlu1 %368  ;;  %v364_v37 = vpop.xlane.xlu0 %363 }
 0x152   : > { %v381_v38 = vmul.f32 0.00390625, %v369_v32  ;;  %v380_v39 = vmul.f32 0.00390625, %v364_v37 }
 0x154   : > { %v385_v42 = vsel %vm264_vm0, %v381_v38, 0.0  ;;  %v384_v43 = vsel %vm264_vm0, %v380_v39, 0.0 }
 0x155   : > { %v437_v33 = vpop.permute.xlu1 %436  ;;  %v374_v13 = vpop.xlane.xlu0 %373  ;;  %v386_v45 = vadd.f32 %v385_v42, %v384_v43 }
 0x156   : > { %v382_v40 = vmul.f32 0.00390625, %v374_v13 }
 0x158   : > { %v387_v44 = vsel %vm264_vm0, %v382_v40, 0.0 }
 0x159   : > { %v441_v34 = vpop.permute.xlu1 %440  ;;  %v388_v48 = vadd.f32 %v387_v44, %v386_v45 }
 0x15d   : > { %v445_v35 = vpop.permute.xlu1 %444  ;;  %v433_v59 = vpop.permute.xlu0 %432 }
 0x161   : > { %v477_v36 = vpop.permute.xlu1 %476 }
 0x165   : > { %v481_v12 = vpop.permute.xlu1 %480 }
 0x169   : > { %v485_v41 = vpop.permute.xlu1 %484 }
 0x19a   : > { %v379_v46 = vpop.xlane.xlu1 %378 }
 0x19b   : > { %v383_v47 = vmul.f32 0.00390625, %v379_v46 }
 0x19d   : > { %v389_v49 = vsel %vm264_vm0, %v383_v47, 0.0 }
 0x19e   : > { %v390_v50 = vadd.f32 %v389_v49, %v388_v48  ;;  %v489_v6 = vpop.permute.xlu1 %488 }
 0x1a0   : > { %v391_v51 = vmul.f32 0.25, %v390_v50 }
 0x1a2   : > { %v392_v53 = vadd.f32 1e-05, %v391_v51 }
 0x1a4   : > { %772 = vrsqrt.f32 %v392_v53 }
 0x1ae   : > { %v773_v54 = vpop.eup %772 }
 0x1af   : > { %v401_v55 = vrot.slane %v773_v54, %v865_v52 }
 0x1b1   : > { %v404_v60 = vmul.f32 %v401_v55, %v868_v56  ;;  %v405_v61 = vmul.f32 %v401_v55, %v872_v58  ;;  %v406_v62 = vmul.f32 %v401_v55, %v311_v24  ;;  %v403_v63 = vmul.f32 %v401_v55, %v870_v57 }
 0x1b3   : > { %v448_v0 = vmul.f32 %v437_v33, %v404_v60  ;;  %v449_v1 = vmul.f32 %v441_v34, %v405_v61  ;;  %v450_v2 = vmul.f32 %v445_v35, %v406_v62  ;;  %v447_v4 = vmul.f32 %v433_v59, %v403_v63 }
 0x1b4   : > { %v589_v34 = vsub.s32 %v586_v25, %v830_v3 }
 0x1b5   : > { %v492_v7 = vadd.f32 %v481_v12, %v448_v0  ;;  %v493_v8 = vadd.f32 %v485_v41, %v449_v1  ;;  %v494_v9 = vadd.f32 %v489_v6, %v450_v2  ;;  %v491_v10 = vadd.f32 %v477_v36, %v447_v4 }
 0x1b7   : > { %v745_v11 = vmul.f32 -1.442695, %v492_v7  ;;  %v746_v14 = vmul.f32 -1.442695, %v493_v8  ;;  %v747_v52 = vmul.f32 -1.442695, %v494_v9 }
 0x1b8   : > { %v744_v15 = vmul.f32 -1.442695, %v491_v10 }
 0x1b9   : > { %774 = vpow2.f32 %v745_v11 }
 0x1ba   : > { %776 = vpow2.f32 %v746_v14 }
 0x1bb   : > { %778 = vpow2.f32 %v747_v52 }
 0x1bc   : > { %780 = vpow2.f32 %v744_v15 }
 0x1c3   : > { %v775_v56 = vpop.eup %774 }
 0x1c4   : > { %v777_v58 = vpop.eup %776  ;;  %v508_v57 = vadd.f32 1.0, %v775_v56 }
 0x1c5   : > { %v779_v16 = vpop.eup %778  ;;  %v509_v17 = vadd.f32 1.0, %v777_v58 }
 0x1c6   : > { %v781_v18 = vpop.eup %780  ;;  %v510_v19 = vadd.f32 1.0, %v779_v16  ;;  %782 = vrcp.f32 %v508_v57 }
 0x1c7   : > { %784 = vrcp.f32 %v509_v17  ;;  %v507_v20 = vadd.f32 1.0, %v781_v18 }
 0x1c8   : > { %786 = vrcp.f32 %v510_v19 }
 0x1c9   : > { %788 = vrcp.f32 %v507_v20 }
 0x1d0   : > { %v783_v23 = vpop.eup %782 }
 0x1d1   : > { %v785_v24 = vpop.eup %784  ;;  %v520_v26 = vmul.f32 %v783_v23, %v492_v7 }
 0x1d2   : > { %v787_v27 = vpop.eup %786  ;;  %v521_v28 = vmul.f32 %v785_v24, %v493_v8 }
 0x1d3   : > { %v789_v29 = vpop.eup %788  ;;  %v522_v30 = vmul.f32 %v787_v27, %v494_v9  ;;  %v541_v31 = vrot.slane %v520_v26, %v841_v5 }
 0x1d4   : > { %v549_v32 = vrot.slane %v521_v28, %v841_v5  ;;  %v519_v33 = vmul.f32 %v789_v29, %v491_v10 }
 0x1d5   : > { %v542_v35 = vcombine.high %v541_v31, %v541_v31  ;;  %v557_v36 = vrot.slane %v522_v30, %v841_v5 }
 0x1d6   : > { %v550_v37 = vcombine.high %v549_v32, %v549_v32  ;;  %v533_v12 = vrot.slane %v519_v33, %v841_v5 }
 0x1d7   : > { %v558_v13 = vcombine.high %v557_v36, %v557_v36  ;;  %v749_v38 = vpack.c.bf16 %v542_v35, %v541_v31 }
 0x1d8   : > { %v750_v39 = vpack.c.bf16 %v550_v37, %v549_v32  ;;  %v534_v40 = vcombine.high %v533_v12, %v533_v12 }
 0x1d9   : > { %v605_v41 = vrot.slane %v749_v38, %v589_v34  ;;  %v751_v42 = vpack.c.bf16 %v558_v13, %v557_v36 }
 0x1da   : > { %v620_v43 = vrot.slane %v750_v39, %v589_v34  ;;  %v748_v44 = vpack.c.bf16 %v534_v40, %v533_v12 }
 0x1db   : > { %v635_v3 = vrot.slane %v751_v42, %v589_v34  ;;  %753 = vst.sshfl [vmem:[%s210_s27 + $0x2] sm:$0x5 pattern:$0x73625140] %v605_v41 }
 0x1dc   : > { %754 = vst.sshfl [vmem:[%s210_s27 + $0x4] sm:$0x5 pattern:$0x73625140] %v620_v43  ;;  %v590_v45 = vrot.slane %v748_v44, %v589_v34 }
 0x1dd   : > { %755 = vst.sshfl [vmem:[%s210_s27 + $0x6] sm:$0x5 pattern:$0x73625140] %v635_v3 }
 0x1de   : > { %752 = vst.sshfl [vmem:[%s210_s27] sm:$0x5 pattern:$0x73625140] %v590_v45 }
 0x1df PF: > { %s13_s12 = sadd.s32 1, %s796_s12  }
 0x1e0   : > { %p10_p4 = scmp.ge.s32.totalorder %s13_s12, 6  }
 0x1e2   :  { %12 = sbr.rel (!%p10_p4) target bundleno = 1 (0x1), region = 68 }

// kernel: _lambda_.31
= control target key start
LH: loop header
LB: loop body
LE: loop exit
PB: predicated region body
PF: predicated region fallthrough
CT: control target
= control target key end

     0   :  { %s593_s12 = smov 0   ;;  %s595_s13 = smov 0   ;;  %s671_s0 = inlined_call_operand.vmem [shape: bf16[16,8], index: 0, kind: input, shape index: {}]   ;;  %s672_s1 = inlined_call_operand.vmem [shape: bf16[8,512], index: 1, kind: input, shape index: {}]   ;;  %s673_s2 = inlined_call_operand.vmem [shape: f32[16,1], index: 2, kind: input, shape index: {}]   ;;  %s674_s3 = inlined_call_operand.vmem [shape: bf16[16,512], index: 3, kind: output, shape index: {}]  }
   0x1   :  { %s597_s14 = smov 0   ;;  %s599_s15 = smov 0  }
   0x2   :  { %s601_s16 = smov 0  }
   0x3 LB: > { %s462_s17 = sadd.s32 4294967295, %s570_s16   ;;  %s25_s18 = sadd.s32 1, %s566_s15  ;;  %s570_s16 = sphi %s601_s16, %s13_s16   ;;  %s566_s15 = sphi %s599_s15, %s679_s15   ;;  %s562_s14 = sphi %s597_s14, %s678_s14   ;;  %s558_s13 = sphi %s595_s13, %s677_s13   ;;  %s554_s12 = sphi %s593_s12, %s676_s12  }
   0x4   : > { %p27_p0 = scmp.ge.s32.totalorder %s25_s18, 2  ;;  %s112_s19 = sadd.s32 1, %s558_s13 }
   0x5   : > { %p122_p1 = scmp.ne.s32.totalorder %s558_s13, %s554_s12  ;;  %p123_p2 = scmp.eq.s32.totalorder %s462_s17, 1 }
   0x6   : > { %s681_s18 = smov (%p27_p0, %s25_s18), 0  ;;  %p468_p4 = scmp.ge.s32.totalorder %s570_s16, 1 }
   0x7   : > { %p625_p3 = por %p123_p2, %p122_p1  ;;  %s108_s21 = ssub.s32 %s566_s15, %s681_s18 }
   0x8   : > { %p174_p5 = scmp.lt.s32.totalorder %s570_s16, 3  ;;  %p110_p6 = scmp.eq.s32.totalorder %s108_s21, 0 }
   0xa   : > { %p175_p7 = pnand %p468_p4, %p174_p5 }
   0xb   : > { %s634_s22 = scalar_select %p110_p6, %s558_s13, %s112_s19  }
   0xc   : > { %178 = sbr.rel (%p175_p7) target bundleno = 257 (0x101), region = 32  ;;  %s470_s23 = sshll.u32 (!%p175_p7), %s562_s14, 1  ;;  %v572_v0 = vmov (!%p175_p7), 0   ;;  %v231_v1 = vld [vmem:[%s673_s2] sm:$0xff] (!%p175_p7)  ;;  %v232_v2 = vld [vmem:[%s673_s2 + $0x8] sm:$0xff] (!%p175_p7)  ;;  %vm257_vm0 = vcmask (!%p175_p7), 1043456  }
   0xd   : > { %p214_p8 = scmp.lt.s32.totalorder (!%p175_p7), %s470_s23, 3  ;;  %296 = vmatprep.mubr.bf16.mxu0 (!%p175_p7), %v572_v0  ;;  %528 = vset.pattern.permute.xlu0 (!%p175_p7), %v572_v0  ;;  %v531_v7 = vld [vmem:[%s671_s0] sm:$0xff] (!%p175_p7)   ;;  %vm253_vm1 = vcmask (!%p175_p7), 64512   ;;  %s204_s7 = sand.u32 (!%p175_p7), 1, %s554_s12  }
   0xe   : > { %235 = vperm.xlu0 (!%p175_p7), %528, %v231_v1   ;;  %s469_s8 = sshll.u32 (!%p175_p7), %s204_s7, 4 }
   0xf   : > { %s206_s9 = scalar_lea.vmem (!%p175_p7), [#allocation2], %s469_s8 }
  0x12   : > { %240 = vperm.xlu0 (!%p175_p7), %528, %v232_v2  }
  0x13   : > { %s683_s23 = smov (!%p214_p8, %s470_s23), 3  ;;  %s486_s10 = sshll.u32 (%p625_p3), %s562_s14, 3 }
  0x14   : > { %s471_s28 = sshll.u32 %s683_s23, 2  ;;  %s333_s17 = scalar_lea.vmem (%p625_p3), %s674_s3, %s486_s10 }
  0x15   : > { %s217_s4 = scalar_lea.vmem %s672_s1, %s471_s28 }
  0x16   : > { %v230_v3 = vld [vmem:[%s217_s4] sm:$0xff] }
  0x17   : > { %v474_v4 = vcombine.high %v230_v3, %v230_v3  ;;  %v473_v5 = vcombine.low %v230_v3, %v230_v3 }
  0x19   : > { %475 = vmatprep.subr.msk.bf16.mxu0 %vm257_vm0, %v474_v4  ;;  %v259_v6 = vsel %vm257_vm0, %v473_v5, 0 }
  0x1a   : > { %265 = vmatpush1.bf16.msra.mxu0 %v259_v6 }
  0x1d   : > { %476 = vmatmul.mubr.msk.bf16.vlgmr.msra.gmra.mrb[0].mxu0 %vm253_vm1, %v531_v7 }
  0x8d   : > { %v236_v8 = vpop.permute.xlu0 %235 }
  0x91   : > { %v241_v12 = vpop.permute.xlu0 %240 }
  0xf0   : > { %v298_v9 = vpop.f32.mrb[0].mxu0 }
  0xf1   : > { %v299_v10 = vadd.f32 %v298_v9, %v236_v8  ;;  %v300_v11 = vpop.f32.mrb[1].mxu0 }
  0xf2   : > { %v301_v13 = vadd.f32 %v300_v11, %v236_v8  ;;  %v302_v14 = vpop.f32.mrb[2].mxu0  ;;  %327 = sbr.rel (!%p625_p3) target bundleno = 257 (0x101), region = 36 }
  0xf3   : > { %v303_v15 = vadd.f32 %v302_v14, %v241_v12  ;;  %v304_v16 = vpop.f32.mrb[3].mxu0 }
  0xf4   : > { %v484_v17 = vpack.c.bf16 %v301_v13, %v299_v10  ;;  %v305_v18 = vadd.f32 %v304_v16, %v241_v12 }
  0xf6   : > { %319 = vst [vmem:[%s206_s9] sm:$0xff] %v484_v17  ;;  %v485_v19 = vpack.c.bf16 %v305_v18, %v303_v15 }
  0xf8   : > { %320 = vst [vmem:[%s206_s9 + $0x8] sm:$0xff] %v485_v19 }
  0xfd   : > { %v363_v20 = vld [vmem:[%s206_s9] sm:$0xff] }
  0xfe   : > { %364 = vst [vmem:[%s333_s17] sm:$0xff] %v363_v20 }
  0xff   : > { %v365_v21 = vld [vmem:[%s206_s9 + $0x8] sm:$0xff] }
 0x100   : > { %366 = vst [vmem:[%s333_s17 + $0x10] sm:$0xff] %v365_v21 }
 0x101 PF: > { %s13_s16 = sadd.s32 1, %s570_s16   ;;  %s676_s12 = smov %s558_s13 }
 0x102   : > { %p10_p9 = scmp.ge.s32.totalorder %s13_s16, 4   ;;  %s677_s13 = smov %s634_s22 }
 0x103   : > { %s678_s14 = smov %s566_s15  ;;  %s679_s15 = smov %s681_s18 }
 0x104   :  { %12 = sbr.rel (!%p10_p9) target bundleno = 3 (0x3), region = 106 }

// kernel: _lambda_.32
= control target key start
LH: loop header
LB: loop body
LE: loop exit
PB: predicated region body
PF: predicated region fallthrough
CT: control target
= control target key end

     0   :  { %s983_s15 = smov 0   ;;  %s985_s16 = smov 0   ;;  %s1124_s0 = inlined_call_operand.vmem [shape: bf16[16,144], index: 0, kind: input, shape index: {}]   ;;  %s1125_s1 = inlined_call_operand.vmem [shape: bf16[144,512], index: 1, kind: input, shape index: {}]   ;;  %s1126_s2 = inlined_call_operand.vmem [shape: f32[16,1], index: 2, kind: input, shape index: {}]   ;;  %s1127_s3 = inlined_call_operand.vmem [shape: bf16[16,512], index: 3, kind: input, shape index: {}]   ;;  %s1128_s4 = inlined_call_operand.vmem [shape: bf16[16,512], index: 4, kind: output, shape index: {}]  }
   0x1   :  { %s987_s17 = smov 0   ;;  %s989_s18 = smov 0  }
   0x2   :  { %s991_s19 = smov 0  }
   0x3 LB: > { %s26_s20 = sadd.s32 1, %s951_s18  ;;  %s796_s21 = sadd.s32 4294967295, %s955_s19   ;;  %s955_s19 = sphi %s991_s19, %s14_s19   ;;  %s951_s18 = sphi %s989_s18, %s1134_s18   ;;  %s947_s17 = sphi %s987_s17, %s1133_s17   ;;  %s943_s16 = sphi %s985_s16, %s1132_s16   ;;  %s939_s15 = sphi %s983_s15, %s1131_s15  }
   0x4   : > { %p28_p0 = scmp.ge.s32.totalorder %s26_s20, 2  ;;  %p66_p1 = scmp.ne.s32.totalorder %s943_s16, %s939_s15 }
   0x5   : > { %p67_p2 = scmp.eq.s32.totalorder %s955_s19, 0  ;;  %p152_p4 = scmp.eq.s32.totalorder %s796_s21, 1 }
   0x6   : > { %s1136_s20 = smov (%p28_p0, %s26_s20), 0  ;;  %s59_s24 = sadd.s32 1, %s943_s16 }
   0x7   : > { %p1015_p3 = por %p67_p2, %p66_p1  ;;  %s56_s23 = ssub.s32 %s951_s18, %s1136_s20 }
   0x8   : > { %p57_p5 = scmp.eq.s32.totalorder %s56_s23, 0  ;;  %p1022_p6 = por %p152_p4, %p66_p1 }
   0x9   : > { %p801_p7 = scmp.ge.s32.totalorder %s955_s19, 2 }
   0xa   : > { %s1027_s26 = scalar_select %p57_p5, %s943_s16, %s59_s24  }
   0xb   : > { %193 = sbr.rel (%p801_p7) target bundleno = 38 (0x26), region = 24 }
  0x12   : > { %196 = sbr.rel (!%p1015_p3) target bundleno = 31 (0x1f), region = 28  ;;  %s198_s27 = sand.u32 (%p1015_p3), 1, %s943_s16  }
  0x13   : > { %s838_s28 = sshll.u32 (%p1015_p3), %s951_s18, 3  ;;  %s843_s29 = smul.u32 (%p1015_p3), 144, %s198_s27 }
  0x14   : > { %s1037_s6 = scalar_lea.vmem (%p1015_p3), %s1125_s1, %s838_s28 }
  0x15   : > { %v265_v0 = vld [vmem:[%s1037_s6] sm:$0xff] (%p1015_p3)  ;;  %v267_v1 = vld [vmem:[%s1037_s6 + $0x10] sm:$0xff] (%p1015_p3)  ;;  %s200_s7 = scalar_lea.vmem (%p1015_p3), [#allocation2], %s843_s29 }
  0x16   : > { %v269_v2 = vld [vmem:[%s1037_s6 + $0x20] sm:$0xff] (%p1015_p3)  ;;  %v271_v3 = vld [vmem:[%s1037_s6 + $0x30] sm:$0xff] (%p1015_p3)  ;;  %266 = vst [vmem:[%s200_s7] sm:$0xff] (%p1015_p3), %v265_v0  ;;  %268 = vst [vmem:[%s200_s7 + $0x8] sm:$0xff] (%p1015_p3), %v267_v1 }
  0x17   : > { %v273_v4 = vld [vmem:[%s1037_s6 + $0x40] sm:$0xff] (%p1015_p3)  ;;  %v275_v5 = vld [vmem:[%s1037_s6 + $0x50] sm:$0xff] (%p1015_p3)  ;;  %270 = vst [vmem:[%s200_s7 + $0x10] sm:$0xff] (%p1015_p3), %v269_v2  ;;  %272 = vst [vmem:[%s200_s7 + $0x18] sm:$0xff] (%p1015_p3), %v271_v3 }
  0x18   : > { %274 = vst [vmem:[%s200_s7 + $0x20] sm:$0xff] (%p1015_p3), %v273_v4  ;;  %276 = vst [vmem:[%s200_s7 + $0x28] sm:$0xff] (%p1015_p3), %v275_v5  ;;  %v277_v6 = vld [vmem:[%s1037_s6 + $0x60] sm:$0xff] (%p1015_p3)  ;;  %v279_v7 = vld [vmem:[%s1037_s6 + $0x70] sm:$0xff] (%p1015_p3) }
  0x19   : > { %v281_v8 = vld [vmem:[%s1037_s6 + $0x80] sm:$0xff]  ;;  %278 = vst [vmem:[%s200_s7 + $0x30] sm:$0xff] %v277_v6  ;;  %280 = vst [vmem:[%s200_s7 + $0x38] sm:$0xff] %v279_v7  ;;  %v283_v9 = vld [vmem:[%s1037_s6 + $0x90] sm:$0xff] }
  0x1a   : > { %282 = vst [vmem:[%s200_s7 + $0x40] sm:$0xff] %v281_v8  ;;  %v285_v10 = vld [vmem:[%s1037_s6 + $0xa0] sm:$0xff]  ;;  %v287_v11 = vld [vmem:[%s1037_s6 + $0xb0] sm:$0xff]  ;;  %284 = vst [vmem:[%s200_s7 + $0x48] sm:$0xff] %v283_v9 }
  0x1b   : > { %286 = vst [vmem:[%s200_s7 + $0x50] sm:$0xff] %v285_v10  ;;  %288 = vst [vmem:[%s200_s7 + $0x58] sm:$0xff] %v287_v11  ;;  %v289_v12 = vld [vmem:[%s1037_s6 + $0xc0] sm:$0xff]  ;;  %v291_v13 = vld [vmem:[%s1037_s6 + $0xd0] sm:$0xff] }
  0x1c   : > { %v293_v14 = vld [vmem:[%s1037_s6 + $0xe0] sm:$0xff]  ;;  %290 = vst [vmem:[%s200_s7 + $0x60] sm:$0xff] %v289_v12  ;;  %292 = vst [vmem:[%s200_s7 + $0x68] sm:$0xff] %v291_v13  ;;  %v295_v15 = vld [vmem:[%s1037_s6 + $0xf0] sm:$0xff] }
  0x1d   : > { %294 = vst [vmem:[%s200_s7 + $0x70] sm:$0xff] %v293_v14  ;;  %v297_v16 = vld [vmem:[%s1037_s6 + $0x100] sm:$0xff]  ;;  %v299_v17 = vld [vmem:[%s1037_s6 + $0x110] sm:$0xff]  ;;  %296 = vst [vmem:[%s200_s7 + $0x78] sm:$0xff] %v295_v15 }
  0x1e   : > { %298 = vst [vmem:[%s200_s7 + $0x80] sm:$0xff] %v297_v16  ;;  %300 = vst [vmem:[%s200_s7 + $0x88] sm:$0xff] %v299_v17 }
  0x1f PF: > { %306 = sbr.rel (!%p1015_p3) target bundleno = 38 (0x26), region = 66  ;;  %s308_s8 = sand.u32 (%p1015_p3), 1, %s943_s16  }
  0x20   : > { %s839_s9 = sshll.u32 (%p1015_p3), %s951_s18, 3  ;;  %s804_s10 = sshll.u32 (%p1015_p3), %s308_s8, 4 }
  0x21   : > { %s316_s13 = scalar_lea.vmem (%p1015_p3), %s1127_s3, %s839_s9  ;;  %s310_s14 = scalar_lea.vmem (%p1015_p3), [#allocation3], %s804_s10 }
  0x22   : > { %v346_v18 = vld [vmem:[%s316_s13] sm:$0xff] (%p1015_p3)  ;;  %v348_v19 = vld [vmem:[%s316_s13 + $0x10] sm:$0xff] (%p1015_p3) }
  0x23   : > { %347 = vst [vmem:[%s310_s14] sm:$0xff] (%p1015_p3), %v346_v18  ;;  %349 = vst [vmem:[%s310_s14 + $0x8] sm:$0xff] (%p1015_p3), %v348_v19 }
  0x26 PF: > { %p807_p8 = scmp.ge.s32.totalorder %s955_s19, 1  ;;  %p354_p9 = scmp.lt.s32.totalorder %s955_s19, 3 }
  0x28   : > { %p355_p10 = pnand %p807_p8, %p354_p9 }
  0x29   : > { %s361_s21 = sand.u32 (!%p355_p10), 1, %s939_s15   ;;  %vm557_vm0 = vcmask (!%p355_p10), 130048   ;;  %v916_v20 = vld [vmem:[%s1124_s0 + $0x4] ss:$8 sps:$4 sm:$0xff] (!%p355_p10)   ;;  %v957_v22 = vmov (!%p355_p10), 0  }
  0x2a   : > { %358 = sbr.rel (%p355_p10) target bundleno = 313 (0x139), region = 104  ;;  %v446_v21 = vld [vmem:[%s1126_s2] sm:$0xff] (!%p355_p10)  ;;  %886 = vset.pattern.permute.xlu0 (!%p355_p10), %v957_v22  ;;  %830 = vmatprep.mubr.msk.bf16.mxu0 (!%p355_p10), %vm557_vm0, %v916_v20  ;;  %v447_v23 = vld [vmem:[%s1126_s2 + $0x8] sm:$0xff] (!%p355_p10)  ;;  %s808_s8 = sshll.u32 (!%p355_p10), %s361_s21, 4 }
  0x2b   : > { %s844_s22 = smul.u32 (!%p355_p10), 144, %s361_s21  ;;  %450 = vperm.xlu0 (!%p355_p10), %886, %v446_v21   ;;  %v914_v42 = vld [vmem:[%s1124_s0] ss:$8 sps:$4 sm:$0xff] (!%p355_p10)   ;;  %s370_s9 = scalar_lea.vmem (!%p355_p10), [#allocation3], %s808_s8 }
  0x2c   : > { %v604_v44 = vld [vmem:[%s370_s9] sm:$0xff] (!%p355_p10)  ;;  %v605_v45 = vld [vmem:[%s370_s9 + $0x8] sm:$0xff] (!%p355_p10)  ;;  %s406_s15 = scalar_lea.vmem (!%p355_p10), [#allocation4], %s808_s8 }
  0x2d   : > { %s1078_s5 = scalar_lea.vmem (!%p355_p10), [#allocation2], %s844_s22  ;;  %v606_v46 = vunpack.c.l.bf16 (!%p355_p10), %v604_v44  ;;  %v607_v48 = vunpack.c.h.bf16 (!%p355_p10), %v604_v44  ;;  %v608_v51 = vunpack.c.l.bf16 (!%p355_p10), %v605_v45  ;;  %v609_v55 = vunpack.c.h.bf16 (!%p355_p10), %v605_v45 }
  0x2e   : > { %v887_v24 = vld [vmem:[%s1078_s5 + $0x4] ss:$8 sps:$4 sm:$0xff] (!%p355_p10)   ;;  %v889_v25 = vld [vmem:[%s1078_s5] ss:$8 sps:$4 sm:$0xff] (!%p355_p10)   ;;  %v890_v26 = vld [vmem:[%s1078_s5 + $0x14] ss:$8 sps:$4 sm:$0xff] (!%p355_p10)  }
  0x2f   : > { %561 = vmatprep.subr.bf16.mxu0 (!%p355_p10), %v887_v24  ;;  %v892_v27 = vld [vmem:[%s1078_s5 + $0x10] ss:$8 sps:$4 sm:$0xff] (!%p355_p10)   ;;  %455 = vperm.xlu0 (!%p355_p10), %886, %v447_v23   ;;  %v893_v28 = vld [vmem:[%s1078_s5 + $0x24] ss:$8 sps:$4 sm:$0xff] (!%p355_p10)   ;;  %v895_v29 = vld [vmem:[%s1078_s5 + $0x20] ss:$8 sps:$4 sm:$0xff] (!%p355_p10)  }
  0x30   : > { %562 = vmatpush1.bf16.msra.mxu0 (!%p355_p10), %v889_v25  ;;  %v896_v30 = vld [vmem:[%s1078_s5 + $0x34] ss:$8 sps:$4 sm:$0xff] (!%p355_p10)   ;;  %v898_v31 = vld [vmem:[%s1078_s5 + $0x30] ss:$8 sps:$4 sm:$0xff] (!%p355_p10)   ;;  %v899_v32 = vld [vmem:[%s1078_s5 + $0x44] ss:$8 sps:$4 sm:$0xff] (!%p355_p10)  }
  0x31   : > { %563 = vmatprep.subr.bf16.mxu0 %v890_v26  ;;  %v901_v33 = vld [vmem:[%s1078_s5 + $0x40] ss:$8 sps:$4 sm:$0xff]   ;;  %v902_v34 = vld [vmem:[%s1078_s5 + $0x54] ss:$8 sps:$4 sm:$0xff]   ;;  %v904_v35 = vld [vmem:[%s1078_s5 + $0x50] ss:$8 sps:$4 sm:$0xff]  }
  0x32   : > { %v905_v36 = vld [vmem:[%s1078_s5 + $0x64] ss:$8 sps:$4 sm:$0xff]   ;;  %v907_v37 = vld [vmem:[%s1078_s5 + $0x60] ss:$8 sps:$4 sm:$0xff]   ;;  %v908_v38 = vld [vmem:[%s1078_s5 + $0x74] ss:$8 sps:$4 sm:$0xff]  }
  0x33   : > { %v910_v39 = vld [vmem:[%s1078_s5 + $0x70] ss:$8 sps:$4 sm:$0xff]   ;;  %v911_v40 = vld [vmem:[%s1078_s5 + $0x84] ss:$8 sps:$4 sm:$0xff]   ;;  %v913_v41 = vld [vmem:[%s1078_s5 + $0x80] ss:$8 sps:$4 sm:$0xff]  }
  0x34   : > { %564 = vmatpush1.bf16.msra.mxu0 %v892_v27  ;;  %s842_s10 = sshll.u32 (%p1022_p6), %s947_s17, 3 }
  0x35   : > { %565 = vmatprep.subr.bf16.mxu0 %v893_v28  ;;  %s640_s13 = scalar_lea.vmem (%p1022_p6), %s1128_s4, %s842_s10 }
  0x38   : > { %566 = vmatpush1.bf16.msra.mxu0 %v895_v29 }
  0x39   : > { %567 = vmatprep.subr.bf16.mxu0 %v896_v30 }
  0x3c   : > { %568 = vmatpush1.bf16.msra.mxu0 %v898_v31 }
  0x3d   : > { %569 = vmatprep.subr.bf16.mxu0 %v899_v32 }
  0x40   : > { %570 = vmatpush1.bf16.msra.mxu0 %v901_v33 }
  0x41   : > { %571 = vmatprep.subr.bf16.mxu0 %v902_v34 }
  0x44   : > { %572 = vmatpush1.bf16.msra.mxu0 %v904_v35 }
  0x45   : > { %573 = vmatprep.subr.bf16.mxu0 %v905_v36 }
  0x48   : > { %574 = vmatpush1.bf16.msra.mxu0 %v907_v37 }
  0x49   : > { %575 = vmatprep.subr.bf16.mxu0 %v908_v38 }
  0x4c   : > { %576 = vmatpush1.bf16.msra.mxu0 %v910_v39 }
  0x4d   : > { %577 = vmatprep.subr.bf16.mxu0 %v911_v40 }
  0x50   : > { %578 = vmatpush1.bf16.msra.mxu0 %v913_v41 }
  0x53   : > { %594 = vmatmul.mubr.bf16.vlgmr.msra.gmra.mrb[0].mxu0 %v914_v42 }
  0xaa   : > { %v451_v43 = vpop.permute.xlu0 %450 }
  0xae   : > { %v456_v52 = vpop.permute.xlu0 %455 }
 0x126   : > { %v595_v47 = vpop.f32.mrb[0].mxu0 }
 0x127   : > { %v596_v49 = vadd.f32 %v595_v47, %v451_v43  ;;  %v597_v50 = vpop.f32.mrb[1].mxu0 }
 0x128   : > { %v598_v53 = vadd.f32 %v597_v50, %v451_v43  ;;  %v599_v54 = vpop.f32.mrb[2].mxu0 }
 0x129   : > { %v610_v56 = vadd.f32 %v606_v46, %v596_v49  ;;  %v600_v57 = vadd.f32 %v599_v54, %v456_v52  ;;  %v601_v58 = vpop.f32.mrb[3].mxu0 }
 0x12a   : > { %v611_v59 = vadd.f32 %v607_v48, %v598_v53  ;;  %v602_v60 = vadd.f32 %v601_v58, %v456_v52  ;;  %634 = sbr.rel (!%p1022_p6) target bundleno = 313 (0x139), region = 116 }
 0x12b   : > { %v612_v61 = vadd.f32 %v608_v51, %v600_v57 }
 0x12c   : > { %v840_v62 = vpack.c.bf16 %v611_v59, %v610_v56  ;;  %v613_v63 = vadd.f32 %v609_v55, %v602_v60 }
 0x12e   : > { %626 = vst [vmem:[%s406_s15] sm:$0xff] %v840_v62  ;;  %v841_v0 = vpack.c.bf16 %v613_v63, %v612_v61 }
 0x130   : > { %627 = vst [vmem:[%s406_s15 + $0x8] sm:$0xff] %v841_v0 }
 0x135   : > { %v670_v1 = vld [vmem:[%s406_s15] sm:$0xff] }
 0x136   : > { %671 = vst [vmem:[%s640_s13] sm:$0xff] %v670_v1 }
 0x137   : > { %v672_v2 = vld [vmem:[%s406_s15 + $0x8] sm:$0xff] }
 0x138   : > { %673 = vst [vmem:[%s640_s13 + $0x10] sm:$0xff] %v672_v2 }
 0x139 PF: > { %s14_s19 = sadd.s32 1, %s955_s19   ;;  %s1131_s15 = smov %s943_s16 }
 0x13a   : > { %p11_p11 = scmp.ge.s32.totalorder %s14_s19, 4   ;;  %s1132_s16 = smov %s1027_s26 }
 0x13b   : > { %s1133_s17 = smov %s951_s18  ;;  %s1134_s18 = smov %s1136_s20 }
 0x13c   :  { %13 = sbr.rel (!%p11_p11) target bundleno = 3 (0x3), region = 199 }

// kernel: _lambda_.33
= control target key start
LH: loop header
LB: loop body
LE: loop exit
PB: predicated region body
PF: predicated region fallthrough
CT: control target
= control target key end

     0   :  { %v204_v0 = vmov 0   ;;  %vm110_vm0 = vcmask 130048   ;;  %s267_s1 = inlined_call_operand.vmem [shape: bf16[144,128], index: 1, kind: input, shape index: {}]   ;;  %s268_s0 = inlined_call_operand.vmem [shape: bf16[16,144], index: 0, kind: input, shape index: {}]   ;;  %s269_s2 = inlined_call_operand.vmem [shape: f32[16,1], index: 2, kind: input, shape index: {}]   ;;  %s270_s3 = inlined_call_operand.vmem [shape: bf16[16,128], index: 3, kind: output, shape index: {}]  }
   0x1   :  { %114 = vmatprep.subr.bf16.mxu0 %v204_v0  ;;  %v192_v1 = vld [vmem:[%s267_s1] sm:$0xff]   ;;  %191 = vset.pattern.permute.xlu0 %v204_v0  ;;  %v193_v2 = vld [vmem:[%s267_s1 + $0x8] sm:$0xff]   ;;  %v194_v3 = vld [vmem:[%s267_s1 + $0x10] sm:$0xff]  }
   0x2   :  { %115 = vmatpush1.bf16.msra.mxu0 %v192_v1  ;;  %v195_v4 = vld [vmem:[%s267_s1 + $0x18] sm:$0xff]   ;;  %v203_v5 = vld [vmem:[%s268_s0 + $0x4] ss:$8 sps:$4 sm:$0xff]   ;;  %v198_v10 = vld [vmem:[%s267_s1 + $0x30] sm:$0xff]  }
   0x3   :  { %116 = vmatprep.subr.bf16.mxu0 %v204_v0  ;;  %v35_v6 = vld [vmem:[%s269_s2] sm:$0xff]  ;;  %180 = vmatprep.mubr.msk.bf16.mxu0 %vm110_vm0, %v203_v5  ;;  %v36_v7 = vld [vmem:[%s269_s2 + $0x8] sm:$0xff]  ;;  %v199_v11 = vld [vmem:[%s267_s1 + $0x38] sm:$0xff]  }
   0x4   :  { %39 = vperm.xlu0 %191, %v35_v6   ;;  %v196_v8 = vld [vmem:[%s267_s1 + $0x20] sm:$0xff]   ;;  %v197_v9 = vld [vmem:[%s267_s1 + $0x28] sm:$0xff]  }
   0x5   :  { %v200_v12 = vld [vmem:[%s267_s1 + $0x40] sm:$0xff]  }
   0x6   :  { %117 = vmatpush1.bf16.msra.mxu0 %v193_v2  ;;  %v201_v13 = vld [vmem:[%s268_s0] ss:$8 sps:$4 sm:$0xff]  }
   0x7   :  { %118 = vmatprep.subr.bf16.mxu0 %v204_v0 }
   0x8   :  { %44 = vperm.xlu0 %191, %v36_v7  }
   0xa   :  { %119 = vmatpush1.bf16.msra.mxu0 %v194_v3 }
   0xb   :  { %120 = vmatprep.subr.bf16.mxu0 %v204_v0 }
   0xe   :  { %121 = vmatpush1.bf16.msra.mxu0 %v195_v4 }
   0xf   :  { %122 = vmatprep.subr.bf16.mxu0 %v204_v0 }
  0x12   :  { %123 = vmatpush1.bf16.msra.mxu0 %v196_v8 }
  0x13   :  { %124 = vmatprep.subr.bf16.mxu0 %v204_v0 }
  0x16   :  { %125 = vmatpush1.bf16.msra.mxu0 %v197_v9 }
  0x17   :  { %126 = vmatprep.subr.bf16.mxu0 %v204_v0 }
  0x1a   :  { %127 = vmatpush1.bf16.msra.mxu0 %v198_v10 }
  0x1b   :  { %128 = vmatprep.subr.bf16.mxu0 %v204_v0 }
  0x1e   :  { %129 = vmatpush1.bf16.msra.mxu0 %v199_v11 }
  0x1f   :  { %130 = vmatprep.subr.bf16.mxu0 %v204_v0 }
  0x22   :  { %131 = vmatpush1.bf16.msra.mxu0 %v200_v12 }
  0x25   :  { %147 = vmatmul.mubr.bf16.vlgmr.msra.gmra.mrb[0].mxu0 %v201_v13 }
  0x83   :  { %v40_v14 = vpop.permute.xlu0 %39 }
  0x87   :  { %v45_v17 = vpop.permute.xlu0 %44 }
  0xf8   :  { %v148_v15 = vpop.f32.mrb[0].mxu0 }
  0xf9   :  { %v150_v16 = vpop.f32.mrb[1].mxu0  ;;  %v149_v19 = vadd.f32 %v148_v15, %v40_v14 }
  0xfa   :  { %v151_v18 = vpop.f32.mrb[2].mxu0 }
  0xfb   :  { %v152_v20 = vadd.f32 %v151_v18, %v45_v17  ;;  %v153_v21 = vpop.f32.mrb[3].mxu0 }
  0xfd   :  { %v188_v22 = vpack.c.bf16 %v152_v20, %v149_v19 }
  0xff   :  { %189 = vst [vmem:[%s270_s3] sm:$0xff] %v188_v22  }

// kernel: _lambda_.34
= control target key start
LH: loop header
LB: loop body
LE: loop exit
PB: predicated region body
PF: predicated region fallthrough
CT: control target
= control target key end

     0   :  { %s552_s12 = smov 0   ;;  %s597_s0 = inlined_call_operand.vmem [shape: bf16[16,2,64], index: 0, kind: input, shape index: {}]   ;;  %s598_s1 = inlined_call_operand.vmem [shape: f32[16,1,1], index: 1, kind: input, shape index: {}]   ;;  %s599_s2 = inlined_call_operand.vmem [shape: f32[16,1,1], index: 2, kind: input, shape index: {}]   ;;  %s600_s3 = inlined_call_operand.vmem [shape: bf16[16,2,64], index: 3, kind: output, shape index: {}]  }
   0x1 LB: > { %s471_s13 = sadd.s32 4294967295, %s529_s12   ;;  %p475_p0 = scmp.ge.s32.totalorder %s529_s12, 1  ;;  %s529_s12 = sphi %s552_s12, %s13_s12  }
   0x2   : > { %p157_p1 = scmp.lt.s32.totalorder %s529_s12, 5 }
   0x4   : > { %p158_p2 = pnand %p475_p0, %p157_p1 }
   0x5   : > { %s476_s14 = sshll.u32 (!%p158_p2), %s471_s13, 2  ;;  %vm215_vm0 = vcmask (!%p158_p2), 517120   ;;  %v531_v12 = vmov (!%p158_p2), 0   ;;  %vm233_vm1 = vcmask (!%p158_p2), 1041408   ;;  %vm401_vm2 = vcmask (!%p158_p2), 516096  }
   0x6   : > { %161 = sbr.rel (%p158_p2) target bundleno = 456 (0x1c8), region = 32  ;;  %p188_p3 = scmp.lt.s32.totalorder (!%p158_p2), %s476_s14, 15  ;;  %504 = vset.pattern.permute.xlu1 (!%p158_p2), %v531_v12  ;;  %503 = vset.pattern.permute.xlu0 (!%p158_p2), %v531_v12 }
   0xd   : > { %s602_s14 = smov (!%p188_p3, %s476_s14), 15 }
   0xe   : > { %s190_s17 = scalar_lea.vmem %s597_s0, %s602_s14  ;;  %s195_s20 = scalar_lea.vmem %s598_s1, %s602_s14 }
   0xf   : > { %v207_v0 = vld [vmem:[%s190_s17] sm:$0x1]  ;;  %v209_v1 = vld [vmem:[%s190_s17 + $0x2] sm:$0x1]  ;;  %v208_v2 = vld [vmem:[%s190_s17 + $0x1] sm:$0x1]  ;;  %s200_s23 = scalar_lea.vmem %s599_s2, %s602_s14  ;;  %s205_s26 = scalar_lea.vmem %s600_s3, %s602_s14 }
  0x10   : > { %v211_v3 = vunpack.c.l.bf16 %v207_v0  ;;  %v213_v4 = vunpack.c.l.bf16 %v209_v1  ;;  %v212_v5 = vunpack.c.l.bf16 %v208_v2  ;;  %v210_v6 = vld [vmem:[%s190_s17 + $0x3] sm:$0x1]  ;;  %v481_v38 = vld [vmem:[%s195_s20 + $0x1] ss:$0 sm:$0xff]  ;;  %v482_v39 = vld [vmem:[%s195_s20 + $0x2] ss:$0 sm:$0xff] }
  0x11   : > { %v214_v7 = vunpack.c.l.bf16 %v210_v6  ;;  %v483_v40 = vld [vmem:[%s195_s20 + $0x3] ss:$0 sm:$0xff]  ;;  %v480_v41 = vld [vmem:[%s195_s20] ss:$0 sm:$0xff]  ;;  %v485_v43 = vld [vmem:[%s200_s23 + $0x1] ss:$0 sm:$0xff] }
  0x12   : > { %v216_v8 = vsel %vm215_vm0, %v211_v3, 0.0  ;;  %v222_v9 = vsel %vm215_vm0, %v213_v4, 0.0  ;;  %v219_v10 = vsel %vm215_vm0, %v212_v5, 0.0  ;;  %v484_v42 = vld [vmem:[%s200_s23] ss:$0 sm:$0xff] }
  0x13   : > { %217 = vadd.xlane.f32.xlu0 %v216_v8  ;;  %223 = vadd.xlane.f32.xlu1 %v222_v9  ;;  %v225_v11 = vsel %vm215_vm0, %v214_v7, 0.0  ;;  %v486_v44 = vld [vmem:[%s200_s23 + $0x2] ss:$0 sm:$0xff]  ;;  %v487_v48 = vld [vmem:[%s200_s23 + $0x3] ss:$0 sm:$0xff] }
  0x17   : > { %220 = vadd.xlane.f32.xlu0 %v219_v10  ;;  %226 = vadd.xlane.f32.xlu1 %v225_v11 }
  0xa0   : > { %v218_v13 = vpop.xlane.xlu0 %217  ;;  %v224_v14 = vpop.xlane.xlu1 %223 }
  0xa1   : > { %v229_v15 = vmul.f32 0.015625, %v218_v13  ;;  %v231_v18 = vmul.f32 0.015625, %v224_v14 }
  0xa3   : > { %v234_v21 = vsel %vm233_vm1, %v229_v15, 0.0  ;;  %v237_v24 = vsel %vm233_vm1, %v231_v18, 0.0 }
  0xa4   : > { %v221_v16 = vpop.xlane.xlu0 %220  ;;  %v227_v17 = vpop.xlane.xlu1 %226 }
  0xa5   : > { %v230_v19 = vmul.f32 0.015625, %v221_v16  ;;  %v232_v20 = vmul.f32 0.015625, %v227_v17 }
  0xa7   : > { %v235_v22 = vsel %vm233_vm1, %v230_v19, 0.0  ;;  %v239_v25 = vsel %vm233_vm1, %v232_v20, 0.0 }
  0xa8   : > { %v236_v23 = vadd.f32 %v235_v22, %v234_v21 }
  0xaa   : > { %v238_v26 = vadd.f32 %v237_v24, %v236_v23 }
  0xac   : > { %v240_v27 = vadd.f32 %v239_v25, %v238_v26 }
  0xae   : > { %v242_v28 = vmul.f32 0.25, %v240_v27 }
  0xb0   : > { %v244_v29 = vsub.f32 %v212_v5, %v242_v28  ;;  %v243_v30 = vsub.f32 %v211_v3, %v242_v28  ;;  %v245_v31 = vsub.f32 %v213_v4, %v242_v28  ;;  %v246_v45 = vsub.f32 %v214_v7, %v242_v28 }
  0xb2   : > { %v248_v32 = vmul.f32 %v244_v29, %v244_v29  ;;  %v247_v33 = vmul.f32 %v243_v30, %v243_v30  ;;  %v249_v36 = vmul.f32 %v245_v31, %v245_v31  ;;  %v250_v46 = vmul.f32 %v246_v45, %v246_v45 }
  0xb4   : > { %v254_v34 = vsel %vm215_vm0, %v248_v32, 0.0  ;;  %v251_v35 = vsel %vm215_vm0, %v247_v33, 0.0  ;;  %v257_v37 = vsel %vm215_vm0, %v249_v36, 0.0  ;;  %v260_v47 = vsel %vm215_vm0, %v250_v46, 0.0 }
  0xb5   : > { %255 = vadd.xlane.f32.xlu1 %v254_v34  ;;  %252 = vadd.xlane.f32.xlu0 %v251_v35 }
  0xb9   : > { %258 = vadd.xlane.f32.xlu0 %v257_v37 }
  0xc6   : > { %310 = vperm.xlu1 %504, %v481_v38  }
  0xca   : > { %314 = vperm.xlu1 %504, %v482_v39  }
  0xce   : > { %318 = vperm.xlu1 %504, %v483_v40  }
  0xcf   : > { %306 = vperm.xlu0 %503, %v480_v41  }
  0xd2   : > { %350 = vperm.xlu1 %504, %v484_v42  }
  0xd6   : > { %354 = vperm.xlu1 %504, %v485_v43  }
  0xda   : > { %358 = vperm.xlu1 %504, %v486_v44  }
  0xfe   : > { %261 = vadd.xlane.f32.xlu1 %v260_v47 }
 0x10f   : > { %362 = vperm.xlu1 %504, %v487_v48  }
 0x142   : > { %v256_v49 = vpop.xlane.xlu1 %255  ;;  %v253_v54 = vpop.xlane.xlu0 %252 }
 0x143   : > { %v264_v57 = vmul.f32 0.015625, %v256_v49  ;;  %v263_v58 = vmul.f32 0.015625, %v253_v54 }
 0x145   : > { %v268_v61 = vsel %vm233_vm1, %v264_v57, 0.0  ;;  %v267_v62 = vsel %vm233_vm1, %v263_v58, 0.0 }
 0x146   : > { %v311_v50 = vpop.permute.xlu1 %310  ;;  %v259_v56 = vpop.xlane.xlu0 %258  ;;  %v269_v0 = vadd.f32 %v268_v61, %v267_v62 }
 0x147   : > { %v265_v59 = vmul.f32 0.015625, %v259_v56 }
 0x149   : > { %v270_v63 = vsel %vm233_vm1, %v265_v59, 0.0 }
 0x14a   : > { %v315_v51 = vpop.permute.xlu1 %314  ;;  %v271_v3 = vadd.f32 %v270_v63, %v269_v0 }
 0x14e   : > { %v319_v52 = vpop.permute.xlu1 %318  ;;  %v307_v9 = vpop.permute.xlu0 %306 }
 0x152   : > { %v351_v53 = vpop.permute.xlu1 %350 }
 0x156   : > { %v355_v55 = vpop.permute.xlu1 %354 }
 0x15a   : > { %v359_v60 = vpop.permute.xlu1 %358 }
 0x18b   : > { %v262_v1 = vpop.xlane.xlu1 %261 }
 0x18c   : > { %v266_v2 = vmul.f32 0.015625, %v262_v1 }
 0x18e   : > { %v272_v4 = vsel %vm233_vm1, %v266_v2, 0.0 }
 0x18f   : > { %v273_v5 = vadd.f32 %v272_v4, %v271_v3  ;;  %v363_v18 = vpop.permute.xlu1 %362 }
 0x191   : > { %v274_v6 = vmul.f32 0.25, %v273_v5 }
 0x193   : > { %v275_v7 = vadd.f32 1e-05, %v274_v6 }
 0x195   : > { %505 = vrsqrt.f32 %v275_v7 }
 0x19f   : > { %v506_v8 = vpop.eup %505 }
 0x1a0   : > { %v278_v10 = vmul.f32 %v506_v8, %v244_v29  ;;  %v279_v11 = vmul.f32 %v506_v8, %v245_v31  ;;  %v280_v12 = vmul.f32 %v506_v8, %v246_v45  ;;  %v277_v13 = vmul.f32 %v506_v8, %v243_v30 }
 0x1a2   : > { %v322_v14 = vmul.f32 %v311_v50, %v278_v10  ;;  %v323_v15 = vmul.f32 %v315_v51, %v279_v11  ;;  %v324_v16 = vmul.f32 %v319_v52, %v280_v12  ;;  %v321_v17 = vmul.f32 %v307_v9, %v277_v13 }
 0x1a4   : > { %v366_v19 = vadd.f32 %v355_v55, %v322_v14  ;;  %v367_v20 = vadd.f32 %v359_v60, %v323_v15  ;;  %v368_v21 = vadd.f32 %v363_v18, %v324_v16  ;;  %v365_v22 = vadd.f32 %v351_v53, %v321_v17 }
 0x1a6   : > { %v489_v23 = vmul.f32 -1.442695, %v366_v19  ;;  %v490_v24 = vmul.f32 -1.442695, %v367_v20  ;;  %v491_v25 = vmul.f32 -1.442695, %v368_v21 }
 0x1a7   : > { %v488_v26 = vmul.f32 -1.442695, %v365_v22 }
 0x1a8   : > { %507 = vpow2.f32 %v489_v23 }
 0x1a9   : > { %509 = vpow2.f32 %v490_v24 }
 0x1aa   : > { %511 = vpow2.f32 %v491_v25 }
 0x1ab   : > { %513 = vpow2.f32 %v488_v26 }
 0x1b2   : > { %v508_v27 = vpop.eup %507 }
 0x1b3   : > { %v510_v28 = vpop.eup %509  ;;  %v382_v29 = vadd.f32 1.0, %v508_v27 }
 0x1b4   : > { %v512_v30 = vpop.eup %511  ;;  %v383_v31 = vadd.f32 1.0, %v510_v28 }
 0x1b5   : > { %v514_v32 = vpop.eup %513  ;;  %v384_v33 = vadd.f32 1.0, %v512_v30  ;;  %515 = vrcp.f32 %v382_v29 }
 0x1b6   : > { %517 = vrcp.f32 %v383_v31  ;;  %v381_v34 = vadd.f32 1.0, %v514_v32 }
 0x1b7   : > { %519 = vrcp.f32 %v384_v33 }
 0x1b8   : > { %521 = vrcp.f32 %v381_v34 }
 0x1bf   : > { %v516_v35 = vpop.eup %515 }
 0x1c0   : > { %v518_v36 = vpop.eup %517  ;;  %v394_v37 = vmul.f32 %v516_v35, %v366_v19 }
 0x1c1   : > { %v520_v38 = vpop.eup %519  ;;  %v395_v39 = vmul.f32 %v518_v36, %v367_v20 }
 0x1c2   : > { %v522_v40 = vpop.eup %521  ;;  %v396_v41 = vmul.f32 %v520_v38, %v368_v21  ;;  %v398_v42 = vpack.c.bf16 %v394_v37, %v394_v37 }
 0x1c3   : > { %v399_v43 = vpack.c.bf16 %v395_v39, %v395_v39  ;;  %v393_v44 = vmul.f32 %v522_v40, %v365_v22 }
 0x1c4   : > { %v400_v45 = vpack.c.bf16 %v396_v41, %v396_v41  ;;  %403 = vst.msk [vmem:[%s205_s26 + $0x1] sm:$0x1] %vm401_vm2, %v398_v42 }
 0x1c5   : > { %404 = vst.msk [vmem:[%s205_s26 + $0x2] sm:$0x1] %vm401_vm2, %v399_v43  ;;  %v397_v46 = vpack.c.bf16 %v393_v44, %v393_v44 }
 0x1c6   : > { %405 = vst.msk [vmem:[%s205_s26 + $0x3] sm:$0x1] %vm401_vm2, %v400_v45 }
 0x1c7   : > { %402 = vst.msk [vmem:[%s205_s26] sm:$0x1] %vm401_vm2, %v397_v46 }
 0x1c8 PF: > { %s13_s12 = sadd.s32 1, %s529_s12  }
 0x1c9   : > { %p10_p4 = scmp.ge.s32.totalorder %s13_s12, 6  }
 0x1cb   :  { %12 = sbr.rel (!%p10_p4) target bundleno = 1 (0x1), region = 68 }

// kernel: _lambda_.35
= control target key start
LH: loop header
LB: loop body
LE: loop exit
PB: predicated region body
PF: predicated region fallthrough
CT: control target
= control target key end

     0   :  { %v259_v0 = vmov 0   ;;  %vm123_vm0 = vcmask 130048   ;;  %s331_s1 = inlined_call_operand.vmem [shape: bf16[144,128], index: 1, kind: input, shape index: {}]   ;;  %s332_s0 = inlined_call_operand.vmem [shape: bf16[24,144], index: 0, kind: input, shape index: {}]   ;;  %s333_s2 = inlined_call_operand.vmem [shape: f32[24,1], index: 2, kind: input, shape index: {}]   ;;  %s334_s3 = inlined_call_operand.vmem [shape: bf16[24,128], index: 3, kind: output, shape index: {}]  }
   0x1   :  { %130 = vmatprep.subr.bf16.mxu0 %v259_v0  ;;  %224 = vmatprep.subr.bf16.mxu1 %v259_v0  ;;  %v245_v1 = vld [vmem:[%s331_s1] sm:$0xff]   ;;  %v246_v2 = vld [vmem:[%s331_s1 + $0x8] sm:$0xff]   ;;  %v247_v3 = vld [vmem:[%s331_s1 + $0x10] sm:$0xff]  }
   0x2   :  { %243 = vset.pattern.permute.xlu0 %v259_v0  ;;  %244 = vset.pattern.permute.xlu1 %v259_v0  ;;  %v248_v4 = vld [vmem:[%s331_s1 + $0x18] sm:$0xff]   ;;  %v256_v5 = vld [vmem:[%s332_s0 + $0x4] ss:$8 sps:$4 sm:$0xff]   ;;  %v17_v6 = vld [vmem:[%s332_s0 + $0x10] sm:$0xff] }
   0x3   :  { %131 = vmatpush1.bf16.msra.mxu0 %v245_v1  ;;  %233 = vmatpush1.bf16.msra.mxu1 %v245_v1  ;;  %v36_v7 = vld [vmem:[%s333_s2] sm:$0xff]  ;;  %v201_v8 = vcombine.high %v17_v6, %v17_v6  ;;  %v38_v9 = vld [vmem:[%s333_s2 + $0x10] sm:$0xff]  ;;  %v37_v10 = vld [vmem:[%s333_s2 + $0x8] sm:$0xff]  ;;  %v200_v17 = vcombine.low %v17_v6, %v17_v6 }
   0x4   :  { %132 = vmatprep.subr.bf16.mxu0 %v259_v0  ;;  %225 = vmatprep.subr.bf16.mxu1 %v259_v0  ;;  %v249_v11 = vld [vmem:[%s331_s1 + $0x20] sm:$0xff]   ;;  %v250_v12 = vld [vmem:[%s331_s1 + $0x28] sm:$0xff]   ;;  %v251_v13 = vld [vmem:[%s331_s1 + $0x30] sm:$0xff]  }
   0x5   :  { %211 = vmatprep.mubr.msk.bf16.mxu0 %vm123_vm0, %v256_v5  ;;  %41 = vperm.xlu0 %243, %v36_v7   ;;  %v252_v14 = vld [vmem:[%s331_s1 + $0x38] sm:$0xff]   ;;  %v253_v15 = vld [vmem:[%s331_s1 + $0x40] sm:$0xff]  }
   0x6   :  { %212 = vmatprep.mubr.msk.bf16.mxu1 %vm123_vm0, %v201_v8  ;;  %51 = vperm.xlu1 %244, %v38_v9   ;;  %v254_v16 = vld [vmem:[%s332_s0] ss:$8 sps:$4 sm:$0xff]  }
   0x7   :  { %133 = vmatpush1.bf16.msra.mxu0 %v246_v2  ;;  %234 = vmatpush1.bf16.msra.mxu1 %v246_v2 }
   0x8   :  { %134 = vmatprep.subr.bf16.mxu0 %v259_v0  ;;  %226 = vmatprep.subr.bf16.mxu1 %v259_v0 }
   0x9   :  { %46 = vperm.xlu0 %243, %v37_v10  }
   0xb   :  { %135 = vmatpush1.bf16.msra.mxu0 %v247_v3  ;;  %235 = vmatpush1.bf16.msra.mxu1 %v247_v3 }
   0xc   :  { %136 = vmatprep.subr.bf16.mxu0 %v259_v0  ;;  %227 = vmatprep.subr.bf16.mxu1 %v259_v0 }
   0xf   :  { %137 = vmatpush1.bf16.msra.mxu0 %v248_v4  ;;  %236 = vmatpush1.bf16.msra.mxu1 %v248_v4 }
  0x10   :  { %138 = vmatprep.subr.bf16.mxu0 %v259_v0  ;;  %228 = vmatprep.subr.bf16.mxu1 %v259_v0 }
  0x13   :  { %139 = vmatpush1.bf16.msra.mxu0 %v249_v11  ;;  %237 = vmatpush1.bf16.msra.mxu1 %v249_v11 }
  0x14   :  { %140 = vmatprep.subr.bf16.mxu0 %v259_v0  ;;  %229 = vmatprep.subr.bf16.mxu1 %v259_v0 }
  0x17   :  { %141 = vmatpush1.bf16.msra.mxu0 %v250_v12  ;;  %238 = vmatpush1.bf16.msra.mxu1 %v250_v12 }
  0x18   :  { %142 = vmatprep.subr.bf16.mxu0 %v259_v0  ;;  %230 = vmatprep.subr.bf16.mxu1 %v259_v0 }
  0x1b   :  { %143 = vmatpush1.bf16.msra.mxu0 %v251_v13  ;;  %239 = vmatpush1.bf16.msra.mxu1 %v251_v13 }
  0x1c   :  { %144 = vmatprep.subr.bf16.mxu0 %v259_v0  ;;  %231 = vmatprep.subr.bf16.mxu1 %v259_v0 }
  0x1f   :  { %145 = vmatpush1.bf16.msra.mxu0 %v252_v14  ;;  %240 = vmatpush1.bf16.msra.mxu1 %v252_v14 }
  0x20   :  { %146 = vmatprep.subr.bf16.mxu0 %v259_v0  ;;  %232 = vmatprep.subr.bf16.mxu1 %v259_v0 }
  0x23   :  { %147 = vmatpush1.bf16.msra.mxu0 %v253_v15  ;;  %241 = vmatpush1.bf16.msra.mxu1 %v253_v15 }
  0x26   :  { %163 = vmatmul.mubr.bf16.vlgmr.msra.gmra.mrb[0].mxu0 %v254_v16  ;;  %171 = vmatmul.mubr.bf16.vlgmr.msra.gmra.mrb[0].mxu1 %v200_v17 }
  0x84   :  { %v42_v18 = vpop.permute.xlu0 %41 }
  0x85   :  { %v52_v19 = vpop.permute.xlu1 %51 }
  0x88   :  { %v47_v20 = vpop.permute.xlu0 %46 }
  0xf9   :  { %v164_v21 = vpop.f32.mrb[0].mxu0  ;;  %v172_v22 = vpop.f32.mrb[0].mxu1 }
  0xfa   :  { %v166_v23 = vpop.f32.mrb[1].mxu0  ;;  %v174_v24 = vpop.f32.mrb[1].mxu1  ;;  %v173_v25 = vadd.f32 %v172_v22, %v52_v19  ;;  %v165_v28 = vadd.f32 %v164_v21, %v42_v18 }
  0xfb   :  { %v167_v26 = vpop.f32.mrb[2].mxu0  ;;  %v175_v27 = vpop.f32.mrb[2].mxu1 }
  0xfc   :  { %v218_v29 = vpack.c.bf16 %v173_v25, %v173_v25  ;;  %v168_v30 = vadd.f32 %v167_v26, %v47_v20  ;;  %v169_v31 = vpop.f32.mrb[3].mxu0  ;;  %v176_v32 = vpop.f32.mrb[3].mxu1 }
  0xfe   :  { %193 = vst [vmem:[%s334_s3 + $0x8] sm:$0xf] %v218_v29  ;;  %v222_v33 = vpack.c.bf16 %v168_v30, %v165_v28 }
 0x100   :  { %223 = vst [vmem:[%s334_s3] sm:$0xff] %v222_v33  }

// kernel: _lambda_.36
= control target key start
LH: loop header
LB: loop body
LE: loop exit
PB: predicated region body
PF: predicated region fallthrough
CT: control target
= control target key end

     0   :  { %s658_s12 = smov 0   ;;  %s789_s0 = inlined_call_operand.vmem [shape: bf16[24,2,64], index: 0, kind: input, shape index: {}]   ;;  %s790_s1 = inlined_call_operand.vmem [shape: f32[24,1,1], index: 1, kind: input, shape index: {}]   ;;  %s791_s2 = inlined_call_operand.vmem [shape: f32[24,1,1], index: 2, kind: input, shape index: {}]   ;;  %s792_s3 = inlined_call_operand.vmem [shape: bf16[24,2,64], index: 3, kind: output, shape index: {}]  }
   0x1 LB: > { %s567_s13 = sadd.s32 4294967295, %s635_s12   ;;  %p571_p0 = scmp.ge.s32.totalorder %s635_s12, 1  ;;  %s635_s12 = sphi %s658_s12, %s13_s12  }
   0x2   : > { %p157_p1 = scmp.lt.s32.totalorder %s635_s12, 5 }
   0x4   : > { %p158_p2 = pnand %p571_p0, %p157_p1 }
   0x5   : > { %s187_s14 = smul.u32 (!%p158_p2), 6, %s567_s13  ;;  %v637_v0 = vmov (!%p158_p2), 0   ;;  %vm219_vm0 = vcmask (!%p158_p2), 517120   ;;  %vm245_vm1 = vcmask (!%p158_p2), 1041408   ;;  %vm495_vm2 = vcmask (!%p158_p2), 516096  }
   0x6   : > { %161 = sbr.rel (%p158_p2) target bundleno = 399 (0x18f), region = 32  ;;  %602 = vset.pattern.permute.xlu1 (!%p158_p2), %v637_v0  ;;  %601 = vset.pattern.permute.xlu0 (!%p158_p2), %v637_v0 }
   0x7   : > { %p188_p3 = scmp.lt.s32.totalorder (!%p158_p2), %s187_s14, 23 }
   0xd   : > { %s794_s14 = smov (!%p188_p3, %s187_s14), 23 }
   0xe   : > { %s190_s17 = scalar_lea.vmem %s789_s0, %s794_s14  ;;  %s195_s20 = scalar_lea.vmem %s790_s1, %s794_s14 }
   0xf   : > { %v672_v1 = vld [vmem:[%s190_s17] sm:$0x1]  ;;  %v674_v2 = vld [vmem:[%s190_s17 + $0x2] sm:$0x1]  ;;  %v676_v3 = vld [vmem:[%s190_s17 + $0x1] sm:$0x1]  ;;  %s712_s23 = scalar_lea.vmem %s791_s2, %s794_s14  ;;  %s205_s26 = scalar_lea.vmem %s792_s3, %s794_s14 }
  0x10   : > { %v213_v4 = vunpack.c.l.bf16 %v672_v1  ;;  %v215_v5 = vunpack.c.l.bf16 %v674_v2  ;;  %v214_v6 = vunpack.c.l.bf16 %v676_v3  ;;  %v681_v7 = vld [vmem:[%s190_s17 + $0x3] sm:$0x1]  ;;  %v684_v9 = vld [vmem:[%s190_s17 + $0x4] sm:$0x1]  ;;  %v686_v10 = vld [vmem:[%s190_s17 + $0x5] sm:$0x1] }
  0x11   : > { %v216_v8 = vunpack.c.l.bf16 %v681_v7  ;;  %v217_v15 = vunpack.c.l.bf16 %v684_v9  ;;  %v218_v16 = vunpack.c.l.bf16 %v686_v10  ;;  %v573_v19 = vld [vmem:[%s195_s20 + $0x1] ss:$0 sm:$0xff]  ;;  %v574_v20 = vld [vmem:[%s195_s20 + $0x2] ss:$0 sm:$0xff]  ;;  %v572_v21 = vld [vmem:[%s195_s20] ss:$0 sm:$0xff] }
  0x12   : > { %v220_v11 = vsel %vm219_vm0, %v213_v4, 0.0  ;;  %v226_v12 = vsel %vm219_vm0, %v215_v5, 0.0  ;;  %v223_v13 = vsel %vm219_vm0, %v214_v6, 0.0  ;;  %v575_v22 = vld [vmem:[%s195_s20 + $0x3] ss:$0 sm:$0xff] }
  0x13   : > { %221 = vadd.xlane.f32.xlu0 %v220_v11  ;;  %227 = vadd.xlane.f32.xlu1 %v226_v12  ;;  %v229_v14 = vsel %vm219_vm0, %v216_v8, 0.0  ;;  %v232_v17 = vsel %vm219_vm0, %v217_v15, 0.0  ;;  %v235_v18 = vsel %vm219_vm0, %v218_v16, 0.0  ;;  %v576_v23 = vld [vmem:[%s195_s20 + $0x4] ss:$0 sm:$0xff] }
  0x14   : > { %v577_v24 = vld [vmem:[%s195_s20 + $0x5] ss:$0 sm:$0xff]  ;;  %v578_v25 = vld [vmem:[%s712_s23] ss:$0 sm:$0xff]  ;;  %v579_v26 = vld [vmem:[%s712_s23 + $0x1] ss:$0 sm:$0xff] }
  0x15   : > { %v580_v27 = vld [vmem:[%s712_s23 + $0x2] ss:$0 sm:$0xff]  ;;  %v581_v7 = vld [vmem:[%s712_s23 + $0x3] ss:$0 sm:$0xff] }
  0x17   : > { %224 = vadd.xlane.f32.xlu0 %v223_v13  ;;  %230 = vadd.xlane.f32.xlu1 %v229_v14 }
  0x1b   : > { %233 = vadd.xlane.f32.xlu0 %v232_v17  ;;  %236 = vadd.xlane.f32.xlu1 %v235_v18 }
  0x2c   : > { %356 = vperm.xlu1 %602, %v573_v19  }
  0x30   : > { %360 = vperm.xlu1 %602, %v574_v20  }
  0x31   : > { %352 = vperm.xlu0 %601, %v572_v21  }
  0x34   : > { %364 = vperm.xlu1 %602, %v575_v22  }
  0x38   : > { %368 = vperm.xlu1 %602, %v576_v23  }
  0x3c   : > { %372 = vperm.xlu1 %602, %v577_v24  }
  0x40   : > { %418 = vperm.xlu1 %602, %v578_v25  }
  0x44   : > { %422 = vperm.xlu1 %602, %v579_v26  }
  0x48   : > { %426 = vperm.xlu1 %602, %v580_v27  }
  0xa0   : > { %v222_v28 = vpop.xlane.xlu0 %221  ;;  %v228_v29 = vpop.xlane.xlu1 %227 }
  0xa1   : > { %v239_v30 = vmul.f32 0.015625, %v222_v28  ;;  %v241_v33 = vmul.f32 0.015625, %v228_v29 }
  0xa3   : > { %v246_v36 = vsel %vm245_vm1, %v239_v30, 0.0  ;;  %v249_v41 = vsel %vm245_vm1, %v241_v33, 0.0 }
  0xa4   : > { %v225_v31 = vpop.xlane.xlu0 %224  ;;  %v231_v32 = vpop.xlane.xlu1 %230 }
  0xa5   : > { %v240_v34 = vmul.f32 0.015625, %v225_v31  ;;  %v242_v35 = vmul.f32 0.015625, %v231_v32 }
  0xa7   : > { %v247_v37 = vsel %vm245_vm1, %v240_v34, 0.0  ;;  %v251_v42 = vsel %vm245_vm1, %v242_v35, 0.0 }
  0xa8   : > { %v248_v38 = vadd.f32 %v247_v37, %v246_v36  ;;  %v234_v39 = vpop.xlane.xlu0 %233  ;;  %v237_v40 = vpop.xlane.xlu1 %236 }
  0xa9   : > { %v243_v43 = vmul.f32 0.015625, %v234_v39  ;;  %v244_v44 = vmul.f32 0.015625, %v237_v40 }
  0xaa   : > { %v250_v45 = vadd.f32 %v249_v41, %v248_v38 }
  0xab   : > { %v253_v46 = vsel %vm245_vm1, %v243_v43, 0.0  ;;  %v255_v48 = vsel %vm245_vm1, %v244_v44, 0.0 }
  0xac   : > { %v252_v47 = vadd.f32 %v251_v42, %v250_v45  ;;  %v357_v9 = vpop.permute.xlu1 %356 }
  0xae   : > { %v254_v49 = vadd.f32 %v253_v46, %v252_v47 }
  0xb0   : > { %v256_v50 = vadd.f32 %v255_v48, %v254_v49  ;;  %v361_v10 = vpop.permute.xlu1 %360  ;;  %v353_v17 = vpop.permute.xlu0 %352 }
  0xb2   : > { %v258_v51 = vmul.f32 0.16666667, %v256_v50 }
  0xb4   : > { %v725_v52 = vsub.f32 %v214_v6, %v258_v51  ;;  %v729_v53 = vsub.f32 %v213_v4, %v258_v51  ;;  %v733_v54 = vsub.f32 %v216_v8, %v258_v51  ;;  %v737_v55 = vsub.f32 %v215_v5, %v258_v51  ;;  %v582_v6 = vld [vmem:[%s712_s23 + $0x4] ss:$0 sm:$0xff]  ;;  %v583_v8 = vld [vmem:[%s712_s23 + $0x5] ss:$0 sm:$0xff]  ;;  %v365_v11 = vpop.permute.xlu1 %364 }
  0xb5   : > { %v743_v58 = vsub.f32 %v218_v16, %v258_v51  ;;  %v745_v59 = vsub.f32 %v217_v15, %v258_v51 }
  0xb6   : > { %v266_v56 = vmul.f32 %v725_v52, %v725_v52  ;;  %v265_v57 = vmul.f32 %v729_v53, %v729_v53  ;;  %v268_v62 = vmul.f32 %v733_v54, %v733_v54  ;;  %v267_v63 = vmul.f32 %v737_v55, %v737_v55 }
  0xb7   : > { %v270_v2 = vmul.f32 %v743_v58, %v743_v58  ;;  %v269_v3 = vmul.f32 %v745_v59, %v745_v59 }
  0xb8   : > { %v274_v60 = vsel %vm219_vm0, %v266_v56, 0.0  ;;  %v271_v61 = vsel %vm219_vm0, %v265_v57, 0.0  ;;  %v280_v0 = vsel %vm219_vm0, %v268_v62, 0.0  ;;  %v277_v1 = vsel %vm219_vm0, %v267_v63, 0.0  ;;  %v369_v12 = vpop.permute.xlu1 %368 }
  0xb9   : > { %275 = vadd.xlane.f32.xlu1 %v274_v60  ;;  %272 = vadd.xlane.f32.xlu0 %v271_v61  ;;  %v286_v4 = vsel %vm219_vm0, %v270_v2, 0.0  ;;  %v283_v5 = vsel %vm219_vm0, %v269_v3, 0.0 }
  0xbc   : > { %v373_v13 = vpop.permute.xlu1 %372 }
  0xbd   : > { %281 = vadd.xlane.f32.xlu1 %v280_v0  ;;  %278 = vadd.xlane.f32.xlu0 %v277_v1 }
  0xc0   : > { %v419_v14 = vpop.permute.xlu1 %418 }
  0xc1   : > { %287 = vadd.xlane.f32.xlu1 %v286_v4  ;;  %284 = vadd.xlane.f32.xlu0 %v283_v5 }
  0xc4   : > { %v423_v15 = vpop.permute.xlu1 %422 }
  0xc8   : > { %v427_v16 = vpop.permute.xlu1 %426 }
  0xd2   : > { %434 = vperm.xlu1 %602, %v582_v6  }
  0xd7   : > { %430 = vperm.xlu0 %601, %v581_v7  }
  0xdb   : > { %438 = vperm.xlu0 %601, %v583_v8  }
 0x146   : > { %v276_v18 = vpop.xlane.xlu1 %275  ;;  %v273_v19 = vpop.xlane.xlu0 %272 }
 0x147   : > { %v290_v20 = vmul.f32 0.015625, %v276_v18  ;;  %v289_v21 = vmul.f32 0.015625, %v273_v19 }
 0x149   : > { %v296_v22 = vsel %vm245_vm1, %v290_v20, 0.0  ;;  %v295_v23 = vsel %vm245_vm1, %v289_v21, 0.0 }
 0x14a   : > { %v282_v24 = vpop.xlane.xlu1 %281  ;;  %v279_v25 = vpop.xlane.xlu0 %278  ;;  %v297_v28 = vadd.f32 %v296_v22, %v295_v23 }
 0x14b   : > { %v292_v26 = vmul.f32 0.015625, %v282_v24  ;;  %v291_v27 = vmul.f32 0.015625, %v279_v25 }
 0x14d   : > { %v298_v29 = vsel %vm245_vm1, %v291_v27, 0.0  ;;  %v300_v33 = vsel %vm245_vm1, %v292_v26, 0.0 }
 0x14e   : > { %v299_v30 = vadd.f32 %v298_v29, %v297_v28  ;;  %v288_v31 = vpop.xlane.xlu1 %287  ;;  %v285_v32 = vpop.xlane.xlu0 %284 }
 0x14f   : > { %v294_v34 = vmul.f32 0.015625, %v288_v31  ;;  %v293_v35 = vmul.f32 0.015625, %v285_v32 }
 0x150   : > { %v301_v36 = vadd.f32 %v300_v33, %v299_v30 }
 0x151   : > { %v302_v37 = vsel %vm245_vm1, %v293_v35, 0.0  ;;  %v304_v39 = vsel %vm245_vm1, %v294_v34, 0.0 }
 0x152   : > { %v303_v38 = vadd.f32 %v302_v37, %v301_v36  ;;  %v435_v61 = vpop.permute.xlu1 %434 }
 0x154   : > { %v305_v40 = vadd.f32 %v304_v39, %v303_v38 }
 0x156   : > { %v306_v41 = vmul.f32 0.16666667, %v305_v40  ;;  %v431_v43 = vpop.permute.xlu0 %430 }
 0x158   : > { %v307_v42 = vadd.f32 1e-05, %v306_v41 }
 0x15a   : > { %603 = vrsqrt.f32 %v307_v42 }
 0x164   : > { %v604_v44 = vpop.eup %603 }
 0x165   : > { %v309_v45 = vmul.f32 %v604_v44, %v729_v53  ;;  %v310_v46 = vmul.f32 %v604_v44, %v725_v52  ;;  %v311_v47 = vmul.f32 %v604_v44, %v737_v55  ;;  %v313_v48 = vmul.f32 %v604_v44, %v745_v59  ;;  %v439_v52 = vpop.permute.xlu0 %438 }
 0x166   : > { %v312_v49 = vmul.f32 %v604_v44, %v733_v54  ;;  %v314_v50 = vmul.f32 %v604_v44, %v743_v58 }
 0x167   : > { %v375_v51 = vmul.f32 %v353_v17, %v309_v45  ;;  %v376_v56 = vmul.f32 %v357_v9, %v310_v46  ;;  %v377_v57 = vmul.f32 %v361_v10, %v311_v47  ;;  %v379_v60 = vmul.f32 %v369_v12, %v313_v48 }
 0x168   : > { %v378_v62 = vmul.f32 %v365_v11, %v312_v49  ;;  %v380_v63 = vmul.f32 %v373_v13, %v314_v50 }
 0x169   : > { %v441_v0 = vadd.f32 %v419_v14, %v375_v51  ;;  %v442_v1 = vadd.f32 %v423_v15, %v376_v56  ;;  %v443_v53 = vadd.f32 %v427_v16, %v377_v57  ;;  %v445_v2 = vadd.f32 %v435_v61, %v379_v60 }
 0x16a   : > { %v444_v3 = vadd.f32 %v431_v43, %v378_v62  ;;  %v446_v55 = vadd.f32 %v439_v52, %v380_v63 }
 0x16b   : > { %v584_v4 = vmul.f32 -1.442695, %v441_v0  ;;  %v585_v59 = vmul.f32 -1.442695, %v442_v1  ;;  %v586_v5 = vmul.f32 -1.442695, %v443_v53 }
 0x16c   : > { %v588_v54 = vmul.f32 -1.442695, %v445_v2  ;;  %v587_v58 = vmul.f32 -1.442695, %v444_v3  ;;  %v589_v6 = vmul.f32 -1.442695, %v446_v55 }
 0x16d   : > { %605 = vpow2.f32 %v584_v4 }
 0x16e   : > { %607 = vpow2.f32 %v585_v59 }
 0x16f   : > { %609 = vpow2.f32 %v586_v5 }
 0x170   : > { %611 = vpow2.f32 %v588_v54 }
 0x171   : > { %613 = vpow2.f32 %v587_v58 }
 0x172   : > { %615 = vpow2.f32 %v589_v6 }
 0x177   : > { %v606_v7 = vpop.eup %605 }
 0x178   : > { %v608_v8 = vpop.eup %607  ;;  %v465_v9 = vadd.f32 1.0, %v606_v7 }
 0x179   : > { %v610_v10 = vpop.eup %609  ;;  %v466_v11 = vadd.f32 1.0, %v608_v8 }
 0x17a   : > { %v612_v12 = vpop.eup %611  ;;  %v467_v13 = vadd.f32 1.0, %v610_v10  ;;  %617 = vrcp.f32 %v465_v9 }
 0x17b   : > { %v614_v14 = vpop.eup %613  ;;  %v469_v15 = vadd.f32 1.0, %v612_v12  ;;  %619 = vrcp.f32 %v466_v11 }
 0x17c   : > { %v616_v16 = vpop.eup %615  ;;  %621 = vrcp.f32 %v467_v13  ;;  %v468_v17 = vadd.f32 1.0, %v614_v14 }
 0x17d   : > { %623 = vrcp.f32 %v469_v15  ;;  %v470_v18 = vadd.f32 1.0, %v616_v16 }
 0x17e   : > { %625 = vrcp.f32 %v468_v17 }
 0x17f   : > { %627 = vrcp.f32 %v470_v18 }
 0x184   : > { %v618_v19 = vpop.eup %617 }
 0x185   : > { %v620_v20 = vpop.eup %619  ;;  %v483_v21 = vmul.f32 %v618_v19, %v441_v0 }
 0x186   : > { %v622_v22 = vpop.eup %621  ;;  %v484_v23 = vmul.f32 %v620_v20, %v442_v1 }
 0x187   : > { %v624_v24 = vpop.eup %623  ;;  %v485_v25 = vmul.f32 %v622_v22, %v443_v53  ;;  %v489_v26 = vpack.c.bf16 %v483_v21, %v483_v21 }
 0x188   : > { %v626_v27 = vpop.eup %625  ;;  %v487_v28 = vmul.f32 %v624_v24, %v445_v2  ;;  %v490_v29 = vpack.c.bf16 %v484_v23, %v484_v23 }
 0x189   : > { %v628_v30 = vpop.eup %627  ;;  %v491_v31 = vpack.c.bf16 %v485_v25, %v485_v25  ;;  %496 = vst.msk [vmem:[%s205_s26] sm:$0x1] %vm495_vm2, %v489_v26  ;;  %v486_v32 = vmul.f32 %v626_v27, %v444_v3 }
 0x18a   : > { %v493_v33 = vpack.c.bf16 %v487_v28, %v487_v28  ;;  %497 = vst.msk [vmem:[%s205_s26 + $0x1] sm:$0x1] %vm495_vm2, %v490_v29  ;;  %v488_v34 = vmul.f32 %v628_v30, %v446_v55 }
 0x18b   : > { %498 = vst.msk [vmem:[%s205_s26 + $0x2] sm:$0x1] %vm495_vm2, %v491_v31  ;;  %v492_v35 = vpack.c.bf16 %v486_v32, %v486_v32 }
 0x18c   : > { %500 = vst.msk [vmem:[%s205_s26 + $0x4] sm:$0x1] %vm495_vm2, %v493_v33  ;;  %v494_v36 = vpack.c.bf16 %v488_v34, %v488_v34 }
 0x18d   : > { %499 = vst.msk [vmem:[%s205_s26 + $0x3] sm:$0x1] %vm495_vm2, %v492_v35 }
 0x18e   : > { %501 = vst.msk [vmem:[%s205_s26 + $0x5] sm:$0x1] %vm495_vm2, %v494_v36 }
 0x18f PF: > { %s13_s12 = sadd.s32 1, %s635_s12  }
 0x190   : > { %p10_p4 = scmp.ge.s32.totalorder %s13_s12, 6  }
 0x192   :  { %12 = sbr.rel (!%p10_p4) target bundleno = 1 (0x1), region = 68 }

// kernel: _lambda_.37
= control target key start
LH: loop header
LB: loop body
LE: loop exit
PB: predicated region body
PF: predicated region fallthrough
CT: control target
= control target key end

     0   :  { %vm52_vm0 = vcmask 130048   ;;  %v158_v1 = vmov 0   ;;  %s203_s1 = inlined_call_operand.vmem [shape: bf16[16,128], index: 1, kind: input, shape index: {}]   ;;  %s204_s0 = inlined_call_operand.vmem [shape: bf16[24,16], index: 0, kind: input, shape index: {}]   ;;  %s205_s2 = inlined_call_operand.vmem [shape: f32[24,1], index: 2, kind: input, shape index: {}]   ;;  %s206_s3 = inlined_call_operand.vmem [shape: bf16[24,128], index: 3, kind: output, shape index: {}]  }
   0x1   :  { %v155_v0 = vld [vmem:[%s203_s1] sm:$0xff]   ;;  %153 = vset.pattern.permute.xlu0 %v158_v1  ;;  %154 = vset.pattern.permute.xlu1 %v158_v1  ;;  %v157_v3 = vld [vmem:[%s204_s0 + $0x8] ss:$0 sps:$4 sm:$0xff]   ;;  %v22_v5 = vld [vmem:[%s205_s2 + $0x10] sm:$0xff] }
   0x2   :  { %146 = vmatprep.subr.bf16.mxu0 %v155_v0  ;;  %v156_v2 = vld [vmem:[%s204_s0] sm:$0xff]   ;;  %v21_v6 = vld [vmem:[%s205_s2 + $0x8] sm:$0xff]  ;;  %35 = vperm.xlu1 %154, %v22_v5  }
   0x3   :  { %v20_v4 = vld [vmem:[%s205_s2] sm:$0xff]  ;;  %147 = vmatpush3.bf16.msra.mxu0 %v155_v0  ;;  %148 = vmatprep.mubr.msk.bf16.mxu0 %vm52_vm0, %v156_v2 }
   0x4   :  { %25 = vperm.xlu0 %153, %v20_v4  }
   0x6   :  { %149 = vmatmul.mubr.msk.bf16.vlgmr.msra.gmra.mrb[0].mxu0 %vm52_vm0, %v157_v3 }
   0x8   :  { %30 = vperm.xlu0 %153, %v21_v6  }
  0x81   :  { %v36_v8 = vpop.permute.xlu1 %35 }
  0x83   :  { %v26_v7 = vpop.permute.xlu0 %25 }
  0x87   :  { %v31_v13 = vpop.permute.xlu0 %30 }
  0xd9   :  { %v150_v9 = vpop.f32.mrb[0].mxu0 }
  0xda   :  { %v102_v10 = vadd.f32 %v150_v9, %v36_v8  ;;  %v93_v11 = vpop.f32.mrb[1].mxu0 }
  0xdb   :  { %v151_v12 = vpop.f32.mrb[2].mxu0  ;;  %v94_v16 = vadd.f32 %v93_v11, %v26_v7 }
  0xdc   :  { %v137_v14 = vpack.c.bf16 %v102_v10, %v102_v10  ;;  %v96_v15 = vpop.f32.mrb[3].mxu0 }
  0xdd   :  { %v97_v17 = vadd.f32 %v96_v15, %v31_v13 }
  0xde   :  { %122 = vst [vmem:[%s206_s3 + $0x8] sm:$0xf] %v137_v14 }
  0xdf   :  { %v141_v18 = vpack.c.bf16 %v97_v17, %v94_v16 }
  0xe1   :  { %142 = vst [vmem:[%s206_s3] sm:$0xff] %v141_v18  }

// kernel: _lambda_.38
= control target key start
LH: loop header
LB: loop body
LE: loop exit
PB: predicated region body
PF: predicated region fallthrough
CT: control target
= control target key end

     0   :  { %v335_v0 = vmov 0   ;;  %vm166_vm0 = vcmask 785408   ;;  %s465_s1 = inlined_call_operand.vmem [shape: bf16[224,128], index: 1, kind: input, shape index: {}]   ;;  %s466_s0 = inlined_call_operand.vmem [shape: bf16[24,224], index: 0, kind: input, shape index: {}]   ;;  %s467_s2 = inlined_call_operand.vmem [shape: f32[24,1], index: 2, kind: input, shape index: {}]   ;;  %s468_s3 = inlined_call_operand.vmem [shape: bf16[24,128], index: 3, kind: input, shape index: {}]   ;;  %s469_s4 = inlined_call_operand.vmem [shape: bf16[24,128], index: 4, kind: output, shape index: {}]  }
   0x1   :  { %173 = vmatprep.subr.bf16.mxu0 %v335_v0  ;;  %285 = vmatprep.subr.bf16.mxu1 %v335_v0  ;;  %v316_v1 = vld [vmem:[%s465_s1] sm:$0xff]   ;;  %v317_v2 = vld [vmem:[%s465_s1 + $0x8] sm:$0xff]   ;;  %v318_v3 = vld [vmem:[%s465_s1 + $0x10] sm:$0xff]  }
   0x2   :  { %314 = vset.pattern.permute.xlu0 %v335_v0  ;;  %315 = vset.pattern.permute.xlu1 %v335_v0  ;;  %v319_v4 = vld [vmem:[%s465_s1 + $0x18] sm:$0xff]   ;;  %v320_v5 = vld [vmem:[%s465_s1 + $0x20] sm:$0xff]   ;;  %v20_v7 = vld [vmem:[%s466_s0 + $0x10] sm:$0xff] }
   0x3   :  { %174 = vmatpush1.bf16.msra.mxu0 %v316_v1  ;;  %299 = vmatpush1.bf16.msra.mxu1 %v316_v1  ;;  %v332_v6 = vld [vmem:[%s466_s0 + $0x4] ss:$8 sps:$4 sm:$0xff]   ;;  %v253_v9 = vcombine.high %v20_v7, %v20_v7  ;;  %v51_v10 = vld [vmem:[%s467_s2 + $0x10] sm:$0xff]  ;;  %v323_v14 = vld [vmem:[%s465_s1 + $0x38] sm:$0xff]   ;;  %v252_v22 = vcombine.low %v20_v7, %v20_v7 }
   0x4   :  { %175 = vmatprep.subr.bf16.mxu0 %v335_v0  ;;  %286 = vmatprep.subr.bf16.mxu1 %v335_v0  ;;  %v49_v8 = vld [vmem:[%s467_s2] sm:$0xff]  ;;  %v50_v11 = vld [vmem:[%s467_s2 + $0x8] sm:$0xff]  ;;  %v322_v13 = vld [vmem:[%s465_s1 + $0x30] sm:$0xff]  }
   0x5   :  { %54 = vperm.xlu0 %314, %v49_v8   ;;  %268 = vmatprep.mubr.msk.bf16.mxu0 %vm166_vm0, %v332_v6  ;;  %v321_v12 = vld [vmem:[%s465_s1 + $0x28] sm:$0xff]   ;;  %v324_v15 = vld [vmem:[%s465_s1 + $0x40] sm:$0xff]   ;;  %v326_v17 = vld [vmem:[%s465_s1 + $0x50] sm:$0xff]  }
   0x6   :  { %64 = vperm.xlu1 %315, %v51_v10   ;;  %269 = vmatprep.mubr.msk.bf16.mxu1 %vm166_vm0, %v253_v9  ;;  %v325_v16 = vld [vmem:[%s465_s1 + $0x48] sm:$0xff]   ;;  %v327_v18 = vld [vmem:[%s465_s1 + $0x58] sm:$0xff]   ;;  %v328_v19 = vld [vmem:[%s465_s1 + $0x60] sm:$0xff]  }
   0x7   :  { %176 = vmatpush1.bf16.msra.mxu0 %v317_v2  ;;  %300 = vmatpush1.bf16.msra.mxu1 %v317_v2  ;;  %v329_v20 = vld [vmem:[%s465_s1 + $0x68] sm:$0xff]   ;;  %v277_v25 = vld [vmem:[%s468_s3] sm:$0xff]  }
   0x8   :  { %177 = vmatprep.subr.bf16.mxu0 %v335_v0  ;;  %287 = vmatprep.subr.bf16.mxu1 %v335_v0  ;;  %v330_v21 = vld [vmem:[%s466_s0] ss:$8 sps:$4 sm:$0xff]   ;;  %v278_v32 = vunpack.c.l.bf16 %v277_v25  ;;  %v279_v36 = vunpack.c.h.bf16 %v277_v25 }
   0x9   :  { %59 = vperm.xlu0 %314, %v50_v11   ;;  %v223_v24 = vld [vmem:[%s468_s3 + $0x8] sm:$0xf] }
   0xa   :  { %v226_v28 = vunpack.c.l.bf16 %v223_v24 }
   0xb   :  { %178 = vmatpush1.bf16.msra.mxu0 %v318_v3  ;;  %301 = vmatpush1.bf16.msra.mxu1 %v318_v3 }
   0xc   :  { %179 = vmatprep.subr.bf16.mxu0 %v335_v0  ;;  %288 = vmatprep.subr.bf16.mxu1 %v335_v0 }
   0xf   :  { %180 = vmatpush1.bf16.msra.mxu0 %v319_v4  ;;  %302 = vmatpush1.bf16.msra.mxu1 %v319_v4 }
  0x10   :  { %181 = vmatprep.subr.bf16.mxu0 %v335_v0  ;;  %289 = vmatprep.subr.bf16.mxu1 %v335_v0 }
  0x13   :  { %182 = vmatpush1.bf16.msra.mxu0 %v320_v5  ;;  %303 = vmatpush1.bf16.msra.mxu1 %v320_v5 }
  0x14   :  { %183 = vmatprep.subr.bf16.mxu0 %v335_v0  ;;  %290 = vmatprep.subr.bf16.mxu1 %v335_v0 }
  0x17   :  { %184 = vmatpush1.bf16.msra.mxu0 %v321_v12  ;;  %304 = vmatpush1.bf16.msra.mxu1 %v321_v12 }
  0x18   :  { %185 = vmatprep.subr.bf16.mxu0 %v335_v0  ;;  %291 = vmatprep.subr.bf16.mxu1 %v335_v0 }
  0x1b   :  { %186 = vmatpush1.bf16.msra.mxu0 %v322_v13  ;;  %305 = vmatpush1.bf16.msra.mxu1 %v322_v13 }
  0x1c   :  { %187 = vmatprep.subr.bf16.mxu0 %v335_v0  ;;  %292 = vmatprep.subr.bf16.mxu1 %v335_v0 }
  0x1f   :  { %188 = vmatpush1.bf16.msra.mxu0 %v323_v14  ;;  %306 = vmatpush1.bf16.msra.mxu1 %v323_v14 }
  0x20   :  { %189 = vmatprep.subr.bf16.mxu0 %v335_v0  ;;  %293 = vmatprep.subr.bf16.mxu1 %v335_v0 }
  0x23   :  { %190 = vmatpush1.bf16.msra.mxu0 %v324_v15  ;;  %307 = vmatpush1.bf16.msra.mxu1 %v324_v15 }
  0x24   :  { %191 = vmatprep.subr.bf16.mxu0 %v335_v0  ;;  %294 = vmatprep.subr.bf16.mxu1 %v335_v0 }
  0x27   :  { %192 = vmatpush1.bf16.msra.mxu0 %v325_v16  ;;  %308 = vmatpush1.bf16.msra.mxu1 %v325_v16 }
  0x28   :  { %193 = vmatprep.subr.bf16.mxu0 %v335_v0  ;;  %295 = vmatprep.subr.bf16.mxu1 %v335_v0 }
  0x2b   :  { %194 = vmatpush1.bf16.msra.mxu0 %v326_v17  ;;  %309 = vmatpush1.bf16.msra.mxu1 %v326_v17 }
  0x2c   :  { %195 = vmatprep.subr.bf16.mxu0 %v335_v0  ;;  %296 = vmatprep.subr.bf16.mxu1 %v335_v0 }
  0x2f   :  { %196 = vmatpush1.bf16.msra.mxu0 %v327_v18  ;;  %310 = vmatpush1.bf16.msra.mxu1 %v327_v18 }
  0x30   :  { %197 = vmatprep.subr.bf16.mxu0 %v335_v0  ;;  %297 = vmatprep.subr.bf16.mxu1 %v335_v0 }
  0x33   :  { %198 = vmatpush1.bf16.msra.mxu0 %v328_v19  ;;  %311 = vmatpush1.bf16.msra.mxu1 %v328_v19 }
  0x34   :  { %199 = vmatprep.subr.bf16.mxu0 %v335_v0  ;;  %298 = vmatprep.subr.bf16.mxu1 %v335_v0 }
  0x37   :  { %200 = vmatpush1.bf16.msra.mxu0 %v329_v20  ;;  %312 = vmatpush1.bf16.msra.mxu1 %v329_v20 }
  0x3a   :  { %206 = vmatmul.mubr.bf16.vlgmr.msra.gmra.mrb[0].mxu0 %v330_v21  ;;  %214 = vmatmul.mubr.bf16.vlgmr.msra.gmra.mrb[0].mxu1 %v252_v22 }
  0x84   :  { %v55_v23 = vpop.permute.xlu0 %54 }
  0x85   :  { %v65_v26 = vpop.permute.xlu1 %64 }
  0x88   :  { %v60_v27 = vpop.permute.xlu0 %59 }
 0x10d   :  { %v207_v29 = vpop.f32.mrb[0].mxu0  ;;  %v215_v30 = vpop.f32.mrb[0].mxu1 }
 0x10e   :  { %v208_v31 = vadd.f32 %v207_v29, %v55_v23  ;;  %v209_v33 = vpop.f32.mrb[1].mxu0  ;;  %v217_v34 = vpop.f32.mrb[1].mxu1  ;;  %v216_v35 = vadd.f32 %v215_v30, %v65_v26 }
 0x10f   :  { %v210_v37 = vpop.f32.mrb[2].mxu0  ;;  %v218_v38 = vpop.f32.mrb[2].mxu1 }
 0x110   :  { %v229_v39 = vadd.f32 %v226_v28, %v216_v35  ;;  %v211_v40 = vadd.f32 %v210_v37, %v60_v27  ;;  %v212_v41 = vpop.f32.mrb[3].mxu0  ;;  %v219_v42 = vpop.f32.mrb[3].mxu1  ;;  %v227_v43 = vadd.f32 %v278_v32, %v208_v31 }
 0x112   :  { %v275_v44 = vpack.c.bf16 %v229_v39, %v229_v39  ;;  %v228_v45 = vadd.f32 %v279_v36, %v211_v40 }
 0x114   :  { %245 = vst [vmem:[%s469_s4 + $0x8] sm:$0xf] %v275_v44  ;;  %v283_v46 = vpack.c.bf16 %v228_v45, %v227_v43 }
 0x116   :  { %284 = vst [vmem:[%s469_s4] sm:$0xff] %v283_v46  }

// kernel: _lambda_.39
= control target key start
LH: loop header
LB: loop body
LE: loop exit
PB: predicated region body
PF: predicated region fallthrough
CT: control target
= control target key end

     0   :  { %v315_v0 = vmov 0   ;;  %vm163_vm0 = vcmask 785408   ;;  %vm231_vm1 = vcmask 257024   ;;  %s437_s1 = inlined_call_operand.vmem [shape: bf16[224,32], index: 1, kind: input, shape index: {}]   ;;  %s438_s0 = inlined_call_operand.vmem [shape: bf16[24,224], index: 0, kind: input, shape index: {}]   ;;  %s439_s2 = inlined_call_operand.vmem [shape: f32[24,1], index: 2, kind: input, shape index: {}]   ;;  %s440_s3 = inlined_call_operand.vmem [shape: bf16[24,32], index: 3, kind: output, shape index: {}]  }
   0x1   :  { %170 = vmatprep.subr.bf16.mxu0 %v315_v0  ;;  %265 = vmatprep.subr.bf16.mxu1 %v315_v0  ;;  %v296_v1 = vld [vmem:[%s437_s1] sm:$0xff]   ;;  %v297_v2 = vld [vmem:[%s437_s1 + $0x8] sm:$0xff]   ;;  %v298_v3 = vld [vmem:[%s437_s1 + $0x10] sm:$0xff]  }
   0x2   :  { %294 = vset.pattern.permute.xlu0 %v315_v0  ;;  %295 = vset.pattern.permute.xlu1 %v315_v0  ;;  %v299_v4 = vld [vmem:[%s437_s1 + $0x18] sm:$0xff]   ;;  %v300_v5 = vld [vmem:[%s437_s1 + $0x20] sm:$0xff]   ;;  %v17_v7 = vld [vmem:[%s438_s0 + $0x10] sm:$0xff] }
   0x3   :  { %171 = vmatpush1.bf16.msra.mxu0 %v296_v1  ;;  %279 = vmatpush1.bf16.msra.mxu1 %v296_v1  ;;  %v312_v6 = vld [vmem:[%s438_s0 + $0x4] ss:$8 sps:$4 sm:$0xff]   ;;  %v242_v9 = vcombine.high %v17_v7, %v17_v7  ;;  %v48_v10 = vld [vmem:[%s439_s2 + $0x10] sm:$0xff]  ;;  %v303_v14 = vld [vmem:[%s437_s1 + $0x38] sm:$0xff]   ;;  %v241_v22 = vcombine.low %v17_v7, %v17_v7 }
   0x4   :  { %172 = vmatprep.subr.bf16.mxu0 %v315_v0  ;;  %266 = vmatprep.subr.bf16.mxu1 %v315_v0  ;;  %v46_v8 = vld [vmem:[%s439_s2] sm:$0xff]  ;;  %v47_v11 = vld [vmem:[%s439_s2 + $0x8] sm:$0xff]  ;;  %v302_v13 = vld [vmem:[%s437_s1 + $0x30] sm:$0xff]  }
   0x5   :  { %51 = vperm.xlu0 %294, %v46_v8   ;;  %257 = vmatprep.mubr.msk.bf16.mxu0 %vm163_vm0, %v312_v6  ;;  %v301_v12 = vld [vmem:[%s437_s1 + $0x28] sm:$0xff]   ;;  %v304_v15 = vld [vmem:[%s437_s1 + $0x40] sm:$0xff]   ;;  %v306_v17 = vld [vmem:[%s437_s1 + $0x50] sm:$0xff]  }
   0x6   :  { %61 = vperm.xlu1 %295, %v48_v10   ;;  %258 = vmatprep.mubr.msk.bf16.mxu1 %vm163_vm0, %v242_v9  ;;  %v305_v16 = vld [vmem:[%s437_s1 + $0x48] sm:$0xff]   ;;  %v307_v18 = vld [vmem:[%s437_s1 + $0x58] sm:$0xff]   ;;  %v308_v19 = vld [vmem:[%s437_s1 + $0x60] sm:$0xff]  }
   0x7   :  { %173 = vmatpush1.bf16.msra.mxu0 %v297_v2  ;;  %280 = vmatpush1.bf16.msra.mxu1 %v297_v2  ;;  %v309_v20 = vld [vmem:[%s437_s1 + $0x68] sm:$0xff]  }
   0x8   :  { %174 = vmatprep.subr.bf16.mxu0 %v315_v0  ;;  %267 = vmatprep.subr.bf16.mxu1 %v315_v0  ;;  %v310_v21 = vld [vmem:[%s438_s0] ss:$8 sps:$4 sm:$0xff]  }
   0x9   :  { %56 = vperm.xlu0 %294, %v47_v11  }
   0xb   :  { %175 = vmatpush1.bf16.msra.mxu0 %v298_v3  ;;  %281 = vmatpush1.bf16.msra.mxu1 %v298_v3 }
   0xc   :  { %176 = vmatprep.subr.bf16.mxu0 %v315_v0  ;;  %268 = vmatprep.subr.bf16.mxu1 %v315_v0 }
   0xf   :  { %177 = vmatpush1.bf16.msra.mxu0 %v299_v4  ;;  %282 = vmatpush1.bf16.msra.mxu1 %v299_v4 }
  0x10   :  { %178 = vmatprep.subr.bf16.mxu0 %v315_v0  ;;  %269 = vmatprep.subr.bf16.mxu1 %v315_v0 }
  0x13   :  { %179 = vmatpush1.bf16.msra.mxu0 %v300_v5  ;;  %283 = vmatpush1.bf16.msra.mxu1 %v300_v5 }
  0x14   :  { %180 = vmatprep.subr.bf16.mxu0 %v315_v0  ;;  %270 = vmatprep.subr.bf16.mxu1 %v315_v0 }
  0x17   :  { %181 = vmatpush1.bf16.msra.mxu0 %v301_v12  ;;  %284 = vmatpush1.bf16.msra.mxu1 %v301_v12 }
  0x18   :  { %182 = vmatprep.subr.bf16.mxu0 %v315_v0  ;;  %271 = vmatprep.subr.bf16.mxu1 %v315_v0 }
  0x1b   :  { %183 = vmatpush1.bf16.msra.mxu0 %v302_v13  ;;  %285 = vmatpush1.bf16.msra.mxu1 %v302_v13 }
  0x1c   :  { %184 = vmatprep.subr.bf16.mxu0 %v315_v0  ;;  %272 = vmatprep.subr.bf16.mxu1 %v315_v0 }
  0x1f   :  { %185 = vmatpush1.bf16.msra.mxu0 %v303_v14  ;;  %286 = vmatpush1.bf16.msra.mxu1 %v303_v14 }
  0x20   :  { %186 = vmatprep.subr.bf16.mxu0 %v315_v0  ;;  %273 = vmatprep.subr.bf16.mxu1 %v315_v0 }
  0x23   :  { %187 = vmatpush1.bf16.msra.mxu0 %v304_v15  ;;  %287 = vmatpush1.bf16.msra.mxu1 %v304_v15 }
  0x24   :  { %188 = vmatprep.subr.bf16.mxu0 %v315_v0  ;;  %274 = vmatprep.subr.bf16.mxu1 %v315_v0 }
  0x27   :  { %189 = vmatpush1.bf16.msra.mxu0 %v305_v16  ;;  %288 = vmatpush1.bf16.msra.mxu1 %v305_v16 }
  0x28   :  { %190 = vmatprep.subr.bf16.mxu0 %v315_v0  ;;  %275 = vmatprep.subr.bf16.mxu1 %v315_v0 }
  0x2b   :  { %191 = vmatpush1.bf16.msra.mxu0 %v306_v17  ;;  %289 = vmatpush1.bf16.msra.mxu1 %v306_v17 }
  0x2c   :  { %192 = vmatprep.subr.bf16.mxu0 %v315_v0  ;;  %276 = vmatprep.subr.bf16.mxu1 %v315_v0 }
  0x2f   :  { %193 = vmatpush1.bf16.msra.mxu0 %v307_v18  ;;  %290 = vmatpush1.bf16.msra.mxu1 %v307_v18 }
  0x30   :  { %194 = vmatprep.subr.bf16.mxu0 %v315_v0  ;;  %277 = vmatprep.subr.bf16.mxu1 %v315_v0 }
  0x33   :  { %195 = vmatpush1.bf16.msra.mxu0 %v308_v19  ;;  %291 = vmatpush1.bf16.msra.mxu1 %v308_v19 }
  0x34   :  { %196 = vmatprep.subr.bf16.mxu0 %v315_v0  ;;  %278 = vmatprep.subr.bf16.mxu1 %v315_v0 }
  0x37   :  { %197 = vmatpush1.bf16.msra.mxu0 %v309_v20  ;;  %292 = vmatpush1.bf16.msra.mxu1 %v309_v20 }
  0x3a   :  { %203 = vmatmul.mubr.bf16.vlgmr.msra.gmra.mrb[0].mxu0 %v310_v21  ;;  %211 = vmatmul.mubr.bf16.vlgmr.msra.gmra.mrb[0].mxu1 %v241_v22 }
  0x84   :  { %v52_v23 = vpop.permute.xlu0 %51 }
  0x85   :  { %v62_v24 = vpop.permute.xlu1 %61 }
  0x88   :  { %v57_v25 = vpop.permute.xlu0 %56 }
 0x10d   :  { %v204_v26 = vpop.f32.mrb[0].mxu0  ;;  %v212_v27 = vpop.f32.mrb[0].mxu1 }
 0x10e   :  { %v205_v28 = vadd.f32 %v204_v26, %v52_v23  ;;  %v206_v29 = vpop.f32.mrb[1].mxu0  ;;  %v214_v30 = vpop.f32.mrb[1].mxu1  ;;  %v213_v31 = vadd.f32 %v212_v27, %v62_v24 }
 0x10f   :  { %v207_v32 = vpop.f32.mrb[2].mxu0  ;;  %v215_v33 = vpop.f32.mrb[2].mxu1 }
 0x110   :  { %v262_v34 = vpack.c.bf16 %v205_v28, %v205_v28  ;;  %v264_v35 = vpack.c.bf16 %v213_v31, %v213_v31  ;;  %v208_v36 = vadd.f32 %v207_v32, %v57_v25  ;;  %v209_v37 = vpop.f32.mrb[3].mxu0  ;;  %v216_v38 = vpop.f32.mrb[3].mxu1 }
 0x112   :  { %232 = vst.msk [vmem:[%s440_s3] sm:$0xf] %vm231_vm1, %v262_v34  ;;  %234 = vst.msk [vmem:[%s440_s3 + $0x8] sm:$0xf] %vm231_vm1, %v264_v35  ;;  %v263_v39 = vpack.c.bf16 %v208_v36, %v208_v36 }
 0x114   :  { %233 = vst.msk [vmem:[%s440_s3 + $0x4] sm:$0xf] %vm231_vm1, %v263_v39 }

// kernel: _lambda_.40
= control target key start
LH: loop header
LB: loop body
LE: loop exit
PB: predicated region body
PF: predicated region fallthrough
CT: control target
= control target key end

     0   :  { %s658_s12 = smov 0   ;;  %s789_s0 = inlined_call_operand.vmem [shape: bf16[24,2,16], index: 0, kind: input, shape index: {}]   ;;  %s790_s1 = inlined_call_operand.vmem [shape: f32[24,1,1], index: 1, kind: input, shape index: {}]   ;;  %s791_s2 = inlined_call_operand.vmem [shape: f32[24,1,1], index: 2, kind: input, shape index: {}]   ;;  %s792_s3 = inlined_call_operand.vmem [shape: bf16[24,2,16], index: 3, kind: output, shape index: {}]  }
   0x1 LB: > { %s567_s13 = sadd.s32 4294967295, %s635_s12   ;;  %p571_p0 = scmp.ge.s32.totalorder %s635_s12, 1  ;;  %s635_s12 = sphi %s658_s12, %s13_s12  }
   0x2   : > { %p157_p1 = scmp.lt.s32.totalorder %s635_s12, 5 }
   0x4   : > { %p158_p2 = pnand %p571_p0, %p157_p1 }
   0x5   : > { %s187_s14 = smul.u32 (!%p158_p2), 6, %s567_s13  ;;  %v637_v0 = vmov (!%p158_p2), 0   ;;  %vm219_vm0 = vcmask (!%p158_p2), 123904   ;;  %vm245_vm1 = vcmask (!%p158_p2), 1041408   ;;  %vm495_vm2 = vcmask (!%p158_p2), 122880  }
   0x6   : > { %161 = sbr.rel (%p158_p2) target bundleno = 399 (0x18f), region = 32  ;;  %602 = vset.pattern.permute.xlu1 (!%p158_p2), %v637_v0  ;;  %601 = vset.pattern.permute.xlu0 (!%p158_p2), %v637_v0 }
   0x7   : > { %p188_p3 = scmp.lt.s32.totalorder (!%p158_p2), %s187_s14, 23 }
   0xd   : > { %s794_s14 = smov (!%p188_p3, %s187_s14), 23 }
   0xe   : > { %s190_s17 = scalar_lea.vmem %s789_s0, %s794_s14  ;;  %s195_s20 = scalar_lea.vmem %s790_s1, %s794_s14 }
   0xf   : > { %v672_v1 = vld [vmem:[%s190_s17] sm:$0x1]  ;;  %v674_v2 = vld [vmem:[%s190_s17 + $0x2] sm:$0x1]  ;;  %v676_v3 = vld [vmem:[%s190_s17 + $0x1] sm:$0x1]  ;;  %s712_s23 = scalar_lea.vmem %s791_s2, %s794_s14  ;;  %s205_s26 = scalar_lea.vmem %s792_s3, %s794_s14 }
  0x10   : > { %v213_v4 = vunpack.c.l.bf16 %v672_v1  ;;  %v215_v5 = vunpack.c.l.bf16 %v674_v2  ;;  %v214_v6 = vunpack.c.l.bf16 %v676_v3  ;;  %v681_v7 = vld [vmem:[%s190_s17 + $0x3] sm:$0x1]  ;;  %v684_v9 = vld [vmem:[%s190_s17 + $0x4] sm:$0x1]  ;;  %v686_v10 = vld [vmem:[%s190_s17 + $0x5] sm:$0x1] }
  0x11   : > { %v216_v8 = vunpack.c.l.bf16 %v681_v7  ;;  %v217_v15 = vunpack.c.l.bf16 %v684_v9  ;;  %v218_v16 = vunpack.c.l.bf16 %v686_v10  ;;  %v573_v19 = vld [vmem:[%s195_s20 + $0x1] ss:$0 sm:$0xff]  ;;  %v574_v20 = vld [vmem:[%s195_s20 + $0x2] ss:$0 sm:$0xff]  ;;  %v572_v21 = vld [vmem:[%s195_s20] ss:$0 sm:$0xff] }
  0x12   : > { %v220_v11 = vsel %vm219_vm0, %v213_v4, 0.0  ;;  %v226_v12 = vsel %vm219_vm0, %v215_v5, 0.0  ;;  %v223_v13 = vsel %vm219_vm0, %v214_v6, 0.0  ;;  %v575_v22 = vld [vmem:[%s195_s20 + $0x3] ss:$0 sm:$0xff] }
  0x13   : > { %221 = vadd.xlane.f32.xlu0 %v220_v11  ;;  %227 = vadd.xlane.f32.xlu1 %v226_v12  ;;  %v229_v14 = vsel %vm219_vm0, %v216_v8, 0.0  ;;  %v232_v17 = vsel %vm219_vm0, %v217_v15, 0.0  ;;  %v235_v18 = vsel %vm219_vm0, %v218_v16, 0.0  ;;  %v576_v23 = vld [vmem:[%s195_s20 + $0x4] ss:$0 sm:$0xff] }
  0x14   : > { %v577_v24 = vld [vmem:[%s195_s20 + $0x5] ss:$0 sm:$0xff]  ;;  %v578_v25 = vld [vmem:[%s712_s23] ss:$0 sm:$0xff]  ;;  %v579_v26 = vld [vmem:[%s712_s23 + $0x1] ss:$0 sm:$0xff] }
  0x15   : > { %v580_v27 = vld [vmem:[%s712_s23 + $0x2] ss:$0 sm:$0xff]  ;;  %v581_v7 = vld [vmem:[%s712_s23 + $0x3] ss:$0 sm:$0xff] }
  0x17   : > { %224 = vadd.xlane.f32.xlu0 %v223_v13  ;;  %230 = vadd.xlane.f32.xlu1 %v229_v14 }
  0x1b   : > { %233 = vadd.xlane.f32.xlu0 %v232_v17  ;;  %236 = vadd.xlane.f32.xlu1 %v235_v18 }
  0x2c   : > { %356 = vperm.xlu1 %602, %v573_v19  }
  0x30   : > { %360 = vperm.xlu1 %602, %v574_v20  }
  0x31   : > { %352 = vperm.xlu0 %601, %v572_v21  }
  0x34   : > { %364 = vperm.xlu1 %602, %v575_v22  }
  0x38   : > { %368 = vperm.xlu1 %602, %v576_v23  }
  0x3c   : > { %372 = vperm.xlu1 %602, %v577_v24  }
  0x40   : > { %418 = vperm.xlu1 %602, %v578_v25  }
  0x44   : > { %422 = vperm.xlu1 %602, %v579_v26  }
  0x48   : > { %426 = vperm.xlu1 %602, %v580_v27  }
  0xa0   : > { %v222_v28 = vpop.xlane.xlu0 %221  ;;  %v228_v29 = vpop.xlane.xlu1 %227 }
  0xa1   : > { %v239_v30 = vmul.f32 0.0625, %v222_v28  ;;  %v241_v33 = vmul.f32 0.0625, %v228_v29 }
  0xa3   : > { %v246_v36 = vsel %vm245_vm1, %v239_v30, 0.0  ;;  %v249_v41 = vsel %vm245_vm1, %v241_v33, 0.0 }
  0xa4   : > { %v225_v31 = vpop.xlane.xlu0 %224  ;;  %v231_v32 = vpop.xlane.xlu1 %230 }
  0xa5   : > { %v240_v34 = vmul.f32 0.0625, %v225_v31  ;;  %v242_v35 = vmul.f32 0.0625, %v231_v32 }
  0xa7   : > { %v247_v37 = vsel %vm245_vm1, %v240_v34, 0.0  ;;  %v251_v42 = vsel %vm245_vm1, %v242_v35, 0.0 }
  0xa8   : > { %v248_v38 = vadd.f32 %v247_v37, %v246_v36  ;;  %v234_v39 = vpop.xlane.xlu0 %233  ;;  %v237_v40 = vpop.xlane.xlu1 %236 }
  0xa9   : > { %v243_v43 = vmul.f32 0.0625, %v234_v39  ;;  %v244_v44 = vmul.f32 0.0625, %v237_v40 }
  0xaa   : > { %v250_v45 = vadd.f32 %v249_v41, %v248_v38 }
  0xab   : > { %v253_v46 = vsel %vm245_vm1, %v243_v43, 0.0  ;;  %v255_v48 = vsel %vm245_vm1, %v244_v44, 0.0 }
  0xac   : > { %v252_v47 = vadd.f32 %v251_v42, %v250_v45  ;;  %v357_v9 = vpop.permute.xlu1 %356 }
  0xae   : > { %v254_v49 = vadd.f32 %v253_v46, %v252_v47 }
  0xb0   : > { %v256_v50 = vadd.f32 %v255_v48, %v254_v49  ;;  %v361_v10 = vpop.permute.xlu1 %360  ;;  %v353_v17 = vpop.permute.xlu0 %352 }
  0xb2   : > { %v258_v51 = vmul.f32 0.16666667, %v256_v50 }
  0xb4   : > { %v725_v52 = vsub.f32 %v214_v6, %v258_v51  ;;  %v729_v53 = vsub.f32 %v213_v4, %v258_v51  ;;  %v733_v54 = vsub.f32 %v216_v8, %v258_v51  ;;  %v737_v55 = vsub.f32 %v215_v5, %v258_v51  ;;  %v582_v6 = vld [vmem:[%s712_s23 + $0x4] ss:$0 sm:$0xff]  ;;  %v583_v8 = vld [vmem:[%s712_s23 + $0x5] ss:$0 sm:$0xff]  ;;  %v365_v11 = vpop.permute.xlu1 %364 }
  0xb5   : > { %v743_v58 = vsub.f32 %v218_v16, %v258_v51  ;;  %v745_v59 = vsub.f32 %v217_v15, %v258_v51 }
  0xb6   : > { %v266_v56 = vmul.f32 %v725_v52, %v725_v52  ;;  %v265_v57 = vmul.f32 %v729_v53, %v729_v53  ;;  %v268_v62 = vmul.f32 %v733_v54, %v733_v54  ;;  %v267_v63 = vmul.f32 %v737_v55, %v737_v55 }
  0xb7   : > { %v270_v2 = vmul.f32 %v743_v58, %v743_v58  ;;  %v269_v3 = vmul.f32 %v745_v59, %v745_v59 }
  0xb8   : > { %v274_v60 = vsel %vm219_vm0, %v266_v56, 0.0  ;;  %v271_v61 = vsel %vm219_vm0, %v265_v57, 0.0  ;;  %v280_v0 = vsel %vm219_vm0, %v268_v62, 0.0  ;;  %v277_v1 = vsel %vm219_vm0, %v267_v63, 0.0  ;;  %v369_v12 = vpop.permute.xlu1 %368 }
  0xb9   : > { %275 = vadd.xlane.f32.xlu1 %v274_v60  ;;  %272 = vadd.xlane.f32.xlu0 %v271_v61  ;;  %v286_v4 = vsel %vm219_vm0, %v270_v2, 0.0  ;;  %v283_v5 = vsel %vm219_vm0, %v269_v3, 0.0 }
  0xbc   : > { %v373_v13 = vpop.permute.xlu1 %372 }
  0xbd   : > { %281 = vadd.xlane.f32.xlu1 %v280_v0  ;;  %278 = vadd.xlane.f32.xlu0 %v277_v1 }
  0xc0   : > { %v419_v14 = vpop.permute.xlu1 %418 }
  0xc1   : > { %287 = vadd.xlane.f32.xlu1 %v286_v4  ;;  %284 = vadd.xlane.f32.xlu0 %v283_v5 }
  0xc4   : > { %v423_v15 = vpop.permute.xlu1 %422 }
  0xc8   : > { %v427_v16 = vpop.permute.xlu1 %426 }
  0xd2   : > { %434 = vperm.xlu1 %602, %v582_v6  }
  0xd7   : > { %430 = vperm.xlu0 %601, %v581_v7  }
  0xdb   : > { %438 = vperm.xlu0 %601, %v583_v8  }
 0x146   : > { %v276_v18 = vpop.xlane.xlu1 %275  ;;  %v273_v19 = vpop.xlane.xlu0 %272 }
 0x147   : > { %v290_v20 = vmul.f32 0.0625, %v276_v18  ;;  %v289_v21 = vmul.f32 0.0625, %v273_v19 }
 0x149   : > { %v296_v22 = vsel %vm245_vm1, %v290_v20, 0.0  ;;  %v295_v23 = vsel %vm245_vm1, %v289_v21, 0.0 }
 0x14a   : > { %v282_v24 = vpop.xlane.xlu1 %281  ;;  %v279_v25 = vpop.xlane.xlu0 %278  ;;  %v297_v28 = vadd.f32 %v296_v22, %v295_v23 }
 0x14b   : > { %v292_v26 = vmul.f32 0.0625, %v282_v24  ;;  %v291_v27 = vmul.f32 0.0625, %v279_v25 }
 0x14d   : > { %v298_v29 = vsel %vm245_vm1, %v291_v27, 0.0  ;;  %v300_v33 = vsel %vm245_vm1, %v292_v26, 0.0 }
 0x14e   : > { %v299_v30 = vadd.f32 %v298_v29, %v297_v28  ;;  %v288_v31 = vpop.xlane.xlu1 %287  ;;  %v285_v32 = vpop.xlane.xlu0 %284 }
 0x14f   : > { %v294_v34 = vmul.f32 0.0625, %v288_v31  ;;  %v293_v35 = vmul.f32 0.0625, %v285_v32 }
 0x150   : > { %v301_v36 = vadd.f32 %v300_v33, %v299_v30 }
 0x151   : > { %v302_v37 = vsel %vm245_vm1, %v293_v35, 0.0  ;;  %v304_v39 = vsel %vm245_vm1, %v294_v34, 0.0 }
 0x152   : > { %v303_v38 = vadd.f32 %v302_v37, %v301_v36  ;;  %v435_v61 = vpop.permute.xlu1 %434 }
 0x154   : > { %v305_v40 = vadd.f32 %v304_v39, %v303_v38 }
 0x156   : > { %v306_v41 = vmul.f32 0.16666667, %v305_v40  ;;  %v431_v43 = vpop.permute.xlu0 %430 }
 0x158   : > { %v307_v42 = vadd.f32 1e-05, %v306_v41 }
 0x15a   : > { %603 = vrsqrt.f32 %v307_v42 }
 0x164   : > { %v604_v44 = vpop.eup %603 }
 0x165   : > { %v309_v45 = vmul.f32 %v604_v44, %v729_v53  ;;  %v310_v46 = vmul.f32 %v604_v44, %v725_v52  ;;  %v311_v47 = vmul.f32 %v604_v44, %v737_v55  ;;  %v313_v48 = vmul.f32 %v604_v44, %v745_v59  ;;  %v439_v52 = vpop.permute.xlu0 %438 }
 0x166   : > { %v312_v49 = vmul.f32 %v604_v44, %v733_v54  ;;  %v314_v50 = vmul.f32 %v604_v44, %v743_v58 }
 0x167   : > { %v375_v51 = vmul.f32 %v353_v17, %v309_v45  ;;  %v376_v56 = vmul.f32 %v357_v9, %v310_v46  ;;  %v377_v57 = vmul.f32 %v361_v10, %v311_v47  ;;  %v379_v60 = vmul.f32 %v369_v12, %v313_v48 }
 0x168   : > { %v378_v62 = vmul.f32 %v365_v11, %v312_v49  ;;  %v380_v63 = vmul.f32 %v373_v13, %v314_v50 }
 0x169   : > { %v441_v0 = vadd.f32 %v419_v14, %v375_v51  ;;  %v442_v1 = vadd.f32 %v423_v15, %v376_v56  ;;  %v443_v53 = vadd.f32 %v427_v16, %v377_v57  ;;  %v445_v2 = vadd.f32 %v435_v61, %v379_v60 }
 0x16a   : > { %v444_v3 = vadd.f32 %v431_v43, %v378_v62  ;;  %v446_v55 = vadd.f32 %v439_v52, %v380_v63 }
 0x16b   : > { %v584_v4 = vmul.f32 -1.442695, %v441_v0  ;;  %v585_v59 = vmul.f32 -1.442695, %v442_v1  ;;  %v586_v5 = vmul.f32 -1.442695, %v443_v53 }
 0x16c   : > { %v588_v54 = vmul.f32 -1.442695, %v445_v2  ;;  %v587_v58 = vmul.f32 -1.442695, %v444_v3  ;;  %v589_v6 = vmul.f32 -1.442695, %v446_v55 }
 0x16d   : > { %605 = vpow2.f32 %v584_v4 }
 0x16e   : > { %607 = vpow2.f32 %v585_v59 }
 0x16f   : > { %609 = vpow2.f32 %v586_v5 }
 0x170   : > { %611 = vpow2.f32 %v588_v54 }
 0x171   : > { %613 = vpow2.f32 %v587_v58 }
 0x172   : > { %615 = vpow2.f32 %v589_v6 }
 0x177   : > { %v606_v7 = vpop.eup %605 }
 0x178   : > { %v608_v8 = vpop.eup %607  ;;  %v465_v9 = vadd.f32 1.0, %v606_v7 }
 0x179   : > { %v610_v10 = vpop.eup %609  ;;  %v466_v11 = vadd.f32 1.0, %v608_v8 }
 0x17a   : > { %v612_v12 = vpop.eup %611  ;;  %v467_v13 = vadd.f32 1.0, %v610_v10  ;;  %617 = vrcp.f32 %v465_v9 }
 0x17b   : > { %v614_v14 = vpop.eup %613  ;;  %v469_v15 = vadd.f32 1.0, %v612_v12  ;;  %619 = vrcp.f32 %v466_v11 }
 0x17c   : > { %v616_v16 = vpop.eup %615  ;;  %621 = vrcp.f32 %v467_v13  ;;  %v468_v17 = vadd.f32 1.0, %v614_v14 }
 0x17d   : > { %623 = vrcp.f32 %v469_v15  ;;  %v470_v18 = vadd.f32 1.0, %v616_v16 }
 0x17e   : > { %625 = vrcp.f32 %v468_v17 }
 0x17f   : > { %627 = vrcp.f32 %v470_v18 }
 0x184   : > { %v618_v19 = vpop.eup %617 }
 0x185   : > { %v620_v20 = vpop.eup %619  ;;  %v483_v21 = vmul.f32 %v618_v19, %v441_v0 }
 0x186   : > { %v622_v22 = vpop.eup %621  ;;  %v484_v23 = vmul.f32 %v620_v20, %v442_v1 }
 0x187   : > { %v624_v24 = vpop.eup %623  ;;  %v485_v25 = vmul.f32 %v622_v22, %v443_v53  ;;  %v489_v26 = vpack.c.bf16 %v483_v21, %v483_v21 }
 0x188   : > { %v626_v27 = vpop.eup %625  ;;  %v487_v28 = vmul.f32 %v624_v24, %v445_v2  ;;  %v490_v29 = vpack.c.bf16 %v484_v23, %v484_v23 }
 0x189   : > { %v628_v30 = vpop.eup %627  ;;  %v491_v31 = vpack.c.bf16 %v485_v25, %v485_v25  ;;  %496 = vst.msk [vmem:[%s205_s26] sm:$0x1] %vm495_vm2, %v489_v26  ;;  %v486_v32 = vmul.f32 %v626_v27, %v444_v3 }
 0x18a   : > { %v493_v33 = vpack.c.bf16 %v487_v28, %v487_v28  ;;  %497 = vst.msk [vmem:[%s205_s26 + $0x1] sm:$0x1] %vm495_vm2, %v490_v29  ;;  %v488_v34 = vmul.f32 %v628_v30, %v446_v55 }
 0x18b   : > { %498 = vst.msk [vmem:[%s205_s26 + $0x2] sm:$0x1] %vm495_vm2, %v491_v31  ;;  %v492_v35 = vpack.c.bf16 %v486_v32, %v486_v32 }
 0x18c   : > { %500 = vst.msk [vmem:[%s205_s26 + $0x4] sm:$0x1] %vm495_vm2, %v493_v33  ;;  %v494_v36 = vpack.c.bf16 %v488_v34, %v488_v34 }
 0x18d   : > { %499 = vst.msk [vmem:[%s205_s26 + $0x3] sm:$0x1] %vm495_vm2, %v492_v35 }
 0x18e   : > { %501 = vst.msk [vmem:[%s205_s26 + $0x5] sm:$0x1] %vm495_vm2, %v494_v36 }
 0x18f PF: > { %s13_s12 = sadd.s32 1, %s635_s12  }
 0x190   : > { %p10_p4 = scmp.ge.s32.totalorder %s13_s12, 6  }
 0x192   :  { %12 = sbr.rel (!%p10_p4) target bundleno = 1 (0x1), region = 68 }

// kernel: _lambda_.43
= control target key start
LH: loop header
LB: loop body
LE: loop exit
PB: predicated region body
PF: predicated region fallthrough
CT: control target
= control target key end

     0   :  { %v331_v0 = vmov 0   ;;  %vm166_vm0 = vcmask 785408   ;;  %vm243_vm1 = vcmask 257024   ;;  %s464_s1 = inlined_call_operand.vmem [shape: bf16[224,32], index: 1, kind: input, shape index: {}]   ;;  %s465_s0 = inlined_call_operand.vmem [shape: bf16[24,224], index: 0, kind: input, shape index: {}]   ;;  %s466_s2 = inlined_call_operand.vmem [shape: f32[24,1], index: 2, kind: input, shape index: {}]   ;;  %s467_s3 = inlined_call_operand.vmem [shape: bf16[24,32], index: 3, kind: input, shape index: {}]   ;;  %s468_s4 = inlined_call_operand.vmem [shape: bf16[24,32], index: 4, kind: output, shape index: {}]  }
   0x1   :  { %173 = vmatprep.subr.bf16.mxu0 %v331_v0  ;;  %281 = vmatprep.subr.bf16.mxu1 %v331_v0  ;;  %v312_v1 = vld [vmem:[%s464_s1] sm:$0xff]   ;;  %v313_v2 = vld [vmem:[%s464_s1 + $0x8] sm:$0xff]   ;;  %v314_v3 = vld [vmem:[%s464_s1 + $0x10] sm:$0xff]  }
   0x2   :  { %310 = vset.pattern.permute.xlu0 %v331_v0  ;;  %311 = vset.pattern.permute.xlu1 %v331_v0  ;;  %v315_v4 = vld [vmem:[%s464_s1 + $0x18] sm:$0xff]   ;;  %v316_v5 = vld [vmem:[%s464_s1 + $0x20] sm:$0xff]   ;;  %v20_v7 = vld [vmem:[%s465_s0 + $0x10] sm:$0xff] }
   0x3   :  { %174 = vmatpush1.bf16.msra.mxu0 %v312_v1  ;;  %295 = vmatpush1.bf16.msra.mxu1 %v312_v1  ;;  %v328_v6 = vld [vmem:[%s465_s0 + $0x4] ss:$8 sps:$4 sm:$0xff]   ;;  %v254_v9 = vcombine.high %v20_v7, %v20_v7  ;;  %v51_v10 = vld [vmem:[%s466_s2 + $0x10] sm:$0xff]  ;;  %v319_v14 = vld [vmem:[%s464_s1 + $0x38] sm:$0xff]   ;;  %v253_v22 = vcombine.low %v20_v7, %v20_v7 }
   0x4   :  { %175 = vmatprep.subr.bf16.mxu0 %v331_v0  ;;  %282 = vmatprep.subr.bf16.mxu1 %v331_v0  ;;  %v49_v8 = vld [vmem:[%s466_s2] sm:$0xff]  ;;  %v50_v11 = vld [vmem:[%s466_s2 + $0x8] sm:$0xff]  ;;  %v318_v13 = vld [vmem:[%s464_s1 + $0x30] sm:$0xff]  }
   0x5   :  { %54 = vperm.xlu0 %310, %v49_v8   ;;  %269 = vmatprep.mubr.msk.bf16.mxu0 %vm166_vm0, %v328_v6  ;;  %v317_v12 = vld [vmem:[%s464_s1 + $0x28] sm:$0xff]   ;;  %v320_v15 = vld [vmem:[%s464_s1 + $0x40] sm:$0xff]   ;;  %v322_v17 = vld [vmem:[%s464_s1 + $0x50] sm:$0xff]  }
   0x6   :  { %64 = vperm.xlu1 %311, %v51_v10   ;;  %270 = vmatprep.mubr.msk.bf16.mxu1 %vm166_vm0, %v254_v9  ;;  %v321_v16 = vld [vmem:[%s464_s1 + $0x48] sm:$0xff]   ;;  %v323_v18 = vld [vmem:[%s464_s1 + $0x58] sm:$0xff]   ;;  %v324_v19 = vld [vmem:[%s464_s1 + $0x60] sm:$0xff]  }
   0x7   :  { %176 = vmatpush1.bf16.msra.mxu0 %v313_v2  ;;  %296 = vmatpush1.bf16.msra.mxu1 %v313_v2  ;;  %v325_v20 = vld [vmem:[%s464_s1 + $0x68] sm:$0xff]   ;;  %v278_v24 = vld [vmem:[%s467_s3] sm:$0xff]  }
   0x8   :  { %177 = vmatprep.subr.bf16.mxu0 %v331_v0  ;;  %283 = vmatprep.subr.bf16.mxu1 %v331_v0  ;;  %v326_v21 = vld [vmem:[%s465_s0] ss:$8 sps:$4 sm:$0xff]   ;;  %v279_v28 = vunpack.c.l.bf16 %v278_v24  ;;  %v280_v36 = vunpack.c.h.bf16 %v278_v24 }
   0x9   :  { %59 = vperm.xlu0 %310, %v50_v11   ;;  %v223_v25 = vld [vmem:[%s467_s3 + $0x8] sm:$0xf] }
   0xa   :  { %v226_v29 = vunpack.c.l.bf16 %v223_v25 }
   0xb   :  { %178 = vmatpush1.bf16.msra.mxu0 %v314_v3  ;;  %297 = vmatpush1.bf16.msra.mxu1 %v314_v3 }
   0xc   :  { %179 = vmatprep.subr.bf16.mxu0 %v331_v0  ;;  %284 = vmatprep.subr.bf16.mxu1 %v331_v0 }
   0xf   :  { %180 = vmatpush1.bf16.msra.mxu0 %v315_v4  ;;  %298 = vmatpush1.bf16.msra.mxu1 %v315_v4 }
  0x10   :  { %181 = vmatprep.subr.bf16.mxu0 %v331_v0  ;;  %285 = vmatprep.subr.bf16.mxu1 %v331_v0 }
  0x13   :  { %182 = vmatpush1.bf16.msra.mxu0 %v316_v5  ;;  %299 = vmatpush1.bf16.msra.mxu1 %v316_v5 }
  0x14   :  { %183 = vmatprep.subr.bf16.mxu0 %v331_v0  ;;  %286 = vmatprep.subr.bf16.mxu1 %v331_v0 }
  0x17   :  { %184 = vmatpush1.bf16.msra.mxu0 %v317_v12  ;;  %300 = vmatpush1.bf16.msra.mxu1 %v317_v12 }
  0x18   :  { %185 = vmatprep.subr.bf16.mxu0 %v331_v0  ;;  %287 = vmatprep.subr.bf16.mxu1 %v331_v0 }
  0x1b   :  { %186 = vmatpush1.bf16.msra.mxu0 %v318_v13  ;;  %301 = vmatpush1.bf16.msra.mxu1 %v318_v13 }
  0x1c   :  { %187 = vmatprep.subr.bf16.mxu0 %v331_v0  ;;  %288 = vmatprep.subr.bf16.mxu1 %v331_v0 }
  0x1f   :  { %188 = vmatpush1.bf16.msra.mxu0 %v319_v14  ;;  %302 = vmatpush1.bf16.msra.mxu1 %v319_v14 }
  0x20   :  { %189 = vmatprep.subr.bf16.mxu0 %v331_v0  ;;  %289 = vmatprep.subr.bf16.mxu1 %v331_v0 }
  0x23   :  { %190 = vmatpush1.bf16.msra.mxu0 %v320_v15  ;;  %303 = vmatpush1.bf16.msra.mxu1 %v320_v15 }
  0x24   :  { %191 = vmatprep.subr.bf16.mxu0 %v331_v0  ;;  %290 = vmatprep.subr.bf16.mxu1 %v331_v0 }
  0x27   :  { %192 = vmatpush1.bf16.msra.mxu0 %v321_v16  ;;  %304 = vmatpush1.bf16.msra.mxu1 %v321_v16 }
  0x28   :  { %193 = vmatprep.subr.bf16.mxu0 %v331_v0  ;;  %291 = vmatprep.subr.bf16.mxu1 %v331_v0 }
  0x2b   :  { %194 = vmatpush1.bf16.msra.mxu0 %v322_v17  ;;  %305 = vmatpush1.bf16.msra.mxu1 %v322_v17 }
  0x2c   :  { %195 = vmatprep.subr.bf16.mxu0 %v331_v0  ;;  %292 = vmatprep.subr.bf16.mxu1 %v331_v0 }
  0x2f   :  { %196 = vmatpush1.bf16.msra.mxu0 %v323_v18  ;;  %306 = vmatpush1.bf16.msra.mxu1 %v323_v18 }
  0x30   :  { %197 = vmatprep.subr.bf16.mxu0 %v331_v0  ;;  %293 = vmatprep.subr.bf16.mxu1 %v331_v0 }
  0x33   :  { %198 = vmatpush1.bf16.msra.mxu0 %v324_v19  ;;  %307 = vmatpush1.bf16.msra.mxu1 %v324_v19 }
  0x34   :  { %199 = vmatprep.subr.bf16.mxu0 %v331_v0  ;;  %294 = vmatprep.subr.bf16.mxu1 %v331_v0 }
  0x37   :  { %200 = vmatpush1.bf16.msra.mxu0 %v325_v20  ;;  %308 = vmatpush1.bf16.msra.mxu1 %v325_v20 }
  0x3a   :  { %206 = vmatmul.mubr.bf16.vlgmr.msra.gmra.mrb[0].mxu0 %v326_v21  ;;  %214 = vmatmul.mubr.bf16.vlgmr.msra.gmra.mrb[0].mxu1 %v253_v22 }
  0x84   :  { %v55_v23 = vpop.permute.xlu0 %54 }
  0x85   :  { %v65_v26 = vpop.permute.xlu1 %64 }
  0x88   :  { %v60_v27 = vpop.permute.xlu0 %59 }
 0x10d   :  { %v207_v30 = vpop.f32.mrb[0].mxu0  ;;  %v215_v31 = vpop.f32.mrb[0].mxu1 }
 0x10e   :  { %v208_v32 = vadd.f32 %v207_v30, %v55_v23  ;;  %v209_v33 = vpop.f32.mrb[1].mxu0  ;;  %v217_v34 = vpop.f32.mrb[1].mxu1  ;;  %v216_v35 = vadd.f32 %v215_v31, %v65_v26 }
 0x10f   :  { %v210_v37 = vpop.f32.mrb[2].mxu0  ;;  %v218_v38 = vpop.f32.mrb[2].mxu1 }
 0x110   :  { %v227_v39 = vadd.f32 %v279_v28, %v208_v32  ;;  %v229_v40 = vadd.f32 %v226_v29, %v216_v35  ;;  %v211_v41 = vadd.f32 %v210_v37, %v60_v27  ;;  %v212_v42 = vpop.f32.mrb[3].mxu0  ;;  %v219_v43 = vpop.f32.mrb[3].mxu1 }
 0x112   :  { %v274_v44 = vpack.c.bf16 %v227_v39, %v227_v39  ;;  %v276_v45 = vpack.c.bf16 %v229_v40, %v229_v40  ;;  %v228_v46 = vadd.f32 %v280_v36, %v211_v41 }
 0x114   :  { %244 = vst.msk [vmem:[%s468_s4] sm:$0xf] %vm243_vm1, %v274_v44  ;;  %246 = vst.msk [vmem:[%s468_s4 + $0x8] sm:$0xf] %vm243_vm1, %v276_v45  ;;  %v275_v47 = vpack.c.bf16 %v228_v46, %v228_v46 }
 0x116   :  { %245 = vst.msk [vmem:[%s468_s4 + $0x4] sm:$0xf] %vm243_vm1, %v275_v47 }

// kernel: _lambda_.44
= control target key start
LH: loop header
LB: loop body
LE: loop exit
PB: predicated region body
PF: predicated region fallthrough
CT: control target
= control target key end

     0   :  { %s586_s12 = smov 0   ;;  %s711_s0 = inlined_call_operand.vmem [shape: bf16[24,2,16], index: 0, kind: input, shape index: {}]   ;;  %s712_s1 = inlined_call_operand.vmem [shape: f32[24,1,1], index: 1, kind: input, shape index: {}]   ;;  %s713_s2 = inlined_call_operand.vmem [shape: f32[24,1,1], index: 2, kind: input, shape index: {}]   ;;  %s714_s3 = inlined_call_operand.vmem [shape: bf16[24,2,16], index: 3, kind: output, shape index: {}]  }
   0x1 LB: > { %s525_s13 = sadd.s32 4294967295, %s563_s12   ;;  %p529_p0 = scmp.ge.s32.totalorder %s563_s12, 1  ;;  %s563_s12 = sphi %s586_s12, %s13_s12  }
   0x2   : > { %p157_p1 = scmp.lt.s32.totalorder %s563_s12, 5 }
   0x4   : > { %p158_p2 = pnand %p529_p0, %p157_p1 }
   0x5   : > { %s187_s14 = smul.u32 (!%p158_p2), 6, %s525_s13  ;;  %v565_v0 = vmov (!%p158_p2), 0   ;;  %vm219_vm0 = vcmask (!%p158_p2), 123904   ;;  %vm245_vm1 = vcmask (!%p158_p2), 1041408   ;;  %vm453_vm2 = vcmask (!%p158_p2), 122880  }
   0x6   : > { %161 = sbr.rel (%p158_p2) target bundleno = 368 (0x170), region = 32  ;;  %554 = vset.pattern.permute.xlu1 (!%p158_p2), %v565_v0  ;;  %553 = vset.pattern.permute.xlu0 (!%p158_p2), %v565_v0 }
   0x7   : > { %p188_p3 = scmp.lt.s32.totalorder (!%p158_p2), %s187_s14, 23 }
   0xd   : > { %s716_s14 = smov (!%p188_p3, %s187_s14), 23 }
   0xe   : > { %s190_s17 = scalar_lea.vmem %s711_s0, %s716_s14  ;;  %s195_s20 = scalar_lea.vmem %s712_s1, %s716_s14 }
   0xf   : > { %v600_v1 = vld [vmem:[%s190_s17] sm:$0x1]  ;;  %v602_v2 = vld [vmem:[%s190_s17 + $0x2] sm:$0x1]  ;;  %v604_v3 = vld [vmem:[%s190_s17 + $0x1] sm:$0x1]  ;;  %s640_s23 = scalar_lea.vmem %s713_s2, %s716_s14  ;;  %s205_s26 = scalar_lea.vmem %s714_s3, %s716_s14 }
  0x10   : > { %v213_v4 = vunpack.c.l.bf16 %v600_v1  ;;  %v215_v5 = vunpack.c.l.bf16 %v602_v2  ;;  %v214_v6 = vunpack.c.l.bf16 %v604_v3  ;;  %v609_v7 = vld [vmem:[%s190_s17 + $0x3] sm:$0x1]  ;;  %v612_v9 = vld [vmem:[%s190_s17 + $0x4] sm:$0x1]  ;;  %v614_v10 = vld [vmem:[%s190_s17 + $0x5] sm:$0x1] }
  0x11   : > { %v216_v8 = vunpack.c.l.bf16 %v609_v7  ;;  %v217_v15 = vunpack.c.l.bf16 %v612_v9  ;;  %v218_v16 = vunpack.c.l.bf16 %v614_v10  ;;  %v531_v19 = vld [vmem:[%s195_s20 + $0x1] ss:$0 sm:$0xff]  ;;  %v532_v20 = vld [vmem:[%s195_s20 + $0x2] ss:$0 sm:$0xff]  ;;  %v530_v21 = vld [vmem:[%s195_s20] ss:$0 sm:$0xff] }
  0x12   : > { %v220_v11 = vsel %vm219_vm0, %v213_v4, 0.0  ;;  %v226_v12 = vsel %vm219_vm0, %v215_v5, 0.0  ;;  %v223_v13 = vsel %vm219_vm0, %v214_v6, 0.0  ;;  %v533_v22 = vld [vmem:[%s195_s20 + $0x3] ss:$0 sm:$0xff] }
  0x13   : > { %221 = vadd.xlane.f32.xlu0 %v220_v11  ;;  %227 = vadd.xlane.f32.xlu1 %v226_v12  ;;  %v229_v14 = vsel %vm219_vm0, %v216_v8, 0.0  ;;  %v232_v17 = vsel %vm219_vm0, %v217_v15, 0.0  ;;  %v235_v18 = vsel %vm219_vm0, %v218_v16, 0.0  ;;  %v534_v23 = vld [vmem:[%s195_s20 + $0x4] ss:$0 sm:$0xff] }
  0x14   : > { %v535_v24 = vld [vmem:[%s195_s20 + $0x5] ss:$0 sm:$0xff]  ;;  %v536_v25 = vld [vmem:[%s640_s23] ss:$0 sm:$0xff]  ;;  %v537_v26 = vld [vmem:[%s640_s23 + $0x1] ss:$0 sm:$0xff] }
  0x15   : > { %v538_v27 = vld [vmem:[%s640_s23 + $0x2] ss:$0 sm:$0xff]  ;;  %v539_v7 = vld [vmem:[%s640_s23 + $0x3] ss:$0 sm:$0xff] }
  0x17   : > { %224 = vadd.xlane.f32.xlu0 %v223_v13  ;;  %230 = vadd.xlane.f32.xlu1 %v229_v14 }
  0x1b   : > { %233 = vadd.xlane.f32.xlu0 %v232_v17  ;;  %236 = vadd.xlane.f32.xlu1 %v235_v18 }
  0x2c   : > { %356 = vperm.xlu1 %554, %v531_v19  }
  0x30   : > { %360 = vperm.xlu1 %554, %v532_v20  }
  0x31   : > { %352 = vperm.xlu0 %553, %v530_v21  }
  0x34   : > { %364 = vperm.xlu1 %554, %v533_v22  }
  0x38   : > { %368 = vperm.xlu1 %554, %v534_v23  }
  0x3c   : > { %372 = vperm.xlu1 %554, %v535_v24  }
  0x40   : > { %418 = vperm.xlu1 %554, %v536_v25  }
  0x44   : > { %422 = vperm.xlu1 %554, %v537_v26  }
  0x48   : > { %426 = vperm.xlu1 %554, %v538_v27  }
  0xa0   : > { %v222_v28 = vpop.xlane.xlu0 %221  ;;  %v228_v29 = vpop.xlane.xlu1 %227 }
  0xa1   : > { %v239_v30 = vmul.f32 0.0625, %v222_v28  ;;  %v241_v33 = vmul.f32 0.0625, %v228_v29 }
  0xa3   : > { %v246_v36 = vsel %vm245_vm1, %v239_v30, 0.0  ;;  %v249_v41 = vsel %vm245_vm1, %v241_v33, 0.0 }
  0xa4   : > { %v225_v31 = vpop.xlane.xlu0 %224  ;;  %v231_v32 = vpop.xlane.xlu1 %230 }
  0xa5   : > { %v240_v34 = vmul.f32 0.0625, %v225_v31  ;;  %v242_v35 = vmul.f32 0.0625, %v231_v32 }
  0xa7   : > { %v247_v37 = vsel %vm245_vm1, %v240_v34, 0.0  ;;  %v251_v42 = vsel %vm245_vm1, %v242_v35, 0.0 }
  0xa8   : > { %v248_v38 = vadd.f32 %v247_v37, %v246_v36  ;;  %v234_v39 = vpop.xlane.xlu0 %233  ;;  %v237_v40 = vpop.xlane.xlu1 %236 }
  0xa9   : > { %v243_v43 = vmul.f32 0.0625, %v234_v39  ;;  %v244_v44 = vmul.f32 0.0625, %v237_v40 }
  0xaa   : > { %v250_v45 = vadd.f32 %v249_v41, %v248_v38 }
  0xab   : > { %v253_v46 = vsel %vm245_vm1, %v243_v43, 0.0  ;;  %v255_v48 = vsel %vm245_vm1, %v244_v44, 0.0 }
  0xac   : > { %v252_v47 = vadd.f32 %v251_v42, %v250_v45  ;;  %v357_v9 = vpop.permute.xlu1 %356 }
  0xae   : > { %v254_v49 = vadd.f32 %v253_v46, %v252_v47 }
  0xb0   : > { %v256_v50 = vadd.f32 %v255_v48, %v254_v49  ;;  %v361_v10 = vpop.permute.xlu1 %360  ;;  %v353_v17 = vpop.permute.xlu0 %352 }
  0xb2   : > { %v258_v51 = vmul.f32 0.16666667, %v256_v50 }
  0xb4   : > { %v653_v52 = vsub.f32 %v214_v6, %v258_v51  ;;  %v657_v53 = vsub.f32 %v213_v4, %v258_v51  ;;  %v661_v54 = vsub.f32 %v216_v8, %v258_v51  ;;  %v665_v55 = vsub.f32 %v215_v5, %v258_v51  ;;  %v540_v6 = vld [vmem:[%s640_s23 + $0x4] ss:$0 sm:$0xff]  ;;  %v541_v8 = vld [vmem:[%s640_s23 + $0x5] ss:$0 sm:$0xff]  ;;  %v365_v11 = vpop.permute.xlu1 %364 }
  0xb5   : > { %v671_v58 = vsub.f32 %v218_v16, %v258_v51  ;;  %v673_v59 = vsub.f32 %v217_v15, %v258_v51 }
  0xb6   : > { %v266_v56 = vmul.f32 %v653_v52, %v653_v52  ;;  %v265_v57 = vmul.f32 %v657_v53, %v657_v53  ;;  %v268_v62 = vmul.f32 %v661_v54, %v661_v54  ;;  %v267_v63 = vmul.f32 %v665_v55, %v665_v55 }
  0xb7   : > { %v270_v2 = vmul.f32 %v671_v58, %v671_v58  ;;  %v269_v3 = vmul.f32 %v673_v59, %v673_v59 }
  0xb8   : > { %v274_v60 = vsel %vm219_vm0, %v266_v56, 0.0  ;;  %v271_v61 = vsel %vm219_vm0, %v265_v57, 0.0  ;;  %v280_v0 = vsel %vm219_vm0, %v268_v62, 0.0  ;;  %v277_v1 = vsel %vm219_vm0, %v267_v63, 0.0  ;;  %v369_v12 = vpop.permute.xlu1 %368 }
  0xb9   : > { %275 = vadd.xlane.f32.xlu1 %v274_v60  ;;  %272 = vadd.xlane.f32.xlu0 %v271_v61  ;;  %v286_v4 = vsel %vm219_vm0, %v270_v2, 0.0  ;;  %v283_v5 = vsel %vm219_vm0, %v269_v3, 0.0 }
  0xbc   : > { %v373_v13 = vpop.permute.xlu1 %372 }
  0xbd   : > { %281 = vadd.xlane.f32.xlu1 %v280_v0  ;;  %278 = vadd.xlane.f32.xlu0 %v277_v1 }
  0xc0   : > { %v419_v14 = vpop.permute.xlu1 %418 }
  0xc1   : > { %287 = vadd.xlane.f32.xlu1 %v286_v4  ;;  %284 = vadd.xlane.f32.xlu0 %v283_v5 }
  0xc4   : > { %v423_v15 = vpop.permute.xlu1 %422 }
  0xc8   : > { %v427_v16 = vpop.permute.xlu1 %426 }
  0xd2   : > { %434 = vperm.xlu1 %554, %v540_v6  }
  0xd7   : > { %430 = vperm.xlu0 %553, %v539_v7  }
  0xdb   : > { %438 = vperm.xlu0 %553, %v541_v8  }
 0x146   : > { %v276_v18 = vpop.xlane.xlu1 %275  ;;  %v273_v19 = vpop.xlane.xlu0 %272 }
 0x147   : > { %v290_v20 = vmul.f32 0.0625, %v276_v18  ;;  %v289_v21 = vmul.f32 0.0625, %v273_v19 }
 0x149   : > { %v296_v22 = vsel %vm245_vm1, %v290_v20, 0.0  ;;  %v295_v23 = vsel %vm245_vm1, %v289_v21, 0.0 }
 0x14a   : > { %v282_v24 = vpop.xlane.xlu1 %281  ;;  %v279_v25 = vpop.xlane.xlu0 %278  ;;  %v297_v28 = vadd.f32 %v296_v22, %v295_v23 }
 0x14b   : > { %v292_v26 = vmul.f32 0.0625, %v282_v24  ;;  %v291_v27 = vmul.f32 0.0625, %v279_v25 }
 0x14d   : > { %v298_v29 = vsel %vm245_vm1, %v291_v27, 0.0  ;;  %v300_v33 = vsel %vm245_vm1, %v292_v26, 0.0 }
 0x14e   : > { %v299_v30 = vadd.f32 %v298_v29, %v297_v28  ;;  %v288_v31 = vpop.xlane.xlu1 %287  ;;  %v285_v32 = vpop.xlane.xlu0 %284 }
 0x14f   : > { %v294_v34 = vmul.f32 0.0625, %v288_v31  ;;  %v293_v35 = vmul.f32 0.0625, %v285_v32 }
 0x150   : > { %v301_v36 = vadd.f32 %v300_v33, %v299_v30 }
 0x151   : > { %v302_v37 = vsel %vm245_vm1, %v293_v35, 0.0  ;;  %v304_v39 = vsel %vm245_vm1, %v294_v34, 0.0 }
 0x152   : > { %v303_v38 = vadd.f32 %v302_v37, %v301_v36  ;;  %v435_v61 = vpop.permute.xlu1 %434 }
 0x154   : > { %v305_v40 = vadd.f32 %v304_v39, %v303_v38 }
 0x156   : > { %v306_v41 = vmul.f32 0.16666667, %v305_v40  ;;  %v431_v43 = vpop.permute.xlu0 %430 }
 0x158   : > { %v307_v42 = vadd.f32 1e-05, %v306_v41 }
 0x15a   : > { %555 = vrsqrt.f32 %v307_v42  ;;  %v439_v2 = vpop.permute.xlu0 %438 }
 0x164   : > { %v556_v44 = vpop.eup %555 }
 0x165   : > { %v309_v45 = vmul.f32 %v556_v44, %v657_v53  ;;  %v310_v46 = vmul.f32 %v556_v44, %v653_v52  ;;  %v311_v47 = vmul.f32 %v556_v44, %v665_v55  ;;  %v313_v48 = vmul.f32 %v556_v44, %v673_v59 }
 0x166   : > { %v312_v49 = vmul.f32 %v556_v44, %v661_v54  ;;  %v314_v50 = vmul.f32 %v556_v44, %v671_v58 }
 0x167   : > { %v375_v51 = vmul.f32 %v353_v17, %v309_v45  ;;  %v376_v56 = vmul.f32 %v357_v9, %v310_v46  ;;  %v377_v57 = vmul.f32 %v361_v10, %v311_v47  ;;  %v379_v60 = vmul.f32 %v369_v12, %v313_v48 }
 0x168   : > { %v378_v62 = vmul.f32 %v365_v11, %v312_v49  ;;  %v380_v63 = vmul.f32 %v373_v13, %v314_v50 }
 0x169   : > { %v441_v0 = vadd.f32 %v419_v14, %v375_v51  ;;  %v442_v53 = vadd.f32 %v423_v15, %v376_v56  ;;  %v443_v1 = vadd.f32 %v427_v16, %v377_v57  ;;  %v445_v52 = vadd.f32 %v435_v61, %v379_v60 }
 0x16a   : > { %v444_v54 = vadd.f32 %v431_v43, %v378_v62  ;;  %v446_v55 = vadd.f32 %v439_v2, %v380_v63 }
 0x16b   : > { %v447_v58 = vpack.c.bf16 %v441_v0, %v441_v0  ;;  %v448_v59 = vpack.c.bf16 %v442_v53, %v442_v53  ;;  %v449_v3 = vpack.c.bf16 %v443_v1, %v443_v1  ;;  %v451_v4 = vpack.c.bf16 %v445_v52, %v445_v52 }
 0x16c   : > { %v450_v5 = vpack.c.bf16 %v444_v54, %v444_v54  ;;  %v452_v6 = vpack.c.bf16 %v446_v55, %v446_v55 }
 0x16d   : > { %454 = vst.msk [vmem:[%s205_s26] sm:$0x1] %vm453_vm2, %v447_v58  ;;  %455 = vst.msk [vmem:[%s205_s26 + $0x1] sm:$0x1] %vm453_vm2, %v448_v59 }
 0x16e   : > { %456 = vst.msk [vmem:[%s205_s26 + $0x2] sm:$0x1] %vm453_vm2, %v449_v3  ;;  %458 = vst.msk [vmem:[%s205_s26 + $0x4] sm:$0x1] %vm453_vm2, %v451_v4 }
 0x16f   : > { %457 = vst.msk [vmem:[%s205_s26 + $0x3] sm:$0x1] %vm453_vm2, %v450_v5  ;;  %459 = vst.msk [vmem:[%s205_s26 + $0x5] sm:$0x1] %vm453_vm2, %v452_v6 }
 0x170 PF: > { %s13_s12 = sadd.s32 1, %s563_s12  }
 0x171   : > { %p10_p4 = scmp.ge.s32.totalorder %s13_s12, 6  }
 0x173   :  { %12 = sbr.rel (!%p10_p4) target bundleno = 1 (0x1), region = 68 }

// kernel: _lambda_.45
= control target key start
LH: loop header
LB: loop body
LE: loop exit
PB: predicated region body
PF: predicated region fallthrough
CT: control target
= control target key end

     0   :  { %vm129_vm0 = vcmask 1043456   ;;  %v333_v0 = vmov 0.0   ;;  %vm334_vm1 = vmmov 0   ;;  %v335_v5 = vmov 0   ;;  %s450_s1 = inlined_call_operand.vmem [shape: bf16[24,32], index: 1, kind: input, shape index: {}]   ;;  %s451_s0 = inlined_call_operand.vmem [shape: bf16[72,24], index: 0, kind: input, shape index: {}]   ;;  %s452_s2 = inlined_call_operand.vmem [shape: f32[72,1], index: 2, kind: input, shape index: {}]   ;;  %s453_s3 = inlined_call_operand.vmem [shape: bf16[72,32], index: 3, kind: output, shape index: {}]  }
   0x1   :  { %293 = vmatprep.subr.bf16.mxu0 %v333_v0  ;;  %317 = vmatprep.subr.bf16.mxu1 %v333_v0  ;;  %v326_v1 = vld [vmem:[%s450_s1] sm:$0xff]   ;;  %v327_v2 = vld [vmem:[%s450_s1 + $0x8] ss:$0 sps:$4 sm:$0xff]   ;;  %v329_v6 = vld [vmem:[%s451_s0 + $0x18] sm:$0xff]   ;;  %vm113_vm2 = vcmask 195584   ;;  %vm242_vm3 = vcmask 257024  }
   0x2   :  { %297 = vmatprep.mubr.msk.bf16.mxu0 %vm334_vm1, %v333_v0  ;;  %309 = vmatprep.mubr.msk.bf16.mxu1 %vm334_vm1, %v333_v0  ;;  %v131_v3 = vsel %vm129_vm0, %v327_v2, 0  ;;  %v328_v4 = vld [vmem:[%s451_s0] sm:$0xff]   ;;  %v29_v8 = vld [vmem:[%s452_s2 + $0x10] sm:$0xff]  ;;  %v28_v9 = vld [vmem:[%s452_s2 + $0x8] sm:$0xff] }
   0x3   :  { %294 = vmatpush3.bf16.msra.mxu0 %v326_v1  ;;  %319 = vmatpush3.bf16.msra.mxu1 %v326_v1  ;;  %v27_v7 = vld [vmem:[%s452_s2] sm:$0xff]  ;;  %v30_v10 = vld [vmem:[%s452_s2 + $0x18] sm:$0xff]  ;;  %v330_v12 = vld [vmem:[%s451_s0 + $0x8] sm:$0xff]  }
   0x4   :  { %295 = vmatprep.subr.bf16.mxu0 %v333_v0  ;;  %318 = vmatprep.subr.bf16.mxu1 %v333_v0  ;;  %v31_v11 = vld [vmem:[%s452_s2 + $0x20] sm:$0xff]  ;;  %v32_v14 = vld [vmem:[%s452_s2 + $0x28] sm:$0xff]  ;;  %v33_v15 = vld [vmem:[%s452_s2 + $0x30] sm:$0xff] }
   0x5   :  { %324 = vset.pattern.permute.xlu0 %v335_v5  ;;  %325 = vset.pattern.permute.xlu1 %v335_v5  ;;  %v331_v13 = vld [vmem:[%s451_s0 + $0x20] ss:$0 sps:$4 sm:$0xff]   ;;  %v34_v16 = vld [vmem:[%s452_s2 + $0x38] sm:$0xff]  ;;  %v332_v18 = vld [vmem:[%s451_s0 + $0x10] sm:$0xff]  }
   0x6   :  { %38 = vperm.xlu0 %324, %v27_v7   ;;  %48 = vperm.xlu1 %325, %v29_v8   ;;  %v35_v17 = vld [vmem:[%s452_s2 + $0x40] sm:$0xff] }
   0x7   :  { %296 = vmatpush3.bf16.msra.mxu0 %v131_v3  ;;  %320 = vmatpush3.bf16.msra.mxu1 %v131_v3 }
   0xa   :  { %298 = vmatmul.mubr.msk.bf16.vlgmr.msra.gmra.mrb[0].mxu0 %vm113_vm2, %v328_v4  ;;  %310 = vmatmul.mubr.msk.bf16.vlgmr.msra.gmra.mrb[0].mxu1 %vm113_vm2, %v329_v6 }
   0xb   :  { %301 = vmatprep.mubr.msk.bf16.mxu0 %vm334_vm1, %v333_v0  ;;  %313 = vmatprep.mubr.msk.bf16.mxu1 %vm334_vm1, %v333_v0 }
   0xc   :  { %43 = vperm.xlu0 %324, %v28_v9   ;;  %53 = vperm.xlu1 %325, %v30_v10  }
  0x10   :  { %58 = vperm.xlu0 %324, %v31_v11   ;;  %63 = vperm.xlu1 %325, %v32_v14  }
  0x12   :  { %302 = vmatmul.mubr.msk.bf16.gmra.mrb[4].mxu0 %vm113_vm2, %v330_v12  ;;  %314 = vmatmul.mubr.msk.bf16.gmra.mrb[4].mxu1 %vm113_vm2, %v331_v13 }
  0x13   :  { %305 = vmatprep.mubr.msk.bf16.mxu0 %vm334_vm1, %v333_v0 }
  0x14   :  { %68 = vperm.xlu0 %324, %v33_v15   ;;  %73 = vperm.xlu1 %325, %v34_v16  }
  0x18   :  { %78 = vperm.xlu0 %324, %v35_v17  }
  0x1a   :  { %306 = vmatmul.mubr.msk.bf16.gmra.mrb[8].mxu0 %vm113_vm2, %v332_v18 }
  0x85   :  { %v39_v19 = vpop.permute.xlu0 %38  ;;  %v49_v20 = vpop.permute.xlu1 %48 }
  0x8b   :  { %v44_v21 = vpop.permute.xlu0 %43  ;;  %v54_v22 = vpop.permute.xlu1 %53 }
  0x8f   :  { %v59_v23 = vpop.permute.xlu0 %58  ;;  %v64_v24 = vpop.permute.xlu1 %63 }
  0x93   :  { %v69_v25 = vpop.permute.xlu0 %68  ;;  %v74_v26 = vpop.permute.xlu1 %73 }
  0x97   :  { %v79_v43 = vpop.permute.xlu0 %78 }
  0xdd   :  { %v167_v27 = vpop.f32.mrb[0].mxu0  ;;  %v191_v28 = vpop.f32.mrb[0].mxu1 }
  0xde   :  { %v168_v29 = vadd.f32 %v167_v27, %v39_v19  ;;  %v299_v30 = vpop.f32.mrb[1].mxu0  ;;  %v192_v31 = vadd.f32 %v191_v28, %v69_v25  ;;  %v311_v32 = vpop.f32.mrb[1].mxu1 }
  0xdf   :  { %v170_v33 = vpop.f32.mrb[2].mxu0  ;;  %v194_v34 = vpop.f32.mrb[2].mxu1 }
  0xe0   :  { %v277_v35 = vpack.c.bf16 %v168_v29, %v168_v29  ;;  %v171_v36 = vadd.f32 %v170_v33, %v44_v21  ;;  %v283_v37 = vpack.c.bf16 %v192_v31, %v192_v31  ;;  %v300_v38 = vpop.f32.mrb[3].mxu0  ;;  %v195_v39 = vadd.f32 %v194_v34, %v74_v26  ;;  %v312_v40 = vpop.f32.mrb[3].mxu1 }
  0xe2   :  { %243 = vst.msk [vmem:[%s453_s3] sm:$0xf] %vm242_vm3, %v277_v35  ;;  %v278_v41 = vpack.c.bf16 %v171_v36, %v171_v36  ;;  %249 = vst.msk [vmem:[%s453_s3 + $0x18] sm:$0xf] %vm242_vm3, %v283_v37  ;;  %v284_v42 = vpack.c.bf16 %v195_v39, %v195_v39 }
  0xe4   :  { %244 = vst.msk [vmem:[%s453_s3 + $0x4] sm:$0xf] %vm242_vm3, %v278_v41  ;;  %250 = vst.msk [vmem:[%s453_s3 + $0x1c] sm:$0xf] %vm242_vm3, %v284_v42 }
  0xe5   :  { %v175_v44 = vpop.f32.mrb[4].mxu0  ;;  %v199_v45 = vpop.f32.mrb[4].mxu1 }
  0xe6   :  { %v176_v46 = vadd.f32 %v175_v44, %v49_v20  ;;  %v200_v47 = vadd.f32 %v199_v45, %v79_v43  ;;  %v303_v48 = vpop.f32.mrb[5].mxu0  ;;  %v315_v49 = vpop.f32.mrb[5].mxu1 }
  0xe7   :  { %v178_v50 = vpop.f32.mrb[6].mxu0  ;;  %v202_v51 = vpop.f32.mrb[6].mxu1 }
  0xe8   :  { %v279_v52 = vpack.c.bf16 %v176_v46, %v176_v46  ;;  %v285_v53 = vpack.c.bf16 %v200_v47, %v200_v47  ;;  %v179_v54 = vadd.f32 %v178_v50, %v54_v22  ;;  %v304_v55 = vpop.f32.mrb[7].mxu0  ;;  %v316_v56 = vpop.f32.mrb[7].mxu1 }
  0xea   :  { %245 = vst.msk [vmem:[%s453_s3 + $0x8] sm:$0xf] %vm242_vm3, %v279_v52  ;;  %251 = vst.msk [vmem:[%s453_s3 + $0x20] sm:$0xf] %vm242_vm3, %v285_v53  ;;  %v280_v57 = vpack.c.bf16 %v179_v54, %v179_v54 }
  0xec   :  { %246 = vst.msk [vmem:[%s453_s3 + $0xc] sm:$0xf] %vm242_vm3, %v280_v57 }
  0xed   :  { %v183_v58 = vpop.f32.mrb[8].mxu0 }
  0xee   :  { %v184_v59 = vadd.f32 %v183_v58, %v59_v23  ;;  %v307_v60 = vpop.f32.mrb[9].mxu0 }
  0xef   :  { %v186_v61 = vpop.f32.mrb[10].mxu0 }
  0xf0   :  { %v281_v62 = vpack.c.bf16 %v184_v59, %v184_v59  ;;  %v187_v63 = vadd.f32 %v186_v61, %v64_v24  ;;  %v308_v0 = vpop.f32.mrb[11].mxu0 }
  0xf2   :  { %247 = vst.msk [vmem:[%s453_s3 + $0x10] sm:$0xf] %vm242_vm3, %v281_v62  ;;  %v282_v1 = vpack.c.bf16 %v187_v63, %v187_v63 }
  0xf4   :  { %248 = vst.msk [vmem:[%s453_s3 + $0x14] sm:$0xf] %vm242_vm3, %v282_v1 }

// kernel: _lambda_.47
= control target key start
LH: loop header
LB: loop body
LE: loop exit
PB: predicated region body
PF: predicated region fallthrough
CT: control target
= control target key end

     0   :  { %v184_v0 = vmov 0   ;;  %vm59_vm0 = vcmask 195584   ;;  %vm66_vm1 = vcmask 1043456   ;;  %vm140_vm2 = vcmask 257024   ;;  %s248_s1 = inlined_call_operand.vmem [shape: bf16[24,32], index: 1, kind: input, shape index: {}]   ;;  %s249_s0 = inlined_call_operand.vmem [shape: bf16[24,24], index: 0, kind: input, shape index: {}]   ;;  %s250_s2 = inlined_call_operand.vmem [shape: f32[24,1], index: 2, kind: input, shape index: {}]   ;;  %s251_s3 = inlined_call_operand.vmem [shape: bf16[24,32], index: 3, kind: input, shape index: {}]   ;;  %s252_s4 = inlined_call_operand.vmem [shape: bf16[24,32], index: 4, kind: output, shape index: {}]  }
   0x1   :  { %178 = vset.pattern.permute.xlu0 %v184_v0  ;;  %179 = vset.pattern.permute.xlu1 %v184_v0  ;;  %v180_v1 = vld [vmem:[%s248_s1] sm:$0xff]   ;;  %v181_v2 = vld [vmem:[%s248_s1 + $0x8] ss:$0 sps:$4 sm:$0xff]   ;;  %v26_v5 = vld [vmem:[%s250_s2 + $0x10] sm:$0xff] }
   0x2   :  { %v182_v3 = vld [vmem:[%s249_s0] sm:$0xff]   ;;  %168 = vmatprep.subr.bf16.mxu0 %v180_v1  ;;  %v68_v6 = vsel %vm66_vm1, %v181_v2, 0  ;;  %v25_v7 = vld [vmem:[%s250_s2 + $0x8] sm:$0xff]  ;;  %39 = vperm.xlu1 %179, %v26_v5  }
   0x3   :  { %v24_v4 = vld [vmem:[%s250_s2] sm:$0xff]  ;;  %169 = vmatpush3.bf16.msra.mxu0 %v180_v1  ;;  %172 = vmatprep.mubr.msk.bf16.mxu0 %vm59_vm0, %v182_v3  ;;  %v183_v8 = vld [vmem:[%s249_s0 + $0x8] ss:$0 sps:$4 sm:$0xff]  }
   0x4   :  { %176 = vmatprep.subr.msk.bf16.mxu0 %vm66_vm1, %v181_v2  ;;  %29 = vperm.xlu0 %178, %v24_v4   ;;  %v120_v9 = vld [vmem:[%s251_s3 + $0x8] sm:$0xf]  ;;  %v161_v11 = vld [vmem:[%s251_s3] sm:$0xff]  }
   0x5   :  { %v123_v13 = vunpack.c.l.bf16 %v120_v9  ;;  %v162_v15 = vunpack.c.l.bf16 %v161_v11  ;;  %v163_v20 = vunpack.c.h.bf16 %v161_v11 }
   0x7   :  { %171 = vmatpush3.bf16.msra.mxu0 %v68_v6 }
   0x8   :  { %34 = vperm.xlu0 %178, %v25_v7  }
   0xa   :  { %173 = vmatmul.mubr.msk.bf16.vlgmr.msra.gmra.mrb[0].mxu0 %vm59_vm0, %v183_v8 }
  0x81   :  { %v40_v12 = vpop.permute.xlu1 %39 }
  0x83   :  { %v30_v10 = vpop.permute.xlu0 %29 }
  0x87   :  { %v35_v21 = vpop.permute.xlu0 %34 }
  0xdd   :  { %v174_v14 = vpop.f32.mrb[0].mxu0 }
  0xde   :  { %v113_v16 = vadd.f32 %v174_v14, %v40_v12  ;;  %v104_v17 = vpop.f32.mrb[1].mxu0 }
  0xdf   :  { %v105_v18 = vadd.f32 %v104_v17, %v30_v10  ;;  %v175_v19 = vpop.f32.mrb[2].mxu0 }
  0xe0   :  { %v126_v22 = vadd.f32 %v123_v13, %v113_v16  ;;  %v107_v23 = vpop.f32.mrb[3].mxu0 }
  0xe1   :  { %v124_v24 = vadd.f32 %v162_v15, %v105_v18  ;;  %v108_v25 = vadd.f32 %v107_v23, %v35_v21 }
  0xe2   :  { %v159_v26 = vpack.c.bf16 %v126_v22, %v126_v22 }
  0xe3   :  { %v157_v27 = vpack.c.bf16 %v124_v24, %v124_v24  ;;  %v125_v28 = vadd.f32 %v163_v20, %v108_v25 }
  0xe4   :  { %143 = vst.msk [vmem:[%s252_s4 + $0x8] sm:$0xf] %vm140_vm2, %v159_v26 }
  0xe5   :  { %141 = vst.msk [vmem:[%s252_s4] sm:$0xf] %vm140_vm2, %v157_v27  ;;  %v158_v29 = vpack.c.bf16 %v125_v28, %v125_v28 }
  0xe7   :  { %142 = vst.msk [vmem:[%s252_s4 + $0x4] sm:$0xf] %vm140_vm2, %v158_v29 }

// kernel: _lambda_.53
= control target key start
LH: loop header
LB: loop body
LE: loop exit
PB: predicated region body
PF: predicated region fallthrough
CT: control target
= control target key end

     0   :  { %v333_v0 = vmov 0   ;;  %vm173_vm0 = vcmask 785408   ;;  %vm245_vm1 = vcmask 257024   ;;  %s462_s1 = inlined_call_operand.vmem [shape: bf16[224,32], index: 1, kind: input, shape index: {}]   ;;  %s463_s0 = inlined_call_operand.vmem [shape: bf16[32,224], index: 0, kind: input, shape index: {}]   ;;  %s464_s2 = inlined_call_operand.vmem [shape: f32[32,1], index: 2, kind: input, shape index: {}]   ;;  %s465_s3 = inlined_call_operand.vmem [shape: bf16[32,32], index: 3, kind: output, shape index: {}]  }
   0x1   :  { %180 = vmatprep.subr.bf16.mxu0 %v333_v0  ;;  %282 = vmatprep.subr.bf16.mxu1 %v333_v0  ;;  %v313_v1 = vld [vmem:[%s462_s1] sm:$0xff]   ;;  %v314_v2 = vld [vmem:[%s462_s1 + $0x8] sm:$0xff]   ;;  %v315_v3 = vld [vmem:[%s462_s1 + $0x10] sm:$0xff]  }
   0x2   :  { %312 = vset.pattern.permute.xlu1 %v333_v0  ;;  %311 = vset.pattern.permute.xlu0 %v333_v0  ;;  %v316_v4 = vld [vmem:[%s462_s1 + $0x18] sm:$0xff]   ;;  %v317_v5 = vld [vmem:[%s462_s1 + $0x20] sm:$0xff]   ;;  %v49_v8 = vld [vmem:[%s464_s2 + $0x10] sm:$0xff] }
   0x3   :  { %181 = vmatpush1.bf16.msra.mxu0 %v313_v1  ;;  %296 = vmatpush1.bf16.msra.mxu1 %v313_v1  ;;  %v329_v6 = vld [vmem:[%s463_s0 + $0x4] ss:$8 sps:$4 sm:$0xff]   ;;  %v332_v7 = vld [vmem:[%s463_s0 + $0x14] ss:$8 sps:$4 sm:$0xff]   ;;  %v327_v21 = vld [vmem:[%s463_s0] ss:$8 sps:$4 sm:$0xff]  }
   0x4   :  { %182 = vmatprep.subr.bf16.mxu0 %v333_v0  ;;  %283 = vmatprep.subr.bf16.mxu1 %v333_v0  ;;  %v47_v9 = vld [vmem:[%s464_s2] sm:$0xff]  ;;  %v318_v10 = vld [vmem:[%s462_s1 + $0x28] sm:$0xff]   ;;  %v50_v11 = vld [vmem:[%s464_s2 + $0x18] sm:$0xff] }
   0x5   :  { %272 = vmatprep.mubr.msk.bf16.mxu0 %vm173_vm0, %v329_v6  ;;  %63 = vperm.xlu1 %312, %v49_v8   ;;  %v48_v12 = vld [vmem:[%s464_s2 + $0x8] sm:$0xff]  ;;  %v319_v13 = vld [vmem:[%s462_s1 + $0x30] sm:$0xff]   ;;  %v320_v14 = vld [vmem:[%s462_s1 + $0x38] sm:$0xff]  }
   0x6   :  { %273 = vmatprep.mubr.msk.bf16.mxu1 %vm173_vm0, %v332_v7  ;;  %53 = vperm.xlu0 %311, %v47_v9   ;;  %v321_v15 = vld [vmem:[%s462_s1 + $0x40] sm:$0xff]   ;;  %v322_v16 = vld [vmem:[%s462_s1 + $0x48] sm:$0xff]   ;;  %v323_v17 = vld [vmem:[%s462_s1 + $0x50] sm:$0xff]  }
   0x7   :  { %183 = vmatpush1.bf16.msra.mxu0 %v314_v2  ;;  %297 = vmatpush1.bf16.msra.mxu1 %v314_v2  ;;  %v324_v18 = vld [vmem:[%s462_s1 + $0x58] sm:$0xff]   ;;  %v325_v19 = vld [vmem:[%s462_s1 + $0x60] sm:$0xff]   ;;  %v326_v20 = vld [vmem:[%s462_s1 + $0x68] sm:$0xff]  }
   0x8   :  { %184 = vmatprep.subr.bf16.mxu0 %v333_v0  ;;  %284 = vmatprep.subr.bf16.mxu1 %v333_v0  ;;  %v330_v22 = vld [vmem:[%s463_s0 + $0x10] ss:$8 sps:$4 sm:$0xff]  }
   0x9   :  { %68 = vperm.xlu1 %312, %v50_v11  }
   0xa   :  { %58 = vperm.xlu0 %311, %v48_v12  }
   0xb   :  { %185 = vmatpush1.bf16.msra.mxu0 %v315_v3  ;;  %298 = vmatpush1.bf16.msra.mxu1 %v315_v3 }
   0xc   :  { %186 = vmatprep.subr.bf16.mxu0 %v333_v0  ;;  %285 = vmatprep.subr.bf16.mxu1 %v333_v0 }
   0xf   :  { %187 = vmatpush1.bf16.msra.mxu0 %v316_v4  ;;  %299 = vmatpush1.bf16.msra.mxu1 %v316_v4 }
  0x10   :  { %188 = vmatprep.subr.bf16.mxu0 %v333_v0  ;;  %286 = vmatprep.subr.bf16.mxu1 %v333_v0 }
  0x13   :  { %189 = vmatpush1.bf16.msra.mxu0 %v317_v5  ;;  %300 = vmatpush1.bf16.msra.mxu1 %v317_v5 }
  0x14   :  { %190 = vmatprep.subr.bf16.mxu0 %v333_v0  ;;  %287 = vmatprep.subr.bf16.mxu1 %v333_v0 }
  0x17   :  { %191 = vmatpush1.bf16.msra.mxu0 %v318_v10  ;;  %301 = vmatpush1.bf16.msra.mxu1 %v318_v10 }
  0x18   :  { %192 = vmatprep.subr.bf16.mxu0 %v333_v0  ;;  %288 = vmatprep.subr.bf16.mxu1 %v333_v0 }
  0x1b   :  { %193 = vmatpush1.bf16.msra.mxu0 %v319_v13  ;;  %302 = vmatpush1.bf16.msra.mxu1 %v319_v13 }
  0x1c   :  { %194 = vmatprep.subr.bf16.mxu0 %v333_v0  ;;  %289 = vmatprep.subr.bf16.mxu1 %v333_v0 }
  0x1f   :  { %195 = vmatpush1.bf16.msra.mxu0 %v320_v14  ;;  %303 = vmatpush1.bf16.msra.mxu1 %v320_v14 }
  0x20   :  { %196 = vmatprep.subr.bf16.mxu0 %v333_v0  ;;  %290 = vmatprep.subr.bf16.mxu1 %v333_v0 }
  0x23   :  { %197 = vmatpush1.bf16.msra.mxu0 %v321_v15  ;;  %304 = vmatpush1.bf16.msra.mxu1 %v321_v15 }
  0x24   :  { %198 = vmatprep.subr.bf16.mxu0 %v333_v0  ;;  %291 = vmatprep.subr.bf16.mxu1 %v333_v0 }
  0x27   :  { %199 = vmatpush1.bf16.msra.mxu0 %v322_v16  ;;  %305 = vmatpush1.bf16.msra.mxu1 %v322_v16 }
  0x28   :  { %200 = vmatprep.subr.bf16.mxu0 %v333_v0  ;;  %292 = vmatprep.subr.bf16.mxu1 %v333_v0 }
  0x2b   :  { %201 = vmatpush1.bf16.msra.mxu0 %v323_v17  ;;  %306 = vmatpush1.bf16.msra.mxu1 %v323_v17 }
  0x2c   :  { %202 = vmatprep.subr.bf16.mxu0 %v333_v0  ;;  %293 = vmatprep.subr.bf16.mxu1 %v333_v0 }
  0x2f   :  { %203 = vmatpush1.bf16.msra.mxu0 %v324_v18  ;;  %307 = vmatpush1.bf16.msra.mxu1 %v324_v18 }
  0x30   :  { %204 = vmatprep.subr.bf16.mxu0 %v333_v0  ;;  %294 = vmatprep.subr.bf16.mxu1 %v333_v0 }
  0x33   :  { %205 = vmatpush1.bf16.msra.mxu0 %v325_v19  ;;  %308 = vmatpush1.bf16.msra.mxu1 %v325_v19 }
  0x34   :  { %206 = vmatprep.subr.bf16.mxu0 %v333_v0  ;;  %295 = vmatprep.subr.bf16.mxu1 %v333_v0 }
  0x37   :  { %207 = vmatpush1.bf16.msra.mxu0 %v326_v20  ;;  %309 = vmatpush1.bf16.msra.mxu1 %v326_v20 }
  0x3a   :  { %213 = vmatmul.mubr.bf16.vlgmr.msra.gmra.mrb[0].mxu0 %v327_v21  ;;  %221 = vmatmul.mubr.bf16.vlgmr.msra.gmra.mrb[0].mxu1 %v330_v22 }
  0x84   :  { %v64_v23 = vpop.permute.xlu1 %63 }
  0x85   :  { %v54_v24 = vpop.permute.xlu0 %53 }
  0x88   :  { %v69_v25 = vpop.permute.xlu1 %68 }
  0x89   :  { %v59_v26 = vpop.permute.xlu0 %58 }
 0x10d   :  { %v214_v27 = vpop.f32.mrb[0].mxu0  ;;  %v222_v28 = vpop.f32.mrb[0].mxu1 }
 0x10e   :  { %v215_v29 = vadd.f32 %v214_v27, %v54_v24  ;;  %v223_v30 = vadd.f32 %v222_v28, %v64_v23  ;;  %v216_v31 = vpop.f32.mrb[1].mxu0  ;;  %v224_v32 = vpop.f32.mrb[1].mxu1 }
 0x10f   :  { %v217_v33 = vpop.f32.mrb[2].mxu0  ;;  %v225_v34 = vpop.f32.mrb[2].mxu1 }
 0x110   :  { %v278_v35 = vpack.c.bf16 %v215_v29, %v215_v29  ;;  %v280_v36 = vpack.c.bf16 %v223_v30, %v223_v30  ;;  %v218_v37 = vadd.f32 %v217_v33, %v59_v26  ;;  %v226_v38 = vadd.f32 %v225_v34, %v69_v25  ;;  %v219_v39 = vpop.f32.mrb[3].mxu0  ;;  %v227_v40 = vpop.f32.mrb[3].mxu1 }
 0x112   :  { %246 = vst.msk [vmem:[%s465_s3] sm:$0xf] %vm245_vm1, %v278_v35  ;;  %248 = vst.msk [vmem:[%s465_s3 + $0x8] sm:$0xf] %vm245_vm1, %v280_v36  ;;  %v279_v41 = vpack.c.bf16 %v218_v37, %v218_v37  ;;  %v281_v42 = vpack.c.bf16 %v226_v38, %v226_v38 }
 0x114   :  { %247 = vst.msk [vmem:[%s465_s3 + $0x4] sm:$0xf] %vm245_vm1, %v279_v41  ;;  %249 = vst.msk [vmem:[%s465_s3 + $0xc] sm:$0xf] %vm245_vm1, %v281_v42 }

// kernel: _lambda_.46
= control target key start
LH: loop header
LB: loop body
LE: loop exit
PB: predicated region body
PF: predicated region fallthrough
CT: control target
= control target key end

     0   :  { %v117_v0 = vlaneseq  ;;  %v3814_v1 = vmov 1966171168   ;;  %vm468_vm0 = vcmask 1041409   ;;  %vm471_vm1 = vcmask 1042434   ;;  %s5016_s0 = inlined_call_operand.vmem [shape: bf16[72,2,16], index: 0, kind: input, shape index: {}]   ;;  %s5017_s1 = inlined_call_operand.vmem [shape: bf16[24,2,16], index: 1, kind: output, shape index: {}]  }
   0x1   :  { %v115_v2 = vunpack.c.l.s4 %v3814_v1  ;;  %v3528_v3 = vld.sshfl [vmem:[%s5016_s0] sm:$0x1 pattern:$0x75316420]  ;;  %vm474_vm2 = vcmask 1043459   ;;  %v3815_v11 = vmov 0.0  }
   0x2   :  { %v3529_v4 = vld.sshfl [vmem:[%s5016_s0 + $0x1] sm:$0x1 pattern:$0x75316420]  ;;  %v118_v5 = vshrl.u32 %v117_v0, 7  ;;  %3764 = vmatprep.subr.bf16.mxu0 %v3815_v11  ;;  %vm477_vm3 = vcmask 1044484  }
   0x3   :  { %v3530_v6 = vld.sshfl [vmem:[%s5016_s0 + $0x2] sm:$0x1 pattern:$0x75316420]  ;;  %v116_v7 = vunpack.c.0.s8 %v115_v2  ;;  %vm480_vm4 = vcmask 1045509   ;;  %vm3816_vm5 = vmmov 0  }
   0x4   :  { %v3531_v8 = vld.sshfl [vmem:[%s5016_s0 + $0x3] sm:$0x1 pattern:$0x75316420]  ;;  %3768 = vmatprep.mubr.msk.bf16.mxu0 %vm3816_vm5, %v3815_v11  ;;  %vm483_vm6 = vcmask 1046534   ;;  %vm486_vm7 = vcmask 1047559  }
   0x5   :  { %v3532_v9 = vld.sshfl [vmem:[%s5016_s0 + $0x4] sm:$0x1 pattern:$0x75316420]  ;;  %v3842_v10 = vsub.s32 %v116_v7, %v118_v5  ;;  %vm969_vm8 = vcmask 1043456   ;;  %vm965_vm9 = vcmask 195584  }
   0x6   :  { %v3533_v12 = vld.sshfl [vmem:[%s5016_s0 + $0x5] sm:$0x1 pattern:$0x75316420]  ;;  %vm1016_vm10 = vcmask 130048   ;;  %vm1674_vm11 = vcmask 122880  }
   0x7   :  { %v3534_v13 = vld.sshfl [vmem:[%s5016_s0 + $0x6] sm:$0x1 pattern:$0x75316420]  ;;  %v120_v14 = vrot.slane %v3528_v3, %v3842_v10  ;;  %v134_v15 = vrot.slane %v3529_v4, %v3842_v10  ;;  %v148_v16 = vrot.slane %v3530_v6, %v3842_v10  ;;  %v162_v17 = vrot.slane %v3531_v8, %v3842_v10 }
   0x8   :  { %v3535_v18 = vld.sshfl [vmem:[%s5016_s0 + $0x7] sm:$0x1 pattern:$0x75316420]  ;;  %v176_v19 = vrot.slane %v3532_v9, %v3842_v10  ;;  %v190_v20 = vrot.slane %v3533_v12, %v3842_v10  ;;  %v204_v21 = vrot.slane %v3534_v13, %v3842_v10  ;;  %vm1675_vm12 = vsmask.f32 256 }
   0x9   :  { %v3536_v22 = vld.sshfl [vmem:[%s5016_s0 + $0x8] sm:$0x1 pattern:$0x75316420]  ;;  %v218_v23 = vrot.slane %v3535_v18, %v3842_v10  ;;  %v3867_v24 = vunpack.c.l.b16 %v120_v14  ;;  %v3869_v25 = vunpack.c.l.b16 %v134_v15  ;;  %v3871_v26 = vunpack.c.l.b16 %v148_v16  ;;  %vm4512_vm13 = vmand %vm1674_vm11, %vm1675_vm12 }
   0xa   :  { %v3537_v27 = vld.sshfl [vmem:[%s5016_s0 + $0x9] sm:$0x1 pattern:$0x75316420]  ;;  %v232_v28 = vrot.slane %v3536_v22, %v3842_v10  ;;  %v3877_v29 = vunpack.c.l.b16 %v162_v17  ;;  %v3879_v30 = vunpack.c.l.b16 %v176_v19  ;;  %v3881_v31 = vunpack.c.l.b16 %v190_v20 }
   0xb   :  { %v3538_v32 = vld.sshfl [vmem:[%s5016_s0 + $0xa] sm:$0x1 pattern:$0x75316420]  ;;  %v246_v33 = vrot.slane %v3537_v27, %v3842_v10  ;;  %v3887_v34 = vunpack.c.l.b16 %v204_v21  ;;  %v3889_v35 = vunpack.c.l.b16 %v218_v23  ;;  %v467_v36 = vrot.slane %v3869_v25, 7 }
   0xc   :  { %v3539_v37 = vld.sshfl [vmem:[%s5016_s0 + $0xb] sm:$0x1 pattern:$0x75316420]  ;;  %v260_v38 = vrot.slane %v3538_v32, %v3842_v10  ;;  %v3896_v39 = vunpack.c.l.b16 %v232_v28  ;;  %v470_v40 = vrot.slane %v3871_v26, 6  ;;  %v473_v41 = vrot.slane %v3877_v29, 5 }
   0xd   :  { %v3540_v42 = vld.sshfl [vmem:[%s5016_s0 + $0xc] sm:$0x1 pattern:$0x75316420]  ;;  %v274_v43 = vrot.slane %v3539_v37, %v3842_v10  ;;  %v3904_v44 = vunpack.c.l.b16 %v246_v33  ;;  %v469_v45 = vsel %vm468_vm0, %v467_v36, %v3867_v24  ;;  %v476_v46 = vrot.slane %v3879_v30, 4 }
   0xe   :  { %v3541_v47 = vld.sshfl [vmem:[%s5016_s0 + $0xd] sm:$0x1 pattern:$0x75316420]  ;;  %v288_v48 = vrot.slane %v3540_v42, %v3842_v10  ;;  %v3913_v49 = vunpack.c.l.b16 %v260_v38  ;;  %v472_v50 = vsel %vm471_vm1, %v470_v40, %v469_v45  ;;  %v479_v51 = vrot.slane %v3881_v31, 3 }
   0xf   :  { %v3542_v52 = vld.sshfl [vmem:[%s5016_s0 + $0xe] sm:$0x1 pattern:$0x75316420]  ;;  %v302_v53 = vrot.slane %v3541_v47, %v3842_v10  ;;  %v3921_v54 = vunpack.c.l.b16 %v274_v43  ;;  %v475_v55 = vsel %vm474_vm2, %v473_v41, %v472_v50  ;;  %v482_v56 = vrot.slane %v3887_v34, 2 }
  0x10   :  { %v3543_v57 = vld.sshfl [vmem:[%s5016_s0 + $0xf] sm:$0x1 pattern:$0x75316420]  ;;  %v316_v58 = vrot.slane %v3542_v52, %v3842_v10  ;;  %v3929_v59 = vunpack.c.l.b16 %v288_v48  ;;  %v478_v60 = vsel %vm477_vm3, %v476_v46, %v475_v55  ;;  %v485_v61 = vrot.slane %v3889_v35, 1 }
  0x11   :  { %v330_v62 = vrot.slane %v3543_v57, %v3842_v10  ;;  %v3934_v63 = vunpack.c.l.b16 %v302_v53  ;;  %v481_v0 = vsel %vm480_vm4, %v479_v51, %v478_v60  ;;  %v488_v1 = vrot.slane %v3904_v44, 7  ;;  %v3544_v2 = vld.sshfl [vmem:[%s5016_s0 + $0x10] sm:$0x1 pattern:$0x75316420] }
  0x12   :  { %v3941_v3 = vunpack.c.l.b16 %v316_v58  ;;  %v484_v4 = vsel %vm483_vm6, %v482_v56, %v481_v0  ;;  %v490_v5 = vrot.slane %v3913_v49, 6  ;;  %v492_v6 = vrot.slane %v3921_v54, 5  ;;  %v3545_v7 = vld.sshfl [vmem:[%s5016_s0 + $0x11] sm:$0x1 pattern:$0x75316420] }
  0x13   :  { %v3949_v8 = vunpack.c.l.b16 %v330_v62  ;;  %v487_v9 = vsel %vm486_vm7, %v485_v61, %v484_v4  ;;  %v489_v12 = vsel %vm468_vm0, %v488_v1, %v3896_v39  ;;  %v494_v13 = vrot.slane %v3929_v59, 4  ;;  %v3546_v14 = vld.sshfl [vmem:[%s5016_s0 + $0x12] sm:$0x1 pattern:$0x75316420] }
  0x14   :  { %v491_v15 = vsel %vm471_vm1, %v490_v5, %v489_v12  ;;  %v496_v16 = vrot.slane %v3934_v63, 3  ;;  %v498_v17 = vrot.slane %v3941_v3, 2  ;;  %v3547_v18 = vld.sshfl [vmem:[%s5016_s0 + $0x13] sm:$0x1 pattern:$0x75316420]  ;;  %v344_v19 = vrot.slane %v3544_v2, %v3842_v10 }
  0x15   :  { %v493_v20 = vsel %vm474_vm2, %v492_v6, %v491_v15  ;;  %v500_v21 = vrot.slane %v3949_v8, 1  ;;  %v3548_v22 = vld.sshfl [vmem:[%s5016_s0 + $0x14] sm:$0x1 pattern:$0x75316420]  ;;  %v358_v23 = vrot.slane %v3545_v7, %v3842_v10  ;;  %v372_v27 = vrot.slane %v3546_v14, %v3842_v10 }
  0x16   :  { %v495_v28 = vsel %vm477_vm3, %v494_v13, %v493_v20  ;;  %v3549_v32 = vld.sshfl [vmem:[%s5016_s0 + $0x15] sm:$0x1 pattern:$0x75316420]  ;;  %v386_v33 = vrot.slane %v3547_v18, %v3842_v10  ;;  %v400_v36 = vrot.slane %v3548_v22, %v3842_v10  ;;  %v3978_v37 = vunpack.c.l.b16 %v344_v19 }
  0x17   :  { %v497_v38 = vsel %vm480_vm4, %v496_v16, %v495_v28  ;;  %v3550_v40 = vld.sshfl [vmem:[%s5016_s0 + $0x16] sm:$0x1 pattern:$0x75316420]  ;;  %v414_v41 = vrot.slane %v3549_v32, %v3842_v10  ;;  %v3985_v42 = vunpack.c.l.b16 %v358_v23  ;;  %v3987_v43 = vunpack.c.l.b16 %v372_v27 }
  0x18   :  { %v499_v45 = vsel %vm483_vm6, %v498_v17, %v497_v38  ;;  %v3551_v46 = vld.sshfl [vmem:[%s5016_s0 + $0x17] sm:$0x1 pattern:$0x75316420]  ;;  %v428_v47 = vrot.slane %v3550_v40, %v3842_v10  ;;  %v3994_v48 = vunpack.c.l.b16 %v386_v33  ;;  %v3996_v50 = vunpack.c.l.b16 %v400_v36 }
  0x19   :  { %v501_v51 = vsel %vm486_vm7, %v500_v21, %v499_v45  ;;  %v442_v52 = vrot.slane %v3551_v46, %v3842_v10  ;;  %v4000_v53 = vunpack.c.l.b16 %v414_v41  ;;  %v502_v55 = vrot.slane %v3985_v42, 7  ;;  %v3555_v33 = vld.sshfl [vmem:[%s5016_s0 + $0x1b] sm:$0x1 pattern:$0x75316420] }
  0x1a   :  { %v516_v56 = vpack.c.b16 %v501_v51, %v487_v9  ;;  %v4003_v57 = vunpack.c.l.b16 %v428_v47  ;;  %v504_v58 = vrot.slane %v3987_v43, 6  ;;  %v506_v60 = vrot.slane %v3994_v48, 5  ;;  %v3558_v45 = vld.sshfl [vmem:[%s5016_s0 + $0x1e] sm:$0x1 pattern:$0x75316420] }
  0x1b   :  { %v4007_v61 = vunpack.c.l.b16 %v442_v52  ;;  %v503_v62 = vsel %vm468_vm0, %v502_v55, %v3978_v37  ;;  %v508_v0 = vrot.slane %v3996_v50, 4  ;;  %v510_v1 = vrot.slane %v4000_v53, 3  ;;  %v3559_v51 = vld.sshfl [vmem:[%s5016_s0 + $0x1f] sm:$0x1 pattern:$0x75316420] }
  0x1c   :  { %520 = vxpose.xlu0.c.b16.start [1/2] (short) (narrow) %v516_v56, 16  ;;  %v505_v2 = vsel %vm471_vm1, %v504_v58, %v503_v62  ;;  %v512_v4 = vrot.slane %v4003_v57, 2  ;;  %v2205_v5 = vrot.slane %v3867_v24, 1  ;;  %v2207_v6 = vrot.slane %v3871_v26, 7 }
  0x1d   :  { %v507_v7 = vsel %vm474_vm2, %v506_v60, %v505_v2  ;;  %v514_v9 = vrot.slane %v4007_v61, 1  ;;  %v2209_v12 = vrot.slane %v3877_v29, 6  ;;  %v2211_v13 = vrot.slane %v3879_v30, 5 }
  0x1e   :  { %v509_v14 = vsel %vm477_vm3, %v508_v0, %v507_v7  ;;  %v2206_v15 = vsel %vm468_vm0, %v3869_v25, %v2205_v5  ;;  %v2213_v16 = vrot.slane %v3881_v31, 4  ;;  %v2215_v17 = vrot.slane %v3887_v34, 3  ;;  %v3560_v52 = vld.sshfl [vmem:[%s5016_s0 + $0x20] sm:$0x1 pattern:$0x75316420] }
  0x1f   :  { %v511_v24 = vsel %vm480_vm4, %v510_v1, %v509_v14  ;;  %v2208_v26 = vsel %vm471_vm1, %v2207_v6, %v2206_v15  ;;  %v2217_v18 = vrot.slane %v3889_v35, 2  ;;  %v2219_v19 = vrot.slane %v3896_v39, 1  ;;  %v3562_v62 = vld.sshfl [vmem:[%s5016_s0 + $0x22] sm:$0x1 pattern:$0x75316420] }
  0x20   :  { %v513_v29 = vsel %vm483_vm6, %v512_v4, %v511_v24  ;;  %v2210_v30 = vsel %vm474_vm2, %v2209_v12, %v2208_v26  ;;  %v2221_v20 = vrot.slane %v3913_v49, 7  ;;  %v2223_v25 = vrot.slane %v3921_v54, 6  ;;  %v3552_v49 = vld.sshfl [vmem:[%s5016_s0 + $0x18] sm:$0x1 pattern:$0x75316420] }
  0x21   :  { %v515_v31 = vsel %vm486_vm7, %v514_v9, %v513_v29  ;;  %v2212_v34 = vsel %vm477_vm3, %v2211_v13, %v2210_v30  ;;  %v2220_v21 = vsel %vm468_vm0, %v3904_v44, %v2219_v19  ;;  %v2225_v22 = vrot.slane %v3929_v59, 5  ;;  %v3553_v54 = vld.sshfl [vmem:[%s5016_s0 + $0x19] sm:$0x1 pattern:$0x75316420] }
  0x22   :  { %v517_v35 = vpack.c.b16 %v515_v31, %v515_v31  ;;  %v2214_v39 = vsel %vm480_vm4, %v2213_v16, %v2212_v34  ;;  %v2222_v23 = vsel %vm471_vm1, %v2221_v20, %v2220_v21  ;;  %v2227_v27 = vrot.slane %v3934_v63, 4  ;;  %v3554_v63 = vld.sshfl [vmem:[%s5016_s0 + $0x1a] sm:$0x1 pattern:$0x75316420] }
  0x23   :  { %v2216_v28 = vsel %vm483_vm6, %v2215_v17, %v2214_v39  ;;  %v2224_v44 = vsel %vm474_vm2, %v2223_v25, %v2222_v23  ;;  %v2229_v59 = vrot.slane %v3941_v3, 3  ;;  %v2231_v32 = vrot.slane %v3949_v8, 2  ;;  %v3556_v3 = vld.sshfl [vmem:[%s5016_s0 + $0x1c] sm:$0x1 pattern:$0x75316420] }
  0x24   :  { %521 = vxpose.xlu0.c.b16.end [2/2] (short) (narrow) %v517_v35, 16  ;;  %v2218_v36 = vsel %vm486_vm7, %v2217_v18, %v2216_v28  ;;  %v2226_v38 = vsel %vm477_vm3, %v2225_v22, %v2224_v44  ;;  %v2233_v40 = vrot.slane %v3978_v37, 1  ;;  %v2235_v41 = vrot.slane %v3987_v43, 7 }
  0x25   :  { %v3557_v8 = vld.sshfl [vmem:[%s5016_s0 + $0x1d] sm:$0x1 pattern:$0x75316420]  ;;  %v2228_v46 = vsel %vm480_vm4, %v2227_v27, %v2226_v38  ;;  %v2237_v47 = vrot.slane %v3994_v48, 6  ;;  %v2239_v37 = vrot.slane %v3996_v50, 5  ;;  %v573_v0 = vrot.slane %v3552_v49, %v3842_v10 }
  0x26   :  { %v2241_v43 = vrot.slane %v4000_v53, 4  ;;  %v2230_v55 = vsel %vm483_vm6, %v2229_v59, %v2228_v46  ;;  %v2234_v56 = vsel %vm468_vm0, %v3985_v42, %v2233_v40  ;;  %v2243_v58 = vrot.slane %v4003_v57, 3  ;;  %v3561_v50 = vld.sshfl [vmem:[%s5016_s0 + $0x21] sm:$0x1 pattern:$0x75316420] }
  0x27   :  { %v2245_v48 = vrot.slane %v4007_v61, 2  ;;  %v2232_v53 = vsel %vm486_vm7, %v2231_v32, %v2230_v55  ;;  %v2236_v60 = vsel %vm471_vm1, %v2235_v41, %v2234_v56  ;;  %v587_v42 = vrot.slane %v3553_v54, %v3842_v10  ;;  %v3563_v61 = vld.sshfl [vmem:[%s5016_s0 + $0x23] sm:$0x1 pattern:$0x75316420] }
  0x28   :  { %v2247_v1 = vpack.c.b16 %v2232_v53, %v2218_v36  ;;  %v2238_v57 = vsel %vm474_vm2, %v2237_v47, %v2236_v60  ;;  %v601_v2 = vrot.slane %v3554_v63, %v3842_v10  ;;  %v615_v4 = vrot.slane %v3555_v33, %v3842_v10  ;;  %v3564_v6 = vld.sshfl [vmem:[%s5016_s0 + $0x24] sm:$0x1 pattern:$0x75316420] }
  0x29   :  { %v2240_v5 = vsel %vm477_vm3, %v2239_v37, %v2238_v57  ;;  %v629_v7 = vrot.slane %v3556_v3, %v3842_v10  ;;  %v643_v9 = vrot.slane %v3557_v8, %v3842_v10  ;;  %v657_v12 = vrot.slane %v3558_v45, %v3842_v10  ;;  %v3565_v14 = vld.sshfl [vmem:[%s5016_s0 + $0x25] sm:$0x1 pattern:$0x75316420] }
  0x2a   :  { %2251 = vxpose.xlu1.c.b16.start [1/2] (short) (narrow) %v2247_v1, 16  ;;  %v2242_v13 = vsel %vm480_vm4, %v2241_v43, %v2240_v5  ;;  %v671_v15 = vrot.slane %v3559_v51, %v3842_v10  ;;  %v685_v16 = vrot.slane %v3560_v52, %v3842_v10  ;;  %v699_v17 = vrot.slane %v3561_v50, %v3842_v10  ;;  %v3566_v26 = vld.sshfl [vmem:[%s5016_s0 + $0x26] sm:$0x1 pattern:$0x75316420] }
  0x2b   :  { %v2244_v24 = vsel %vm483_vm6, %v2243_v58, %v2242_v13  ;;  %v713_v18 = vrot.slane %v3562_v62, %v3842_v10  ;;  %v727_v19 = vrot.slane %v3563_v61, %v3842_v10  ;;  %v741_v29 = vrot.slane %v3564_v6, %v3842_v10  ;;  %v3567_v20 = vld.sshfl [vmem:[%s5016_s0 + $0x27] sm:$0x1 pattern:$0x75316420] }
  0x2c   :  { %v2246_v30 = vsel %vm486_vm7, %v2245_v48, %v2244_v24  ;;  %v755_v25 = vrot.slane %v3565_v14, %v3842_v10  ;;  %v769_v31 = vrot.slane %v3566_v26, %v3842_v10  ;;  %v4129_v34 = vunpack.c.l.b16 %v573_v0  ;;  %v3568_v40 = vld.sshfl [vmem:[%s5016_s0 + $0x28] sm:$0x1 pattern:$0x75316420] }
  0x2d   :  { %v2248_v21 = vpack.c.b16 %v2246_v30, %v2246_v30  ;;  %v783_v22 = vrot.slane %v3567_v20, %v3842_v10  ;;  %v4132_v35 = vunpack.c.l.b16 %v587_v42  ;;  %v4134_v39 = vunpack.c.l.b16 %v601_v2  ;;  %v3569_v46 = vld.sshfl [vmem:[%s5016_s0 + $0x29] sm:$0x1 pattern:$0x75316420] }
  0x2e   :  { %v4136_v23 = vunpack.c.l.b16 %v615_v4  ;;  %v4138_v27 = vunpack.c.l.b16 %v629_v7  ;;  %v4140_v49 = vunpack.c.l.b16 %v643_v9  ;;  %v4142_v54 = vunpack.c.l.b16 %v657_v12  ;;  %v3570_v47 = vld.sshfl [vmem:[%s5016_s0 + $0x2a] sm:$0x1 pattern:$0x75316420] }
  0x2f   :  { %2252 = vxpose.xlu1.c.b16.end [2/2] (short) (narrow) %v2248_v21, 16  ;;  %v4144_v28 = vunpack.c.l.b16 %v671_v15  ;;  %v4146_v44 = vunpack.c.l.b16 %v685_v16  ;;  %v4148_v59 = vunpack.c.l.b16 %v699_v17  ;;  %v4150_v32 = vunpack.c.l.b16 %v713_v18  ;;  %v3571_v55 = vld.sshfl [vmem:[%s5016_s0 + $0x2b] sm:$0x1 pattern:$0x75316420] }
  0x30   :  { %v4152_v63 = vunpack.c.l.b16 %v727_v19  ;;  %v4154_v33 = vunpack.c.l.b16 %v741_v29  ;;  %v4156_v36 = vunpack.c.l.b16 %v755_v25  ;;  %v4158_v38 = vunpack.c.l.b16 %v769_v31  ;;  %v3572_v61 = vld.sshfl [vmem:[%s5016_s0 + $0x2c] sm:$0x1 pattern:$0x75316420] }
  0x31   :  { %v4163_v41 = vunpack.c.l.b16 %v783_v22  ;;  %v920_v3 = vrot.slane %v4132_v35, 7  ;;  %v922_v8 = vrot.slane %v4134_v39, 6  ;;  %v924_v45 = vrot.slane %v4136_v23, 5 }
  0x32   :  { %v926_v37 = vrot.slane %v4138_v27, 4  ;;  %v928_v43 = vrot.slane %v4140_v49, 3  ;;  %v930_v51 = vrot.slane %v4142_v54, 2  ;;  %v932_v52 = vrot.slane %v4144_v28, 1 }
  0x33   :  { %v921_v56 = vsel %vm468_vm0, %v920_v3, %v4129_v34  ;;  %v934_v58 = vrot.slane %v4148_v59, 7  ;;  %v936_v48 = vrot.slane %v4150_v32, 6  ;;  %v938_v50 = vrot.slane %v4152_v63, 5 }
  0x34   :  { %v923_v53 = vsel %vm471_vm1, %v922_v8, %v921_v56  ;;  %v940_v60 = vrot.slane %v4154_v33, 4  ;;  %v942_v62 = vrot.slane %v4156_v36, 3  ;;  %v944_v0 = vrot.slane %v4158_v38, 2 }
  0x35   :  { %v925_v42 = vsel %vm474_vm2, %v924_v45, %v923_v53  ;;  %v935_v1 = vsel %vm468_vm0, %v934_v58, %v4146_v44  ;;  %v946_v57 = vrot.slane %v4163_v41, 1  ;;  %v797_v2 = vrot.slane %v3568_v40, %v3842_v10  ;;  %v3573_v6 = vld.sshfl [vmem:[%s5016_s0 + $0x2d] sm:$0x1 pattern:$0x75316420] }
  0x36   :  { %v927_v4 = vsel %vm477_vm3, %v926_v37, %v925_v42  ;;  %v937_v5 = vsel %vm471_vm1, %v936_v48, %v935_v1  ;;  %v811_v7 = vrot.slane %v3569_v46, %v3842_v10  ;;  %v825_v9 = vrot.slane %v3570_v47, %v3842_v10  ;;  %v3574_v14 = vld.sshfl [vmem:[%s5016_s0 + $0x2e] sm:$0x1 pattern:$0x75316420] }
  0x37   :  { %v929_v12 = vsel %vm480_vm4, %v928_v43, %v927_v4  ;;  %v939_v13 = vsel %vm474_vm2, %v938_v50, %v937_v5  ;;  %v839_v15 = vrot.slane %v3571_v55, %v3842_v10  ;;  %v853_v16 = vrot.slane %v3572_v61, %v3842_v10  ;;  %v3575_v26 = vld.sshfl [vmem:[%s5016_s0 + $0x2f] sm:$0x1 pattern:$0x75316420] }
  0x38   :  { %v931_v17 = vsel %vm483_vm6, %v930_v51, %v929_v12  ;;  %v941_v24 = vsel %vm477_vm3, %v940_v60, %v939_v13  ;;  %v867_v18 = vrot.slane %v3573_v6, %v3842_v10  ;;  %v881_v19 = vrot.slane %v3574_v14, %v3842_v10 }
  0x39   :  { %v933_v29 = vsel %vm486_vm7, %v932_v52, %v931_v17  ;;  %v943_v30 = vsel %vm480_vm4, %v942_v62, %v941_v24  ;;  %v895_v20 = vrot.slane %v3575_v26, %v3842_v10  ;;  %v4222_v25 = vunpack.c.l.b16 %v797_v2 }
  0x3a   :  { %v945_v31 = vsel %vm483_vm6, %v944_v0, %v943_v30  ;;  %v913_v21 = vunpack.c.l.b16 %v811_v7  ;;  %v4225_v22 = vunpack.c.l.b16 %v825_v9  ;;  %v4227_v40 = vunpack.c.l.b16 %v839_v15 }
  0x3b   :  { %v947_v3 = vsel %vm486_vm7, %v946_v57, %v945_v31  ;;  %v4230_v8 = vunpack.c.l.b16 %v853_v16  ;;  %v4232_v45 = vunpack.c.l.b16 %v867_v18  ;;  %v4234_v46 = vunpack.c.l.b16 %v881_v19 }
  0x3c   :  { %v962_v47 = vpack.c.b16 %v947_v3, %v933_v29  ;;  %v4236_v37 = vunpack.c.l.b16 %v895_v20  ;;  %v948_v43 = vrot.slane %v913_v21, 7  ;;  %v950_v51 = vrot.slane %v4225_v22, 6 }
  0x3d   :  { %v952_v52 = vrot.slane %v4227_v40, 5  ;;  %v954_v55 = vrot.slane %v4230_v8, 4  ;;  %v956_v56 = vrot.slane %v4232_v45, 3  ;;  %v958_v58 = vrot.slane %v4234_v46, 2 }
  0x3e   :  { %3765 = vmatpush3.bf16.msra.mxu0 %v962_v47  ;;  %v949_v48 = vsel %vm468_vm0, %v948_v43, %v4222_v25  ;;  %v960_v50 = vrot.slane %v4236_v37, 1  ;;  %v2651_v53 = vrot.slane %v4129_v34, 1  ;;  %v2653_v60 = vrot.slane %v4134_v39, 7 }
  0x3f   :  { %3766 = vmatprep.subr.bf16.mxu0 %v3815_v11  ;;  %v951_v62 = vsel %vm471_vm1, %v950_v51, %v949_v48  ;;  %v2655_v0 = vrot.slane %v4136_v23, 6  ;;  %v2657_v42 = vrot.slane %v4138_v27, 5  ;;  %v2659_v1 = vrot.slane %v4140_v49, 4 }
  0x40   :  { %v953_v57 = vsel %vm474_vm2, %v952_v52, %v951_v62  ;;  %v2652_v61 = vsel %vm468_vm0, %v4132_v35, %v2651_v53  ;;  %v2661_v2 = vrot.slane %v4142_v54, 3  ;;  %v2663_v34 = vrot.slane %v4144_v28, 2 }
  0x41   :  { %v955_v39 = vsel %vm477_vm3, %v954_v55, %v953_v57  ;;  %v2654_v4 = vsel %vm471_vm1, %v2653_v60, %v2652_v61  ;;  %v2665_v5 = vrot.slane %v4146_v44, 1  ;;  %v2667_v23 = vrot.slane %v4150_v32, 7 }
  0x42   :  { %v957_v27 = vsel %vm480_vm4, %v956_v56, %v955_v39  ;;  %v2656_v49 = vsel %vm474_vm2, %v2655_v0, %v2654_v4  ;;  %v2669_v6 = vrot.slane %v4152_v63, 6  ;;  %v2671_v35 = vrot.slane %v4154_v33, 5 }
  0x43   :  { %v959_v54 = vsel %vm483_vm6, %v958_v58, %v957_v27  ;;  %v2658_v28 = vsel %vm477_vm3, %v2657_v42, %v2656_v49  ;;  %v2666_v7 = vsel %vm468_vm0, %v4148_v59, %v2665_v5  ;;  %v2673_v9 = vrot.slane %v4156_v36, 4 }
  0x44   :  { %v961_v44 = vsel %vm486_vm7, %v960_v50, %v959_v54  ;;  %v2660_v32 = vsel %vm480_vm4, %v2659_v1, %v2658_v28  ;;  %v2668_v12 = vsel %vm471_vm1, %v2667_v23, %v2666_v7  ;;  %v2675_v13 = vrot.slane %v4158_v38, 3 }
  0x45   :  { %v963_v63 = vpack.c.b16 %v961_v44, %v961_v44  ;;  %v2662_v33 = vsel %vm483_vm6, %v2661_v2, %v2660_v32  ;;  %v2670_v14 = vsel %vm474_vm2, %v2669_v6, %v2668_v12  ;;  %v2677_v15 = vrot.slane %v4163_v41, 2 }
  0x46   :  { %v2664_v16 = vsel %vm486_vm7, %v2663_v34, %v2662_v33  ;;  %v2672_v59 = vsel %vm477_vm3, %v2671_v35, %v2670_v14  ;;  %v2679_v36 = vrot.slane %v4222_v25, 1  ;;  %v2681_v17 = vrot.slane %v4225_v22, 7  ;;  %v3578_v14 = vld.sshfl [vmem:[%s5016_s0 + $0x31] sm:$0x1 pattern:$0x75316420] }
  0x47   :  { %v971_v24 = vsel %vm969_vm8, %v963_v63, 0  ;;  %v2674_v26 = vsel %vm480_vm4, %v2673_v9, %v2672_v59  ;;  %v2683_v38 = vrot.slane %v4227_v40, 6  ;;  %v2685_v18 = vrot.slane %v4230_v8, 5 }
  0x48   :  { %3767 = vmatpush3.bf16.msra.mxu0 %v971_v24  ;;  %v2676_v19 = vsel %vm483_vm6, %v2675_v13, %v2674_v26  ;;  %v2680_v41 = vsel %vm468_vm0, %v913_v21, %v2679_v36  ;;  %v2687_v29 = vrot.slane %v4232_v45, 4  ;;  %v2689_v25 = vrot.slane %v4234_v46, 3  ;;  %v3577_v59 = vld.sshfl [vmem:[%s5016_s0 + $0x30] sm:$0x1 pattern:$0x75316420] }
  0x49   :  { %3778 = vmatprep.subr.bf16.mxu0 %v3815_v11  ;;  %v2678_v30 = vsel %vm486_vm7, %v2677_v15, %v2676_v19  ;;  %v2682_v20 = vsel %vm471_vm1, %v2681_v17, %v2680_v41  ;;  %v2691_v40 = vrot.slane %v4236_v37, 2  ;;  %v3579_v15 = vld.sshfl [vmem:[%s5016_s0 + $0x32] sm:$0x1 pattern:$0x75316420]  ;;  %v1077_v24 = vrot.slane %v3577_v59, %v3842_v10 }
  0x4a   :  { %v2693_v31 = vpack.c.b16 %v2678_v30, %v2664_v16  ;;  %v2684_v22 = vsel %vm474_vm2, %v2683_v38, %v2682_v20  ;;  %v1091_v16 = vrot.slane %v3578_v14, %v3842_v10  ;;  %v1105_v36 = vrot.slane %v3579_v15, %v3842_v10  ;;  %v3580_v17 = vld.sshfl [vmem:[%s5016_s0 + $0x33] sm:$0x1 pattern:$0x75316420] }
  0x4b   :  { %v2686_v3 = vsel %vm477_vm3, %v2685_v18, %v2684_v22  ;;  %v3581_v38 = vld.sshfl [vmem:[%s5016_s0 + $0x34] sm:$0x1 pattern:$0x75316420]  ;;  %v1119_v18 = vrot.slane %v3580_v17, %v3842_v10  ;;  %v1400_v30 = vunpack.c.l.b16 %v1077_v24  ;;  %vm3402_vm14 = vsmask.f32 7938 }
  0x4c   :  { %v2688_v8 = vsel %vm480_vm4, %v2687_v29, %v2686_v3  ;;  %v1401_v26 = vunpack.c.l.b16 %v1091_v16  ;;  %v4342_v19 = vunpack.c.l.b16 %v1105_v36  ;;  %v3582_v41 = vld.sshfl [vmem:[%s5016_s0 + $0x35] sm:$0x1 pattern:$0x75316420]  ;;  %v1133_v29 = vrot.slane %v3581_v38, %v3842_v10  ;;  %vm4774_vm15 = vmand %vm1674_vm11, %vm3402_vm14 }
  0x4d   :  { %v2690_v21 = vsel %vm483_vm6, %v2689_v25, %v2688_v8  ;;  %v3583_v25 = vld.sshfl [vmem:[%s5016_s0 + $0x36] sm:$0x1 pattern:$0x75316420]  ;;  %v4352_v22 = vunpack.c.l.b16 %v1119_v18 }
  0x4e   :  { %v2692_v45 = vsel %vm486_vm7, %v2691_v40, %v2690_v21  ;;  %v1424_v20 = vrot.slane %v1401_v26, 7  ;;  %v1426_v40 = vrot.slane %v4342_v19, 6  ;;  %v3584_v3 = vld.sshfl [vmem:[%s5016_s0 + $0x37] sm:$0x1 pattern:$0x75316420]  ;;  %v1161_v8 = vrot.slane %v3583_v25, %v3842_v10 }
  0x4f   :  { %v2694_v47 = vpack.c.b16 %v2692_v45, %v2692_v45  ;;  %v4359_v21 = vunpack.c.l.b16 %v1133_v29 }
  0x50   :  { %v1425_v45 = vsel %vm468_vm0, %v1424_v20, %v1400_v30 }
  0x51   :  { %v2700_v43 = vsel %vm969_vm8, %v2694_v47, 0  ;;  %v3585_v47 = vld.sshfl [vmem:[%s5016_s0 + $0x38] sm:$0x1 pattern:$0x75316420] }
  0x86   :  { %v528_v51 = vpop.trf.xlu0 }
  0x87   :  { %3769 = vmatmul.mubr.msk.bf16.vlgmr.msra.gmra.mrb[0].mxu0 %vm965_vm9, %v528_v51 }
  0x88   :  { %3779 = vmatpush3.bf16.msra.mxu0 %v2693_v31  ;;  %3782 = vmatprep.mubr.msk.bf16.mxu0 %vm3816_vm5, %v3815_v11  ;;  %v1147_v31 = vrot.slane %v3582_v41, %v3842_v10 }
  0x89   :  { %3780 = vmatprep.subr.bf16.mxu0 %v3815_v11 }
  0x8a   :  { %v4366_v51 = vunpack.c.l.b16 %v1147_v31 }
  0x8c   :  { %3781 = vmatpush3.bf16.msra.mxu0 %v2700_v43  ;;  %v1175_v43 = vrot.slane %v3584_v3, %v3842_v10 }
  0x91   :  { %v2259_v46 = vpop.trf.xlu1 }
  0x92   :  { %3783 = vmatmul.mubr.msk.bf16.vlgmr.msra.gmra.mrb[4].mxu0 %vm965_vm9, %v2259_v46  ;;  %v1427_v46 = vsel %vm471_vm1, %v1426_v40, %v1425_v45 }
 0x15a   :  { %v1007_v37 = vpop.f32.mrb[0].mxu0 }
 0x15b   :  { %v1014_v52 = vmul.f32 0.20412415, %v1007_v37  ;;  %v3770_v55 = vpop.f32.mrb[1].mxu0  ;;  %v1428_v37 = vrot.slane %v4352_v22, 5 }
 0x15c   :  { %v1010_v56 = vpop.f32.mrb[2].mxu0  ;;  %v1189_v55 = vrot.slane %v3585_v47, %v3842_v10 }
 0x15d   :  { %v1015_v58 = vmul.f32 0.20412415, %v1010_v56  ;;  %v3771_v48 = vpop.f32.mrb[3].mxu0  ;;  %v1017_v50 = vsel %vm1016_vm10, %v1014_v52, -inf  ;;  %v4374_v56 = vunpack.c.l.b16 %v1161_v8  ;;  %v3154_v8 = vrot.slane %v4342_v19, 7 }
 0x15e   :  { %1018 = vmax.xlane.f32.xlu0 %v1017_v50  ;;  %v3587_v48 = vld.sshfl [vmem:[%s5016_s0 + $0x3a] sm:$0x1 pattern:$0x75316420] }
 0x15f   :  { %v1020_v53 = vsel %vm1016_vm10, %v1015_v58, -inf }
 0x160   :  { %1021 = vmax.xlane.f32.xlu1 %v1020_v53  ;;  %v4381_v53 = vunpack.c.l.b16 %v1175_v43 }
 0x162   :  { %v3164_v19 = vrot.slane %v4381_v53, 2 }
 0x165   :  { %v2736_v60 = vpop.f32.mrb[4].mxu0 }
 0x166   :  { %v2743_v62 = vmul.f32 0.20412415, %v2736_v60  ;;  %v3784_v0 = vpop.f32.mrb[5].mxu0  ;;  %v1429_v60 = vsel %vm474_vm2, %v1428_v37, %v1427_v46  ;;  %v3156_v46 = vrot.slane %v4352_v22, 6  ;;  %v3158_v37 = vrot.slane %v4359_v21, 5 }
 0x167   :  { %v2739_v11 = vpop.f32.mrb[6].mxu0  ;;  %v3588_v0 = vld.sshfl [vmem:[%s5016_s0 + $0x3b] sm:$0x1 pattern:$0x75316420] }
 0x168   :  { %v2744_v42 = vmul.f32 0.20412415, %v2739_v11  ;;  %v3785_v1 = vpop.f32.mrb[7].mxu0  ;;  %v2745_v57 = vsel %vm1016_vm10, %v2743_v62, -inf  ;;  %v1217_v11 = vrot.slane %v3587_v48, %v3842_v10 }
 0x169   :  { %2746 = vmax.xlane.f32.xlu0 %v2745_v57  ;;  %v3589_v1 = vld.sshfl [vmem:[%s5016_s0 + $0x3c] sm:$0x1 pattern:$0x75316420]  ;;  %v1231_v57 = vrot.slane %v3588_v0, %v3842_v10 }
 0x16a   :  { %v2748_v61 = vsel %vm1016_vm10, %v2744_v42, -inf }
 0x16b   :  { %2749 = vmax.xlane.f32.xlu1 %v2748_v61  ;;  %v1408_v61 = vunpack.c.l.b16 %v1189_v55 }
 0x1eb   :  { %v1019_v2 = vpop.xlane.xlu0 %1018 }
 0x1ec   :  { %v1023_v34 = vsub.f32 %v1014_v52, %v1019_v2  ;;  %v3586_v52 = vld.sshfl [vmem:[%s5016_s0 + $0x39] sm:$0x1 pattern:$0x75316420] }
 0x1ed   :  { %v1022_v39 = vpop.xlane.xlu1 %1021  ;;  %v1203_v50 = vrot.slane %v3586_v52, %v3842_v10  ;;  %v3160_v52 = vrot.slane %v4366_v51, 4 }
 0x1ee   :  { %v1025_v4 = vmul.f32 1.442695, %v1023_v34  ;;  %v1024_v5 = vsub.f32 %v1015_v58, %v1022_v39  ;;  %v1430_v58 = vrot.slane %v4359_v21, 4  ;;  %v1434_v34 = vrot.slane %v4374_v56, 2 }
 0x1ef   :  { %v1409_v2 = vunpack.c.l.b16 %v1203_v50  ;;  %v3590_v39 = vld.sshfl [vmem:[%s5016_s0 + $0x3d] sm:$0x1 pattern:$0x75316420]  ;;  %v3166_v50 = vrot.slane %v1408_v61, 1 }
 0x1f0   :  { %3798 = vpow2.f32 %v1025_v4  ;;  %v1027_v23 = vmul.f32 1.442695, %v1024_v5  ;;  %v1245_v4 = vrot.slane %v3589_v1, %v3842_v10  ;;  %v1410_v5 = vunpack.c.l.b16 %v1217_v11 }
 0x1f1   :  { %v3167_v22 = vsel %vm468_vm0, %v1409_v2, %v3166_v50 }
 0x1f2   :  { %3800 = vpow2.f32 %v1027_v23 }
 0x1f6   :  { %v2747_v27 = vpop.xlane.xlu0 %2746 }
 0x1f7   :  { %v2751_v49 = vsub.f32 %v2743_v62, %v2747_v27  ;;  %v1432_v62 = vrot.slane %v4366_v51, 3  ;;  %v3152_v27 = vrot.slane %v1400_v30, 1 }
 0x1f8   :  { %v2750_v6 = vpop.xlane.xlu1 %2749 }
 0x1f9   :  { %v2753_v35 = vmul.f32 1.442695, %v2751_v49  ;;  %v2752_v54 = vsub.f32 %v2744_v42, %v2750_v6  ;;  %v1431_v42 = vsel %vm477_vm3, %v1430_v58, %v1429_v60  ;;  %v3591_v49 = vld.sshfl [vmem:[%s5016_s0 + $0x3e] sm:$0x1 pattern:$0x75316420]  ;;  %v1259_v6 = vrot.slane %v3590_v39, %v3842_v10 }
 0x1fa   :  { %v4307_v28 = vpop.eup %3798  ;;  %v1433_v23 = vsel %vm480_vm4, %v1432_v62, %v1431_v42  ;;  %v3153_v14 = vsel %vm468_vm0, %v1401_v26, %v3152_v27  ;;  %v3162_v58 = vrot.slane %v4374_v56, 3  ;;  %v3168_v62 = vrot.slane %v1410_v5, 7 }
 0x1fb   :  { %3802 = vpow2.f32 %v2753_v35  ;;  %v2755_v7 = vmul.f32 1.442695, %v2752_v54  ;;  %v1029_v9 = vsel %vm1016_vm10, %v4307_v28, 0.0  ;;  %v1411_v35 = vunpack.c.l.b16 %v1231_v57 }
 0x1fc   :  { %v4311_v44 = vpop.eup %3800  ;;  %1030 = vadd.xlane.f32.xlu0 %v1029_v9  ;;  %v1436_v54 = vrot.slane %v4381_v53, 1  ;;  %v3592_v9 = vld.sshfl [vmem:[%s5016_s0 + $0x3f] sm:$0x1 pattern:$0x75316420]  ;;  %v1413_v16 = vunpack.c.l.b16 %v1259_v6  ;;  %v1435_v24 = vsel %vm483_vm6, %v1434_v34, %v1433_v23  ;;  %v3155_v43 = vsel %vm471_vm1, %v3154_v8, %v3153_v14 }
 0x1fd   :  { %3804 = vpow2.f32 %v2755_v7  ;;  %v1032_v32 = vsel %vm1016_vm10, %v4311_v44, 0.0  ;;  %v1438_v7 = vrot.slane %v1409_v2, 7  ;;  %v1287_v15 = vrot.slane %v3592_v9, %v3842_v10  ;;  %v3595_v23 = vld.sshfl [vmem:[%s5016_s0 + $0x42] sm:$0x1 pattern:$0x75316420] }
 0x1fe   :  { %1033 = vadd.xlane.f32.xlu1 %v1032_v32  ;;  %v1273_v32 = vrot.slane %v3591_v49, %v3842_v10  ;;  %v1442_v36 = vrot.slane %v1411_v35, 5  ;;  %v1446_v30 = vrot.slane %v1413_v16, 3  ;;  %v1437_v26 = vsel %vm486_vm7, %v1436_v54, %v1435_v24  ;;  %v3593_v49 = vld.sshfl [vmem:[%s5016_s0 + $0x40] sm:$0x1 pattern:$0x75316420] }
 0x1ff   :  { %v1439_v59 = vsel %vm468_vm0, %v1438_v7, %v1408_v61  ;;  %v1415_v41 = vunpack.c.l.b16 %v1287_v15  ;;  %v3157_v55 = vsel %vm474_vm2, %v3156_v46, %v3155_v43  ;;  %v3170_v0 = vrot.slane %v1411_v35, 6  ;;  %v3596_v6 = vld.sshfl [vmem:[%s5016_s0 + $0x43] sm:$0x1 pattern:$0x75316420] }
 0x200   :  { %v1414_v17 = vunpack.c.l.b16 %v1273_v32  ;;  %v3159_v48 = vsel %vm477_vm3, %v3158_v37, %v3157_v55  ;;  %v3169_v42 = vsel %vm471_vm1, %v3168_v62, %v3167_v22  ;;  %v3174_v56 = vrot.slane %v1413_v16, 4  ;;  %v3597_v9 = vld.sshfl [vmem:[%s5016_s0 + $0x44] sm:$0x1 pattern:$0x75316420] }
 0x201   :  { %v1450_v40 = vrot.slane %v1415_v41, 1  ;;  %v3161_v60 = vsel %vm480_vm4, %v3160_v52, %v3159_v48  ;;  %v3171_v57 = vsel %vm474_vm2, %v3170_v0, %v3169_v42  ;;  %v3178_v53 = vrot.slane %v1415_v41, 2  ;;  %v3598_v15 = vld.sshfl [vmem:[%s5016_s0 + $0x45] sm:$0x1 pattern:$0x75316420] }
 0x202   :  { %v1448_v25 = vrot.slane %v1414_v17, 2  ;;  %v3163_v11 = vsel %vm483_vm6, %v3162_v58, %v3161_v60  ;;  %v3176_v1 = vrot.slane %v1414_v17, 3  ;;  %v1329_v35 = vrot.slane %v3595_v23, %v3842_v10  ;;  %v3599_v24 = vld.sshfl [vmem:[%s5016_s0 + $0x46] sm:$0x1 pattern:$0x75316420] }
 0x203   :  { %v4434_v51 = vsel %vm486_vm7, %v3164_v19, %v3163_v11  ;;  %v1301_v54 = vrot.slane %v3593_v49, %v3842_v10  ;;  %v1343_v32 = vrot.slane %v3596_v6, %v3842_v10  ;;  %v1357_v16 = vrot.slane %v3597_v9, %v3842_v10 }
 0x205   :  { %v4315_v12 = vpop.eup %3802 }
 0x206   :  { %v2757_v13 = vsel %vm1016_vm10, %v4315_v12, 0.0 }
 0x207   :  { %v4319_v63 = vpop.eup %3804  ;;  %2758 = vadd.xlane.f32.xlu0 %v2757_v13  ;;  %v1412_v13 = vunpack.c.l.b16 %v1245_v4 }
 0x208   :  { %v2760_v33 = vsel %vm1016_vm10, %v4319_v63, 0.0 }
 0x209   :  { %2761 = vadd.xlane.f32.xlu1 %v2760_v33  ;;  %v1440_v33 = vrot.slane %v1410_v5, 6  ;;  %v1444_v18 = vrot.slane %v1412_v13, 4  ;;  %v3172_v21 = vrot.slane %v1412_v13, 5  ;;  %v1418_v13 = vunpack.c.l.b16 %v1329_v35 }
 0x20a   :  { %v3594_v5 = vld.sshfl [vmem:[%s5016_s0 + $0x41] sm:$0x1 pattern:$0x75316420] }
 0x20b   :  { %v1441_v38 = vsel %vm471_vm1, %v1440_v33, %v1439_v59  ;;  %v3173_v61 = vsel %vm477_vm3, %v3172_v21, %v3171_v57  ;;  %v1315_v27 = vrot.slane %v3594_v5, %v3842_v10  ;;  %v1416_v33 = vunpack.c.l.b16 %v1301_v54 }
 0x20c   :  { %v1443_v29 = vsel %vm474_vm2, %v1442_v36, %v1441_v38  ;;  %v3175_v34 = vsel %vm480_vm4, %v3174_v56, %v3173_v61  ;;  %v1419_v59 = vunpack.c.l.b16 %v1343_v32  ;;  %v1454_v17 = vrot.slane %v1418_v13, 6 }
 0x20d   :  { %v1445_v20 = vsel %vm477_vm3, %v1444_v18, %v1443_v29  ;;  %v3177_v39 = vsel %vm483_vm6, %v3176_v1, %v3175_v34  ;;  %v1417_v7 = vunpack.c.l.b16 %v1315_v27  ;;  %v1371_v38 = vrot.slane %v3598_v15, %v3842_v10 }
 0x20e   :  { %v1447_v31 = vsel %vm480_vm4, %v1446_v30, %v1445_v20  ;;  %v4442_v4 = vsel %vm486_vm7, %v3178_v53, %v3177_v39  ;;  %v1420_v29 = vunpack.c.l.b16 %v1357_v16  ;;  %v1456_v30 = vrot.slane %v1419_v59, 5  ;;  %v3600_v20 = vld.sshfl [vmem:[%s5016_s0 + $0x47] sm:$0x1 pattern:$0x75316420] }
 0x20f   :  { %v1449_v3 = vsel %vm483_vm6, %v1448_v25, %v1447_v31  ;;  %v3194_v2 = vpack.c.b16 %v4442_v4, %v4434_v51  ;;  %v1452_v14 = vrot.slane %v1417_v7, 7  ;;  %v1385_v25 = vrot.slane %v3599_v24, %v3842_v10 }
 0x210   :  { %v1451_v45 = vsel %vm486_vm7, %v1450_v40, %v1449_v3  ;;  %v1421_v31 = vunpack.c.l.b16 %v1371_v38  ;;  %v1458_v40 = vrot.slane %v1420_v29, 4  ;;  %v1399_v3 = vrot.slane %v3600_v20, %v3842_v10  ;;  %v1725_v20 = vld [vmem:[%s5017_s1 + $0x10] sm:$0x1] }
 0x211   :  { %v1466_v47 = vpack.c.b16 %v1451_v45, %v1437_v26  ;;  %v1453_v18 = vsel %vm468_vm0, %v1452_v14, %v1416_v33  ;;  %v1422_v45 = vunpack.c.l.b16 %v1385_v25  ;;  %v3182_v58 = vrot.slane %v1418_v13, 7 }
 0x212   :  { %v1455_v26 = vsel %vm471_vm1, %v1454_v17, %v1453_v18  ;;  %v1460_v43 = vrot.slane %v1421_v31, 3  ;;  %v1423_v55 = vunpack.c.l.b16 %v1399_v3  ;;  %v3184_v22 = vrot.slane %v1419_v59, 6 }
 0x213   :  { %3774 = vmatprep.mubr.msk.bf16.mxu1 %vm1016_vm10, %v1466_v47  ;;  %v1457_v8 = vsel %vm474_vm2, %v1456_v30, %v1455_v26  ;;  %v3180_v47 = vrot.slane %v1416_v33, 1  ;;  %v1462_v48 = vrot.slane %v1422_v45, 2  ;;  %v3186_v57 = vrot.slane %v1420_v29, 5 }
 0x214   :  { %v1459_v46 = vsel %vm477_vm3, %v1458_v40, %v1457_v8  ;;  %v1464_v21 = vrot.slane %v1423_v55, 1  ;;  %v3190_v23 = vrot.slane %v1422_v45, 3  ;;  %v3192_v54 = vrot.slane %v1423_v55, 2 }
 0x215   :  { %v3181_v19 = vsel %vm468_vm0, %v1417_v7, %v3180_v47  ;;  %v1461_v62 = vsel %vm480_vm4, %v1460_v43, %v1459_v46  ;;  %v1728_v43 = vld [vmem:[%s5017_s1 + $0x11] sm:$0x1]  ;;  %v1731_v46 = vld [vmem:[%s5017_s1 + $0x12] sm:$0x1] }
 0x216   :  { %v3183_v42 = vsel %vm471_vm1, %v3182_v58, %v3181_v19  ;;  %v1463_v1 = vsel %vm483_vm6, %v1462_v48, %v1461_v62  ;;  %v1734_v48 = vld [vmem:[%s5017_s1 + $0x13] sm:$0x1]  ;;  %v1740_v19 = vld [vmem:[%s5017_s1 + $0x15] sm:$0x1] }
 0x217   :  { %v3185_v61 = vsel %vm474_vm2, %v3184_v22, %v3183_v42  ;;  %v1465_v34 = vsel %vm486_vm7, %v1464_v21, %v1463_v1 }
 0x218   :  { %v1467_v5 = vpack.c.b16 %v1465_v34, %v1465_v34 }
 0x289   :  { %v1031_v36 = vpop.xlane.xlu0 %1030 }
 0x28a   :  { %3806 = vrcp.f32 %v1031_v36 }
 0x28b   :  { %v1034_v41 = vpop.xlane.xlu1 %1033 }
 0x28c   :  { %3808 = vrcp.f32 %v1034_v41 }
 0x294   :  { %v3807_v37 = vpop.eup %3806  ;;  %v2759_v52 = vpop.xlane.xlu0 %2758 }
 0x295   :  { %3810 = vrcp.f32 %v2759_v52  ;;  %v1037_v0 = vmul.f32 %v3807_v37, %v4307_v28  ;;  %v3188_v28 = vrot.slane %v1421_v31, 4  ;;  %v1737_v37 = vld [vmem:[%s5017_s1 + $0x14] sm:$0x1] }
 0x296   :  { %v3809_v50 = vpop.eup %3808  ;;  %v2762_v60 = vpop.xlane.xlu1 %2761 }
 0x297   :  { %3812 = vrcp.f32 %v2762_v60  ;;  %v1038_v11 = vmul.f32 %v3809_v50, %v4311_v44  ;;  %v3187_v44 = vsel %vm477_vm3, %v3186_v57, %v3185_v61  ;;  %v1743_v50 = vld [vmem:[%s5017_s1 + $0x16] sm:$0x1]  ;;  %v1746_v57 = vld [vmem:[%s5017_s1 + $0x17] sm:$0x1] }
 0x298   :  { %v3189_v49 = vsel %vm480_vm4, %v3188_v28, %v3187_v44 }
 0x299   :  { %v1039_v56 = vpack.c.bf16 %v1038_v11, %v1037_v0  ;;  %v3191_v9 = vsel %vm483_vm6, %v3190_v23, %v3189_v49 }
 0x29b   :  { %3792 = vmatprep.subr.msk.bf16.mxu1 %vm1016_vm10, %v1039_v56  ;;  %v1475_v53 = vsel %vm1016_vm10, %v1039_v56, 0 }
 0x29c   :  { %3773 = vmatpush3.bf16.xpose.msra.mxu1 %v1475_v53 }
 0x29f   :  { %v3811_v39 = vpop.eup %3810 }
 0x2a0   :  { %v2765_v6 = vmul.f32 %v3811_v39, %v4315_v12  ;;  %v3193_v12 = vsel %vm486_vm7, %v3192_v54, %v3191_v9 }
 0x2a1   :  { %v3813_v27 = vpop.eup %3812  ;;  %v3195_v13 = vpack.c.b16 %v3193_v12, %v3193_v12 }
 0x2a2   :  { %v2766_v35 = vmul.f32 %v3813_v27, %v4319_v63 }
 0x2a3   :  { %3775 = vmatmul.mubr.msk.bf16.vlgmr.msra.gmra.mrb[0].mxu1 %vm1016_vm10, %v1467_v5 }
 0x2a4   :  { %v2767_v7 = vpack.c.bf16 %v2766_v35, %v2765_v6  ;;  %3788 = vmatprep.mubr.msk.bf16.mxu1 %vm1016_vm10, %v3194_v2 }
 0x2a6   :  { %3793 = vmatprep.subr.msk.bf16.mxu1 %vm1016_vm10, %v2767_v7  ;;  %v3203_v32 = vsel %vm1016_vm10, %v2767_v7, 0 }
 0x2a7   :  { %3787 = vmatpush3.bf16.xpose.msra.mxu1 %v3203_v32 }
 0x2ae   :  { %3789 = vmatmul.mubr.msk.bf16.vlgmr.msra.gmra.mrb[4].mxu1 %vm1016_vm10, %v3195_v13 }
 0x376   :  { %v3776_v63 = vpop.f32.mrb[0].mxu1 }
 0x377   :  { %v1526_v33 = vpack.c.bf16 %v3776_v63, %v3776_v63  ;;  %v1511_v14 = vpop.f32.mrb[1].mxu1 }
 0x378   :  { %v3777_v15 = vpop.f32.mrb[2].mxu1 }
 0x379   :  { %v1584_v51 = vrot.slane %v1526_v33, %v3842_v10  ;;  %v1514_v4 = vpop.f32.mrb[3].mxu1 }
 0x37a   :  { %v1525_v2 = vpack.c.bf16 %v1514_v4, %v1511_v14  ;;  %v3603_v16 = vpack.c.bf16 %v1514_v4, %v1514_v4 }
 0x37b   :  { %v1585_v59 = vcombine.high %v1584_v51, %v1584_v51  ;;  %v1592_v36 = vrot.slane %v1584_v51, %v3842_v10 }
 0x37c   :  { %v1536_v17 = vrot.slane %v1525_v2, %v3842_v10  ;;  %v1543_v24 = vrot.slane %v3603_v16, %v3842_v10  ;;  %v1677_v2 = vld [vmem:[%s5017_s1] sm:$0x1]  ;;  %v1680_v16 = vld [vmem:[%s5017_s1 + $0x1] sm:$0x1] }
 0x37d   :  { %v1599_v38 = vrot.slane %v1585_v59, %v3842_v10  ;;  %v1600_v18 = vcombine.high %v1592_v36, %v1592_v36  ;;  %v1619_v41 = vunpack.i.h.s16 %v1592_v36  ;;  %v3612_v29 = vpack.i.b16 %v1592_v36, %v1592_v36 }
 0x37e   :  { %v1544_v25 = vcombine.high %v1536_v17, %v1536_v17  ;;  %v1545_v26 = vcombine.high %v1543_v24, %v1543_v24  ;;  %v4520_v31 = vrot.slane %v1536_v17, %v3842_v10  ;;  %v4523_v40 = vrot.slane %v1543_v24, %v3842_v10 }
 0x37f   :  { %v1601_v3 = vcombine.high %v1599_v38, %v1599_v38  ;;  %v1621_v8 = vunpack.i.h.s16 %v1599_v38  ;;  %v1623_v45 = vunpack.i.h.s16 %v1600_v18  ;;  %v1643_v47 = vpack.i.b16 %v1619_v41, %v1619_v41  ;;  %v1689_v41 = vld [vmem:[%s5017_s1 + $0x4] sm:$0x1] }
 0x380   :  { %v3613_v52 = vpack.i.b16 %v1599_v38, %v1599_v38  ;;  %v3614_v55 = vpack.i.b16 %v1600_v18, %v1600_v18  ;;  %v1726_v58 = vsel %vm4512_vm13, %v3612_v29, %v1725_v20  ;;  %v4546_v60 = vrot.slane %v1544_v25, %v3842_v10  ;;  %v1683_v38 = vld [vmem:[%s5017_s1 + $0x2] sm:$0x1]  ;;  %v1686_v18 = vld [vmem:[%s5017_s1 + $0x3] sm:$0x1]  ;;  %v1701_v29 = vld [vmem:[%s5017_s1 + $0x8] sm:$0x1] }
 0x381   :  { %v1625_v62 = vunpack.i.h.s16 %v1601_v3  ;;  %v1645_v0 = vpack.i.b16 %v1621_v8, %v1621_v8  ;;  %v1647_v11 = vpack.i.b16 %v1623_v45, %v1623_v45  ;;  %v3615_v22 = vpack.i.b16 %v1601_v3, %v1601_v3  ;;  %1727 = vst [vmem:[%s5017_s1 + $0x10] sm:$0x1] %v1726_v58  ;;  %v4551_v21 = vpop.f32.mrb[4].mxu1  ;;  %v1692_v3 = vld [vmem:[%s5017_s1 + $0x5] sm:$0x1] }
 0x382   :  { %v1729_v42 = vsel %vm4512_vm13, %v1643_v47, %v1728_v43  ;;  %v1732_v56 = vsel %vm4512_vm13, %v3613_v52, %v1731_v46  ;;  %v1738_v1 = vsel %vm4512_vm13, %v3614_v55, %v1737_v37  ;;  %v4563_v53 = vrot.slane %v1545_v26, %v3842_v10  ;;  %v4565_v61 = vpop.f32.mrb[5].mxu1  ;;  %v1695_v8 = vld [vmem:[%s5017_s1 + $0x6] sm:$0x1]  ;;  %v1698_v45 = vld [vmem:[%s5017_s1 + $0x7] sm:$0x1] }
 0x383   :  { %v1649_v34 = vpack.i.b16 %v1625_v62, %v1625_v62  ;;  %1730 = vst [vmem:[%s5017_s1 + $0x11] sm:$0x1] %v1729_v42  ;;  %1733 = vst [vmem:[%s5017_s1 + $0x12] sm:$0x1] %v1732_v56  ;;  %v1735_v28 = vsel %vm4512_vm13, %v1645_v0, %v1734_v48  ;;  %v1741_v44 = vsel %vm4512_vm13, %v1647_v11, %v1740_v19  ;;  %v3791_v5 = vpop.f32.mrb[6].mxu1  ;;  %v1603_v7 = vunpack.i.h.s16 %v4520_v31 }
 0x384   :  { %1739 = vst [vmem:[%s5017_s1 + $0x14] sm:$0x1] %v1738_v1  ;;  %v1744_v39 = vsel %vm4512_vm13, %v3615_v22, %v1743_v50  ;;  %1736 = vst [vmem:[%s5017_s1 + $0x13] sm:$0x1] %v1735_v28  ;;  %v1574_v23 = vcombine.high %v4520_v31, %v4520_v31  ;;  %v4595_v27 = vcombine.high %v4523_v40, %v4523_v40  ;;  %v4603_v35 = vpop.f32.mrb[7].mxu1  ;;  %v1605_v9 = vunpack.i.h.s16 %v4546_v60 }
 0x385   :  { %1742 = vst [vmem:[%s5017_s1 + $0x15] sm:$0x1] %v1741_v44  ;;  %1745 = vst [vmem:[%s5017_s1 + $0x16] sm:$0x1] %v1744_v39  ;;  %v1576_v49 = vcombine.high %v4546_v60, %v4546_v60  ;;  %v4601_v6 = vcombine.high %v4563_v53, %v4563_v53  ;;  %v1747_v54 = vsel %vm4512_vm13, %v1649_v34, %v1746_v57  ;;  %v1611_v32 = vunpack.i.h.s16 %v4523_v40  ;;  %v1704_v37 = vld [vmem:[%s5017_s1 + $0x9] sm:$0x1] }
 0x386   :  { %1748 = vst [vmem:[%s5017_s1 + $0x17] sm:$0x1] %v1747_v54  ;;  %v1607_v12 = vunpack.i.h.s16 %v1574_v23  ;;  %v1613_v63 = vunpack.i.h.s16 %v4563_v53  ;;  %v1615_v33 = vunpack.i.h.s16 %v4595_v27  ;;  %v3604_v15 = vpack.i.b16 %v4520_v31, %v4520_v31  ;;  %v1707_v52 = vld [vmem:[%s5017_s1 + $0xa] sm:$0x1]  ;;  %v1710_v55 = vld [vmem:[%s5017_s1 + $0xb] sm:$0x1] }
 0x387   :  { %v1609_v13 = vunpack.i.h.s16 %v1576_v49  ;;  %v1617_v14 = vunpack.i.h.s16 %v4601_v6  ;;  %v1627_v51 = vpack.i.b16 %v1603_v7, %v1603_v7  ;;  %v3605_v4 = vpack.i.b16 %v4546_v60, %v4546_v60  ;;  %v1713_v60 = vld [vmem:[%s5017_s1 + $0xc] sm:$0x1]  ;;  %v1716_v62 = vld [vmem:[%s5017_s1 + $0xd] sm:$0x1]  ;;  %v1719_v0 = vld [vmem:[%s5017_s1 + $0xe] sm:$0x1] }
 0x388   :  { %v1629_v59 = vpack.i.b16 %v1605_v9, %v1605_v9  ;;  %v3606_v36 = vpack.i.b16 %v1574_v23, %v1574_v23  ;;  %v1631_v17 = vpack.i.b16 %v1607_v12, %v1607_v12  ;;  %v3607_v24 = vpack.i.b16 %v1576_v49, %v1576_v49  ;;  %v1722_v1 = vld [vmem:[%s5017_s1 + $0xf] sm:$0x1] }
 0x389   :  { %v1633_v20 = vpack.i.b16 %v1609_v13, %v1609_v13  ;;  %v3608_v25 = vpack.i.b16 %v4523_v40, %v4523_v40  ;;  %v1635_v26 = vpack.i.b16 %v1611_v32, %v1611_v32  ;;  %v3609_v31 = vpack.i.b16 %v4563_v53, %v4563_v53 }
 0x38a   :  { %v1637_v47 = vpack.i.b16 %v1613_v63, %v1613_v63  ;;  %v3610_v40 = vpack.i.b16 %v4595_v27, %v4595_v27  ;;  %v1639_v43 = vpack.i.b16 %v1615_v33, %v1615_v33  ;;  %v3611_v46 = vpack.i.b16 %v4601_v6, %v4601_v6 }
 0x38b   :  { %v1641_v58 = vpack.i.b16 %v1617_v14, %v1617_v14  ;;  %v1678_v48 = vsel %vm4512_vm13, %v3604_v15, %v1677_v2  ;;  %v1681_v19 = vsel %vm4512_vm13, %v1627_v51, %v1680_v16  ;;  %v1684_v50 = vsel %vm4512_vm13, %v3605_v4, %v1683_v38  ;;  %v3452_v4 = vld [vmem:[%s5017_s1 + $0x10] sm:$0x1] }
 0x38c   :  { %1679 = vst [vmem:[%s5017_s1] sm:$0x1] %v1678_v48  ;;  %1682 = vst [vmem:[%s5017_s1 + $0x1] sm:$0x1] %v1681_v19  ;;  %v1687_v11 = vsel %vm4512_vm13, %v1629_v59, %v1686_v18  ;;  %v1690_v22 = vsel %vm4512_vm13, %v3606_v36, %v1689_v41  ;;  %v1693_v42 = vsel %vm4512_vm13, %v1631_v17, %v1692_v3  ;;  %v3455_v41 = vld [vmem:[%s5017_s1 + $0x11] sm:$0x1] }
 0x38d   :  { %1685 = vst [vmem:[%s5017_s1 + $0x2] sm:$0x1] %v1684_v50  ;;  %v1696_v56 = vsel %vm4512_vm13, %v3607_v24, %v1695_v8  ;;  %1688 = vst [vmem:[%s5017_s1 + $0x3] sm:$0x1] %v1687_v11  ;;  %v1699_v57 = vsel %vm4512_vm13, %v1633_v20, %v1698_v45  ;;  %v1702_v53 = vsel %vm4512_vm13, %v3608_v25, %v1701_v29  ;;  %v3464_v29 = vld [vmem:[%s5017_s1 + $0x14] sm:$0x1] }
 0x38e   :  { %1691 = vst [vmem:[%s5017_s1 + $0x4] sm:$0x1] %v1690_v22  ;;  %1694 = vst [vmem:[%s5017_s1 + $0x5] sm:$0x1] %v1693_v42  ;;  %v1705_v34 = vsel %vm4512_vm13, %v1635_v26, %v1704_v37  ;;  %v1708_v28 = vsel %vm4512_vm13, %v3609_v31, %v1707_v52  ;;  %v1711_v44 = vsel %vm4512_vm13, %v1637_v47, %v1710_v55  ;;  %v3461_v31 = vld [vmem:[%s5017_s1 + $0x13] sm:$0x1] }
 0x38f   :  { %1697 = vst [vmem:[%s5017_s1 + $0x6] sm:$0x1] %v1696_v56  ;;  %1700 = vst [vmem:[%s5017_s1 + $0x7] sm:$0x1] %v1699_v57  ;;  %v1714_v39 = vsel %vm4512_vm13, %v3610_v40, %v1713_v60  ;;  %v1717_v5 = vsel %vm4512_vm13, %v1639_v43, %v1716_v62  ;;  %v1720_v23 = vsel %vm4512_vm13, %v3611_v46, %v1719_v0  ;;  %v3467_v3 = vld [vmem:[%s5017_s1 + $0x15] sm:$0x1] }
 0x390   :  { %1703 = vst [vmem:[%s5017_s1 + $0x8] sm:$0x1] %v1702_v53  ;;  %1706 = vst [vmem:[%s5017_s1 + $0x9] sm:$0x1] %v1705_v34  ;;  %v1723_v27 = vsel %vm4512_vm13, %v1641_v58, %v1722_v1  ;;  %v3254_v49 = vpack.c.bf16 %v4551_v21, %v4551_v21  ;;  %v3253_v6 = vpack.c.bf16 %v4603_v35, %v4565_v61  ;;  %v3470_v8 = vld [vmem:[%s5017_s1 + $0x16] sm:$0x1] }
 0x391   :  { %1709 = vst [vmem:[%s5017_s1 + $0xa] sm:$0x1] %v1708_v28  ;;  %1712 = vst [vmem:[%s5017_s1 + $0xb] sm:$0x1] %v1711_v44  ;;  %v3739_v54 = vpack.c.bf16 %v4603_v35, %v4603_v35  ;;  %v3473_v58 = vld [vmem:[%s5017_s1 + $0x17] sm:$0x1] }
 0x392   :  { %1715 = vst [vmem:[%s5017_s1 + $0xc] sm:$0x1] %v1714_v39  ;;  %1718 = vst [vmem:[%s5017_s1 + $0xd] sm:$0x1] %v1717_v5  ;;  %v3312_v7 = vrot.slane %v3254_v49, %v3842_v10  ;;  %v3264_v9 = vrot.slane %v3253_v6, %v3842_v10 }
 0x393   :  { %1721 = vst [vmem:[%s5017_s1 + $0xe] sm:$0x1] %v1720_v23  ;;  %1724 = vst [vmem:[%s5017_s1 + $0xf] sm:$0x1] %v1723_v27  ;;  %v3271_v30 = vrot.slane %v3739_v54, %v3842_v10  ;;  %v3404_v5 = vld [vmem:[%s5017_s1] sm:$0x1] }
 0x394   :  { %v3313_v32 = vcombine.high %v3312_v7, %v3312_v7  ;;  %v3320_v21 = vrot.slane %v3312_v7, %v3842_v10  ;;  %v3272_v12 = vcombine.high %v3264_v9, %v3264_v9  ;;  %v4767_v61 = vrot.slane %v3264_v9, %v3842_v10  ;;  %v3407_v23 = vld [vmem:[%s5017_s1 + $0x1] sm:$0x1]  ;;  %v3410_v27 = vld [vmem:[%s5017_s1 + $0x2] sm:$0x1]  ;;  %v3413_v9 = vld [vmem:[%s5017_s1 + $0x3] sm:$0x1] }
 0x395   :  { %v3273_v13 = vcombine.high %v3271_v30, %v3271_v30  ;;  %v4770_v35 = vrot.slane %v3271_v30, %v3842_v10  ;;  %v3416_v30 = vld [vmem:[%s5017_s1 + $0x4] sm:$0x1] }
 0x396   :  { %v3327_v63 = vrot.slane %v3313_v32, %v3842_v10  ;;  %v3328_v33 = vcombine.high %v3320_v21, %v3320_v21  ;;  %v3347_v14 = vunpack.i.h.s16 %v3320_v21  ;;  %v3748_v15 = vpack.i.b16 %v3320_v21, %v3320_v21  ;;  %v3419_v32 = vld [vmem:[%s5017_s1 + $0x5] sm:$0x1] }
 0x397   :  { %v4782_v2 = vrot.slane %v3272_v12, %v3842_v10  ;;  %v4785_v16 = vrot.slane %v3273_v13, %v3842_v10  ;;  %v4789_v59 = vcombine.high %v4767_v61, %v4767_v61  ;;  %v4793_v36 = vcombine.high %v4770_v35, %v4770_v35  ;;  %v3458_v10 = vld [vmem:[%s5017_s1 + $0x12] sm:$0x1] }
 0x398   :  { %v3329_v17 = vcombine.high %v3327_v63, %v3327_v63  ;;  %v3349_v24 = vunpack.i.h.s16 %v3327_v63  ;;  %v3351_v38 = vunpack.i.h.s16 %v3328_v33  ;;  %v3371_v18 = vpack.i.b16 %v3347_v14, %v3347_v14  ;;  %v3428_v14 = vld [vmem:[%s5017_s1 + $0x8] sm:$0x1] }
 0x399   :  { %v3749_v20 = vpack.i.b16 %v3327_v63, %v3327_v63  ;;  %v3750_v25 = vpack.i.b16 %v3328_v33, %v3328_v33  ;;  %v3453_v26 = vsel %vm4774_vm15, %v3748_v15, %v3452_v4  ;;  %v4817_v45 = vcombine.high %v4782_v2, %v4782_v2  ;;  %v3422_v63 = vld [vmem:[%s5017_s1 + $0x6] sm:$0x1]  ;;  %v3425_v33 = vld [vmem:[%s5017_s1 + $0x7] sm:$0x1] }
 0x39a   :  { %v3353_v47 = vunpack.i.h.s16 %v3329_v17  ;;  %v3373_v40 = vpack.i.b16 %v3349_v24, %v3349_v24  ;;  %v3375_v43 = vpack.i.b16 %v3351_v38, %v3351_v38  ;;  %v3751_v46 = vpack.i.b16 %v3329_v17, %v3329_v17  ;;  %3454 = vst [vmem:[%s5017_s1 + $0x10] sm:$0x1] %v3453_v26  ;;  %v3437_v17 = vld [vmem:[%s5017_s1 + $0xb] sm:$0x1] }
 0x39b   :  { %v3456_v37 = vsel %vm4774_vm15, %v3371_v18, %v3455_v41  ;;  %v3459_v52 = vsel %vm4774_vm15, %v3749_v20, %v3458_v10  ;;  %v3465_v55 = vsel %vm4774_vm15, %v3750_v25, %v3464_v29  ;;  %v4833_v48 = vcombine.high %v4785_v16, %v4785_v16  ;;  %v3440_v41 = vld [vmem:[%s5017_s1 + $0xc] sm:$0x1]  ;;  %v3443_v10 = vld [vmem:[%s5017_s1 + $0xd] sm:$0x1]  ;;  %v3446_v29 = vld [vmem:[%s5017_s1 + $0xe] sm:$0x1] }
 0x39c   :  { %v3377_v19 = vpack.i.b16 %v3353_v47, %v3353_v47  ;;  %3457 = vst [vmem:[%s5017_s1 + $0x11] sm:$0x1] %v3456_v37  ;;  %3460 = vst [vmem:[%s5017_s1 + $0x12] sm:$0x1] %v3459_v52  ;;  %v3462_v50 = vsel %vm4774_vm15, %v3373_v40, %v3461_v31  ;;  %v3468_v60 = vsel %vm4774_vm15, %v3375_v43, %v3467_v3  ;;  %v3331_v0 = vunpack.i.h.s16 %v4767_v61  ;;  %v3449_v3 = vld [vmem:[%s5017_s1 + $0xf] sm:$0x1] }
 0x39d   :  { %3466 = vst [vmem:[%s5017_s1 + $0x14] sm:$0x1] %v3465_v55  ;;  %v3471_v62 = vsel %vm4774_vm15, %v3751_v46, %v3470_v8  ;;  %3463 = vst [vmem:[%s5017_s1 + $0x13] sm:$0x1] %v3462_v50  ;;  %v3333_v11 = vunpack.i.h.s16 %v4782_v2  ;;  %v3335_v22 = vunpack.i.h.s16 %v4789_v59  ;;  %v3337_v42 = vunpack.i.h.s16 %v4817_v45 }
 0x39e   :  { %3469 = vst [vmem:[%s5017_s1 + $0x15] sm:$0x1] %v3468_v60  ;;  %3472 = vst [vmem:[%s5017_s1 + $0x16] sm:$0x1] %v3471_v62  ;;  %v3474_v56 = vsel %vm4774_vm15, %v3377_v19, %v3473_v58  ;;  %v3339_v1 = vunpack.i.h.s16 %v4770_v35  ;;  %v3341_v57 = vunpack.i.h.s16 %v4785_v16  ;;  %v3343_v53 = vunpack.i.h.s16 %v4793_v36 }
 0x39f   :  { %3475 = vst [vmem:[%s5017_s1 + $0x17] sm:$0x1] %v3474_v56  ;;  %v3345_v34 = vunpack.i.h.s16 %v4833_v48  ;;  %v3740_v28 = vpack.i.b16 %v4767_v61, %v4767_v61  ;;  %v3355_v44 = vpack.i.b16 %v3331_v0, %v3331_v0  ;;  %v3741_v39 = vpack.i.b16 %v4782_v2, %v4782_v2 }
 0x3a0   :  { %v3357_v49 = vpack.i.b16 %v3333_v11, %v3333_v11  ;;  %v3742_v6 = vpack.i.b16 %v4789_v59, %v4789_v59  ;;  %v3359_v54 = vpack.i.b16 %v3335_v22, %v3335_v22  ;;  %v3743_v7 = vpack.i.b16 %v4817_v45, %v4817_v45  ;;  %v3434_v59 = vld [vmem:[%s5017_s1 + $0xa] sm:$0x1] }
 0x3a1   :  { %v3361_v21 = vpack.i.b16 %v3337_v42, %v3337_v42  ;;  %v3744_v12 = vpack.i.b16 %v4770_v35, %v4770_v35  ;;  %v3363_v13 = vpack.i.b16 %v3339_v1, %v3339_v1  ;;  %v3745_v61 = vpack.i.b16 %v4785_v16, %v4785_v16  ;;  %v3431_v16 = vld [vmem:[%s5017_s1 + $0x9] sm:$0x1] }
 0x3a2   :  { %v3365_v15 = vpack.i.b16 %v3341_v57, %v3341_v57  ;;  %v3746_v35 = vpack.i.b16 %v4793_v36, %v4793_v36  ;;  %v3367_v4 = vpack.i.b16 %v3343_v53, %v3343_v53  ;;  %v3747_v2 = vpack.i.b16 %v4833_v48, %v4833_v48 }
 0x3a3   :  { %v3369_v24 = vpack.i.b16 %v3345_v34, %v3345_v34  ;;  %v3405_v36 = vsel %vm4774_vm15, %v3740_v28, %v3404_v5  ;;  %v3408_v38 = vsel %vm4774_vm15, %v3355_v44, %v3407_v23  ;;  %v3411_v18 = vsel %vm4774_vm15, %v3741_v39, %v3410_v27 }
 0x3a4   :  { %3406 = vst [vmem:[%s5017_s1] sm:$0x1] %v3405_v36  ;;  %3409 = vst [vmem:[%s5017_s1 + $0x1] sm:$0x1] %v3408_v38  ;;  %v3414_v20 = vsel %vm4774_vm15, %v3357_v49, %v3413_v9  ;;  %v3417_v25 = vsel %vm4774_vm15, %v3742_v6, %v3416_v30  ;;  %v3420_v26 = vsel %vm4774_vm15, %v3359_v54, %v3419_v32 }
 0x3a5   :  { %3412 = vst [vmem:[%s5017_s1 + $0x2] sm:$0x1] %v3411_v18  ;;  %v3423_v31 = vsel %vm4774_vm15, %v3743_v7, %v3422_v63  ;;  %3415 = vst [vmem:[%s5017_s1 + $0x3] sm:$0x1] %v3414_v20  ;;  %v3426_v8 = vsel %vm4774_vm15, %v3361_v21, %v3425_v33  ;;  %v3429_v45 = vsel %vm4774_vm15, %v3744_v12, %v3428_v14 }
 0x3a6   :  { %3418 = vst [vmem:[%s5017_s1 + $0x4] sm:$0x1] %v3417_v25  ;;  %3421 = vst [vmem:[%s5017_s1 + $0x5] sm:$0x1] %v3420_v26  ;;  %v3432_v47 = vsel %vm4774_vm15, %v3363_v13, %v3431_v16  ;;  %v3435_v40 = vsel %vm4774_vm15, %v3745_v61, %v3434_v59  ;;  %v3438_v43 = vsel %vm4774_vm15, %v3365_v15, %v3437_v17 }
 0x3a7   :  { %3424 = vst [vmem:[%s5017_s1 + $0x6] sm:$0x1] %v3423_v31  ;;  %3427 = vst [vmem:[%s5017_s1 + $0x7] sm:$0x1] %v3426_v8  ;;  %v3441_v46 = vsel %vm4774_vm15, %v3746_v35, %v3440_v41  ;;  %v3444_v37 = vsel %vm4774_vm15, %v3367_v4, %v3443_v10  ;;  %v3447_v52 = vsel %vm4774_vm15, %v3747_v2, %v3446_v29 }
 0x3a8   :  { %3430 = vst [vmem:[%s5017_s1 + $0x8] sm:$0x1] %v3429_v45  ;;  %3433 = vst [vmem:[%s5017_s1 + $0x9] sm:$0x1] %v3432_v47  ;;  %v3450_v55 = vsel %vm4774_vm15, %v3369_v24, %v3449_v3 }
 0x3a9   :  { %3436 = vst [vmem:[%s5017_s1 + $0xa] sm:$0x1] %v3435_v40  ;;  %3439 = vst [vmem:[%s5017_s1 + $0xb] sm:$0x1] %v3438_v43 }
 0x3aa   :  { %3442 = vst [vmem:[%s5017_s1 + $0xc] sm:$0x1] %v3441_v46  ;;  %3445 = vst [vmem:[%s5017_s1 + $0xd] sm:$0x1] %v3444_v37 }
 0x3ab   :  { %3448 = vst [vmem:[%s5017_s1 + $0xe] sm:$0x1] %v3447_v52  ;;  %3451 = vst [vmem:[%s5017_s1 + $0xf] sm:$0x1] %v3450_v55 }

</bundles_post_ra>
